<compile_context>
chip_gen: v7x
topology: tpu7x:2x2x1
jax: 0.10.0
libtpu: 0.0.40
codegen_flags: <defaults>
</compile_context>

<pallas_src>
import jax
import jax.numpy as jnp
from jax import lax
from jax.experimental import pallas as pl
from jax.experimental.pallas import tpu as pltpu

NUM_CLASSES = 1
N_BATCH = 2
C_IN, H_IN, W_IN = 3, 4, 1000          # forced so that flatten dim == 63360
CH = C_IN * H_IN                       # 12
W1_OUT = W_IN - 4                      # 996  (conv1 kw=5)
W2_OUT = W1_OUT - 4                    # 992  (conv2 kw=5)
W3_OUT = W2_OUT - 2                    # 990  (conv3 kw=3)
FLAT = 64 * W3_OUT                     # 63360
HIDDEN = 128
FC1_NUM_K = 3                          # kt = 21120 (multiple of 128)


# ---------------------------------------------------------------------------
# Kernel 1: fused conv1 -> relu -> conv2 -> relu -> conv3 -> relu
# One grid step per batch element ("parallel" -> both TCs on v7x); each layer
# is one im2col matmul; output stored as bf16.
# ---------------------------------------------------------------------------
def conv_stack_kernel(x_ref, w1_ref, b1_ref, w2_ref, b2_ref, w3_ref, b3_ref,
                      o_ref, im1_ref, h1_ref, im2_ref, h2_ref, im3_ref):
    # ---- conv1: im2col (kw-major rows), then (16,60)@(60,996) ----
    for kw in range(5):
        im1_ref[kw * CH:(kw + 1) * CH, :] = x_ref[0, :, kw:kw + W1_OUT]
    h1_ref[...] = jnp.maximum(
        jnp.dot(w1_ref[...], im1_ref[...],
                preferred_element_type=jnp.float32) + b1_ref[...], 0.0)

    # ---- conv2: (32,80)@(80,992) ----
    for kw in range(5):
        im2_ref[kw * 16:(kw + 1) * 16, :] = h1_ref[:, kw:kw + W2_OUT]
    h2_ref[...] = jnp.maximum(
        jnp.dot(w2_ref[...], im2_ref[...],
                preferred_element_type=jnp.float32) + b2_ref[...], 0.0)

    # ---- conv3: (64,96)@(96,990), epilogue chunked to bound live vregs ----
    for kw in range(3):
        im3_ref[kw * 32:(kw + 1) * 32, :] = h2_ref[:, kw:kw + W3_OUT]
    for c0, cw in ((0, 512), (512, W3_OUT - 512)):
        o_ref[0, :, c0:c0 + cw] = jnp.maximum(
            jnp.dot(w3_ref[...], im3_ref[:, c0:c0 + cw],
                    preferred_element_type=jnp.float32) + b3_ref[...],
            0.0).astype(o_ref.dtype)


def conv_stack(x_nchw, w1f, b1, w2f, b2, w3f, b3):
    n, c, h, w = x_nchw.shape
    xr = x_nchw.reshape(n, c * h, w)              # f-index = c*H + hh (row-major)
    return pl.pallas_call(
        conv_stack_kernel,
        out_shape=jax.ShapeDtypeStruct((n, 64, W3_OUT), jnp.bfloat16),
        grid_spec=pltpu.PrefetchScalarGridSpec(
            num_scalar_prefetch=0,
            grid=(n,),
            in_specs=[
                pl.BlockSpec((1, c * h, w), lambda i: (i, 0, 0)),
                pl.BlockSpec((16, 5 * CH), lambda i: (0, 0)),
                pl.BlockSpec((16, 1), lambda i: (0, 0)),
                pl.BlockSpec((32, 5 * 16), lambda i: (0, 0)),
                pl.BlockSpec((32, 1), lambda i: (0, 0)),
                pl.BlockSpec((64, 3 * 32), lambda i: (0, 0)),
                pl.BlockSpec((64, 1), lambda i: (0, 0)),
            ],
            out_specs=pl.BlockSpec((1, 64, W3_OUT), lambda i: (i, 0, 0)),
            scratch_shapes=[
                pltpu.VMEM((5 * CH, W1_OUT), jnp.float32),   # im2col for conv1
                pltpu.VMEM((16, W1_OUT), jnp.float32),       # h1
                pltpu.VMEM((5 * 16, W2_OUT), jnp.float32),   # im2col for conv2
                pltpu.VMEM((32, W2_OUT), jnp.float32),       # h2
                pltpu.VMEM((3 * 32, W3_OUT), jnp.float32),   # im2col for conv3
            ],
        ),
        compiler_params=pltpu.CompilerParams(
            dimension_semantics=("parallel",)),
    )(xr, w1f, b1.reshape(16, 1), w2f, b2.reshape(32, 1),
      w3f, b3.reshape(64, 1))


# ---------------------------------------------------------------------------
# Kernel 2: fc1 (63360 -> 128) with K-tiled int8 weights (dequantized to bf16
# in-kernel, f32 accumulation, per-column scale folded into the finalize),
# then relu -> fc2 (128 -> num_classes) -> log_softmax.  Also emits the raw
# logits for verification.
# ---------------------------------------------------------------------------
def fc_head_kernel(feat_ref, w1k_ref, scale_ref, b1_ref, w2_ref, b2_ref,
                   out_ref, logits_ref, acc_ref):
    k = pl.program_id(0)

    @pl.when(k == 0)
    def _():
        acc_ref[...] = jnp.zeros_like(acc_ref)

    wk = w1k_ref[...].astype(jnp.bfloat16)          # int8 (exact in bf16)
    acc_ref[...] += jnp.dot(feat_ref[...], wk,      # bf16 x bf16 -> f32 acc
                            preferred_element_type=jnp.float32)

    @pl.when(k == pl.num_programs(0) - 1)
    def _():
        h = jnp.maximum(acc_ref[...] * scale_ref[...] + b1_ref[...], 0.0)
        logits = jnp.dot(h, w2_ref[...],
                         preferred_element_type=jnp.float32) + b2_ref[...]
        logits_ref[...] = logits
        m = jnp.max(logits, axis=1, keepdims=True)
        lse = jnp.log(jnp.sum(jnp.exp(logits - m), axis=1, keepdims=True)) + m
        out_ref[...] = logits - lse                 # log_softmax


def fc_head(feat_flat_bf16, w1q, w1_scale, b1, w2t, b2, *, num_k=FC1_NUM_K):
    n, k_total = feat_flat_bf16.shape
    assert k_total % num_k == 0
    kt = k_total // num_k                      # 63360 / 3 = 21120
    assert kt % 128 == 0
    hid = w1q.shape[1]
    ncls = w2t.shape[1]

    return pl.pallas_call(
        fc_head_kernel,
        out_shape=(jax.ShapeDtypeStruct((n, ncls), jnp.float32),
                   jax.ShapeDtypeStruct((n, ncls), jnp.float32)),
        grid_spec=pltpu.PrefetchScalarGridSpec(
            num_scalar_prefetch=0,
            grid=(num_k,),
            in_specs=[
                pl.BlockSpec((n, kt), lambda k: (0, k)),    # bf16 activations
                pl.BlockSpec((kt, hid), lambda k: (k, 0)),  # int8 weight tile
                pl.BlockSpec((1, hid), lambda k: (0, 0)),   # per-column scale
                pl.BlockSpec((1, hid), lambda k: (0, 0)),   # fc1 bias
                pl.BlockSpec((hid, ncls), lambda k: (0, 0)),
                pl.BlockSpec((1, ncls), lambda k: (0, 0)),
            ],
            out_specs=[
                pl.BlockSpec((n, ncls), lambda k: (0, 0)),  # log_softmax out
                pl.BlockSpec((n, ncls), lambda k: (0, 0)),  # raw logits
            ],
            scratch_shapes=[pltpu.VMEM((n, hid), jnp.float32)],
        ),
        compiler_params=pltpu.CompilerParams(
            dimension_semantics=("arbitrary",)),
    )(feat_flat_bf16, w1q, w1_scale.reshape(1, hid), b1.reshape(1, hid),
      w2t, b2.reshape(1, ncls))


# ---------------------------------------------------------------------------
# One-time parameter preparation (outside the jitted forward):
#  * conv weights flattened to im2col layout (rows ordered kw-major, c-minor)
#  * fc1 weight transposed, quantized to int8 with per-output-column scales
#  * fc2 weight transposed (f32)
# ---------------------------------------------------------------------------
def prepare_params(params):
    (w1, b1, w2, b2, w3, b3, fc1_w, fc1_b, fc2_w, fc2_b) = params
    w1f = w1.reshape(16, CH, 5).transpose(0, 2, 1).reshape(16, 5 * CH)
    w2f = w2.reshape(32, 16, 5).transpose(0, 2, 1).reshape(32, 5 * 16)
    w3f = w3.reshape(64, 32, 3).transpose(0, 2, 1).reshape(64, 3 * 32)

    w1t = jnp.asarray(fc1_w.T, jnp.float32)                       # (FLAT, 128)
    w1_scale = jnp.maximum(jnp.max(jnp.abs(w1t), axis=0), 1e-30) / 127.0
    w1q = jnp.clip(jnp.round(w1t / w1_scale[None, :]),
                   -127.0, 127.0).astype(jnp.int8)                # int8 weights
    fc2_wt = jnp.asarray(fc2_w.T, jnp.float32)                    # (128, ncls)
    return (w1f, b1, w2f, b2, w3f, b3, w1q, w1_scale, fc1_b, fc2_wt, fc2_b)


def creator_recognizer_forward(x, prep):
    (w1f, b1, w2f, b2, w3f, b3, w1q, w1_scale, fc1_b, fc2_wt, fc2_b) = prep
    feat = conv_stack(x, w1f, b1, w2f, b2, w3f, b3)          # (N, 64, 990) bf16
    feat_flat = feat.reshape(x.shape[0], FLAT)               # torch.flatten order
    out, logits = fc_head(feat_flat, w1q, w1_scale, fc1_b, fc2_wt, fc2_b)
    return out, logits, feat                                 # logits/feat: checks


def init_params(key):
    ks = jax.random.split(key, 10)

    def u(k, shape, fan_in):
        bound = 1.0 / jnp.sqrt(fan_in)
        return jax.random.uniform(k, shape, jnp.float32, -bound, bound)

    w1 = u(ks[0], (16, 3, 4, 5), 3 * 4 * 5)
    b1 = u(ks[1], (16,), 3 * 4 * 5)
    w2 = u(ks[2], (32, 16, 1, 5), 16 * 5)
    b2 = u(ks[3], (32,), 16 * 5)
    w3 = u(ks[4], (64, 32, 1, 3), 32 * 3)
    b3 = u(ks[5], (64,), 32 * 3)
    fc1_w = u(ks[6], (HIDDEN, FLAT), FLAT)
    fc1_b = u(ks[7], (HIDDEN,), FLAT)
    fc2_w = u(ks[8], (NUM_CLASSES, HIDDEN), HIDDEN)
    fc2_b = u(ks[9], (NUM_CLASSES,), HIDDEN)
    return (w1, b1, w2, b2, w3, b3, fc1_w, fc1_b, fc2_w, fc2_b)


# ---------------------------------------------------------------------------
# Pure-JAX references (correctness checks only).
# ---------------------------------------------------------------------------
def conv_reference(x, params):
    (w1, b1, w2, b2, w3, b3, *_rest) = params
    dn = ("NCHW", "OIHW", "NCHW")

    def conv(inp, w, b):
        y = lax.conv_general_dilated(inp, w, (1, 1), "VALID",
                                     dimension_numbers=dn,
                                     precision=lax.Precision.HIGHEST)
        return jnp.maximum(y + b[None, :, None, None], 0.0)

    h = conv(x, w1, b1)
    h = conv(h, w2, b2)
    h = conv(h, w3, b3)
    return h[:, :, 0, :]                               # (N, 64, 990)


def fc_reference_quant(feat_flat_bf16, w1q, w1_scale, b1, w2t, b2):
    """Same quantized math as the kernel -> checks kernel correctness."""
    acc = jnp.dot(feat_flat_bf16.astype(jnp.float32), w1q.astype(jnp.float32),
                  precision=lax.Precision.HIGHEST)
    h = jnp.maximum(acc * w1_scale[None, :] + b1[None, :], 0.0)
    return jnp.dot(h, w2t, precision=lax.Precision.HIGHEST) + b2[None, :]


def fc_reference_fp32(feat_flat_f32, fc1_w, fc1_b, fc2_w, fc2_b):
    """Full-precision fc reference -> bounds int8/bf16 quantization drift."""
    h = jnp.maximum(jnp.dot(feat_flat_f32, fc1_w.T,
                            precision=lax.Precision.HIGHEST) + fc1_b[None, :],
                    0.0)
    return jnp.dot(h, fc2_w.T, precision=lax.Precision.HIGHEST) + fc2_b[None, :]


if __name__ == "__main__":
    key = jax.random.PRNGKey(0)
    kx, kp = jax.random.split(key)
    x = jax.random.normal(kx, (N_BATCH, C_IN, H_IN, W_IN), jnp.float32)
    params = init_params(kp)
    prep = prepare_params(params)            # one-time weight prep (int8 fc1)

    fwd = jax.jit(creator_recognizer_forward)
    out, logits, feat = fwd(x, prep)
    out = jax.block_until_ready(out)
    logits = jax.block_until_ready(logits)
    feat = jax.block_until_ready(feat)

    assert out.shape == (N_BATCH, NUM_CLASSES) and out.dtype == jnp.float32

    # conv stack (bf16 output) matches the XLA conv reference
    feat_ref = conv_reference(x, params)
    assert jnp.allclose(feat.astype(jnp.float32), feat_ref,
                        rtol=2e-2, atol=2e-2), "conv mismatch"

    # fc head kernel matches a pure-JAX reference with identical quantization
    feat_flat = feat.reshape(N_BATCH, FLAT)
    (w1q, w1_scale, fc1_b_p, fc2_wt, fc2_b_p) = prep[6:]
    logits_qref = fc_reference_quant(feat_flat, w1q, w1_scale, fc1_b_p,
                                     fc2_wt, fc2_b_p)
    assert jnp.allclose(logits, logits_qref, rtol=1e-2, atol=5e-3), \
        "fc kernel mismatch vs quantized reference"

    # int8/bf16 quantization drift vs full-precision fc reference stays small
    logits_fp = fc_reference_fp32(feat_ref.reshape(N_BATCH, FLAT),
                                  params[6], params[7], params[8], params[9])
    assert jnp.allclose(logits, logits_fp, rtol=3e-2, atol=3e-2), \
        "quantization drift too large"

    # log_softmax over a single class is identically zero
    assert jnp.allclose(out, 0.0, atol=1e-5), "log_softmax mismatch"
    assert bool(jnp.all(jnp.isfinite(out)))

    print("KERNEL_OK")
</pallas_src>

<mosaic_0001>
module attributes {stable_mosaic.version = 11 : i64} {
  func.func @fc_head_kernel(%arg0: i32, %arg1: memref<2x21120xbf16, #tpu.memory_space<vmem>>, %arg2: memref<21120x128xi8, #tpu.memory_space<vmem>>, %arg3: memref<1x128xf32, #tpu.memory_space<vmem>>, %arg4: memref<1x128xf32, #tpu.memory_space<vmem>>, %arg5: memref<128x1xf32, #tpu.memory_space<vmem>>, %arg6: memref<1x1xf32, #tpu.memory_space<vmem>>, %arg7: memref<2x1xf32, #tpu.memory_space<vmem>>, %arg8: memref<2x1xf32, #tpu.memory_space<vmem>>, %arg9: memref<2x128xf32, #tpu.memory_space<vmem>>) attributes {dimension_semantics = [#tpu.dimension_semantics<arbitrary>], iteration_bounds = array<i64: 3>, scalar_prefetch = 0 : i64, scratch_operands = 1 : i64, tpu.core_type = #tpu.core_type<tc>, window_params = [{transform_indices = @transform_0, window_bounds = array<i64: 2, 21120>}, {transform_indices = @transform_1, window_bounds = array<i64: 21120, 128>}, {pipeline_mode = #tpu.pipeline_mode<synchronous>, transform_indices = @transform_2, window_bounds = array<i64: 1, 128>}, {pipeline_mode = #tpu.pipeline_mode<synchronous>, transform_indices = @transform_3, window_bounds = array<i64: 1, 128>}, {pipeline_mode = #tpu.pipeline_mode<synchronous>, transform_indices = @transform_4, window_bounds = array<i64: 128, 1>}, {pipeline_mode = #tpu.pipeline_mode<synchronous>, transform_indices = @transform_5, window_bounds = array<i64: 1, 1>}, {pipeline_mode = #tpu.pipeline_mode<synchronous>, transform_indices = @transform_6, window_bounds = array<i64: 2, 1>}, {pipeline_mode = #tpu.pipeline_mode<synchronous>, transform_indices = @transform_7, window_bounds = array<i64: 2, 1>}]} {
    %c0_i32 = arith.constant 0 : i32
    %0 = arith.cmpi eq, %arg0, %c0_i32 : i32
    %1 = arith.extui %0 : i1 to i32
    %c0_i32_0 = arith.constant 0 : i32
    %2 = arith.cmpi ne, %1, %c0_i32_0 : i32
    scf.if %2 {
      %cst_9 = arith.constant 0.000000e+00 : f32
      %13 = vector.broadcast %cst_9 : f32 to vector<2x128xf32>
      %c0_10 = arith.constant 0 : index
      %c0_11 = arith.constant 0 : index
      %14 = vector.load %arg9[%c0_10, %c0_11] : memref<2x128xf32, #tpu.memory_space<vmem>>, vector<2x128xf32>
      tpu.vector_store %arg9[%c0_10, %c0_11], %13 {strides = array<i32>} : memref<2x128xf32, #tpu.memory_space<vmem>>, vector<2x128xf32>,
    } else {
    }
    %c0 = arith.constant 0 : index
    %c0_1 = arith.constant 0 : index
    %3 = vector.load %arg2[%c0, %c0_1] : memref<21120x128xi8, #tpu.memory_space<vmem>>, vector<21120x128xi8>
    %4 = arith.sitofp %3 : vector<21120x128xi8> to vector<21120x128xbf16>
    %c0_2 = arith.constant 0 : index
    %c0_3 = arith.constant 0 : index
    %5 = vector.load %arg9[%c0_2, %c0_3] : memref<2x128xf32, #tpu.memory_space<vmem>>, vector<2x128xf32>
    %c0_4 = arith.constant 0 : index
    %c0_5 = arith.constant 0 : index
    %6 = vector.load %arg1[%c0_4, %c0_5] : memref<2x21120xbf16, #tpu.memory_space<vmem>>, vector<2x21120xbf16>
    %cst = arith.constant dense<0.000000e+00> : vector<2x128xf32>
    %7 = tpu.matmul %6, %4, %cst {dimension_numbers = #tpu.dot_dimension_numbers<[1], [0], [0], [1], [0, 0, 1, 1], [], []>} : vector<2x21120xbf16>, vector<21120x128xbf16>, vector<2x128xf32> -> vector<2x128xf32>
    %8 = arith.addf %5, %7 : vector<2x128xf32>
    %c0_6 = arith.constant 0 : index
    %c0_7 = arith.constant 0 : index
    %9 = vector.load %arg9[%c0_6, %c0_7] : memref<2x128xf32, #tpu.memory_space<vmem>>, vector<2x128xf32>
    tpu.vector_store %arg9[%c0_6, %c0_7], %8 {strides = array<i32>} : memref<2x128xf32, #tpu.memory_space<vmem>>, vector<2x128xf32>,
    %c2_i32 = arith.constant 2 : i32
    %10 = arith.cmpi eq, %arg0, %c2_i32 : i32
    %11 = arith.extui %10 : i1 to i32
    %c0_i32_8 = arith.constant 0 : i32
    %12 = arith.cmpi ne, %11, %c0_i32_8 : i32
    scf.if %12 {
      %c0_9 = arith.constant 0 : index
      %c0_10 = arith.constant 0 : index
      %13 = vector.load %arg9[%c0_9, %c0_10] : memref<2x128xf32, #tpu.memory_space<vmem>>, vector<2x128xf32>
      %c0_11 = arith.constant 0 : index
      %c0_12 = arith.constant 0 : index
      %14 = vector.load %arg3[%c0_11, %c0_12] : memref<1x128xf32, #tpu.memory_space<vmem>>, vector<1x128xf32>
      %15 = vector.broadcast %14 : vector<1x128xf32> to vector<2x128xf32>
      %16 = arith.mulf %13, %15 : vector<2x128xf32>
      %c0_13 = arith.constant 0 : index
      %c0_14 = arith.constant 0 : index
      %17 = vector.load %arg4[%c0_13, %c0_14] : memref<1x128xf32, #tpu.memory_space<vmem>>, vector<1x128xf32>
      %18 = vector.broadcast %17 : vector<1x128xf32> to vector<2x128xf32>
      %19 = arith.addf %16, %18 : vector<2x128xf32>
      %cst_15 = arith.constant 0.000000e+00 : f32
      %20 = vector.broadcast %cst_15 : f32 to vector<2x128xf32>
      %21 = arith.maximumf %19, %20 : vector<2x128xf32>
      %c0_16 = arith.constant 0 : index
      %c0_17 = arith.constant 0 : index
      %22 = vector.load %arg5[%c0_16, %c0_17] : memref<128x1xf32, #tpu.memory_space<vmem>>, vector<128x1xf32>
      %cst_18 = arith.constant dense<0.000000e+00> : vector<2x1xf32>
      %23 = tpu.matmul %21, %22, %cst_18 {dimension_numbers = #tpu.dot_dimension_numbers<[1], [0], [0], [1], [0, 0, 1, 1], [], []>} : vector<2x128xf32>, vector<128x1xf32>, vector<2x1xf32> -> vector<2x1xf32>
      %c0_19 = arith.constant 0 : index
      %c0_20 = arith.constant 0 : index
      %24 = vector.load %arg6[%c0_19, %c0_20] : memref<1x1xf32, #tpu.memory_space<vmem>>, vector<1x1xf32>
      %25 = vector.broadcast %24 : vector<1x1xf32> to vector<2x1xf32>
      %26 = arith.addf %23, %25 : vector<2x1xf32>
      %c0_21 = arith.constant 0 : index
      %c0_22 = arith.constant 0 : index
      %27 = vector.load %arg8[%c0_21, %c0_22] : memref<2x1xf32, #tpu.memory_space<vmem>>, vector<2x1xf32>
      tpu.vector_store %arg8[%c0_21, %c0_22], %26 {strides = array<i32>} : memref<2x1xf32, #tpu.memory_space<vmem>>, vector<2x1xf32>,
      %cst_23 = arith.constant dense<0xFF800000> : vector<2xf32>
      %28 = vector.multi_reduction <maximumf>, %26, %cst_23 [1] : vector<2x1xf32> to vector<2xf32>
      %29 = vector.shape_cast %28 : vector<2xf32> to vector<2x1xf32>
      %30 = arith.subf %26, %29 : vector<2x1xf32>
      %31 = math.exp %30 : vector<2x1xf32>
      %cst_24 = arith.constant dense<0.000000e+00> : vector<2xf32>
      %32 = vector.multi_reduction <add>, %31, %cst_24 [1] : vector<2x1xf32> to vector<2xf32>
      %33 = vector.shape_cast %32 : vector<2xf32> to vector<2x1xf32>
      %34 = math.log %33 : vector<2x1xf32>
      %35 = arith.addf %34, %29 : vector<2x1xf32>
      %36 = arith.subf %26, %35 : vector<2x1xf32>
      %c0_25 = arith.constant 0 : index
      %c0_26 = arith.constant 0 : index
      %37 = vector.load %arg7[%c0_25, %c0_26] : memref<2x1xf32, #tpu.memory_space<vmem>>, vector<2x1xf32>
      tpu.vector_store %arg7[%c0_25, %c0_26], %36 {strides = array<i32>} : memref<2x1xf32, #tpu.memory_space<vmem>>, vector<2x1xf32>,
    } else {
    }
    return
  }
  func.func @transform_0(%arg0: i32) -> (i32, i32) {
    %c0_i32 = arith.constant 0 : i32
    %c0_i32_0 = arith.constant 0 : i32
    return %c0_i32, %arg0 : i32, i32
  }
  func.func @transform_1(%arg0: i32) -> (i32, i32) {
    %c0_i32 = arith.constant 0 : i32
    %c0_i32_0 = arith.constant 0 : i32
    return %arg0, %c0_i32 : i32, i32
  }
  func.func @transform_2(%arg0: i32) -> (i32, i32) {
    %c0_i32 = arith.constant 0 : i32
    %c0_i32_0 = arith.constant 0 : i32
    %c0_i32_1 = arith.constant 0 : i32
    return %c0_i32, %c0_i32_0 : i32, i32
  }
  func.func @transform_3(%arg0: i32) -> (i32, i32) {
    %c0_i32 = arith.constant 0 : i32
    %c0_i32_0 = arith.constant 0 : i32
    %c0_i32_1 = arith.constant 0 : i32
    return %c0_i32, %c0_i32_0 : i32, i32
  }
  func.func @transform_4(%arg0: i32) -> (i32, i32) {
    %c0_i32 = arith.constant 0 : i32
    %c0_i32_0 = arith.constant 0 : i32
    %c0_i32_1 = arith.constant 0 : i32
    return %c0_i32, %c0_i32_0 : i32, i32
  }
  func.func @transform_5(%arg0: i32) -> (i32, i32) {
    %c0_i32 = arith.constant 0 : i32
    %c0_i32_0 = arith.constant 0 : i32
    %c0_i32_1 = arith.constant 0 : i32
    return %c0_i32, %c0_i32_0 : i32, i32
  }
  func.func @transform_6(%arg0: i32) -> (i32, i32) {
    %c0_i32 = arith.constant 0 : i32
    %c0_i32_0 = arith.constant 0 : i32
    %c0_i32_1 = arith.constant 0 : i32
    return %c0_i32, %c0_i32_0 : i32, i32
  }
  func.func @transform_7(%arg0: i32) -> (i32, i32) {
    %c0_i32 = arith.constant 0 : i32
    %c0_i32_0 = arith.constant 0 : i32
    %c0_i32_1 = arith.constant 0 : i32
    return %c0_i32, %c0_i32_0 : i32, i32
  }
}

module attributes {stable_mosaic.version = 11 : i64} {
  func.func @conv_stack_kernel(%arg0: i32, %arg1: memref<1x12x1000xf32, #tpu.memory_space<vmem>>, %arg2: memref<16x60xf32, #tpu.memory_space<vmem>>, %arg3: memref<16x1xf32, #tpu.memory_space<vmem>>, %arg4: memref<32x80xf32, #tpu.memory_space<vmem>>, %arg5: memref<32x1xf32, #tpu.memory_space<vmem>>, %arg6: memref<64x96xf32, #tpu.memory_space<vmem>>, %arg7: memref<64x1xf32, #tpu.memory_space<vmem>>, %arg8: memref<1x64x990xbf16, #tpu.memory_space<vmem>>, %arg9: memref<60x996xf32, #tpu.memory_space<vmem>>, %arg10: memref<16x996xf32, #tpu.memory_space<vmem>>, %arg11: memref<80x992xf32, #tpu.memory_space<vmem>>, %arg12: memref<32x992xf32, #tpu.memory_space<vmem>>, %arg13: memref<96x990xf32, #tpu.memory_space<vmem>>) attributes {dimension_semantics = [#tpu.dimension_semantics<parallel>], iteration_bounds = array<i64: 2>, scalar_prefetch = 0 : i64, scratch_operands = 5 : i64, tpu.core_type = #tpu.core_type<tc>, window_params = [{transform_indices = @transform_0, window_bounds = array<i64: 1, 12, 1000>}, {pipeline_mode = #tpu.pipeline_mode<synchronous>, transform_indices = @transform_1, window_bounds = array<i64: 16, 60>}, {pipeline_mode = #tpu.pipeline_mode<synchronous>, transform_indices = @transform_2, window_bounds = array<i64: 16, 1>}, {pipeline_mode = #tpu.pipeline_mode<synchronous>, transform_indices = @transform_3, window_bounds = array<i64: 32, 80>}, {pipeline_mode = #tpu.pipeline_mode<synchronous>, transform_indices = @transform_4, window_bounds = array<i64: 32, 1>}, {pipeline_mode = #tpu.pipeline_mode<synchronous>, transform_indices = @transform_5, window_bounds = array<i64: 64, 96>}, {pipeline_mode = #tpu.pipeline_mode<synchronous>, transform_indices = @transform_6, window_bounds = array<i64: 64, 1>}, {transform_indices = @transform_7, window_bounds = array<i64: 1, 64, 990>}]} {
    %c0 = arith.constant 0 : index
    %c0_0 = arith.constant 0 : index
    %c0_1 = arith.constant 0 : index
    %0 = vector.load %arg1[%c0, %c0_0, %c0_1] : memref<1x12x1000xf32, #tpu.memory_space<vmem>>, vector<1x12x996xf32>
    %1 = vector.shape_cast %0 : vector<1x12x996xf32> to vector<12x996xf32>
    %c0_2 = arith.constant 0 : index
    %c0_3 = arith.constant 0 : index
    %2 = vector.load %arg9[%c0_2, %c0_3] : memref<60x996xf32, #tpu.memory_space<vmem>>, vector<12x996xf32>
    tpu.vector_store %arg9[%c0_2, %c0_3], %1 {strides = array<i32>} : memref<60x996xf32, #tpu.memory_space<vmem>>, vector<12x996xf32>,
    %c0_4 = arith.constant 0 : index
    %c0_5 = arith.constant 0 : index
    %c1 = arith.constant 1 : index
    %3 = vector.load %arg1[%c0_4, %c0_5, %c1] : memref<1x12x1000xf32, #tpu.memory_space<vmem>>, vector<1x12x996xf32>
    %4 = vector.shape_cast %3 : vector<1x12x996xf32> to vector<12x996xf32>
    %c12 = arith.constant 12 : index
    %c0_6 = arith.constant 0 : index
    %5 = vector.load %arg9[%c12, %c0_6] : memref<60x996xf32, #tpu.memory_space<vmem>>, vector<12x996xf32>
    tpu.vector_store %arg9[%c12, %c0_6], %4 {strides = array<i32>} : memref<60x996xf32, #tpu.memory_space<vmem>>, vector<12x996xf32>,
    %c0_7 = arith.constant 0 : index
    %c0_8 = arith.constant 0 : index
    %c2 = arith.constant 2 : index
    %6 = vector.load %arg1[%c0_7, %c0_8, %c2] : memref<1x12x1000xf32, #tpu.memory_space<vmem>>, vector<1x12x996xf32>
    %7 = vector.shape_cast %6 : vector<1x12x996xf32> to vector<12x996xf32>
    %c24 = arith.constant 24 : index
    %c0_9 = arith.constant 0 : index
    %8 = vector.load %arg9[%c24, %c0_9] : memref<60x996xf32, #tpu.memory_space<vmem>>, vector<12x996xf32>
    tpu.vector_store %arg9[%c24, %c0_9], %7 {strides = array<i32>} : memref<60x996xf32, #tpu.memory_space<vmem>>, vector<12x996xf32>,
    %c0_10 = arith.constant 0 : index
    %c0_11 = arith.constant 0 : index
    %c3 = arith.constant 3 : index
    %9 = vector.load %arg1[%c0_10, %c0_11, %c3] : memref<1x12x1000xf32, #tpu.memory_space<vmem>>, vector<1x12x996xf32>
    %10 = vector.shape_cast %9 : vector<1x12x996xf32> to vector<12x996xf32>
    %c36 = arith.constant 36 : index
    %c0_12 = arith.constant 0 : index
    %11 = vector.load %arg9[%c36, %c0_12] : memref<60x996xf32, #tpu.memory_space<vmem>>, vector<12x996xf32>
    tpu.vector_store %arg9[%c36, %c0_12], %10 {strides = array<i32>} : memref<60x996xf32, #tpu.memory_space<vmem>>, vector<12x996xf32>,
    %c0_13 = arith.constant 0 : index
    %c0_14 = arith.constant 0 : index
    %c4 = arith.constant 4 : index
    %12 = vector.load %arg1[%c0_13, %c0_14, %c4] : memref<1x12x1000xf32, #tpu.memory_space<vmem>>, vector<1x12x996xf32>
    %13 = vector.shape_cast %12 : vector<1x12x996xf32> to vector<12x996xf32>
    %c48 = arith.constant 48 : index
    %c0_15 = arith.constant 0 : index
    %14 = vector.load %arg9[%c48, %c0_15] : memref<60x996xf32, #tpu.memory_space<vmem>>, vector<12x996xf32>
    tpu.vector_store %arg9[%c48, %c0_15], %13 {strides = array<i32>} : memref<60x996xf32, #tpu.memory_space<vmem>>, vector<12x996xf32>,
    %c0_16 = arith.constant 0 : index
    %c0_17 = arith.constant 0 : index
    %15 = vector.load %arg2[%c0_16, %c0_17] : memref<16x60xf32, #tpu.memory_space<vmem>>, vector<16x60xf32>
    %c0_18 = arith.constant 0 : index
    %c0_19 = arith.constant 0 : index
    %16 = vector.load %arg9[%c0_18, %c0_19] : memref<60x996xf32, #tpu.memory_space<vmem>>, vector<60x996xf32>
    %cst = arith.constant dense<0.000000e+00> : vector<16x996xf32>
    %17 = tpu.matmul %15, %16, %cst {dimension_numbers = #tpu.dot_dimension_numbers<[1], [0], [0], [1], [0, 0, 1, 1], [], []>} : vector<16x60xf32>, vector<60x996xf32>, vector<16x996xf32> -> vector<16x996xf32>
    %c0_20 = arith.constant 0 : index
    %c0_21 = arith.constant 0 : index
    %18 = vector.load %arg3[%c0_20, %c0_21] : memref<16x1xf32, #tpu.memory_space<vmem>>, vector<16x1xf32>
    %19 = vector.broadcast %18 : vector<16x1xf32> to vector<16x996xf32>
    %20 = arith.addf %17, %19 : vector<16x996xf32>
    %cst_22 = arith.constant 0.000000e+00 : f32
    %21 = vector.broadcast %cst_22 : f32 to vector<16x996xf32>
    %22 = arith.maximumf %20, %21 : vector<16x996xf32>
    %c0_23 = arith.constant 0 : index
    %c0_24 = arith.constant 0 : index
    %23 = vector.load %arg10[%c0_23, %c0_24] : memref<16x996xf32, #tpu.memory_space<vmem>>, vector<16x996xf32>
    tpu.vector_store %arg10[%c0_23, %c0_24], %22 {strides = array<i32>} : memref<16x996xf32, #tpu.memory_space<vmem>>, vector<16x996xf32>,
    %c0_25 = arith.constant 0 : index
    %c0_26 = arith.constant 0 : index
    %24 = vector.load %arg10[%c0_25, %c0_26] : memref<16x996xf32, #tpu.memory_space<vmem>>, vector<16x992xf32>
    %c0_27 = arith.constant 0 : index
    %c0_28 = arith.constant 0 : index
    %25 = vector.load %arg11[%c0_27, %c0_28] : memref<80x992xf32, #tpu.memory_space<vmem>>, vector<16x992xf32>
    tpu.vector_store %arg11[%c0_27, %c0_28], %24 {strides = array<i32>} : memref<80x992xf32, #tpu.memory_space<vmem>>, vector<16x992xf32>,
    %c0_29 = arith.constant 0 : index
    %c1_30 = arith.constant 1 : index
    %26 = vector.load %arg10[%c0_29, %c1_30] : memref<16x996xf32, #tpu.memory_space<vmem>>, vector<16x992xf32>
    %c16 = arith.constant 16 : index
    %c0_31 = arith.constant 0 : index
    %27 = vector.load %arg11[%c16, %c0_31] : memref<80x992xf32, #tpu.memory_space<vmem>>, vector<16x992xf32>
    tpu.vector_store %arg11[%c16, %c0_31], %26 {strides = array<i32>} : memref<80x992xf32, #tpu.memory_space<vmem>>, vector<16x992xf32>,
    %c0_32 = arith.constant 0 : index
    %c2_33 = arith.constant 2 : index
    %28 = vector.load %arg10[%c0_32, %c2_33] : memref<16x996xf32, #tpu.memory_space<vmem>>, vector<16x992xf32>
    %c32 = arith.constant 32 : index
    %c0_34 = arith.constant 0 : index
    %29 = vector.load %arg11[%c32, %c0_34] : memref<80x992xf32, #tpu.memory_space<vmem>>, vector<16x992xf32>
    tpu.vector_store %arg11[%c32, %c0_34], %28 {strides = array<i32>} : memref<80x992xf32, #tpu.memory_space<vmem>>, vector<16x992xf32>,
    %c0_35 = arith.constant 0 : index
    %c3_36 = arith.constant 3 : index
    %30 = vector.load %arg10[%c0_35, %c3_36] : memref<16x996xf32, #tpu.memory_space<vmem>>, vector<16x992xf32>
    %c48_37 = arith.constant 48 : index
    %c0_38 = arith.constant 0 : index
    %31 = vector.load %arg11[%c48_37, %c0_38] : memref<80x992xf32, #tpu.memory_space<vmem>>, vector<16x992xf32>
    tpu.vector_store %arg11[%c48_37, %c0_38], %30 {strides = array<i32>} : memref<80x992xf32, #tpu.memory_space<vmem>>, vector<16x992xf32>,
    %c0_39 = arith.constant 0 : index
    %c4_40 = arith.constant 4 : index
    %32 = vector.load %arg10[%c0_39, %c4_40] : memref<16x996xf32, #tpu.memory_space<vmem>>, vector<16x992xf32>
    %c64 = arith.constant 64 : index
    %c0_41 = arith.constant 0 : index
    %33 = vector.load %arg11[%c64, %c0_41] : memref<80x992xf32, #tpu.memory_space<vmem>>, vector<16x992xf32>
    tpu.vector_store %arg11[%c64, %c0_41], %32 {strides = array<i32>} : memref<80x992xf32, #tpu.memory_space<vmem>>, vector<16x992xf32>,
    %c0_42 = arith.constant 0 : index
    %c0_43 = arith.constant 0 : index
    %34 = vector.load %arg4[%c0_42, %c0_43] : memref<32x80xf32, #tpu.memory_space<vmem>>, vector<32x80xf32>
    %c0_44 = arith.constant 0 : index
    %c0_45 = arith.constant 0 : index
    %35 = vector.load %arg11[%c0_44, %c0_45] : memref<80x992xf32, #tpu.memory_space<vmem>>, vector<80x992xf32>
    %cst_46 = arith.constant dense<0.000000e+00> : vector<32x992xf32>
    %36 = tpu.matmul %34, %35, %cst_46 {dimension_numbers = #tpu.dot_dimension_numbers<[1], [0], [0], [1], [0, 0, 1, 1], [], []>} : vector<32x80xf32>, vector<80x992xf32>, vector<32x992xf32> -> vector<32x992xf32>
    %c0_47 = arith.constant 0 : index
    %c0_48 = arith.constant 0 : index
    %37 = vector.load %arg5[%c0_47, %c0_48] : memref<32x1xf32, #tpu.memory_space<vmem>>, vector<32x1xf32>
    %38 = vector.broadcast %37 : vector<32x1xf32> to vector<32x992xf32>
    %39 = arith.addf %36, %38 : vector<32x992xf32>
    %cst_49 = arith.constant 0.000000e+00 : f32
    %40 = vector.broadcast %cst_49 : f32 to vector<32x992xf32>
    %41 = arith.maximumf %39, %40 : vector<32x992xf32>
    %c0_50 = arith.constant 0 : index
    %c0_51 = arith.constant 0 : index
    %42 = vector.load %arg12[%c0_50, %c0_51] : memref<32x992xf32, #tpu.memory_space<vmem>>, vector<32x992xf32>
    tpu.vector_store %arg12[%c0_50, %c0_51], %41 {strides = array<i32>} : memref<32x992xf32, #tpu.memory_space<vmem>>, vector<32x992xf32>,
    %c0_52 = arith.constant 0 : index
    %c0_53 = arith.constant 0 : index
    %43 = vector.load %arg12[%c0_52, %c0_53] : memref<32x992xf32, #tpu.memory_space<vmem>>, vector<32x990xf32>
    %c0_54 = arith.constant 0 : index
    %c0_55 = arith.constant 0 : index
    %44 = vector.load %arg13[%c0_54, %c0_55] : memref<96x990xf32, #tpu.memory_space<vmem>>, vector<32x990xf32>
    tpu.vector_store %arg13[%c0_54, %c0_55], %43 {strides = array<i32>} : memref<96x990xf32, #tpu.memory_space<vmem>>, vector<32x990xf32>,
    %c0_56 = arith.constant 0 : index
    %c1_57 = arith.constant 1 : index
    %45 = vector.load %arg12[%c0_56, %c1_57] : memref<32x992xf32, #tpu.memory_space<vmem>>, vector<32x990xf32>
    %c32_58 = arith.constant 32 : index
    %c0_59 = arith.constant 0 : index
    %46 = vector.load %arg13[%c32_58, %c0_59] : memref<96x990xf32, #tpu.memory_space<vmem>>, vector<32x990xf32>
    tpu.vector_store %arg13[%c32_58, %c0_59], %45 {strides = array<i32>} : memref<96x990xf32, #tpu.memory_space<vmem>>, vector<32x990xf32>,
    %c0_60 = arith.constant 0 : index
    %c2_61 = arith.constant 2 : index
    %47 = vector.load %arg12[%c0_60, %c2_61] : memref<32x992xf32, #tpu.memory_space<vmem>>, vector<32x990xf32>
    %c64_62 = arith.constant 64 : index
    %c0_63 = arith.constant 0 : index
    %48 = vector.load %arg13[%c64_62, %c0_63] : memref<96x990xf32, #tpu.memory_space<vmem>>, vector<32x990xf32>
    tpu.vector_store %arg13[%c64_62, %c0_63], %47 {strides = array<i32>} : memref<96x990xf32, #tpu.memory_space<vmem>>, vector<32x990xf32>,
    %c0_64 = arith.constant 0 : index
    %c0_65 = arith.constant 0 : index
    %49 = vector.load %arg6[%c0_64, %c0_65] : memref<64x96xf32, #tpu.memory_space<vmem>>, vector<64x96xf32>
    %c0_66 = arith.constant 0 : index
    %c0_67 = arith.constant 0 : index
    %50 = vector.load %arg13[%c0_66, %c0_67] : memref<96x990xf32, #tpu.memory_space<vmem>>, vector<96x512xf32>
    %cst_68 = arith.constant dense<0.000000e+00> : vector<64x512xf32>
    %51 = tpu.matmul %49, %50, %cst_68 {dimension_numbers = #tpu.dot_dimension_numbers<[1], [0], [0], [1], [0, 0, 1, 1], [], []>} : vector<64x96xf32>, vector<96x512xf32>, vector<64x512xf32> -> vector<64x512xf32>
    %c0_69 = arith.constant 0 : index
    %c0_70 = arith.constant 0 : index
    %52 = vector.load %arg7[%c0_69, %c0_70] : memref<64x1xf32, #tpu.memory_space<vmem>>, vector<64x1xf32>
    %53 = vector.broadcast %52 : vector<64x1xf32> to vector<64x512xf32>
    %54 = arith.addf %51, %53 : vector<64x512xf32>
    %cst_71 = arith.constant 0.000000e+00 : f32
    %55 = vector.broadcast %cst_71 : f32 to vector<64x512xf32>
    %56 = arith.maximumf %54, %55 : vector<64x512xf32>
    %57 = arith.truncf %56 : vector<64x512xf32> to vector<64x512xbf16>
    %c0_72 = arith.constant 0 : index
    %c0_73 = arith.constant 0 : index
    %c0_74 = arith.constant 0 : index
    %58 = vector.load %arg8[%c0_72, %c0_73, %c0_74] : memref<1x64x990xbf16, #tpu.memory_space<vmem>>, vector<1x64x512xbf16>
    %59 = vector.shape_cast %58 : vector<1x64x512xbf16> to vector<64x512xbf16>
    %60 = vector.shape_cast %57 : vector<64x512xbf16> to vector<1x64x512xbf16>
    tpu.vector_store %arg8[%c0_72, %c0_73, %c0_74], %60 {strides = array<i32>} : memref<1x64x990xbf16, #tpu.memory_space<vmem>>, vector<1x64x512xbf16>,
    %c0_75 = arith.constant 0 : index
    %c0_76 = arith.constant 0 : index
    %61 = vector.load %arg6[%c0_75, %c0_76] : memref<64x96xf32, #tpu.memory_space<vmem>>, vector<64x96xf32>
    %c0_77 = arith.constant 0 : index
    %c512 = arith.constant 512 : index
    %62 = vector.load %arg13[%c0_77, %c512] : memref<96x990xf32, #tpu.memory_space<vmem>>, vector<96x478xf32>
    %cst_78 = arith.constant dense<0.000000e+00> : vector<64x478xf32>
    %63 = tpu.matmul %61, %62, %cst_78 {dimension_numbers = #tpu.dot_dimension_numbers<[1], [0], [0], [1], [0, 0, 1, 1], [], []>} : vector<64x96xf32>, vector<96x478xf32>, vector<64x478xf32> -> vector<64x478xf32>
    %c0_79 = arith.constant 0 : index
    %c0_80 = arith.constant 0 : index
    %64 = vector.load %arg7[%c0_79, %c0_80] : memref<64x1xf32, #tpu.memory_space<vmem>>, vector<64x1xf32>
    %65 = vector.broadcast %64 : vector<64x1xf32> to vector<64x478xf32>
    %66 = arith.addf %63, %65 : vector<64x478xf32>
    %cst_81 = arith.constant 0.000000e+00 : f32
    %67 = vector.broadcast %cst_81 : f32 to vector<64x478xf32>
    %68 = arith.maximumf %66, %67 : vector<64x478xf32>
    %69 = arith.truncf %68 : vector<64x478xf32> to vector<64x478xbf16>
    %c0_82 = arith.constant 0 : index
    %c0_83 = arith.constant 0 : index
    %c512_84 = arith.constant 512 : index
    %70 = vector.load %arg8[%c0_82, %c0_83, %c512_84] : memref<1x64x990xbf16, #tpu.memory_space<vmem>>, vector<1x64x478xbf16>
    %71 = vector.shape_cast %70 : vector<1x64x478xbf16> to vector<64x478xbf16>
    %72 = vector.shape_cast %69 : vector<64x478xbf16> to vector<1x64x478xbf16>
    tpu.vector_store %arg8[%c0_82, %c0_83, %c512_84], %72 {strides = array<i32>} : memref<1x64x990xbf16, #tpu.memory_space<vmem>>, vector<1x64x478xbf16>,
    return
  }
  func.func @transform_0(%arg0: i32) -> (i32, i32, i32) {
    %c0_i32 = arith.constant 0 : i32
    %c0_i32_0 = arith.constant 0 : i32
    %c0_i32_1 = arith.constant 0 : i32
    return %arg0, %c0_i32, %c0_i32_0 : i32, i32, i32
  }
  func.func @transform_1(%arg0: i32) -> (i32, i32) {
    %c0_i32 = arith.constant 0 : i32
    %c0_i32_0 = arith.constant 0 : i32
    %c0_i32_1 = arith.constant 0 : i32
    return %c0_i32, %c0_i32_0 : i32, i32
  }
  func.func @transform_2(%arg0: i32) -> (i32, i32) {
    %c0_i32 = arith.constant 0 : i32
    %c0_i32_0 = arith.constant 0 : i32
    %c0_i32_1 = arith.constant 0 : i32
    return %c0_i32, %c0_i32_0 : i32, i32
  }
  func.func @transform_3(%arg0: i32) -> (i32, i32) {
    %c0_i32 = arith.constant 0 : i32
    %c0_i32_0 = arith.constant 0 : i32
    %c0_i32_1 = arith.constant 0 : i32
    return %c0_i32, %c0_i32_0 : i32, i32
  }
  func.func @transform_4(%arg0: i32) -> (i32, i32) {
    %c0_i32 = arith.constant 0 : i32
    %c0_i32_0 = arith.constant 0 : i32
    %c0_i32_1 = arith.constant 0 : i32
    return %c0_i32, %c0_i32_0 : i32, i32
  }
  func.func @transform_5(%arg0: i32) -> (i32, i32) {
    %c0_i32 = arith.constant 0 : i32
    %c0_i32_0 = arith.constant 0 : i32
    %c0_i32_1 = arith.constant 0 : i32
    return %c0_i32, %c0_i32_0 : i32, i32
  }
  func.func @transform_6(%arg0: i32) -> (i32, i32) {
    %c0_i32 = arith.constant 0 : i32
    %c0_i32_0 = arith.constant 0 : i32
    %c0_i32_1 = arith.constant 0 : i32
    return %c0_i32, %c0_i32_0 : i32, i32
  }
  func.func @transform_7(%arg0: i32) -> (i32, i32, i32) {
    %c0_i32 = arith.constant 0 : i32
    %c0_i32_0 = arith.constant 0 : i32
    %c0_i32_1 = arith.constant 0 : i32
    return %arg0, %c0_i32, %c0_i32_0 : i32, i32, i32
  }
}

</mosaic_0001>

<bundles_post_ra>
// kernel: creator_recognizer_forward.2
= control target key start
LH: loop header
LB: loop body
LE: loop exit
PB: predicated region body
PF: predicated region fallthrough
CT: control target
= control target key end

     0   :  { %12 = vsyncpa [#allocation8], 0  ;;  %s5910_s0 = inlined_call_operand.vmem [shape: f32[2,12,1000], index: 0, kind: input, shape index: {}]   ;;  %s5911_s1 = inlined_call_operand.hbm [shape: f32[16,60], index: 1, kind: input, shape index: {}]   ;;  %s5912_s2 = inlined_call_operand.vmem [shape: f32[16,1], index: 2, kind: input, shape index: {}]   ;;  %s5913_s3 = inlined_call_operand.hbm [shape: f32[32,80], index: 3, kind: input, shape index: {}]   ;;  %s5914_s4 = inlined_call_operand.vmem [shape: f32[32,1], index: 4, kind: input, shape index: {}]   ;;  %s5915_s5 = inlined_call_operand.hbm [shape: f32[64,96], index: 5, kind: input, shape index: {}]   ;;  %s5916_s6 = inlined_call_operand.vmem [shape: f32[64,1], index: 6, kind: input, shape index: {}]   ;;  %s5917_s7 = inlined_call_operand.vmem [shape: bf16[2,64,990], index: 7, kind: output, shape index: {}]  }
   0x1   :  { %13 = vsyncpa [#allocation10], 0  ;;  %s4500_s24 = smov 0  }
   0x2 LB: > { %s4506_s25 = sadd.s32 4294967295, %s4446_s24   ;;  %p3905_p0 = scmp.ge.s32.totalorder %s4446_s24, 1  ;;  %s4446_s24 = sphi %s4500_s24, %s19_s24  }
   0x3   : > { %p202_p1 = scmp.lt.s32.totalorder %s4446_s24, 3  ;;  %p5918_p2 = scmp.eq.s32.totalorder %s4506_s25, 0 }
   0x4   : > { %s4448_s27 = smov [#allocation9]   ;;  %s4449_s29 = smov [#allocation7]  }
   0x5   : > { %p4511_p3 = pnand %p3905_p0, %p202_p1  ;;  %s230_s28 = sshll.u32 %s4448_s27, 4  ;;  %s231_s28 = int_to_ptr.vmem [resolvable:$true] %s230_s28 }
   0x6   : > { %s214_s30 = sshll.u32 %s4449_s29, 4  ;;  %s4450_s9 = smov [#allocation11]   ;;  %s4523_s30 = int_to_ptr.vmem [resolvable:$true] %s214_s30 }
   0x7   : > { %s5920_s26 = scalar_select %p4511_p3, 1, 0 }
   0x8   : > { %p4310_p4 = pneg %p4511_p3  ;;  %s246_s10 = sshll.u32 %s4450_s9, 4  ;;  %s4525_s10 = int_to_ptr.vmem [resolvable:$true] %s246_s10 }
   0x9   : > { %s4348_s13 = scalar_lea.hbm %s5913_s3, 512 }
   0xa   : > { %p4519_p5 = pnand %p5918_p2, %p4310_p4  ;;  %p4349_p6 = scmp.ne.s32.totalorder %s5913_s3, %s4348_s13 }
   0xb   : > { %p4355_p10 = scmp.lt.u32.totalorder %s4348_s13, %s5913_s3 }
   0xc   : > { %p4535_p7 = pneg %p4519_p5 }
   0xe   : > { %p4351_p8 = pnand %p4535_p7, %p4349_p6 }
  0x10   : > { %p4352_p9 = pneg %p4351_p8 }
  0x12   : > { %p4357_p11 = pnand %p4355_p10, %p4352_p9 }
  0x14   : > { %4360 = shalt.err (!%p4357_p11)
}
  0x15   : > { %s4361_s19 = scalar_lea.vmem %s231_s28, 512  ;;  %p4369_p1 = scmp.lt.s32.totalorder %s231_s28, %s231_s28 }
  0x16   : > { %p4362_p12 = scmp.ne.s32.totalorder %s231_s28, %s4361_s19  ;;  %p4370_p4 = scmp.lt.s32.totalorder %s4361_s19, %s4361_s19 }
  0x18   : > { %p4364_p13 = pnand %p4362_p12, %p4535_p7  ;;  %p4371_p2 = por %p4370_p4, %p4369_p1 }
  0x1a   : > { %p4365_p0 = pneg %p4364_p13 }
  0x1c   : > { %p4372_p3 = pnand %p4371_p2, %p4365_p0 }
  0x1e   : > { %4375 = shalt.err (!%p4372_p3)
}
  0x1f   : > { %s4451_s20 = smov 128   ;;  %s4452_s21 = smov 8  }
  0x20   : > { %4316 = dma.hbm_to_vmem [thread:$0]  (!%p4519_p5), %s5913_s3, 512, %s231_s28, [#allocation10], %s4451_s20, %s4451_s20, %s4452_s21  }
  0x21   : > { %s4376_s9 = scalar_lea.hbm %s5911_s1, 256 }
  0x22   : > { %p4377_p2 = scmp.ne.s32.totalorder %s5911_s1, %s4376_s9  ;;  %p4383_p8 = scmp.lt.u32.totalorder %s4376_s9, %s5911_s1 }
  0x24   : > { %p4379_p3 = pnand %p4377_p2, %p4535_p7 }
  0x26   : > { %p4380_p6 = pneg %p4379_p3 }
  0x28   : > { %p4385_p9 = pnand %p4383_p8, %p4380_p6 }
  0x2a   : > { %4388 = shalt.err (!%p4385_p9)
}
  0x2b   : > { %s4389_s28 = scalar_lea.vmem %s4523_s30, 256  ;;  %p4397_p13 = scmp.lt.s32.totalorder %s4523_s30, %s4523_s30 }
  0x2c   : > { %p4390_p10 = scmp.ne.s32.totalorder %s4523_s30, %s4389_s28  ;;  %p4398_p0 = scmp.lt.s32.totalorder %s4389_s28, %s4389_s28 }
  0x2e   : > { %p4392_p11 = pnand %p4390_p10, %p4535_p7  ;;  %p4399_p1 = por %p4398_p0, %p4397_p13 }
  0x30   : > { %p4393_p12 = pneg %p4392_p11 }
  0x32   : > { %p4400_p4 = pnand %p4399_p1, %p4393_p12 }
  0x34   : > { %4403 = shalt.err (!%p4400_p4)
}
  0x35   : > { %4313 = dma.hbm_to_vmem [thread:$0]  (!%p4519_p5), %s5911_s1, 256, %s4523_s30, [#allocation8], %s4451_s20, %s4451_s20, %s4452_s21  }
  0x36   : > { %s4404_s22 = scalar_lea.hbm %s5915_s5, 1024 }
  0x37   : > { %p4405_p2 = scmp.ne.s32.totalorder %s5915_s5, %s4404_s22  ;;  %p4411_p8 = scmp.lt.u32.totalorder %s4404_s22, %s5915_s5 }
  0x39   : > { %p4407_p3 = pnand %p4405_p2, %p4535_p7 }
  0x3b   : > { %p4408_p6 = pneg %p4407_p3 }
  0x3d   : > { %p4413_p9 = pnand %p4411_p8, %p4408_p6 }
  0x3f   : > { %4416 = shalt.err (!%p4413_p9)
}
  0x40   : > { %s4417_s30 = scalar_lea.vmem %s4525_s10, 1024  ;;  %p4425_p13 = scmp.lt.s32.totalorder %s4525_s10, %s4525_s10 }
  0x41   : > { %p4418_p10 = scmp.ne.s32.totalorder %s4525_s10, %s4417_s30  ;;  %p4426_p0 = scmp.lt.s32.totalorder %s4417_s30, %s4417_s30 }
  0x43   : > { %p4420_p11 = pnand %p4418_p10, %p4535_p7  ;;  %p4427_p1 = por %p4426_p0, %p4425_p13 }
  0x45   : > { %p4421_p12 = pneg %p4420_p11 }
  0x47   : > { %p4428_p4 = pnand %p4427_p1, %p4421_p12 }
  0x49   : > { %4431 = shalt.err (!%p4428_p4)
}
  0x4a   : > { %4319 = dma.hbm_to_vmem [thread:$0]  (!%p4519_p5), %s5915_s5, 1024, %s4525_s10, [#allocation10], %s4451_s20, %s4451_s20, %s4452_s21  }
  0x4b   : > { %p5923_p2 = scmp.ne.s32.totalorder %s5920_s26, 0 }
  0x4c   : > { %p5924_p7 = scmp.eq.s32.totalorder (!%p5923_p2), %s4506_s25, 0 }
  0x4d   : > { %273 = sbr.rel (%p5923_p2) target bundleno = 1446 (0x5a6), region = 48 }
  0x54   : > { %4437 = dma.done.wait (%p5924_p7), [#allocation8], 256   ;;  %p5925_p3 = pmov %p5924_p7 }
  0x56   : > { %4439 = vsyncadd (%p5925_p3), [#allocation8], 4294967040  ;;  %p5926_p6 = pmov %p5925_p3 }
  0x57   : > { %p5927_p8 = pmov %p5925_p3 }
  0x58   : > { %4441 = dma.done.wait (%p5926_p6), [#allocation10], 1536  }
  0x59   : > { %4443 = vsyncadd (%p5927_p8), [#allocation10], 4294965760  ;;  %p313_p9 = scmp.lt.s32.totalorder %s4506_s25, 1  ;;  %s4453_s20 = smov 127   ;;  %vm389_vm0 = vcmask 1043456   ;;  %vm346_vm1 = vcmask 818176  }
  0x5a   : > { %s4454_s21 = smov 126   ;;  %s4455_s13 = smov 125   ;;  %vm355_vm2 = vcmask 814080   ;;  %v4457_v61 = vmov 0.0   ;;  %vm446_vm3 = vcmask 1039360   ;;  %vm558_vm4 = vcmask 1031168  }
  0x5b   : > { %s5933_s25 = smov (!%p313_p9, %s4506_s25), 1  ;;  %s4456_s14 = smov 124   ;;  %1024 = vmatprep.mubr.f32.mxu0 %v4457_v61  ;;  %1101 = vmatprep.mubr.f32.mxu1 %v4457_v61  ;;  %vm693_vm5 = vcmask 1022976   ;;  %vm804_vm6 = vcmask 1014784   ;;  %vm4459_vm7 = vmmov 1   ;;  %vm484_vm9 = vcmask 818180  }
  0x5c   : > { %s4016_s26 = sshll.u32 %s5933_s25, 7  ;;  %vm4879_vm8 = vmpackc.low %vm389_vm0, %vm4459_vm7  ;;  %vm929_vm10 = vcmask 490496   ;;  %vm1323_vm11 = vcmask 785408   ;;  %vm1881_vm12 = vcmask 654336   ;;  %vm2353_vm13 = vcmask 769024   ;;  %s4017_s27 = sshll.u32 %s5933_s25, 8 }
  0x5d   : > { %s4624_s16 = scalar_lea.vmem %s5910_s0, %s4016_s26  ;;  %s5834_s30 = scalar_lea.vmem %s5917_s7, %s4017_s27  ;;  %vm3800_vm14 = vcmask 769028  }
  0x5e   : > { %v4627_v0 = vld [vmem:[%s4624_s16 + $0x8] sm:$0xff]  ;;  %v4630_v1 = vld [vmem:[%s4624_s16] sm:$0xff]  ;;  %v4633_v2 = vld [vmem:[%s4624_s16 + $0x10] sm:$0xff] }
  0x5f   : > { %v391_v3 = vrot.slane %v4627_v0, 4  ;;  %v4637_v4 = vrot.slane %v4630_v1, 4  ;;  %v4640_v5 = vld [vmem:[%s4624_s16 + $0x18] sm:$0xff]  ;;  %v4643_v6 = vld [vmem:[%s4624_s16 + $0x20] sm:$0xff]  ;;  %v4646_v7 = vld [vmem:[%s4624_s16 + $0x28] sm:$0xff]  ;;  %v392_v9 = vrot.slane %v4633_v2, 4 }
  0x60   : > { %v366_v8 = vld [vmem:[%s4624_s16 + $0x48] sm:$0xf]  ;;  %v4654_v10 = vrot.slane %v4640_v5, 4  ;;  %v367_v12 = vld [vmem:[%s4624_s16 + $0x50] sm:$0xf]  ;;  %v4664_v14 = vrot.slane %v4643_v6, 4  ;;  %vm5873_vm15 = vmor %vm3800_vm14, %vm389_vm0 }
  0x61   : > { %416 = vrot.lane.b32.xlu0 %v391_v3, %s4453_s20  ;;  %414 = vrot.lane.b32.xlu1 %v4637_v4, %s4453_s20  ;;  %v400_v11 = vrot.slane %v366_v8, 4  ;;  %v4658_v13 = vld [vmem:[%s4624_s16 + $0x30] sm:$0xff]  ;;  %v402_v16 = vrot.slane %v367_v12, 4  ;;  %v365_v17 = vld [vmem:[%s4624_s16 + $0x40] sm:$0xf]  ;;  %v395_v63 = vrot.slane %v4646_v7, 4 }
  0x62   : > { %v398_v19 = vrot.slane %v365_v17, 4  ;;  %v368_v20 = vld [vmem:[%s4624_s16 + $0x58] sm:$0xf]  ;;  %v369_v21 = vld [vmem:[%s4624_s16 + $0x60] sm:$0xf] }
  0x63   : > { %v401_v15 = vsel %vm389_vm0, %v391_v3, %v400_v11  ;;  %v403_v18 = vsel %vm389_vm0, %v392_v9, %v402_v16  ;;  %v404_v23 = vrot.slane %v368_v20, 4  ;;  %v406_v24 = vrot.slane %v369_v21, 4  ;;  %v332_v25 = vld [vmem:[%s4624_s16 + $0x48] sm:$0xf]  ;;  %v331_v26 = vld [vmem:[%s4624_s16 + $0x40] sm:$0xf] }
  0x64   : > { %v399_v22 = vsel %vm389_vm0, %v4637_v4, %v398_v19  ;;  %v334_v27 = vld [vmem:[%s4624_s16 + $0x58] sm:$0xf]  ;;  %349 = vst [vmem:[#allocation2 + $0x48] sm:$0xf] %v332_v25  ;;  %348 = vst [vmem:[#allocation2 + $0x40] sm:$0xf] %v331_v26 }
  0x65   : > { %418 = vrot.lane.b32.xlu0 %v392_v9, %s4453_s20  ;;  %420 = vrot.lane.b32.xlu1 %v4654_v10, %s4453_s20  ;;  %351 = vst [vmem:[#allocation2 + $0x58] sm:$0xf] %v334_v27  ;;  %v333_v28 = vld [vmem:[%s4624_s16 + $0x50] sm:$0xf]  ;;  %v405_v29 = vsel %vm389_vm0, %v4654_v10, %v404_v23  ;;  %v407_v30 = vsel %vm389_vm0, %v4664_v14, %v406_v24  ;;  %v503_v31 = vld [vmem:[%s4624_s16 + $0x48] sm:$0xf] }
  0x66   : > { %350 = vst [vmem:[#allocation2 + $0x50] sm:$0xf] %v333_v28  ;;  %v614_v32 = vld [vmem:[%s4624_s16 + $0x48] sm:$0xf]  ;;  %v504_v33 = vld [vmem:[%s4624_s16 + $0x50] sm:$0xf] }
  0x67   : > { %v647_v34 = vrot.slane %v614_v32, 4  ;;  %v615_v35 = vld [vmem:[%s4624_s16 + $0x50] sm:$0xf]  ;;  %v502_v39 = vld [vmem:[%s4624_s16 + $0x40] sm:$0xf]  ;;  %v4750_v56 = vld [vmem:[%s4624_s16 + $0x38] sm:$0xff] }
  0x68   : > { %v649_v37 = vrot.slane %v615_v35, 4  ;;  %v505_v40 = vld [vmem:[%s4624_s16 + $0x58] sm:$0xf]  ;;  %v506_v41 = vld [vmem:[%s4624_s16 + $0x60] sm:$0xf]  ;;  %347 = vst.msk [vmem:[#allocation2 + $0x38] sm:$0xff] %vm346_vm1, %v4750_v56 }
  0x69   : > { %422 = vrot.lane.b32.xlu0 %v4664_v14, %s4453_s20  ;;  %432 = vrot.lane.b32.xlu1 %v401_v15, %s4453_s20  ;;  %v648_v36 = vsel %vm389_vm0, %v391_v3, %v647_v34  ;;  %v613_v42 = vld [vmem:[%s4624_s16 + $0x40] sm:$0xf]  ;;  %v616_v44 = vld [vmem:[%s4624_s16 + $0x58] sm:$0xf] }
  0x6a   : > { %v650_v38 = vsel %vm389_vm0, %v392_v9, %v649_v37  ;;  %v645_v43 = vrot.slane %v613_v42, 4  ;;  %v617_v45 = vld [vmem:[%s4624_s16 + $0x60] sm:$0xf]  ;;  %v651_v47 = vrot.slane %v616_v44, 4  ;;  %v749_v51 = vld [vmem:[%s4624_s16 + $0x48] sm:$0xf] }
  0x6b   : > { %v653_v48 = vrot.slane %v617_v45, 4  ;;  %v750_v52 = vld [vmem:[%s4624_s16 + $0x50] sm:$0xf]  ;;  %v336_v53 = vld [vmem:[%s4624_s16 + $0x68] sm:$0xf] }
  0x6c   : > { %v646_v46 = vsel %vm389_vm0, %v4637_v4, %v645_v43  ;;  %v652_v49 = vsel %vm389_vm0, %v4654_v10, %v651_v47  ;;  %v335_v54 = vld [vmem:[%s4624_s16 + $0x60] sm:$0xf]  ;;  %353 = vst [vmem:[#allocation2 + $0x68] sm:$0xf] %v336_v53  ;;  %v338_v57 = vld [vmem:[%s4624_s16 + $0x78] sm:$0xf] }
  0x6d   : > { %434 = vrot.lane.b32.xlu0 %v403_v18, %s4453_s20  ;;  %528 = vrot.lane.b32.xlu1 %v4627_v0, %s4454_s21  ;;  %v654_v50 = vsel %vm389_vm0, %v4664_v14, %v653_v48  ;;  %352 = vst [vmem:[#allocation2 + $0x60] sm:$0xf] %v335_v54  ;;  %v748_v55 = vld [vmem:[%s4624_s16 + $0x40] sm:$0xf]  ;;  %356 = vst.msk [vmem:[#allocation2 + $0x78] sm:$0xf] %vm355_vm2, %v338_v57 }
  0x6e   : > { %v337_v58 = vld [vmem:[%s4624_s16 + $0x70] sm:$0xf]  ;;  %v751_v59 = vld [vmem:[%s4624_s16 + $0x58] sm:$0xf]  ;;  %v752_v60 = vld [vmem:[%s4624_s16 + $0x60] sm:$0xf] }
  0x6f   : > { %354 = vst [vmem:[#allocation2 + $0x70] sm:$0xf] %v337_v58  ;;  %v370_v62 = vld [vmem:[%s4624_s16 + $0x68] sm:$0xf]  ;;  %v371_v8 = vld [vmem:[%s4624_s16 + $0x70] sm:$0xf] }
  0x70   : > { %v410_v11 = vrot.slane %v371_v8, 4  ;;  %v372_v12 = vld [vmem:[%s4624_s16 + $0x78] sm:$0xf]  ;;  %v507_v17 = vld [vmem:[%s4624_s16 + $0x68] sm:$0xf]  ;;  %v4458_v53 = vmov 0  }
  0x71   : > { %530 = vrot.lane.b32.xlu0 %v4633_v2, %s4454_s21  ;;  %430 = vrot.lane.b32.xlu1 %v399_v22, %s4453_s20  ;;  %v412_v15 = vrot.slane %v372_v12, 4  ;;  %v618_v18 = vld [vmem:[%s4624_s16 + $0x68] sm:$0xf]  ;;  %v508_v19 = vld [vmem:[%s4624_s16 + $0x70] sm:$0xf] }
  0x72   : > { %v655_v20 = vrot.slane %v618_v18, 4  ;;  %v619_v21 = vld [vmem:[%s4624_s16 + $0x70] sm:$0xf]  ;;  %v620_v24 = vld [vmem:[%s4624_s16 + $0x78] sm:$0xf]  ;;  %4346 = vset.pattern.permute.xlu0 %v4458_v53  ;;  %v918_v54 = vld [vmem:[%s5912_s2 + $0x8] sm:$0xff]  ;;  %4347 = vset.pattern.permute.xlu1 %v4458_v53 }
  0x73   : > { %v657_v23 = vrot.slane %v619_v21, 4  ;;  %v509_v26 = vld [vmem:[%s4624_s16 + $0x78] sm:$0xf]  ;;  %v659_v27 = vrot.slane %v620_v24, 4  ;;  %v753_v32 = vld [vmem:[%s4624_s16 + $0x68] sm:$0xf] }
  0x74   : > { %v656_v22 = vsel %vm389_vm0, %v395_v63, %v655_v20 }
  0x75   : > { %436 = vrot.lane.b32.xlu0 %v405_v29, %s4453_s20  ;;  %438 = vrot.lane.b32.xlu1 %v407_v30, %s4453_s20 }
  0x79   : > { %526 = vrot.lane.b32.xlu0 %v4630_v1, %s4454_s21  ;;  %532 = vrot.lane.b32.xlu1 %v4640_v5, %s4454_s21 }
  0x7d   : > { %534 = vrot.lane.b32.xlu0 %v4643_v6, %s4454_s21  ;;  %544 = vrot.lane.b32.xlu1 %v503_v31, %s4454_s21 }
  0x81   : > { %546 = vrot.lane.b32.xlu0 %v504_v33, %s4454_s21  ;;  %663 = vrot.lane.b32.xlu1 %v391_v3, %s4455_s13  ;;  %v396_v3 = vrot.slane %v4658_v13, 4  ;;  %v754_v33 = vld [vmem:[%s4624_s16 + $0x70] sm:$0xf] }
  0x83   : > { %v658_v25 = vsel %vm389_vm0, %v396_v3, %v657_v23 }
  0x85   : > { %665 = vrot.lane.b32.xlu0 %v392_v9, %s4455_s13  ;;  %679 = vrot.lane.b32.xlu1 %v648_v36, %s4455_s13  ;;  %v397_v9 = vrot.slane %v4750_v56, 4 }
  0x87   : > { %v413_v16 = vsel %vm389_vm0, %v397_v9, %v412_v15  ;;  %v660_v28 = vsel %vm389_vm0, %v397_v9, %v659_v27 }
  0x89   : > { %681 = vrot.lane.b32.xlu0 %v650_v38, %s4455_s13  ;;  %542 = vrot.lane.b32.xlu1 %v502_v39, %s4454_s21  ;;  %v755_v38 = vld [vmem:[%s4624_s16 + $0x78] sm:$0xf] }
  0x8d   : > { %548 = vrot.lane.b32.xlu0 %v505_v40, %s4454_s21  ;;  %550 = vrot.lane.b32.xlu1 %v506_v41, %s4454_s21 }
  0x91   : > { %661 = vrot.lane.b32.xlu0 %v4637_v4, %s4455_s13  ;;  %667 = vrot.lane.b32.xlu1 %v4654_v10, %s4455_s13  ;;  %v408_v4 = vrot.slane %v370_v62, 4 }
  0x93   : > { %v409_v10 = vsel %vm389_vm0, %v395_v63, %v408_v4 }
  0x95   : > { %669 = vrot.lane.b32.xlu0 %v4664_v14, %s4455_s13  ;;  %677 = vrot.lane.b32.xlu1 %v646_v46, %s4455_s13  ;;  %v411_v14 = vsel %vm389_vm0, %v396_v3, %v410_v11 }
  0x99   : > { %683 = vrot.lane.b32.xlu0 %v652_v49, %s4455_s13  ;;  %685 = vrot.lane.b32.xlu1 %v654_v50, %s4455_s13  ;;  %v917_v49 = vld [vmem:[%s5912_s2] sm:$0xff] }
  0x9d   : > { %774 = vrot.lane.b32.xlu0 %v4627_v0, %s4456_s14  ;;  %776 = vrot.lane.b32.xlu1 %v4633_v2, %s4456_s14 }
  0xa1   : > { %790 = vrot.lane.b32.xlu0 %v749_v51, %s4456_s14  ;;  %792 = vrot.lane.b32.xlu1 %v750_v52, %s4456_s14 }
  0xa5   : > { %772 = vrot.lane.b32.xlu0 %v4630_v1, %s4456_s14  ;;  %778 = vrot.lane.b32.xlu1 %v4640_v5, %s4456_s14 }
  0xa9   : > { %780 = vrot.lane.b32.xlu0 %v4643_v6, %s4456_s14  ;;  %788 = vrot.lane.b32.xlu1 %v748_v55, %s4456_s14 }
  0xad   : > { %794 = vrot.lane.b32.xlu0 %v751_v59, %s4456_s14  ;;  %796 = vrot.lane.b32.xlu1 %v752_v60, %s4456_s14 }
  0xb1   : > { %424 = vrot.lane.b32.xlu0 %v395_v63, %s4453_s20  ;;  %426 = vrot.lane.b32.xlu1 %v396_v3, %s4453_s20 }
  0xb5   : > { %428 = vrot.lane.b32.xlu0 %v397_v9, %s4453_s20  ;;  %440 = vrot.lane.b32.xlu1 %v409_v10, %s4453_s20 }
  0xb9   : > { %442 = vrot.lane.b32.xlu0 %v411_v14, %s4453_s20  ;;  %536 = vrot.lane.b32.xlu1 %v4646_v7, %s4454_s21 }
  0xbd   : > { %538 = vrot.lane.b32.xlu0 %v4658_v13, %s4454_s21  ;;  %444 = vrot.lane.b32.xlu1 %v413_v16, %s4453_s20 }
  0xc1   : > { %540 = vrot.lane.b32.xlu0 %v4750_v56, %s4454_s21  ;;  %552 = vrot.lane.b32.xlu1 %v507_v17, %s4454_s21 }
  0xc5   : > { %554 = vrot.lane.b32.xlu0 %v508_v19, %s4454_s21  ;;  %671 = vrot.lane.b32.xlu1 %v395_v63, %s4455_s13 }
  0xc9   : > { %673 = vrot.lane.b32.xlu0 %v396_v3, %s4455_s13  ;;  %687 = vrot.lane.b32.xlu1 %v656_v22, %s4455_s13 }
  0xcd   : > { %689 = vrot.lane.b32.xlu0 %v658_v25, %s4455_s13  ;;  %556 = vrot.lane.b32.xlu1 %v509_v26, %s4454_s21 }
  0xd1   : > { %675 = vrot.lane.b32.xlu0 %v397_v9, %s4455_s13  ;;  %691 = vrot.lane.b32.xlu1 %v660_v28, %s4455_s13 }
  0xd3   : > { %v417_v29 = vpop.permute.xlu0 %416  ;;  %v415_v30 = vpop.permute.xlu1 %414 }
  0xd4   : > { %v447_v31 = vsel %vm446_vm3, %v415_v30, %v417_v29 }
  0xd5   : > { %477 = vst [vmem:[#allocation2 + $0x40] sm:$0xf0] %v447_v31  ;;  %782 = vrot.lane.b32.xlu0 %v4646_v7, %s4456_s14  ;;  %784 = vrot.lane.b32.xlu1 %v4658_v13, %s4456_s14 }
  0xd7   : > { %v419_v34 = vpop.permute.xlu0 %418  ;;  %v421_v35 = vpop.permute.xlu1 %420 }
  0xd8   : > { %v448_v36 = vsel %vm446_vm3, %v417_v29, %v419_v34  ;;  %v449_v37 = vsel %vm446_vm3, %v419_v34, %v421_v35 }
  0xd9   : > { %478 = vst [vmem:[#allocation2 + $0x48] sm:$0xf0] %v448_v36  ;;  %479 = vst [vmem:[#allocation2 + $0x50] sm:$0xf0] %v449_v37  ;;  %798 = vrot.lane.b32.xlu0 %v753_v32, %s4456_s14  ;;  %800 = vrot.lane.b32.xlu1 %v754_v33, %s4456_s14 }
  0xdb   : > { %v4817_v39 = vpop.permute.xlu0 %422  ;;  %v433_v40 = vpop.permute.xlu1 %432 }
  0xdc   : > { %v450_v41 = vsel %vm446_vm3, %v421_v35, %v4817_v39  ;;  %v861_v44 = vld [vmem:[#allocation2 + $0x40] sm:$0xff] }
  0xdd   : > { %480 = vst [vmem:[#allocation2 + $0x58] sm:$0xf0] %v450_v41  ;;  %786 = vrot.lane.b32.xlu0 %v4750_v56, %s4456_s14  ;;  %802 = vrot.lane.b32.xlu1 %v755_v38, %s4456_s14  ;;  %v4052_v48 = vpack.c.bf16 %v861_v44, %v4630_v1 }
  0xdf   : > { %v435_v42 = vpop.permute.xlu0 %434  ;;  %v529_v43 = vpop.permute.xlu1 %528 }
  0xe0   : > { %v455_v45 = vsel %vm446_vm3, %v433_v40, %v435_v42  ;;  %v862_v46 = vld [vmem:[#allocation2 + $0x48] sm:$0xff]  ;;  %v863_v52 = vld [vmem:[#allocation2 + $0x50] sm:$0xff] }
  0xe1   : > { %v4050_v47 = vpack.c.bf16 %v862_v46, %v4627_v0  ;;  %921 = vperm.xlu0 %4346, %v917_v49   ;;  %v4070_v58 = vpack.c.bf16 %v863_v52, %v4633_v2  ;;  %926 = vperm.xlu1 %4347, %v918_v54  }
  0xe3   : > { %v531_v50 = vpop.permute.xlu0 %530  ;;  %v431_v51 = vpop.permute.xlu1 %430  ;;  %4051 = vmatprep.subr.bf16.mxu0 %v4050_v47 }
  0xe4   : > { %v560_v55 = vsel %vm558_vm4, %v529_v43, %v531_v50  ;;  %v454_v0 = vsel %vm446_vm3, %v431_v51, %v433_v40  ;;  %4053 = vmatpush1.bf16.msra.mxu0 %v4052_v48  ;;  %v864_v1 = vld [vmem:[#allocation2 + $0x58] sm:$0xff] }
  0xe5   : > { %v4068_v56 = vpack.c.bf16 %v864_v1, %v4640_v5  ;;  %v4054_v57 = vpack.c.bf16 %v560_v55, %v455_v45 }
  0xe7   : > { %v437_v59 = vpop.permute.xlu0 %436  ;;  %v4837_v60 = vpop.permute.xlu1 %438  ;;  %4069 = vmatprep.subr.bf16.mxu1 %v4068_v56  ;;  %4055 = vmatprep.subr.bf16.mxu0 %v4054_v57 }
  0xe8   : > { %v456_v62 = vsel %vm446_vm3, %v435_v42, %v437_v59  ;;  %v457_v63 = vsel %vm446_vm3, %v437_v59, %v4837_v60  ;;  %4071 = vmatpush1.bf16.msra.mxu1 %v4070_v58 }
  0xeb   : > { %v527_v3 = vpop.permute.xlu0 %526  ;;  %v533_v4 = vpop.permute.xlu1 %532 }
  0xec   : > { %v559_v5 = vsel %vm558_vm4, %v527_v3, %v529_v43  ;;  %v561_v8 = vsel %vm558_vm4, %v531_v50, %v533_v4 }
  0xed   : > { %v4056_v9 = vpack.c.bf16 %v559_v5, %v454_v0  ;;  %v4074_v14 = vpack.c.bf16 %v561_v8, %v456_v62 }
  0xef   : > { %v4844_v2 = vpop.permute.xlu0 %534  ;;  %v545_v10 = vpop.permute.xlu1 %544  ;;  %4057 = vmatpush1.bf16.msra.mxu0 %v4056_v9 }
  0xf0   : > { %v562_v11 = vsel %vm558_vm4, %v533_v4, %v4844_v2 }
  0xf1   : > { %v4072_v12 = vpack.c.bf16 %v562_v11, %v457_v63 }
  0xf3   : > { %v547_v15 = vpop.permute.xlu0 %546  ;;  %v664_v16 = vpop.permute.xlu1 %663  ;;  %4073 = vmatprep.subr.bf16.mxu1 %v4072_v12 }
  0xf4   : > { %v567_v17 = vsel %vm558_vm4, %v545_v10, %v547_v15  ;;  %4075 = vmatpush1.bf16.msra.mxu1 %v4074_v14 }
  0xf5   : > { %598 = vst [vmem:[#allocation2 + $0x108] sm:$0xf] %v567_v17 }
  0xf7   : > { %v666_v18 = vpop.permute.xlu0 %665  ;;  %v680_v19 = vpop.permute.xlu1 %679 }
  0xf8   : > { %v695_v20 = vsel %vm693_vm5, %v664_v16, %v666_v18 }
  0xf9   : > { %725 = vst [vmem:[#allocation2 + $0x108] sm:$0xf0] %v695_v20 }
  0xfb   : > { %v682_v21 = vpop.permute.xlu0 %681  ;;  %v543_v22 = vpop.permute.xlu1 %542 }
  0xfc   : > { %v702_v23 = vsel %vm693_vm5, %v680_v19, %v682_v21  ;;  %v566_v24 = vsel %vm558_vm4, %v543_v22, %v545_v10 }
  0xfd   : > { %597 = vst [vmem:[#allocation2 + $0x100] sm:$0xf] %v566_v24 }
  0xff   : > { %v549_v25 = vpop.permute.xlu0 %548  ;;  %v4852_v26 = vpop.permute.xlu1 %550 }
 0x100   : > { %v568_v27 = vsel %vm558_vm4, %v547_v15, %v549_v25  ;;  %v569_v28 = vsel %vm558_vm4, %v549_v25, %v4852_v26  ;;  %v886_v29 = vld [vmem:[#allocation2 + $0x108] sm:$0xff] }
 0x101   : > { %599 = vst [vmem:[#allocation2 + $0x110] sm:$0xf] %v568_v27  ;;  %600 = vst [vmem:[#allocation2 + $0x118] sm:$0xf] %v569_v28  ;;  %v4058_v30 = vpack.c.bf16 %v702_v23, %v886_v29 }
 0x103   : > { %v662_v31 = vpop.permute.xlu0 %661  ;;  %v668_v32 = vpop.permute.xlu1 %667  ;;  %4059 = vmatprep.subr.bf16.mxu0 %v4058_v30  ;;  %v4906_v30 = vld [vmem:[#allocation7 + $0x8] sm:$0xff] }
 0x104   : > { %v694_v33 = vsel %vm693_vm5, %v662_v31, %v664_v16  ;;  %v696_v34 = vsel %vm693_vm5, %v666_v18, %v668_v32 }
 0x105   : > { %724 = vst [vmem:[#allocation2 + $0x100] sm:$0xf0] %v694_v33  ;;  %726 = vst [vmem:[#allocation2 + $0x110] sm:$0xf0] %v696_v34 }
 0x107   : > { %v4859_v35 = vpop.permute.xlu0 %669  ;;  %v678_v36 = vpop.permute.xlu1 %677 }
 0x108   : > { %v697_v37 = vsel %vm693_vm5, %v668_v32, %v4859_v35  ;;  %v701_v38 = vsel %vm693_vm5, %v678_v36, %v680_v19 }
 0x109   : > { %727 = vst [vmem:[#allocation2 + $0x118] sm:$0xf0] %v697_v37  ;;  %v860_v37 = vld [vmem:[#allocation2 + $0x38] sm:$0xff] }
 0x10b   : > { %v684_v40 = vpop.permute.xlu0 %683  ;;  %v4864_v41 = vpop.permute.xlu1 %685 }
 0x10c   : > { %v703_v42 = vsel %vm693_vm5, %v682_v21, %v684_v40  ;;  %v704_v43 = vsel %vm693_vm5, %v684_v40, %v4864_v41  ;;  %v885_v44 = vld [vmem:[#allocation2 + $0x100] sm:$0xff]  ;;  %v887_v48 = vld [vmem:[#allocation2 + $0x110] sm:$0xff] }
 0x10d   : > { %v4060_v45 = vpack.c.bf16 %v701_v38, %v885_v44  ;;  %v4078_v52 = vpack.c.bf16 %v703_v42, %v887_v48  ;;  %v4895_v21 = vld [vmem:[#allocation7] sm:$0xff] }
 0x10f   : > { %v775_v46 = vpop.permute.xlu0 %774  ;;  %v777_v47 = vpop.permute.xlu1 %776  ;;  %4061 = vmatpush1.bf16.msra.mxu0 %v4060_v45 }
 0x110   : > { %v806_v49 = vsel %vm804_vm6, %v775_v46, %v777_v47  ;;  %v888_v50 = vld [vmem:[#allocation2 + $0x118] sm:$0xff] }
 0x111   : > { %v4076_v51 = vpack.c.bf16 %v704_v43, %v888_v50 }
 0x113   : > { %v791_v53 = vpop.permute.xlu0 %790  ;;  %v793_v54 = vpop.permute.xlu1 %792  ;;  %4077 = vmatprep.subr.bf16.mxu1 %v4076_v51 }
 0x114   : > { %v813_v55 = vsel %vm804_vm6, %v791_v53, %v793_v54  ;;  %4079 = vmatpush1.bf16.msra.mxu1 %v4078_v52 }
 0x115   : > { %844 = vst [vmem:[#allocation2 + $0x1c8] sm:$0xf] %v813_v55 }
 0x117   : > { %v773_v0 = vpop.permute.xlu0 %772  ;;  %v779_v1 = vpop.permute.xlu1 %778 }
 0x118   : > { %v805_v56 = vsel %vm804_vm6, %v773_v0, %v775_v46  ;;  %v807_v57 = vsel %vm804_vm6, %v777_v47, %v779_v1 }
 0x11b   : > { %v4873_v58 = vpop.permute.xlu0 %780  ;;  %v789_v59 = vpop.permute.xlu1 %788 }
 0x11c   : > { %v808_v62 = vsel %vm804_vm6, %v779_v1, %v4873_v58  ;;  %v812_v63 = vsel %vm804_vm6, %v789_v59, %v791_v53  ;;  %v910_v3 = vld [vmem:[#allocation2 + $0x1c8] sm:$0xf] }
 0x11d   : > { %843 = vst [vmem:[#allocation2 + $0x1c0] sm:$0xf] %v812_v63  ;;  %v4062_v5 = vpack.c.bf16 %v910_v3, %v806_v49 }
 0x11f   : > { %v795_v8 = vpop.permute.xlu0 %794  ;;  %v4883_v9 = vpop.permute.xlu1 %796  ;;  %4064 = vmatprep.subr.msk.bf16.mxu0 %vm4879_vm8, %v4062_v5 }
 0x120   : > { %v814_v10 = vsel %vm804_vm6, %v793_v54, %v795_v8  ;;  %v815_v11 = vsel %vm804_vm6, %v795_v8, %v4883_v9 }
 0x121   : > { %845 = vst [vmem:[#allocation2 + $0x1d0] sm:$0xf] %v814_v10  ;;  %846 = vst [vmem:[#allocation2 + $0x1d8] sm:$0xf] %v815_v11 }
 0x123   : > { %v425_v12 = vpop.permute.xlu0 %424  ;;  %v427_v14 = vpop.permute.xlu1 %426 }
 0x124   : > { %v451_v15 = vsel %vm446_vm3, %v4817_v39, %v425_v12  ;;  %v452_v16 = vsel %vm446_vm3, %v425_v12, %v427_v14  ;;  %v909_v17 = vld [vmem:[#allocation2 + $0x1c0] sm:$0xf] }
 0x125   : > { %481 = vst [vmem:[#allocation2 + $0x60] sm:$0xf0] %v451_v15  ;;  %482 = vst [vmem:[#allocation2 + $0x68] sm:$0xf0] %v452_v16  ;;  %v4065_v18 = vpack.c.bf16 %v909_v17, %v805_v56 }
 0x127   : > { %v429_v19 = vpop.permute.xlu0 %428  ;;  %v441_v20 = vpop.permute.xlu1 %440  ;;  %4067 = vmatpush1.bf16.msk.msra.mxu0 %vm4879_vm8, %v4065_v18 }
 0x128   : > { %v453_v22 = vsel %vm446_vm3, %v427_v14, %v429_v19  ;;  %485 = vst.msk [vmem:[#allocation2 + $0x78] sm:$0xf0] %vm484_vm9, %v429_v19  ;;  %v458_v39 = vsel %vm446_vm3, %v4837_v60, %v441_v20  ;;  %v912_v23 = vld [vmem:[#allocation2 + $0x1d8] sm:$0xf]  ;;  %v911_v24 = vld [vmem:[#allocation2 + $0x1d0] sm:$0xf] }
 0x129   : > { %483 = vst [vmem:[#allocation2 + $0x70] sm:$0xf0] %v453_v22  ;;  %v4080_v25 = vpack.c.bf16 %v912_v23, %v808_v62  ;;  %v4083_v27 = vpack.c.bf16 %v911_v24, %v807_v57 }
 0x12a   : > { %3920 = vmatmul.mubr.msk.f32.vlgmr.msra.gmra.mrb[0].mxu0 %vm929_vm10, %v4895_v21 }
 0x12b   : > { %v443_v28 = vpop.permute.xlu0 %442  ;;  %v537_v29 = vpop.permute.xlu1 %536  ;;  %4082 = vmatprep.subr.msk.bf16.mxu1 %vm4879_vm8, %v4080_v25  ;;  %1030 = vmatprep.mubr.f32.mxu0 %v4457_v61 }
 0x12c   : > { %v459_v31 = vsel %vm446_vm3, %v441_v20, %v443_v28  ;;  %v563_v60 = vsel %vm558_vm4, %v4844_v2, %v537_v29  ;;  %4085 = vmatpush1.bf16.msk.msra.mxu1 %vm4879_vm8, %v4083_v27  ;;  %v866_v32 = vld [vmem:[#allocation2 + $0x68] sm:$0xff]  ;;  %v865_v33 = vld [vmem:[#allocation2 + $0x60] sm:$0xff] }
 0x12d   : > { %v4086_v34 = vpack.c.bf16 %v866_v32, %v4646_v7  ;;  %v4088_v36 = vpack.c.bf16 %v865_v33, %v4643_v6  ;;  %v4092_v46 = vpack.c.bf16 %v563_v60, %v458_v39 }
 0x12e   : > { %3921 = vmatmul.mubr.msk.f32.gmra.mrb[2].mxu0 %vm929_vm10, %v4906_v30 }
 0x12f   : > { %v539_v38 = vpop.permute.xlu0 %538  ;;  %v445_v40 = vpop.permute.xlu1 %444  ;;  %3924 = vmatmul.mubr.msk.f32.vlgmr.msra.gmra.mrb[0].mxu1 %vm929_vm10, %v4895_v21  ;;  %4087 = vmatprep.subr.bf16.mxu0 %v4086_v34  ;;  %v868_v2 = vld [vmem:[#allocation2 + $0x78] sm:$0xff] }
 0x130   : > { %v564_v42 = vsel %vm558_vm4, %v537_v29, %v539_v38  ;;  %v460_v43 = vsel %vm446_vm3, %v443_v28, %v445_v40  ;;  %493 = vst.msk [vmem:[#allocation2 + $0xb8] sm:$0xff] %vm346_vm1, %v445_v40  ;;  %4089 = vmatpush1.bf16.msra.mxu0 %v4088_v36  ;;  %1107 = vmatprep.mubr.f32.mxu1 %v4457_v61  ;;  %v867_v7 = vld [vmem:[#allocation2 + $0x70] sm:$0xff] }
 0x131   : > { %v4104_v6 = vpack.c.bf16 %v868_v2, %v860_v37  ;;  %v4106_v44 = vpack.c.bf16 %v867_v7, %v4658_v13  ;;  %v4090_v45 = vpack.c.bf16 %v564_v42, %v459_v31  ;;  %1178 = vmatprep.mubr.f32.mxu0 %v4457_v61 }
 0x133   : > { %4105 = vmatprep.subr.bf16.mxu1 %v4104_v6  ;;  %v541_v47 = vpop.permute.xlu0 %540  ;;  %v553_v48 = vpop.permute.xlu1 %552  ;;  %3925 = vmatmul.mubr.msk.f32.gmra.mrb[2].mxu1 %vm929_vm10, %v4906_v30 }
 0x134   : > { %4091 = vmatprep.subr.bf16.mxu0 %v4090_v45  ;;  %v565_v49 = vsel %vm558_vm4, %v539_v38, %v541_v47  ;;  %596 = vst.msk [vmem:[#allocation2 + $0xf8] sm:$0xff] %vm346_vm1, %v541_v47  ;;  %v570_v50 = vsel %vm558_vm4, %v4852_v26, %v553_v48  ;;  %4107 = vmatpush1.bf16.msra.mxu1 %v4106_v44 }
 0x135   : > { %4093 = vmatpush1.bf16.msra.mxu0 %v4092_v46  ;;  %601 = vst [vmem:[#allocation2 + $0x120] sm:$0xf] %v570_v50  ;;  %1255 = vmatprep.mubr.f32.mxu1 %v4457_v61  ;;  %v4110_v59 = vpack.c.bf16 %v565_v49, %v460_v43 }
 0x137   : > { %v555_v13 = vpop.permute.xlu0 %554  ;;  %v672_v51 = vpop.permute.xlu1 %671  ;;  %v876_v54 = vld [vmem:[#allocation2 + $0xb8] sm:$0xff] }
 0x138   : > { %v571_v52 = vsel %vm558_vm4, %v553_v48, %v555_v13  ;;  %v698_v53 = vsel %vm693_vm5, %v4859_v35, %v672_v51 }
 0x139   : > { %602 = vst [vmem:[#allocation2 + $0x128] sm:$0xf] %v571_v52  ;;  %728 = vst [vmem:[#allocation2 + $0x120] sm:$0xf0] %v698_v53 }
 0x13b   : > { %v674_v55 = vpop.permute.xlu0 %673  ;;  %v688_v0 = vpop.permute.xlu1 %687  ;;  %v884_v1 = vld [vmem:[#allocation2 + $0xf8] sm:$0xff] }
 0x13c   : > { %v699_v26 = vsel %vm693_vm5, %v672_v51, %v674_v55  ;;  %v705_v56 = vsel %vm693_vm5, %v4864_v41, %v688_v0  ;;  %v4108_v57 = vpack.c.bf16 %v884_v1, %v876_v54 }
 0x13d   : > { %729 = vst [vmem:[#allocation2 + $0x128] sm:$0xf0] %v699_v26 }
 0x13e   : > { %4109 = vmatprep.subr.bf16.mxu1 %v4108_v57 }
 0x13f   : > { %v690_v62 = vpop.permute.xlu0 %689  ;;  %v557_v63 = vpop.permute.xlu1 %556  ;;  %4111 = vmatpush1.bf16.msra.mxu1 %v4110_v59 }
 0x140   : > { %v706_v35 = vsel %vm693_vm5, %v688_v0, %v690_v62  ;;  %v572_v3 = vsel %vm558_vm4, %v555_v13, %v557_v63  ;;  %604 = vst.msk [vmem:[#allocation2 + $0x138] sm:$0xf] %vm355_vm2, %v557_v63  ;;  %v889_v10 = vld [vmem:[#allocation2 + $0x120] sm:$0xff] }
 0x141   : > { %603 = vst [vmem:[#allocation2 + $0x130] sm:$0xf] %v572_v3  ;;  %v4096_v15 = vpack.c.bf16 %v705_v56, %v889_v10 }
 0x143   : > { %v676_v5 = vpop.permute.xlu0 %675  ;;  %v692_v8 = vpop.permute.xlu1 %691 }
 0x144   : > { %v700_v11 = vsel %vm693_vm5, %v674_v55, %v676_v5  ;;  %731 = vst.msk [vmem:[#allocation2 + $0x138] sm:$0xf0] %vm484_vm9, %v676_v5  ;;  %v707_v41 = vsel %vm693_vm5, %v690_v62, %v692_v8  ;;  %v890_v12 = vld [vmem:[#allocation2 + $0x128] sm:$0xff] }
 0x145   : > { %739 = vst.msk [vmem:[#allocation2 + $0x178] sm:$0xff] %vm346_vm1, %v692_v8  ;;  %730 = vst [vmem:[#allocation2 + $0x130] sm:$0xf0] %v700_v11  ;;  %v4094_v14 = vpack.c.bf16 %v706_v35, %v890_v12 }
 0x147   : > { %v783_v16 = vpop.permute.xlu0 %782  ;;  %v785_v17 = vpop.permute.xlu1 %784  ;;  %4095 = vmatprep.subr.bf16.mxu0 %v4094_v14 }
 0x148   : > { %v809_v18 = vsel %vm804_vm6, %v4873_v58, %v783_v16  ;;  %v810_v19 = vsel %vm804_vm6, %v783_v16, %v785_v17  ;;  %4097 = vmatpush1.bf16.msra.mxu0 %v4096_v15 }
 0x14b   : > { %v799_v20 = vpop.permute.xlu0 %798  ;;  %v801_v22 = vpop.permute.xlu1 %800  ;;  %v892_v39 = vld [vmem:[#allocation2 + $0x138] sm:$0xff] }
 0x14c   : > { %v900_v23 = vld [vmem:[#allocation2 + $0x178] sm:$0xff]  ;;  %v816_v24 = vsel %vm804_vm6, %v4883_v9, %v799_v20  ;;  %v817_v25 = vsel %vm804_vm6, %v799_v20, %v801_v22  ;;  %v891_v28 = vld [vmem:[#allocation2 + $0x130] sm:$0xff] }
 0x14d   : > { %v4112_v27 = vpack.c.bf16 %v900_v23, %v892_v39  ;;  %847 = vst [vmem:[#allocation2 + $0x1e0] sm:$0xf] %v816_v24  ;;  %848 = vst [vmem:[#allocation2 + $0x1e8] sm:$0xf] %v817_v25  ;;  %v4114_v29 = vpack.c.bf16 %v707_v41, %v891_v28 }
 0x14f   : > { %4113 = vmatprep.subr.bf16.mxu1 %v4112_v27  ;;  %v787_v31 = vpop.permute.xlu0 %786  ;;  %v803_v58 = vpop.permute.xlu1 %802 }
 0x150   : > { %4115 = vmatpush1.bf16.msra.mxu1 %v4114_v29  ;;  %v811_v60 = vsel %vm804_vm6, %v785_v17, %v787_v31  ;;  %842 = vst.msk [vmem:[#allocation2 + $0x1b8] sm:$0xff] %vm346_vm1, %v787_v31  ;;  %v818_v32 = vsel %vm804_vm6, %v801_v22, %v803_v58 }
 0x151   : > { %850 = vst.msk [vmem:[#allocation2 + $0x1f8] sm:$0xf] %vm355_vm2, %v803_v58  ;;  %849 = vst [vmem:[#allocation2 + $0x1f0] sm:$0xf] %v818_v32 }
 0x154   : > { %v914_v9 = vld [vmem:[#allocation2 + $0x1e8] sm:$0xf]  ;;  %v913_v33 = vld [vmem:[#allocation2 + $0x1e0] sm:$0xf] }
 0x155   : > { %v4098_v34 = vpack.c.bf16 %v914_v9, %v810_v19  ;;  %v4101_v36 = vpack.c.bf16 %v913_v33, %v809_v18 }
 0x157   : > { %4100 = vmatprep.subr.msk.bf16.mxu0 %vm4879_vm8, %v4098_v34  ;;  %v908_v37 = vld [vmem:[#allocation2 + $0x1b8] sm:$0xff] }
 0x158   : > { %v916_v38 = vld [vmem:[#allocation2 + $0x1f8] sm:$0xf]  ;;  %4103 = vmatpush1.bf16.msk.msra.mxu0 %vm4879_vm8, %v4101_v36  ;;  %v915_v2 = vld [vmem:[#allocation2 + $0x1f0] sm:$0xf] }
 0x159   : > { %v4116_v40 = vpack.c.bf16 %v916_v38, %v908_v37  ;;  %v4119_v42 = vpack.c.bf16 %v915_v2, %v811_v60 }
 0x15b   : > { %4118 = vmatprep.subr.msk.bf16.mxu1 %vm4879_vm8, %v4116_v40  ;;  %3928 = vmatmul.mubr.msk.f32.vlgmr.msra.gmra.mrb[4].mxu0 %vm929_vm10, %v4895_v21 }
 0x15c   : > { %4121 = vmatpush1.bf16.msk.msra.mxu1 %vm4879_vm8, %v4119_v42  ;;  %1184 = vmatprep.mubr.f32.mxu0 %v4457_v61 }
 0x15f   : > { %3932 = vmatmul.mubr.msk.f32.vlgmr.msra.gmra.mrb[4].mxu1 %vm929_vm10, %v4895_v21  ;;  %3929 = vmatmul.mubr.msk.f32.gmra.mrb[6].mxu0 %vm929_vm10, %v4906_v30 }
 0x160   : > { %1261 = vmatprep.mubr.f32.mxu1 %v4457_v61  ;;  %1958 = vmatprep.mubr.f32.mxu0 %v4457_v61  ;;  %v4975_v43 = vpop.permute.xlu0 %921  ;;  %v4979_v44 = vpop.permute.xlu1 %926 }
 0x163   : > { %3933 = vmatmul.mubr.msk.f32.gmra.mrb[6].mxu1 %vm929_vm10, %v4906_v30 }
 0x164   : > { %2047 = vmatprep.mubr.f32.mxu1 %v4457_v61 }
 0x1fd   : > { %v1026_v4 = vpop.f32.mrb[0].mxu0 }
 0x1fe   : > { %v1027_v6 = vadd.f32 %v1026_v4, %v4975_v43  ;;  %v1028_v7 = vpop.f32.mrb[1].mxu0  ;;  %v1857_v4 = vld [vmem:[%s5914_s4] sm:$0xff] }
 0x1ff   : > { %v1029_v21 = vadd.f32 %v1028_v7, %v4975_v43 }
 0x200   : > { %v1268_v45 = vmax.f32 %v1027_v6, 0.0 }
 0x201   : > { %v1269_v46 = vmax.f32 %v1029_v21, 0.0  ;;  %v1032_v47 = vpop.f32.mrb[2].mxu0  ;;  %v1859_v21 = vld [vmem:[%s5914_s4 + $0x10] sm:$0xff] }
 0x202   : > { %v1033_v48 = vadd.f32 %v1032_v47, %v4979_v44  ;;  %v1034_v49 = vpop.f32.mrb[3].mxu0  ;;  %v1103_v50 = vpop.f32.mrb[0].mxu1  ;;  %1365 = vrot.lane.b32.xlu1 %v1268_v45, %s4453_s20 }
 0x203   : > { %v1035_v30 = vadd.f32 %v1034_v49, %v4979_v44  ;;  %v1104_v13 = vadd.f32 %v1103_v50, %v4975_v43  ;;  %v1105_v51 = vpop.f32.mrb[1].mxu1  ;;  %v1860_v50 = vld [vmem:[%s5914_s4 + $0x18] sm:$0xff] }
 0x204   : > { %v1276_v52 = vmax.f32 %v1033_v48, 0.0  ;;  %v1106_v53 = vadd.f32 %v1105_v51, %v4975_v43 }
 0x205   : > { %v4986_v54 = vmax.f32 %v1035_v30, 0.0  ;;  %v1270_v55 = vmax.f32 %v1104_v13, 0.0 }
 0x206   : > { %v1271_v0 = vmax.f32 %v1106_v53, 0.0  ;;  %v1109_v1 = vpop.f32.mrb[2].mxu1  ;;  %1475 = vrot.lane.b32.xlu1 %v1268_v45, %s4454_s21  ;;  %v4124_v26 = vpack.c.bf16 %v1276_v52, %v1268_v45 }
 0x207   : > { %v1110_v56 = vadd.f32 %v1109_v1, %v4979_v44  ;;  %v1111_v57 = vpop.f32.mrb[3].mxu1  ;;  %1369 = vrot.lane.b32.xlu0 %v1270_v55, %s4453_s20  ;;  %v4122_v59 = vpack.c.bf16 %v4986_v54, %v1269_v46 }
 0x208   : > { %v1112_v62 = vadd.f32 %v1111_v57, %v4979_v44 }
 0x209   : > { %v1278_v63 = vmax.f32 %v1110_v56, 0.0  ;;  %4123 = vmatprep.subr.bf16.mxu0 %v4122_v59 }
 0x20a   : > { %v4993_v35 = vmax.f32 %v1112_v62, 0.0  ;;  %1585 = vrot.lane.b32.xlu1 %v1268_v45, %s4455_s13  ;;  %4125 = vmatpush1.bf16.msra.mxu0 %v4124_v26 }
 0x20b   : > { %1479 = vrot.lane.b32.xlu0 %v1270_v55, %s4454_s21  ;;  %v4144_v3 = vpack.c.bf16 %v1278_v63, %v1270_v55 }
 0x20c   : > { %v4142_v5 = vpack.c.bf16 %v4993_v35, %v1271_v0 }
 0x20e   : > { %1695 = vrot.lane.b32.xlu1 %v1268_v45, %s4456_s14  ;;  %4143 = vmatprep.subr.bf16.mxu1 %v4142_v5  ;;  %v1858_v45 = vld [vmem:[%s5914_s4 + $0x8] sm:$0xff] }
 0x20f   : > { %1589 = vrot.lane.b32.xlu0 %v1270_v55, %s4455_s13  ;;  %4145 = vmatpush1.bf16.msra.mxu1 %v4144_v3 }
 0x212   : > { %1367 = vrot.lane.b32.xlu1 %v1269_v46, %s4453_s20 }
 0x213   : > { %1699 = vrot.lane.b32.xlu0 %v1270_v55, %s4456_s14 }
 0x216   : > { %1477 = vrot.lane.b32.xlu1 %v1269_v46, %s4454_s21 }
 0x217   : > { %1385 = vrot.lane.b32.xlu0 %v1278_v63, %s4453_s20 }
 0x21a   : > { %1587 = vrot.lane.b32.xlu1 %v1269_v46, %s4455_s13 }
 0x21b   : > { %1381 = vrot.lane.b32.xlu0 %v1276_v52, %s4453_s20 }
 0x21e   : > { %1697 = vrot.lane.b32.xlu1 %v1269_v46, %s4456_s14 }
 0x21f   : > { %1495 = vrot.lane.b32.xlu0 %v1278_v63, %s4454_s21 }
 0x222   : > { %1371 = vrot.lane.b32.xlu1 %v1271_v0, %s4453_s20 }
 0x223   : > { %1491 = vrot.lane.b32.xlu0 %v1276_v52, %s4454_s21 }
 0x226   : > { %1481 = vrot.lane.b32.xlu1 %v1271_v0, %s4454_s21 }
 0x227   : > { %1605 = vrot.lane.b32.xlu0 %v1278_v63, %s4455_s13 }
 0x22a   : > { %1591 = vrot.lane.b32.xlu1 %v1271_v0, %s4455_s13 }
 0x22b   : > { %1601 = vrot.lane.b32.xlu0 %v1276_v52, %s4455_s13 }
 0x22e   : > { %v1180_v8 = vpop.f32.mrb[4].mxu0  ;;  %1701 = vrot.lane.b32.xlu1 %v1271_v0, %s4456_s14 }
 0x22f   : > { %v1181_v10 = vadd.f32 %v1180_v8, %v4975_v43  ;;  %v1182_v11 = vpop.f32.mrb[5].mxu0  ;;  %1715 = vrot.lane.b32.xlu0 %v1278_v63, %s4456_s14 }
 0x230   : > { %v1183_v41 = vadd.f32 %v1182_v11, %v4975_v43 }
 0x231   : > { %v5018_v12 = vmax.f32 %v1181_v10, 0.0 }
 0x232   : > { %v1257_v14 = vpop.f32.mrb[4].mxu1  ;;  %v5020_v15 = vmax.f32 %v1183_v41, 0.0  ;;  %v1186_v17 = vpop.f32.mrb[6].mxu0  ;;  %1383 = vrot.lane.b32.xlu1 %v4986_v54, %s4453_s20 }
 0x233   : > { %v1258_v16 = vadd.f32 %v1257_v14, %v4975_v43  ;;  %v1259_v18 = vpop.f32.mrb[5].mxu1  ;;  %v1187_v19 = vadd.f32 %v1186_v17, %v4979_v44  ;;  %v1188_v22 = vpop.f32.mrb[7].mxu0  ;;  %1711 = vrot.lane.b32.xlu0 %v1276_v52, %s4456_s14 }
 0x234   : > { %v1260_v20 = vadd.f32 %v1259_v18, %v4975_v43  ;;  %v1189_v23 = vadd.f32 %v1188_v22, %v4979_v44 }
 0x235   : > { %v5028_v39 = vmax.f32 %v1258_v16, 0.0  ;;  %v5031_v24 = vmax.f32 %v1187_v19, 0.0 }
 0x236   : > { %v1275_v25 = vmax.f32 %v1260_v20, 0.0  ;;  %v1263_v27 = vpop.f32.mrb[6].mxu1  ;;  %v5033_v28 = vmax.f32 %v1189_v23, 0.0  ;;  %1493 = vrot.lane.b32.xlu1 %v4986_v54, %s4454_s21 }
 0x237   : > { %v1264_v29 = vadd.f32 %v1263_v27, %v4979_v44  ;;  %v1265_v31 = vpop.f32.mrb[7].mxu1  ;;  %1373 = vrot.lane.b32.xlu0 %v5018_v12, %s4453_s20  ;;  %v4164_v60 = vpack.c.bf16 %v5031_v24, %v5018_v12 }
 0x238   : > { %1291 = vst.msk [vmem:[#allocation3 + $0x38] sm:$0xff] %vm346_vm1, %v1275_v25  ;;  %v1266_v58 = vadd.f32 %v1265_v31, %v4979_v44  ;;  %v4162_v9 = vpack.c.bf16 %v5033_v28, %v5020_v15 }
 0x239   : > { %v5044_v32 = vmax.f32 %v1264_v29, 0.0 }
 0x23a   : > { %v1283_v33 = vmax.f32 %v1266_v58, 0.0  ;;  %1603 = vrot.lane.b32.xlu1 %v4986_v54, %s4455_s13 }
 0x23b   : > { %v4184_v34 = vpack.c.bf16 %v5044_v32, %v5028_v39  ;;  %1377 = vrot.lane.b32.xlu0 %v5028_v39, %s4453_s20 }
 0x23c   : > { %1299 = vst.msk [vmem:[#allocation3 + $0x78] sm:$0xff] %vm346_vm1, %v1283_v33 }
 0x23e   : > { %1713 = vrot.lane.b32.xlu1 %v4986_v54, %s4456_s14 }
 0x23f   : > { %v1307_v36 = vld [vmem:[#allocation3 + $0x38] sm:$0xff]  ;;  %1483 = vrot.lane.b32.xlu0 %v5018_v12, %s4454_s21 }
 0x240   : > { %1324 = vst.msk [vmem:[#allocation4 + $0x38] sm:$0xff] %vm1323_vm11, %v1307_v36 }
 0x242   : > { %1387 = vrot.lane.b32.xlu1 %v4993_v35, %s4453_s20 }
 0x243   : > { %v1315_v37 = vld [vmem:[#allocation3 + $0x78] sm:$0xff]  ;;  %1487 = vrot.lane.b32.xlu0 %v5028_v39, %s4454_s21 }
 0x244   : > { %1332 = vst.msk [vmem:[#allocation4 + $0x78] sm:$0xff] %vm1323_vm11, %v1315_v37 }
 0x246   : > { %1497 = vrot.lane.b32.xlu1 %v4993_v35, %s4454_s21 }
 0x247   : > { %1593 = vrot.lane.b32.xlu0 %v5018_v12, %s4455_s13 }
 0x24a   : > { %1607 = vrot.lane.b32.xlu1 %v4993_v35, %s4455_s13 }
 0x24b   : > { %1597 = vrot.lane.b32.xlu0 %v5028_v39, %s4455_s13 }
 0x24e   : > { %1717 = vrot.lane.b32.xlu1 %v4993_v35, %s4456_s14 }
 0x24f   : > { %1703 = vrot.lane.b32.xlu0 %v5018_v12, %s4456_s14  ;;  %v5196_v12 = vld [vmem:[#allocation9 + $0x10] sm:$0xff] }
 0x252   : > { %1375 = vrot.lane.b32.xlu1 %v5020_v15, %s4453_s20 }
 0x253   : > { %1707 = vrot.lane.b32.xlu0 %v5028_v39, %s4456_s14 }
 0x256   : > { %1485 = vrot.lane.b32.xlu1 %v5020_v15, %s4454_s21 }
 0x257   : > { %1389 = vrot.lane.b32.xlu0 %v5031_v24, %s4453_s20 }
 0x25a   : > { %1595 = vrot.lane.b32.xlu1 %v5020_v15, %s4455_s13 }
 0x25b   : > { %1393 = vrot.lane.b32.xlu0 %v5044_v32, %s4453_s20 }
 0x25e   : > { %1705 = vrot.lane.b32.xlu1 %v5020_v15, %s4456_s14 }
 0x25f   : > { %1499 = vrot.lane.b32.xlu0 %v5031_v24, %s4454_s21 }
 0x262   : > { %1391 = vrot.lane.b32.xlu1 %v5033_v28, %s4453_s20 }
 0x263   : > { %1503 = vrot.lane.b32.xlu0 %v5044_v32, %s4454_s21 }
 0x266   : > { %1501 = vrot.lane.b32.xlu1 %v5033_v28, %s4454_s21 }
 0x267   : > { %1609 = vrot.lane.b32.xlu0 %v5031_v24, %s4455_s13 }
 0x26a   : > { %1611 = vrot.lane.b32.xlu1 %v5033_v28, %s4455_s13 }
 0x26b   : > { %1613 = vrot.lane.b32.xlu0 %v5044_v32, %s4455_s13 }
 0x26e   : > { %1721 = vrot.lane.b32.xlu1 %v5033_v28, %s4456_s14 }
 0x26f   : > { %1719 = vrot.lane.b32.xlu0 %v5031_v24, %s4456_s14 }
 0x272   : > { %1379 = vrot.lane.b32.xlu1 %v1307_v36, %s4453_s20 }
 0x273   : > { %1723 = vrot.lane.b32.xlu0 %v5044_v32, %s4456_s14 }
 0x274   : > { %v1366_v38 = vpop.permute.xlu1 %1365 }
 0x276   : > { %1489 = vrot.lane.b32.xlu1 %v1307_v36, %s4454_s21 }
 0x277   : > { %1395 = vrot.lane.b32.xlu0 %v1315_v37, %s4453_s20 }
 0x278   : > { %v1476_v40 = vpop.permute.xlu1 %1475 }
 0x279   : > { %v1370_v2 = vpop.permute.xlu0 %1369 }
 0x27a   : > { %1599 = vrot.lane.b32.xlu1 %v1307_v36, %s4455_s13 }
 0x27b   : > { %1505 = vrot.lane.b32.xlu0 %v1315_v37, %s4454_s21 }
 0x27c   : > { %v1586_v42 = vpop.permute.xlu1 %1585 }
 0x27d   : > { %v1480_v43 = vpop.permute.xlu0 %1479 }
 0x27e   : > { %1709 = vrot.lane.b32.xlu1 %v1307_v36, %s4456_s14 }
 0x27f   : > { %1615 = vrot.lane.b32.xlu0 %v1315_v37, %s4455_s13 }
 0x280   : > { %v1696_v6 = vpop.permute.xlu1 %1695 }
 0x281   : > { %v1590_v7 = vpop.permute.xlu0 %1589 }
 0x282   : > { %1863 = vperm.xlu1 %4347, %v1857_v4  }
 0x283   : > { %1725 = vrot.lane.b32.xlu0 %v1315_v37, %s4456_s14 }
 0x284   : > { %v1368_v44 = vpop.permute.xlu1 %1367 }
 0x285   : > { %v1397_v46 = vsel %vm446_vm3, %v1366_v38, %v1368_v44  ;;  %v1398_v47 = vsel %vm446_vm3, %v1368_v44, %v1370_v2  ;;  %v1700_v48 = vpop.permute.xlu0 %1699 }
 0x286   : > { %1873 = vperm.xlu1 %4347, %v1859_v21  }
 0x287   : > { %1868 = vperm.xlu0 %4346, %v1858_v45  }
 0x288   : > { %v1478_v49 = vpop.permute.xlu1 %1477 }
 0x289   : > { %v1507_v30 = vsel %vm558_vm4, %v1476_v40, %v1478_v49  ;;  %v1508_v13 = vsel %vm558_vm4, %v1478_v49, %v1480_v43  ;;  %v1386_v51 = vpop.permute.xlu0 %1385  ;;  %v5171_v49 = vld [vmem:[#allocation9] sm:$0xff] }
 0x28b   : > { %1878 = vperm.xlu0 %4346, %v1860_v50  }
 0x28c   : > { %v1588_v52 = vpop.permute.xlu1 %1587 }
 0x28d   : > { %v1617_v53 = vsel %vm693_vm5, %v1586_v42, %v1588_v52  ;;  %v1618_v54 = vsel %vm693_vm5, %v1588_v52, %v1590_v7  ;;  %v1382_v55 = vpop.permute.xlu0 %1381 }
 0x290   : > { %v1698_v0 = vpop.permute.xlu1 %1697 }
 0x291   : > { %v1727_v1 = vsel %vm804_vm6, %v1696_v6, %v1698_v0  ;;  %v1728_v26 = vsel %vm804_vm6, %v1698_v0, %v1700_v48  ;;  %v1496_v56 = vpop.permute.xlu0 %1495 }
 0x294   : > { %v1372_v57 = vpop.permute.xlu1 %1371 }
 0x295   : > { %v5140_v59 = vsel %vm446_vm3, %v1370_v2, %v1372_v57  ;;  %v1492_v62 = vpop.permute.xlu0 %1491 }
 0x298   : > { %v1482_v63 = vpop.permute.xlu1 %1481 }
 0x299   : > { %v5143_v35 = vsel %vm558_vm4, %v1480_v43, %v1482_v63  ;;  %v1606_v3 = vpop.permute.xlu0 %1605 }
 0x29c   : > { %v1592_v5 = vpop.permute.xlu1 %1591 }
 0x29d   : > { %v5146_v8 = vsel %vm693_vm5, %v1590_v7, %v1592_v5  ;;  %v1602_v10 = vpop.permute.xlu0 %1601 }
 0x2a0   : > { %v5148_v11 = vpop.permute.xlu1 %1701 }
 0x2a1   : > { %v5152_v41 = vsel %vm804_vm6, %v1700_v48, %v5148_v11  ;;  %v1716_v14 = vpop.permute.xlu0 %1715 }
 0x2a4   : > { %v1384_v16 = vpop.permute.xlu1 %1383 }
 0x2a5   : > { %v1404_v17 = vsel %vm446_vm3, %v1382_v55, %v1384_v16  ;;  %v1405_v18 = vsel %vm446_vm3, %v1384_v16, %v1386_v51  ;;  %v1712_v19 = vpop.permute.xlu0 %1711 }
 0x2a6   : > { %v4126_v20 = vpack.c.bf16 %v1405_v18, %v1398_v47  ;;  %v4128_v22 = vpack.c.bf16 %v1404_v17, %v1397_v46 }
 0x2a8   : > { %v1494_v23 = vpop.permute.xlu1 %1493  ;;  %4127 = vmatprep.subr.bf16.mxu0 %v4126_v20 }
 0x2a9   : > { %v1514_v25 = vsel %vm558_vm4, %v1492_v62, %v1494_v23  ;;  %v1515_v27 = vsel %vm558_vm4, %v1494_v23, %v1496_v56  ;;  %v1374_v29 = vpop.permute.xlu0 %1373  ;;  %4129 = vmatpush1.bf16.msra.mxu0 %v4128_v22 }
 0x2aa   : > { %v5159_v31 = vsel %vm446_vm3, %v1372_v57, %v1374_v29  ;;  %v4130_v58 = vpack.c.bf16 %v1515_v27, %v1508_v13  ;;  %v4132_v33 = vpack.c.bf16 %v1514_v25, %v1507_v30 }
 0x2ac   : > { %v1604_v36 = vpop.permute.xlu1 %1603  ;;  %4131 = vmatprep.subr.bf16.mxu0 %v4130_v58 }
 0x2ad   : > { %v1624_v37 = vsel %vm693_vm5, %v1602_v10, %v1604_v36  ;;  %v1625_v38 = vsel %vm693_vm5, %v1604_v36, %v1606_v3  ;;  %v5163_v40 = vpop.permute.xlu0 %1377  ;;  %4133 = vmatpush1.bf16.msra.mxu0 %v4132_v33 }
 0x2ae   : > { %v4134_v2 = vpack.c.bf16 %v1625_v38, %v1618_v54  ;;  %v4136_v42 = vpack.c.bf16 %v1624_v37, %v1617_v53  ;;  %v5207_v54 = vld [vmem:[#allocation9 + $0x18] sm:$0xff] }
 0x2b0   : > { %v1714_v43 = vpop.permute.xlu1 %1713  ;;  %4135 = vmatprep.subr.bf16.mxu0 %v4134_v2 }
 0x2b1   : > { %v1734_v4 = vsel %vm804_vm6, %v1712_v19, %v1714_v43  ;;  %v1735_v6 = vsel %vm804_vm6, %v1714_v43, %v1716_v14  ;;  %v1484_v7 = vpop.permute.xlu0 %1483  ;;  %4137 = vmatpush1.bf16.msra.mxu0 %v4136_v42 }
 0x2b2   : > { %v1510_v21 = vsel %vm558_vm4, %v1482_v63, %v1484_v7  ;;  %v4138_v44 = vpack.c.bf16 %v1735_v6, %v1728_v26  ;;  %v4140_v45 = vpack.c.bf16 %v1734_v4, %v1727_v1 }
 0x2b4   : > { %v1388_v46 = vpop.permute.xlu1 %1387  ;;  %4139 = vmatprep.subr.bf16.mxu0 %v4138_v44 }
 0x2b5   : > { %v1406_v47 = vsel %vm446_vm3, %v1386_v51, %v1388_v46  ;;  %v5169_v48 = vpop.permute.xlu0 %1487  ;;  %4141 = vmatpush1.bf16.msra.mxu0 %v4140_v45  ;;  %v5183_v51 = vld [vmem:[#allocation9 + $0x8] sm:$0xff] }
 0x2b6   : > { %4163 = vmatprep.subr.bf16.mxu0 %v4162_v9 }
 0x2b8   : > { %v1498_v50 = vpop.permute.xlu1 %1497  ;;  %3934 = vmatmul.mubr.msk.f32.vlgmr.msra.gmra.mrb[8].mxu0 %vm1881_vm12, %v5171_v49 }
 0x2b9   : > { %v1516_v30 = vsel %vm558_vm4, %v1496_v56, %v1498_v50  ;;  %v1594_v13 = vpop.permute.xlu0 %1593  ;;  %4165 = vmatpush1.bf16.msra.mxu0 %v4164_v60  ;;  %1964 = vmatprep.mubr.f32.mxu0 %v4457_v61 }
 0x2ba   : > { %v5186_v52 = vsel %vm693_vm5, %v1592_v5, %v1594_v13 }
 0x2bc   : > { %v1608_v15 = vpop.permute.xlu1 %1607  ;;  %3935 = vmatmul.mubr.msk.f32.gmra.mrb[10].mxu0 %vm1881_vm12, %v5183_v51 }
 0x2bd   : > { %v5191_v28 = vsel %vm693_vm5, %v1606_v3, %v1608_v15  ;;  %v5193_v9 = vpop.permute.xlu0 %1597  ;;  %1970 = vmatprep.mubr.f32.mxu0 %v4457_v61 }
 0x2be   : > { %v4156_v44 = vpack.c.bf16 %v5191_v28, %v5146_v8  ;;  %v1792_v8 = vld [vmem:[#allocation4 + $0x78] sm:$0xff] }
 0x2c0   : > { %v5198_v24 = vpop.permute.xlu1 %1717  ;;  %3936 = vmatmul.mubr.msk.f32.gmra.mrb[12].mxu0 %vm1881_vm12, %v5196_v12 }
 0x2c1   : > { %v5204_v60 = vsel %vm804_vm6, %v1716_v14, %v5198_v24  ;;  %v1704_v53 = vpop.permute.xlu0 %1703  ;;  %1976 = vmatprep.mubr.f32.mxu0 %v4457_v61  ;;  %v4148_v14 = vpack.c.bf16 %v1406_v47, %v5140_v59 }
 0x2c2   : > { %v5211_v55 = vsel %vm804_vm6, %v5148_v11, %v1704_v53 }
 0x2c4   : > { %v1376_v0 = vpop.permute.xlu1 %1375  ;;  %3937 = vmatmul.mubr.msk.f32.gmra.mrb[14].mxu0 %vm1881_vm12, %v5207_v54 }
 0x2c5   : > { %v1401_v1 = vsel %vm446_vm3, %v1374_v29, %v1376_v0  ;;  %v1402_v26 = vsel %vm446_vm3, %v1376_v0, %v5163_v40  ;;  %v5218_v56 = vpop.permute.xlu0 %1707  ;;  %2136 = vmatprep.mubr.f32.mxu0 %v4457_v61  ;;  %v4152_v29 = vpack.c.bf16 %v1516_v30, %v5143_v35 }
 0x2c8   : > { %v1486_v57 = vpop.permute.xlu1 %1485 }
 0x2c9   : > { %v1511_v62 = vsel %vm558_vm4, %v1484_v7, %v1486_v57  ;;  %v1512_v63 = vsel %vm558_vm4, %v1486_v57, %v5169_v48  ;;  %v1390_v3 = vpop.permute.xlu0 %1389 }
 0x2ca   : > { %v1407_v5 = vsel %vm446_vm3, %v1388_v46, %v1390_v3 }
 0x2cb   : > { %v4146_v10 = vpack.c.bf16 %v1407_v5, %v5159_v31 }
 0x2cc   : > { %v1596_v11 = vpop.permute.xlu1 %1595 }
 0x2cd   : > { %v1621_v16 = vsel %vm693_vm5, %v1594_v13, %v1596_v11  ;;  %v1622_v17 = vsel %vm693_vm5, %v1596_v11, %v5193_v9  ;;  %v5230_v18 = vpop.permute.xlu0 %1393  ;;  %4147 = vmatprep.subr.bf16.mxu1 %v4146_v10 }
 0x2ce   : > { %4149 = vmatpush1.bf16.msra.mxu1 %v4148_v14 }
 0x2d0   : > { %v1706_v19 = vpop.permute.xlu1 %1705 }
 0x2d1   : > { %v5233_v20 = vsel %vm804_vm6, %v1704_v53, %v1706_v19  ;;  %v1732_v22 = vsel %vm804_vm6, %v1706_v19, %v5218_v56  ;;  %v1500_v23 = vpop.permute.xlu0 %1499 }
 0x2d2   : > { %v1517_v25 = vsel %vm558_vm4, %v1498_v50, %v1500_v23 }
 0x2d3   : > { %v4150_v59 = vpack.c.bf16 %v1517_v25, %v1510_v21 }
 0x2d4   : > { %v1392_v27 = vpop.permute.xlu1 %1391 }
 0x2d5   : > { %v1408_v31 = vsel %vm446_vm3, %v1390_v3, %v1392_v27  ;;  %v1409_v58 = vsel %vm446_vm3, %v1392_v27, %v5230_v18  ;;  %v5242_v33 = vpop.permute.xlu0 %1503  ;;  %4151 = vmatprep.subr.bf16.mxu1 %v4150_v59 }
 0x2d6   : > { %4153 = vmatpush1.bf16.msra.mxu1 %v4152_v29  ;;  %v4166_v36 = vpack.c.bf16 %v1409_v58, %v1402_v26  ;;  %v4168_v37 = vpack.c.bf16 %v1408_v31, %v1401_v1  ;;  %v4160_v1 = vpack.c.bf16 %v5204_v60, %v5152_v41  ;;  %v1784_v26 = vld [vmem:[#allocation4 + $0x38] sm:$0xff] }
 0x2d8   : > { %v1502_v38 = vpop.permute.xlu1 %1501  ;;  %4167 = vmatprep.subr.bf16.mxu0 %v4166_v36 }
 0x2d9   : > { %v1518_v2 = vsel %vm558_vm4, %v1500_v23, %v1502_v38  ;;  %v1519_v42 = vsel %vm558_vm4, %v1502_v38, %v5242_v33  ;;  %v1610_v43 = vpop.permute.xlu0 %1609  ;;  %4169 = vmatpush1.bf16.msra.mxu0 %v4168_v37 }
 0x2da   : > { %v1627_v35 = vsel %vm693_vm5, %v1608_v15, %v1610_v43  ;;  %v4170_v4 = vpack.c.bf16 %v1519_v42, %v1512_v63  ;;  %v4172_v6 = vpack.c.bf16 %v1518_v2, %v1511_v62  ;;  %v4182_v63 = vpack.c.bf16 %v1792_v8, %v1784_v26 }
 0x2db   : > { %v4154_v7 = vpack.c.bf16 %v1627_v35, %v5186_v52 }
 0x2dc   : > { %v1612_v21 = vpop.permute.xlu1 %1611  ;;  %4171 = vmatprep.subr.bf16.mxu0 %v4170_v4 }
 0x2dd   : > { %v1628_v45 = vsel %vm693_vm5, %v1610_v43, %v1612_v21  ;;  %v1614_v46 = vpop.permute.xlu0 %1613  ;;  %4155 = vmatprep.subr.bf16.mxu1 %v4154_v7  ;;  %4173 = vmatpush1.bf16.msra.mxu0 %v4172_v6 }
 0x2de   : > { %v1629_v47 = vsel %vm693_vm5, %v1612_v21, %v1614_v46  ;;  %4157 = vmatpush1.bf16.msra.mxu1 %v4156_v44  ;;  %v4176_v13 = vpack.c.bf16 %v1628_v45, %v1621_v16 }
 0x2df   : > { %v4174_v50 = vpack.c.bf16 %v1629_v47, %v1622_v17 }
 0x2e0   : > { %v1722_v30 = vpop.permute.xlu1 %1721 }
 0x2e1   : > { %v1720_v15 = vpop.permute.xlu0 %1719  ;;  %4175 = vmatprep.subr.bf16.mxu0 %v4174_v50 }
 0x2e2   : > { %v1737_v52 = vsel %vm804_vm6, %v5198_v24, %v1720_v15  ;;  %v1738_v53 = vsel %vm804_vm6, %v1720_v15, %v1722_v30  ;;  %4177 = vmatpush1.bf16.msra.mxu0 %v4176_v13 }
 0x2e3   : > { %v4158_v28 = vpack.c.bf16 %v1737_v52, %v5211_v55  ;;  %v4180_v55 = vpack.c.bf16 %v1738_v53, %v5233_v20 }
 0x2e4   : > { %v1380_v0 = vpop.permute.xlu1 %1379 }
 0x2e5   : > { %v1403_v57 = vsel %vm446_vm3, %v5163_v40, %v1380_v0  ;;  %1434 = vst.msk [vmem:[#allocation4 + $0xb8] sm:$0xff] %vm1323_vm11, %v1380_v0  ;;  %v1724_v62 = vpop.permute.xlu0 %1723  ;;  %4159 = vmatprep.subr.bf16.mxu1 %v4158_v28 }
 0x2e6   : > { %v1739_v24 = vsel %vm804_vm6, %v1722_v30, %v1724_v62  ;;  %4161 = vmatpush1.bf16.msra.mxu1 %v4160_v1 }
 0x2e7   : > { %4183 = vmatprep.subr.bf16.mxu1 %v4182_v63  ;;  %v4178_v3 = vpack.c.bf16 %v1739_v24, %v1732_v22 }
 0x2e8   : > { %v1490_v5 = vpop.permute.xlu1 %1489 }
 0x2e9   : > { %v1513_v41 = vsel %vm558_vm4, %v5169_v48, %v1490_v5  ;;  %1544 = vst.msk [vmem:[#allocation4 + $0x138] sm:$0xff] %vm1323_vm11, %v1490_v5  ;;  %v1396_v60 = vpop.permute.xlu0 %1395  ;;  %3938 = vmatmul.mubr.msk.f32.vlgmr.msra.gmra.mrb[8].mxu1 %vm1881_vm12, %v5171_v49  ;;  %4179 = vmatprep.subr.bf16.mxu0 %v4178_v3 }
 0x2ea   : > { %v1410_v40 = vsel %vm446_vm3, %v5230_v18, %v1396_v60  ;;  %1442 = vst.msk [vmem:[#allocation4 + $0xf8] sm:$0xff] %vm1323_vm11, %v1396_v60  ;;  %4181 = vmatpush1.bf16.msra.mxu0 %v4180_v55  ;;  %4185 = vmatpush1.bf16.msra.mxu1 %v4184_v34 }
 0x2eb   : > { %2053 = vmatprep.mubr.f32.mxu1 %v4457_v61 }
 0x2ec   : > { %v1600_v48 = vpop.permute.xlu1 %1599 }
 0x2ed   : > { %v1623_v10 = vsel %vm693_vm5, %v5193_v9, %v1600_v48  ;;  %1654 = vst.msk [vmem:[#allocation4 + $0x1b8] sm:$0xff] %vm1323_vm11, %v1600_v48  ;;  %v1506_v11 = vpop.permute.xlu0 %1505  ;;  %3939 = vmatmul.mubr.msk.f32.gmra.mrb[10].mxu1 %vm1881_vm12, %v5183_v51  ;;  %3942 = vmatmul.mubr.msk.f32.vlgmr.msra.gmra.mrb[16].mxu0 %vm1881_vm12, %v5171_v49  ;;  %v1800_v9 = vld [vmem:[#allocation4 + $0xb8] sm:$0xff] }
 0x2ee   : > { %v1520_v14 = vsel %vm558_vm4, %v5242_v33, %v1506_v11  ;;  %1552 = vst.msk [vmem:[#allocation4 + $0x178] sm:$0xff] %vm1323_vm11, %v1506_v11  ;;  %2059 = vmatprep.mubr.f32.mxu1 %v4457_v61  ;;  %2142 = vmatprep.mubr.f32.mxu0 %v4457_v61 }
 0x2ef   : > { %v4192_v59 = vpack.c.bf16 %v1520_v14, %v1513_v41 }
 0x2f0   : > { %v1710_v39 = vpop.permute.xlu1 %1709  ;;  %v1816_v20 = vld [vmem:[#allocation4 + $0x138] sm:$0xff] }
 0x2f1   : > { %v1733_v32 = vsel %vm804_vm6, %v5218_v56, %v1710_v39  ;;  %1764 = vst.msk [vmem:[#allocation4 + $0x238] sm:$0xff] %vm1323_vm11, %v1710_v39  ;;  %v1616_v34 = vpop.permute.xlu0 %1615  ;;  %v1808_v16 = vld [vmem:[#allocation4 + $0xf8] sm:$0xff]  ;;  %3940 = vmatmul.mubr.msk.f32.gmra.mrb[12].mxu1 %vm1881_vm12, %v5196_v12  ;;  %3943 = vmatmul.mubr.msk.f32.gmra.mrb[18].mxu0 %vm1881_vm12, %v5183_v51  ;;  %v4188_v56 = vpack.c.bf16 %v1410_v40, %v1403_v57 }
 0x2f2   : > { %v1630_v17 = vsel %vm693_vm5, %v1614_v46, %v1616_v34  ;;  %1662 = vst.msk [vmem:[#allocation4 + $0x1f8] sm:$0xff] %vm1323_vm11, %v1616_v34  ;;  %v4186_v18 = vpack.c.bf16 %v1808_v16, %v1800_v9  ;;  %2065 = vmatprep.mubr.f32.mxu1 %v4457_v61  ;;  %2148 = vmatprep.mubr.f32.mxu0 %v4457_v61 }
 0x2f3   : > { %v4196_v58 = vpack.c.bf16 %v1630_v17, %v1623_v10 }
 0x2f4   : > { %4187 = vmatprep.subr.bf16.mxu1 %v4186_v18  ;;  %v1832_v27 = vld [vmem:[#allocation4 + $0x1b8] sm:$0xff] }
 0x2f5   : > { %v1726_v19 = vpop.permute.xlu0 %1725  ;;  %4189 = vmatpush1.bf16.msra.mxu1 %v4188_v56  ;;  %v1824_v22 = vld [vmem:[#allocation4 + $0x178] sm:$0xff]  ;;  %3944 = vmatmul.mubr.msk.f32.gmra.mrb[20].mxu0 %vm1881_vm12, %v5196_v12 }
 0x2f6   : > { %v1740_v23 = vsel %vm804_vm6, %v1724_v62, %v1726_v19  ;;  %1772 = vst.msk [vmem:[#allocation4 + $0x278] sm:$0xff] %vm1323_vm11, %v1726_v19  ;;  %v4190_v25 = vpack.c.bf16 %v1824_v22, %v1816_v20  ;;  %3941 = vmatmul.mubr.msk.f32.gmra.mrb[14].mxu1 %vm1881_vm12, %v5207_v54  ;;  %2154 = vmatprep.mubr.f32.mxu0 %v4457_v61 }
 0x2f7   : > { %2225 = vmatprep.mubr.f32.mxu1 %v4457_v61  ;;  %v4200_v38 = vpack.c.bf16 %v1740_v23, %v1733_v32 }
 0x2f8   : > { %4191 = vmatprep.subr.bf16.mxu1 %v4190_v25  ;;  %v1848_v33 = vld [vmem:[#allocation4 + $0x238] sm:$0xff] }
 0x2f9   : > { %4193 = vmatpush1.bf16.msra.mxu1 %v4192_v59  ;;  %v1840_v29 = vld [vmem:[#allocation4 + $0x1f8] sm:$0xff]  ;;  %3945 = vmatmul.mubr.msk.f32.gmra.mrb[22].mxu0 %vm1881_vm12, %v5207_v54 }
 0x2fa   : > { %v4194_v31 = vpack.c.bf16 %v1840_v29, %v1832_v27  ;;  %3011 = vmatprep.mubr.f32.mxu0 %v4457_v61 }
 0x2fc   : > { %4195 = vmatprep.subr.bf16.mxu1 %v4194_v31 }
 0x2fd   : > { %4197 = vmatpush1.bf16.msra.mxu1 %v4196_v58  ;;  %v1856_v36 = vld [vmem:[#allocation4 + $0x278] sm:$0xff] }
 0x2fe   : > { %v4198_v37 = vpack.c.bf16 %v1856_v36, %v1848_v33 }
 0x300   : > { %4199 = vmatprep.subr.bf16.mxu1 %v4198_v37 }
 0x301   : > { %4201 = vmatpush1.bf16.msra.mxu1 %v4200_v38  ;;  %v5322_v2 = vpop.permute.xlu1 %1863 }
 0x304   : > { %3946 = vmatmul.mubr.msk.f32.vlgmr.msra.gmra.mrb[16].mxu1 %vm1881_vm12, %v5171_v49 }
 0x305   : > { %2231 = vmatprep.mubr.f32.mxu1 %v4457_v61  ;;  %v5331_v45 = vpop.permute.xlu1 %1873 }
 0x306   : > { %v5326_v4 = vpop.permute.xlu0 %1868 }
 0x308   : > { %3947 = vmatmul.mubr.msk.f32.gmra.mrb[18].mxu1 %vm1881_vm12, %v5183_v51 }
 0x309   : > { %2237 = vmatprep.mubr.f32.mxu1 %v4457_v61 }
 0x30a   : > { %v5337_v8 = vpop.permute.xlu0 %1878 }
 0x30c   : > { %3948 = vmatmul.mubr.msk.f32.gmra.mrb[20].mxu1 %vm1881_vm12, %v5196_v12 }
 0x30d   : > { %2243 = vmatprep.mubr.f32.mxu1 %v4457_v61 }
 0x310   : > { %3949 = vmatmul.mubr.msk.f32.gmra.mrb[22].mxu1 %vm1881_vm12, %v5207_v54 }
 0x311   : > { %3124 = vmatprep.mubr.f32.mxu1 %v4457_v61 }
 0x38b   : > { %v1960_v49 = vpop.f32.mrb[8].mxu0 }
 0x38c   : > { %v1961_v42 = vadd.f32 %v1960_v49, %v5322_v2  ;;  %v1962_v43 = vpop.f32.mrb[9].mxu0 }
 0x38d   : > { %v1963_v51 = vadd.f32 %v1962_v43, %v5322_v2 }
 0x38e   : > { %v2250_v35 = vmax.f32 %v1961_v42, 0.0 }
 0x38f   : > { %v2251_v6 = vmax.f32 %v1963_v51, 0.0  ;;  %v1966_v12 = vpop.f32.mrb[10].mxu0 }
 0x390   : > { %v1967_v7 = vadd.f32 %v1966_v12, %v5326_v4  ;;  %v1968_v21 = vpop.f32.mrb[11].mxu0  ;;  %2443 = vrot.lane.b32.xlu1 %v2250_v35, %s4453_s20 }
 0x391   : > { %v1969_v54 = vadd.f32 %v1968_v21, %v5326_v4 }
 0x392   : > { %v2258_v44 = vmax.f32 %v1967_v7, 0.0 }
 0x393   : > { %v2259_v46 = vmax.f32 %v1969_v54, 0.0  ;;  %v1972_v47 = vpop.f32.mrb[12].mxu0 }
 0x394   : > { %v1973_v50 = vadd.f32 %v1972_v47, %v5331_v45  ;;  %v1974_v30 = vpop.f32.mrb[13].mxu0  ;;  %2459 = vrot.lane.b32.xlu0 %v2258_v44, %s4453_s20  ;;  %2663 = vrot.lane.b32.xlu1 %v2250_v35, %s4454_s21  ;;  %v4204_v13 = vpack.c.bf16 %v2258_v44, %v2250_v35 }
 0x395   : > { %v1975_v15 = vadd.f32 %v1974_v30, %v5331_v45  ;;  %v4202_v52 = vpack.c.bf16 %v2259_v46, %v2251_v6 }
 0x396   : > { %v2266_v53 = vmax.f32 %v1973_v50, 0.0 }
 0x397   : > { %v2267_v28 = vmax.f32 %v1975_v15, 0.0  ;;  %v1978_v0 = vpop.f32.mrb[14].mxu0  ;;  %4203 = vmatprep.subr.bf16.mxu0 %v4202_v52 }
 0x398   : > { %v1979_v1 = vadd.f32 %v1978_v0, %v5337_v8  ;;  %v1980_v26 = vpop.f32.mrb[15].mxu0  ;;  %2679 = vrot.lane.b32.xlu0 %v2258_v44, %s4454_s21  ;;  %2445 = vrot.lane.b32.xlu1 %v2251_v6, %s4453_s20 }
 0x399   : > { %v1981_v57 = vadd.f32 %v1980_v26, %v5337_v8  ;;  %4205 = vmatpush1.bf16.msra.mxu0 %v4204_v13 }
 0x39a   : > { %v2274_v62 = vmax.f32 %v1979_v1, 0.0 }
 0x39b   : > { %v2275_v63 = vmax.f32 %v1981_v57, 0.0 }
 0x39c   : > { %2491 = vrot.lane.b32.xlu0 %v2274_v62, %s4453_s20  ;;  %2665 = vrot.lane.b32.xlu1 %v2251_v6, %s4454_s21  ;;  %v4208_v24 = vpack.c.bf16 %v2274_v62, %v2266_v53 }
 0x39d   : > { %v4206_v3 = vpack.c.bf16 %v2275_v63, %v2267_v28 }
 0x39f   : > { %4207 = vmatprep.subr.bf16.mxu0 %v4206_v3 }
 0x3a0   : > { %2711 = vrot.lane.b32.xlu0 %v2274_v62, %s4454_s21  ;;  %2461 = vrot.lane.b32.xlu1 %v2259_v46, %s4453_s20 }
 0x3a1   : > { %4209 = vmatpush1.bf16.msra.mxu0 %v4208_v24 }
 0x3a4   : > { %2681 = vrot.lane.b32.xlu1 %v2259_v46, %s4454_s21 }
 0x3a8   : > { %2475 = vrot.lane.b32.xlu1 %v2266_v53, %s4453_s20 }
 0x3ac   : > { %2695 = vrot.lane.b32.xlu1 %v2266_v53, %s4454_s21 }
 0x3b0   : > { %2477 = vrot.lane.b32.xlu1 %v2267_v28, %s4453_s20 }
 0x3b4   : > { %2697 = vrot.lane.b32.xlu1 %v2267_v28, %s4454_s21 }
 0x3b8   : > { %2493 = vrot.lane.b32.xlu1 %v2275_v63, %s4453_s20 }
 0x3bc   : > { %v2049_v5 = vpop.f32.mrb[8].mxu1  ;;  %2713 = vrot.lane.b32.xlu1 %v2275_v63, %s4454_s21 }
 0x3bd   : > { %v2050_v55 = vadd.f32 %v2049_v5, %v5322_v2  ;;  %v2051_v41 = vpop.f32.mrb[9].mxu1 }
 0x3be   : > { %v2052_v60 = vadd.f32 %v2051_v41, %v5322_v2 }
 0x3bf   : > { %v2252_v40 = vmax.f32 %v2050_v55, 0.0 }
 0x3c0   : > { %v2253_v48 = vmax.f32 %v2052_v60, 0.0  ;;  %v2055_v10 = vpop.f32.mrb[10].mxu1  ;;  %v2138_v11 = vpop.f32.mrb[16].mxu0 }
 0x3c1   : > { %v2056_v14 = vadd.f32 %v2055_v10, %v5326_v4  ;;  %v2139_v39 = vadd.f32 %v2138_v11, %v5322_v2  ;;  %v2057_v32 = vpop.f32.mrb[11].mxu1  ;;  %v2140_v34 = vpop.f32.mrb[17].mxu0  ;;  %2447 = vrot.lane.b32.xlu0 %v2252_v40, %s4453_s20 }
 0x3c2   : > { %v2058_v9 = vadd.f32 %v2057_v32, %v5326_v4  ;;  %v2141_v16 = vadd.f32 %v2140_v34, %v5322_v2  ;;  %2449 = vrot.lane.b32.xlu1 %v2253_v48, %s4453_s20 }
 0x3c3   : > { %v2260_v17 = vmax.f32 %v2056_v14, 0.0  ;;  %v5362_v18 = vmax.f32 %v2139_v39, 0.0 }
 0x3c4   : > { %v2261_v56 = vmax.f32 %v2058_v9, 0.0  ;;  %v5364_v19 = vmax.f32 %v2141_v16, 0.0  ;;  %v2061_v20 = vpop.f32.mrb[12].mxu1  ;;  %v2144_v22 = vpop.f32.mrb[18].mxu0 }
 0x3c5   : > { %v2062_v23 = vadd.f32 %v2061_v20, %v5331_v45  ;;  %v2145_v25 = vadd.f32 %v2144_v22, %v5326_v4  ;;  %v2063_v59 = vpop.f32.mrb[13].mxu1  ;;  %v2146_v27 = vpop.f32.mrb[19].mxu0  ;;  %2667 = vrot.lane.b32.xlu0 %v2252_v40, %s4454_s21  ;;  %v4228_v29 = vpack.c.bf16 %v2260_v17, %v2252_v40 }
 0x3c6   : > { %v2064_v31 = vadd.f32 %v2063_v59, %v5331_v45  ;;  %v2147_v58 = vadd.f32 %v2146_v27, %v5326_v4  ;;  %2669 = vrot.lane.b32.xlu1 %v2253_v48, %s4454_s21  ;;  %v4226_v33 = vpack.c.bf16 %v2261_v56, %v2253_v48 }
 0x3c7   : > { %v2268_v36 = vmax.f32 %v2062_v23, 0.0  ;;  %v5372_v37 = vmax.f32 %v2145_v25, 0.0 }
 0x3c8   : > { %v2269_v38 = vmax.f32 %v2064_v31, 0.0  ;;  %v5374_v49 = vmax.f32 %v2147_v58, 0.0  ;;  %v2150_v42 = vpop.f32.mrb[20].mxu0  ;;  %4227 = vmatprep.subr.bf16.mxu1 %v4226_v33 }
 0x3c9   : > { %v2067_v43 = vpop.f32.mrb[14].mxu1  ;;  %v2151_v51 = vadd.f32 %v2150_v42, %v5331_v45  ;;  %v2152_v35 = vpop.f32.mrb[21].mxu0  ;;  %2463 = vrot.lane.b32.xlu0 %v2260_v17, %s4453_s20  ;;  %4229 = vmatpush1.bf16.msra.mxu1 %v4228_v29  ;;  %v4252_v6 = vpack.c.bf16 %v5372_v37, %v5362_v18  ;;  %v2875_v42 = vld [vmem:[%s5916_s6] sm:$0xff] }
 0x3ca   : > { %v2068_v12 = vadd.f32 %v2067_v43, %v5337_v8  ;;  %v2069_v7 = vpop.f32.mrb[15].mxu1  ;;  %v2153_v21 = vadd.f32 %v2152_v35, %v5331_v45  ;;  %2465 = vrot.lane.b32.xlu1 %v2261_v56, %s4453_s20  ;;  %v4250_v54 = vpack.c.bf16 %v5374_v49, %v5364_v19 }
 0x3cb   : > { %v5385_v44 = vmax.f32 %v2151_v51, 0.0  ;;  %v2070_v46 = vadd.f32 %v2069_v7, %v5337_v8 }
 0x3cc   : > { %v5388_v47 = vmax.f32 %v2068_v12, 0.0  ;;  %v5390_v50 = vmax.f32 %v2153_v21, 0.0  ;;  %v2156_v30 = vpop.f32.mrb[22].mxu0  ;;  %v2877_v12 = vld [vmem:[%s5916_s6 + $0x10] sm:$0xff] }
 0x3cd   : > { %v2277_v13 = vmax.f32 %v2070_v46, 0.0  ;;  %v2157_v15 = vadd.f32 %v2156_v30, %v5337_v8  ;;  %v2158_v52 = vpop.f32.mrb[23].mxu0  ;;  %2683 = vrot.lane.b32.xlu0 %v2260_v17, %s4454_s21 }
 0x3ce   : > { %v2159_v53 = vadd.f32 %v2158_v52, %v5337_v8  ;;  %2685 = vrot.lane.b32.xlu1 %v2261_v56, %s4454_s21  ;;  %v4232_v28 = vpack.c.bf16 %v5388_v47, %v2268_v36 }
 0x3cf   : > { %v5397_v0 = vmax.f32 %v2157_v15, 0.0  ;;  %v4230_v1 = vpack.c.bf16 %v2277_v13, %v2269_v38  ;;  %v2881_v15 = vld [vmem:[%s5916_s6 + $0x30] sm:$0xff] }
 0x3d0   : > { %v5399_v26 = vmax.f32 %v2159_v53, 0.0 }
 0x3d1   : > { %2451 = vrot.lane.b32.xlu0 %v5362_v18, %s4453_s20  ;;  %4231 = vmatprep.subr.bf16.mxu1 %v4230_v1  ;;  %v4256_v57 = vpack.c.bf16 %v5397_v0, %v5385_v44 }
 0x3d2   : > { %2453 = vrot.lane.b32.xlu1 %v5364_v19, %s4453_s20  ;;  %4233 = vmatpush1.bf16.msra.mxu1 %v4232_v28  ;;  %v4254_v62 = vpack.c.bf16 %v5399_v26, %v5390_v50 }
 0x3d5   : > { %2671 = vrot.lane.b32.xlu0 %v5362_v18, %s4454_s21 }
 0x3d6   : > { %2481 = vrot.lane.b32.xlu1 %v2269_v38, %s4453_s20 }
 0x3d7   : > { %v2227_v63 = vpop.f32.mrb[16].mxu1 }
 0x3d8   : > { %v2228_v24 = vadd.f32 %v2227_v63, %v5322_v2  ;;  %v2229_v3 = vpop.f32.mrb[17].mxu1 }
 0x3d9   : > { %v2230_v5 = vadd.f32 %v2229_v3, %v5322_v2  ;;  %2479 = vrot.lane.b32.xlu0 %v2268_v36, %s4453_s20 }
 0x3da   : > { %v5415_v55 = vmax.f32 %v2228_v24, 0.0  ;;  %2701 = vrot.lane.b32.xlu1 %v2269_v38, %s4454_s21 }
 0x3db   : > { %v2257_v41 = vmax.f32 %v2230_v5, 0.0  ;;  %v2233_v60 = vpop.f32.mrb[18].mxu1 }
 0x3dc   : > { %v2234_v40 = vadd.f32 %v2233_v60, %v5326_v4  ;;  %v2235_v48 = vpop.f32.mrb[19].mxu1 }
 0x3dd   : > { %2289 = vst.msk [vmem:[#allocation5 + $0x38] sm:$0xff] %vm1323_vm11, %v2257_v41  ;;  %v2236_v10 = vadd.f32 %v2235_v48, %v5326_v4  ;;  %2699 = vrot.lane.b32.xlu0 %v2268_v36, %s4454_s21 }
 0x3de   : > { %v5422_v11 = vmax.f32 %v2234_v40, 0.0  ;;  %2469 = vrot.lane.b32.xlu1 %v5374_v49, %s4453_s20  ;;  %v2876_v40 = vld [vmem:[%s5916_s6 + $0x8] sm:$0xff] }
 0x3df   : > { %v2265_v2 = vmax.f32 %v2236_v10, 0.0  ;;  %v2239_v14 = vpop.f32.mrb[20].mxu1  ;;  %v2878_v10 = vld [vmem:[%s5916_s6 + $0x18] sm:$0xff] }
 0x3e0   : > { %v2240_v39 = vadd.f32 %v2239_v14, %v5331_v45  ;;  %v2241_v32 = vpop.f32.mrb[21].mxu1  ;;  %v4276_v34 = vpack.c.bf16 %v5422_v11, %v5415_v55 }
 0x3e1   : > { %2297 = vst.msk [vmem:[#allocation5 + $0x78] sm:$0xff] %vm1323_vm11, %v2265_v2  ;;  %v2242_v9 = vadd.f32 %v2241_v32, %v5331_v45  ;;  %2467 = vrot.lane.b32.xlu0 %v5372_v37, %s4453_s20 }
 0x3e2   : > { %v5433_v4 = vmax.f32 %v2240_v39, 0.0  ;;  %2497 = vrot.lane.b32.xlu1 %v2277_v13, %s4453_s20 }
 0x3e3   : > { %v2273_v16 = vmax.f32 %v2242_v9, 0.0  ;;  %v2245_v17 = vpop.f32.mrb[22].mxu1  ;;  %v2880_v9 = vld [vmem:[%s5916_s6 + $0x28] sm:$0xff] }
 0x3e4   : > { %v2321_v56 = vld [vmem:[#allocation5 + $0x38] sm:$0xff]  ;;  %v2246_v20 = vadd.f32 %v2245_v17, %v5337_v8  ;;  %v2247_v22 = vpop.f32.mrb[23].mxu1 }
 0x3e5   : > { %2305 = vst.msk [vmem:[#allocation5 + $0xb8] sm:$0xff] %vm1323_vm11, %v2273_v16  ;;  %v2248_v23 = vadd.f32 %v2247_v22, %v5337_v8  ;;  %2687 = vrot.lane.b32.xlu0 %v5372_v37, %s4454_s21  ;;  %v2882_v22 = vld [vmem:[%s5916_s6 + $0x38] sm:$0xff] }
 0x3e6   : > { %2354 = vst.msk [vmem:[#allocation6 + $0x38] sm:$0xff] %vm2353_vm13, %v2321_v56  ;;  %v5442_v45 = vmax.f32 %v2246_v20, 0.0  ;;  %2673 = vrot.lane.b32.xlu1 %v5364_v19, %s4454_s21 }
 0x3e7   : > { %v2281_v25 = vmax.f32 %v2248_v23, 0.0 }
 0x3e8   : > { %v2329_v59 = vld [vmem:[#allocation5 + $0x78] sm:$0xff] }
 0x3e9   : > { %2313 = vst.msk [vmem:[#allocation5 + $0xf8] sm:$0xff] %vm1323_vm11, %v2281_v25  ;;  %2495 = vrot.lane.b32.xlu0 %v5388_v47, %s4453_s20 }
 0x3ea   : > { %2362 = vst.msk [vmem:[#allocation6 + $0x78] sm:$0xff] %vm2353_vm13, %v2329_v59  ;;  %2717 = vrot.lane.b32.xlu1 %v2277_v13, %s4454_s21 }
 0x3ec   : > { %v2337_v8 = vld [vmem:[#allocation5 + $0xb8] sm:$0xff] }
 0x3ed   : > { %2715 = vrot.lane.b32.xlu0 %v5388_v47, %s4454_s21  ;;  %2370 = vst.msk [vmem:[#allocation6 + $0xb8] sm:$0xff] %vm2353_vm13, %v2337_v8  ;;  %v2879_v47 = vld [vmem:[%s5916_s6 + $0x20] sm:$0xff] }
 0x3ee   : > { %2689 = vrot.lane.b32.xlu1 %v5374_v49, %s4454_s21 }
 0x3f0   : > { %v2345_v27 = vld [vmem:[#allocation5 + $0xf8] sm:$0xff] }
 0x3f1   : > { %2483 = vrot.lane.b32.xlu0 %v5385_v44, %s4453_s20  ;;  %2378 = vst.msk [vmem:[#allocation6 + $0xf8] sm:$0xff] %vm2353_vm13, %v2345_v27 }
 0x3f2   : > { %2485 = vrot.lane.b32.xlu1 %v5390_v50, %s4453_s20 }
 0x3f5   : > { %2703 = vrot.lane.b32.xlu0 %v5385_v44, %s4454_s21 }
 0x3f6   : > { %2705 = vrot.lane.b32.xlu1 %v5390_v50, %s4454_s21  ;;  %v5665_v50 = vld [vmem:[#allocation11 + $0x10] sm:$0xff] }
 0x3f9   : > { %2499 = vrot.lane.b32.xlu0 %v5397_v0, %s4453_s20 }
 0x3fa   : > { %2501 = vrot.lane.b32.xlu1 %v5399_v26, %s4453_s20 }
 0x3fd   : > { %2719 = vrot.lane.b32.xlu0 %v5397_v0, %s4454_s21 }
 0x3fe   : > { %2457 = vrot.lane.b32.xlu1 %v2321_v56, %s4453_s20 }
 0x401   : > { %2455 = vrot.lane.b32.xlu0 %v5415_v55, %s4453_s20 }
 0x402   : > { %2677 = vrot.lane.b32.xlu1 %v2321_v56, %s4454_s21  ;;  %v2444_v29 = vpop.permute.xlu1 %2443 }
 0x405   : > { %2675 = vrot.lane.b32.xlu0 %v5415_v55, %s4454_s21 }
 0x406   : > { %2489 = vrot.lane.b32.xlu1 %v2337_v8, %s4453_s20  ;;  %v2664_v31 = vpop.permute.xlu1 %2663  ;;  %v2460_v43 = vpop.permute.xlu0 %2459 }
 0x409   : > { %2471 = vrot.lane.b32.xlu0 %v5422_v11, %s4453_s20 }
 0x40a   : > { %2721 = vrot.lane.b32.xlu1 %v5399_v26, %s4454_s21  ;;  %v2446_v58 = vpop.permute.xlu1 %2445  ;;  %v2680_v7 = vpop.permute.xlu0 %2679 }
 0x40b   : > { %v5483_v33 = vsel %vm446_vm3, %v2444_v29, %v2446_v58 }
 0x40d   : > { %2691 = vrot.lane.b32.xlu0 %v5422_v11, %s4454_s21 }
 0x40e   : > { %2709 = vrot.lane.b32.xlu1 %v2337_v8, %s4454_s21  ;;  %v2666_v36 = vpop.permute.xlu1 %2665  ;;  %v2492_v24 = vpop.permute.xlu0 %2491 }
 0x40f   : > { %v5489_v38 = vsel %vm558_vm4, %v2664_v31, %v2666_v36 }
 0x411   : > { %2473 = vrot.lane.b32.xlu0 %v2329_v59, %s4453_s20 }
 0x412   : > { %2885 = vperm.xlu1 %4347, %v2875_v42   ;;  %v2462_v51 = vpop.permute.xlu1 %2461  ;;  %v2712_v41 = vpop.permute.xlu0 %2711 }
 0x413   : > { %v2514_v35 = vsel %vm446_vm3, %v2460_v43, %v2462_v51 }
 0x414   : > { %v4212_v29 = vpack.c.bf16 %v2514_v35, %v5483_v33 }
 0x415   : > { %2693 = vrot.lane.b32.xlu0 %v2329_v59, %s4454_s21 }
 0x416   : > { %2895 = vperm.xlu1 %4347, %v2877_v12   ;;  %v2682_v21 = vpop.permute.xlu1 %2681 }
 0x417   : > { %v5501_v46 = vsel %vm558_vm4, %v2680_v7, %v2682_v21 }
 0x418   : > { %v4220_v30 = vpack.c.bf16 %v5501_v46, %v5489_v38 }
 0x419   : > { %2487 = vrot.lane.b32.xlu0 %v5433_v4, %s4453_s20 }
 0x41a   : > { %2905 = vperm.xlu1 %4347, %v2879_v47   ;;  %v2476_v13 = vpop.permute.xlu1 %2475 }
 0x41d   : > { %2707 = vrot.lane.b32.xlu0 %v5433_v4, %s4454_s21 }
 0x41e   : > { %2915 = vperm.xlu1 %4347, %v2881_v15   ;;  %v2696_v52 = vpop.permute.xlu1 %2695 }
 0x421   : > { %2503 = vrot.lane.b32.xlu0 %v5442_v45, %s4453_s20 }
 0x422   : > { %3383 = vperm.xlu1 %4347, %v2875_v42   ;;  %v2478_v53 = vpop.permute.xlu1 %2477 }
 0x423   : > { %v5518_v28 = vsel %vm446_vm3, %v2476_v13, %v2478_v53 }
 0x425   : > { %2505 = vrot.lane.b32.xlu0 %v2345_v27, %s4453_s20 }
 0x426   : > { %3393 = vperm.xlu1 %4347, %v2877_v12   ;;  %v2698_v1 = vpop.permute.xlu1 %2697 }
 0x427   : > { %v5522_v63 = vsel %vm558_vm4, %v2696_v52, %v2698_v1 }
 0x429   : > { %2723 = vrot.lane.b32.xlu0 %v5442_v45, %s4454_s21 }
 0x42a   : > { %3403 = vperm.xlu1 %4347, %v2879_v47   ;;  %v5526_v3 = vpop.permute.xlu1 %2493 }
 0x42b   : > { %v5530_v5 = vsel %vm446_vm3, %v2492_v24, %v5526_v3 }
 0x42d   : > { %2725 = vrot.lane.b32.xlu0 %v2345_v27, %s4454_s21 }
 0x42e   : > { %3413 = vperm.xlu1 %4347, %v2881_v15   ;;  %v5533_v60 = vpop.permute.xlu1 %2713 }
 0x42f   : > { %v5540_v48 = vsel %vm558_vm4, %v2712_v41, %v5533_v60 }
 0x431   : > { %2890 = vperm.xlu0 %4346, %v2876_v40  }
 0x433   : > { %v2448_v2 = vpop.permute.xlu0 %2447 }
 0x434   : > { %v2508_v14 = vsel %vm446_vm3, %v2446_v58, %v2448_v2  ;;  %v2450_v39 = vpop.permute.xlu1 %2449 }
 0x435   : > { %v2509_v32 = vsel %vm446_vm3, %v2448_v2, %v2450_v39  ;;  %2900 = vperm.xlu0 %4346, %v2878_v10  }
 0x437   : > { %v2668_v16 = vpop.permute.xlu0 %2667 }
 0x438   : > { %v5551_v17 = vsel %vm558_vm4, %v2666_v36, %v2668_v16  ;;  %v2670_v56 = vpop.permute.xlu1 %2669 }
 0x439   : > { %v5554_v20 = vsel %vm558_vm4, %v2668_v16, %v2670_v56  ;;  %2910 = vperm.xlu0 %4346, %v2880_v9  }
 0x43b   : > { %v2464_v23 = vpop.permute.xlu0 %2463 }
 0x43c   : > { %v2515_v25 = vsel %vm446_vm3, %v2462_v51, %v2464_v23  ;;  %v2466_v59 = vpop.permute.xlu1 %2465 }
 0x43d   : > { %v2516_v8 = vsel %vm446_vm3, %v2464_v23, %v2466_v59  ;;  %2920 = vperm.xlu0 %4346, %v2882_v22   ;;  %v4210_v27 = vpack.c.bf16 %v2515_v25, %v2508_v14 }
 0x43e   : > { %v4236_v16 = vpack.c.bf16 %v2516_v8, %v2509_v32  ;;  %v4216_v32 = vpack.c.bf16 %v5530_v5, %v5518_v28 }
 0x43f   : > { %v2684_v31 = vpop.permute.xlu0 %2683  ;;  %4211 = vmatprep.subr.bf16.mxu0 %v4210_v27 }
 0x440   : > { %v2735_v58 = vsel %vm558_vm4, %v2682_v21, %v2684_v31  ;;  %v2686_v36 = vpop.permute.xlu1 %2685  ;;  %4213 = vmatpush1.bf16.msra.mxu0 %v4212_v29 }
 0x441   : > { %v5564_v42 = vsel %vm558_vm4, %v2684_v31, %v2686_v36  ;;  %3388 = vperm.xlu0 %4346, %v2876_v40  }
 0x442   : > { %v4244_v26 = vpack.c.bf16 %v5564_v42, %v5554_v20  ;;  %v3328_v42 = vld [vmem:[#allocation6 + $0x38] sm:$0xff] }
 0x443   : > { %v2452_v43 = vpop.permute.xlu0 %2451 }
 0x444   : > { %v2510_v51 = vsel %vm446_vm3, %v2450_v39, %v2452_v43  ;;  %v5567_v12 = vpop.permute.xlu1 %2453 }
 0x445   : > { %v5571_v7 = vsel %vm446_vm3, %v2452_v43, %v5567_v12  ;;  %3398 = vperm.xlu0 %4346, %v2878_v10  }
 0x447   : > { %v2672_v33 = vpop.permute.xlu0 %2671 }
 0x448   : > { %v5574_v35 = vsel %vm558_vm4, %v2670_v56, %v2672_v33  ;;  %v2482_v21 = vpop.permute.xlu1 %2481 }
 0x449   : > { %3408 = vperm.xlu0 %4346, %v2880_v9  }
 0x44b   : > { %v2480_v47 = vpop.permute.xlu0 %2479 }
 0x44c   : > { %v2522_v13 = vsel %vm446_vm3, %v2478_v53, %v2480_v47  ;;  %v5578_v15 = vsel %vm446_vm3, %v2480_v47, %v2482_v21  ;;  %v2702_v52 = vpop.permute.xlu1 %2701 }
 0x44d   : > { %3418 = vperm.xlu0 %4346, %v2882_v22  }
 0x44f   : > { %v2700_v24 = vpop.permute.xlu0 %2699 }
 0x450   : > { %v2742_v41 = vsel %vm558_vm4, %v2698_v1, %v2700_v24  ;;  %v5582_v40 = vsel %vm558_vm4, %v2700_v24, %v2702_v52  ;;  %v5584_v10 = vpop.permute.xlu1 %2469 }
 0x453   : > { %v2468_v2 = vpop.permute.xlu0 %2467 }
 0x454   : > { %v2517_v14 = vsel %vm446_vm3, %v2466_v59, %v2468_v2  ;;  %v5589_v39 = vsel %vm446_vm3, %v2468_v2, %v5584_v10  ;;  %v2498_v53 = vpop.permute.xlu1 %2497  ;;  %v3332_v2 = vld [vmem:[#allocation6 + $0x78] sm:$0xff] }
 0x455   : > { %v4234_v9 = vpack.c.bf16 %v2517_v14, %v2510_v51  ;;  %v4260_v55 = vpack.c.bf16 %v5589_v39, %v5571_v7  ;;  %v5739_v7 = vld [vmem:[#allocation11 + $0x38] sm:$0xff] }
 0x457   : > { %v2688_v56 = vpop.permute.xlu0 %2687  ;;  %4235 = vmatprep.subr.bf16.mxu1 %v4234_v9 }
 0x458   : > { %v2737_v22 = vsel %vm558_vm4, %v2686_v36, %v2688_v56  ;;  %v5592_v1 = vpop.permute.xlu1 %2673  ;;  %4237 = vmatpush1.bf16.msra.mxu1 %v4236_v16  ;;  %v4218_v36 = vpack.c.bf16 %v2735_v58, %v5551_v17  ;;  %v4224_v17 = vpack.c.bf16 %v5540_v48, %v5522_v63  ;;  %v5648_v48 = vld [vmem:[#allocation11 + $0x8] sm:$0xff] }
 0x459   : > { %v5596_v23 = vsel %vm558_vm4, %v2672_v33, %v5592_v1  ;;  %v4242_v18 = vpack.c.bf16 %v2737_v22, %v5574_v35  ;;  %v3336_v22 = vld [vmem:[#allocation6 + $0xb8] sm:$0xff] }
 0x45b   : > { %v2496_v25 = vpop.permute.xlu0 %2495 }
 0x45c   : > { %v2529_v59 = vsel %vm446_vm3, %v5526_v3, %v2496_v25  ;;  %v2530_v27 = vsel %vm446_vm3, %v2496_v25, %v2498_v53  ;;  %v2718_v29 = vpop.permute.xlu1 %2717 }
 0x45d   : > { %v4214_v31 = vpack.c.bf16 %v2529_v59, %v2522_v13 }
 0x45f   : > { %v2716_v8 = vpop.permute.xlu0 %2715  ;;  %4215 = vmatprep.subr.bf16.mxu0 %v4214_v31 }
 0x460   : > { %v2749_v43 = vsel %vm558_vm4, %v5533_v60, %v2716_v8  ;;  %v5607_v51 = vsel %vm558_vm4, %v2716_v8, %v2718_v29  ;;  %v5609_v33 = vpop.permute.xlu1 %2689  ;;  %4217 = vmatpush1.bf16.msra.mxu0 %v4216_v32 }
 0x461   : > { %v5613_v3 = vsel %vm558_vm4, %v2688_v56, %v5609_v33  ;;  %4219 = vmatprep.subr.bf16.mxu0 %v4218_v36  ;;  %v4222_v28 = vpack.c.bf16 %v2749_v43, %v2742_v41  ;;  %v4248_v20 = vpack.c.bf16 %v5607_v51, %v5582_v40  ;;  %v5694_v56 = vld [vmem:[#allocation11 + $0x20] sm:$0xff]  ;;  %v3340_v40 = vld [vmem:[#allocation6 + $0xf8] sm:$0xff]  ;;  %v5726_v36 = vld [vmem:[#allocation11 + $0x30] sm:$0xff] }
 0x463   : > { %v2484_v47 = vpop.permute.xlu0 %2483 }
 0x464   : > { %v2524_v5 = vsel %vm446_vm3, %v2482_v21, %v2484_v47  ;;  %v5616_v13 = vpop.permute.xlu1 %2485  ;;  %4221 = vmatpush1.bf16.msra.mxu0 %v4220_v30  ;;  %v5630_v21 = vld [vmem:[#allocation11] sm:$0xff] }
 0x465   : > { %v5623_v60 = vsel %vm446_vm3, %v2484_v47, %v5616_v13  ;;  %4223 = vmatprep.subr.bf16.mxu0 %v4222_v28 }
 0x467   : > { %v2704_v58 = vpop.permute.xlu0 %2703 }
 0x468   : > { %v2744_v24 = vsel %vm558_vm4, %v2702_v52, %v2704_v58  ;;  %v5628_v41 = vpop.permute.xlu1 %2705  ;;  %4225 = vmatpush1.bf16.msra.mxu0 %v4224_v17 }
 0x469   : > { %v5634_v38 = vsel %vm558_vm4, %v2704_v58, %v5628_v41  ;;  %4251 = vmatprep.subr.bf16.mxu0 %v4250_v54  ;;  %v4240_v54 = vpack.c.bf16 %v2530_v27, %v5578_v15 }
 0x46b   : > { %v2500_v46 = vpop.permute.xlu0 %2499  ;;  %3950 = vmatmul.mubr.msk.f32.vlgmr.msra.gmra.mrb[24].mxu0 %vm1323_vm11, %v5630_v21 }
 0x46c   : > { %v2531_v30 = vsel %vm446_vm3, %v2498_v53, %v2500_v46  ;;  %v5642_v63 = vpop.permute.xlu1 %2501  ;;  %4253 = vmatpush1.bf16.msra.mxu0 %v4252_v6  ;;  %3017 = vmatprep.mubr.f32.mxu0 %v4457_v61 }
 0x46d   : > { %v5652_v19 = vsel %vm446_vm3, %v2500_v46, %v5642_v63  ;;  %4255 = vmatprep.subr.bf16.mxu0 %v4254_v62  ;;  %v4238_v49 = vpack.c.bf16 %v2531_v30, %v2524_v5 }
 0x46f   : > { %v2720_v52 = vpop.permute.xlu0 %2719  ;;  %3951 = vmatmul.mubr.msk.f32.gmra.mrb[26].mxu0 %vm1323_vm11, %v5648_v48  ;;  %4239 = vmatprep.subr.bf16.mxu1 %v4238_v49 }
 0x470   : > { %v2751_v37 = vsel %vm558_vm4, %v2718_v29, %v2720_v52  ;;  %v2458_v6 = vpop.permute.xlu1 %2457  ;;  %4241 = vmatpush1.bf16.msra.mxu1 %v4240_v54  ;;  %4257 = vmatpush1.bf16.msra.mxu0 %v4256_v57  ;;  %v5679_v57 = vld [vmem:[#allocation11 + $0x18] sm:$0xff]  ;;  %v5709_v29 = vld [vmem:[#allocation11 + $0x28] sm:$0xff] }
 0x471   : > { %2574 = vst.msk [vmem:[#allocation6 + $0x138] sm:$0xff] %vm2353_vm13, %v2458_v6  ;;  %4243 = vmatprep.subr.bf16.mxu1 %v4242_v18  ;;  %3023 = vmatprep.mubr.f32.mxu0 %v4457_v61  ;;  %v4246_v35 = vpack.c.bf16 %v2751_v37, %v2744_v24 }
 0x473   : > { %v2456_v62 = vpop.permute.xlu0 %2455  ;;  %3952 = vmatmul.mubr.msk.f32.gmra.mrb[28].mxu0 %vm1323_vm11, %v5665_v50 }
 0x474   : > { %v2512_v15 = vsel %vm446_vm3, %v5567_v12, %v2456_v62  ;;  %v5676_v44 = vsel %vm446_vm3, %v2456_v62, %v2458_v6  ;;  %v2678_v0 = vpop.permute.xlu1 %2677  ;;  %4245 = vmatpush1.bf16.msra.mxu1 %v4244_v26  ;;  %3029 = vmatprep.mubr.f32.mxu0 %v4457_v61  ;;  %v4274_v12 = vpack.c.bf16 %v3332_v2, %v3328_v42 }
 0x475   : > { %2794 = vst.msk [vmem:[#allocation6 + $0x238] sm:$0xff] %vm2353_vm13, %v2678_v0  ;;  %4247 = vmatprep.subr.bf16.mxu1 %v4246_v35 }
 0x477   : > { %v2676_v14 = vpop.permute.xlu0 %2675  ;;  %3953 = vmatmul.mubr.msk.f32.gmra.mrb[30].mxu0 %vm1323_vm11, %v5679_v57 }
 0x478   : > { %v5688_v53 = vsel %vm558_vm4, %v5592_v1, %v2676_v14  ;;  %v5691_v9 = vsel %vm558_vm4, %v2676_v14, %v2678_v0  ;;  %v2490_v16 = vpop.permute.xlu1 %2489  ;;  %4249 = vmatpush1.bf16.msra.mxu1 %v4248_v20  ;;  %3035 = vmatprep.mubr.f32.mxu0 %v4457_v61  ;;  %v4278_v1 = vpack.c.bf16 %v3340_v40, %v3336_v22 }
 0x479   : > { %2590 = vst.msk [vmem:[#allocation6 + $0x1b8] sm:$0xff] %vm2353_vm13, %v2490_v16  ;;  %4275 = vmatprep.subr.bf16.mxu1 %v4274_v12 }
 0x47b   : > { %v2472_v25 = vpop.permute.xlu0 %2471  ;;  %3954 = vmatmul.mubr.msk.f32.gmra.mrb[32].mxu0 %vm1323_vm11, %v5694_v56  ;;  %3958 = vmatmul.mubr.msk.f32.vlgmr.msra.gmra.mrb[24].mxu1 %vm1323_vm11, %v5630_v21 }
 0x47c   : > { %v2519_v59 = vsel %vm446_vm3, %v5584_v10, %v2472_v25  ;;  %v5703_v27 = vpop.permute.xlu1 %2721  ;;  %4277 = vmatpush1.bf16.msra.mxu1 %v4276_v34  ;;  %3041 = vmatprep.mubr.f32.mxu0 %v4457_v61  ;;  %v4280_v10 = vpack.c.bf16 %v5442_v45, %v5433_v4 }
 0x47d   : > { %v5713_v31 = vsel %vm558_vm4, %v2720_v52, %v5703_v27  ;;  %4279 = vmatprep.subr.bf16.mxu1 %v4278_v1  ;;  %3130 = vmatprep.mubr.f32.mxu1 %v4457_v61  ;;  %v4258_v32 = vpack.c.bf16 %v2519_v59, %v2512_v15 }
 0x47e   : > { %v4272_v26 = vpack.c.bf16 %v5713_v31, %v5634_v38 }
 0x47f   : > { %v2692_v8 = vpop.permute.xlu0 %2691  ;;  %3955 = vmatmul.mubr.msk.f32.gmra.mrb[34].mxu0 %vm1323_vm11, %v5709_v29  ;;  %3959 = vmatmul.mubr.msk.f32.gmra.mrb[26].mxu1 %vm1323_vm11, %v5648_v48 }
 0x480   : > { %v2739_v11 = vsel %vm558_vm4, %v5609_v33, %v2692_v8  ;;  %v2710_v34 = vpop.permute.xlu1 %2709  ;;  %4259 = vmatprep.subr.bf16.mxu0 %v4258_v32  ;;  %4281 = vmatpush1.bf16.msra.mxu1 %v4280_v10  ;;  %v3344_v33 = vld [vmem:[#allocation6 + $0x138] sm:$0xff] }
 0x481   : > { %2810 = vst.msk [vmem:[#allocation6 + $0x2b8] sm:$0xff] %vm2353_vm13, %v2710_v34  ;;  %4261 = vmatpush1.bf16.msra.mxu0 %v4260_v55  ;;  %3047 = vmatprep.mubr.f32.mxu0 %v4457_v61  ;;  %v4266_v18 = vpack.c.bf16 %v2739_v11, %v5688_v53  ;;  %v3352_v35 = vld [vmem:[#allocation6 + $0x1b8] sm:$0xff] }
 0x482   : > { %3136 = vmatprep.mubr.f32.mxu1 %v4457_v61 }
 0x483   : > { %v2474_v4 = vpop.permute.xlu0 %2473  ;;  %3956 = vmatmul.mubr.msk.f32.gmra.mrb[36].mxu0 %vm1323_vm11, %v5726_v36  ;;  %3960 = vmatmul.mubr.msk.f32.gmra.mrb[28].mxu1 %vm1323_vm11, %v5665_v50 }
 0x484   : > { %v2520_v45 = vsel %vm446_vm3, %v2472_v25, %v2474_v4  ;;  %2582 = vst.msk [vmem:[#allocation6 + $0x178] sm:$0xff] %vm2353_vm13, %v2474_v4  ;;  %3053 = vmatprep.mubr.f32.mxu0 %v4457_v61  ;;  %3142 = vmatprep.mubr.f32.mxu1 %v4457_v61 }
 0x485   : > { %v4284_v58 = vpack.c.bf16 %v2520_v45, %v5676_v44 }
 0x487   : > { %v2694_v39 = vpop.permute.xlu0 %2693  ;;  %3957 = vmatmul.mubr.msk.f32.gmra.mrb[38].mxu0 %vm1323_vm11, %v5739_v7  ;;  %3961 = vmatmul.mubr.msk.f32.gmra.mrb[30].mxu1 %vm1323_vm11, %v5679_v57 }
 0x488   : > { %v2740_v43 = vsel %vm558_vm4, %v2692_v8, %v2694_v39  ;;  %2802 = vst.msk [vmem:[#allocation6 + $0x278] sm:$0xff] %vm2353_vm13, %v2694_v39  ;;  %3148 = vmatprep.mubr.f32.mxu1 %v4457_v61  ;;  %3509 = vmatprep.mubr.f32.mxu0 %v4457_v61  ;;  %v3368_v42 = vld [vmem:[#allocation6 + $0x2b8] sm:$0xff] }
 0x489   : > { %v4292_v38 = vpack.c.bf16 %v2740_v43, %v5691_v9 }
 0x48b   : > { %v2488_v51 = vpop.permute.xlu0 %2487  ;;  %v3348_v47 = vld [vmem:[#allocation6 + $0x178] sm:$0xff]  ;;  %3962 = vmatmul.mubr.msk.f32.gmra.mrb[32].mxu1 %vm1323_vm11, %v5694_v56 }
 0x48c   : > { %v2526_v28 = vsel %vm446_vm3, %v5616_v13, %v2488_v51  ;;  %v2527_v5 = vsel %vm446_vm3, %v2488_v51, %v2490_v16  ;;  %v4282_v17 = vpack.c.bf16 %v3348_v47, %v3344_v33  ;;  %3154 = vmatprep.mubr.f32.mxu1 %v4457_v61 }
 0x48e   : > { %4283 = vmatprep.subr.bf16.mxu1 %v4282_v17 }
 0x48f   : > { %v2708_v24 = vpop.permute.xlu0 %2707  ;;  %4285 = vmatpush1.bf16.msra.mxu1 %v4284_v58  ;;  %v3364_v44 = vld [vmem:[#allocation6 + $0x278] sm:$0xff] }
 0x490   : > { %v2746_v46 = vsel %vm558_vm4, %v5628_v41, %v2708_v24  ;;  %v2747_v30 = vsel %vm558_vm4, %v2708_v24, %v2710_v34  ;;  %3963 = vmatmul.mubr.msk.f32.gmra.mrb[34].mxu1 %vm1323_vm11, %v5709_v29  ;;  %v4264_v41 = vpack.c.bf16 %v5652_v19, %v5623_v60 }
 0x491   : > { %3160 = vmatprep.mubr.f32.mxu1 %v4457_v61 }
 0x493   : > { %v2504_v13 = vpop.permute.xlu0 %2503 }
 0x494   : > { %v2533_v49 = vsel %vm446_vm3, %v5642_v63, %v2504_v13  ;;  %3964 = vmatmul.mubr.msk.f32.gmra.mrb[36].mxu1 %vm1323_vm11, %v5726_v36  ;;  %v4268_v63 = vpack.c.bf16 %v5613_v3, %v5596_v23  ;;  %v3360_v3 = vld [vmem:[#allocation6 + $0x238] sm:$0xff] }
 0x495   : > { %3166 = vmatprep.mubr.f32.mxu1 %v4457_v61  ;;  %v4262_v54 = vpack.c.bf16 %v2533_v49, %v2526_v28  ;;  %v4290_v20 = vpack.c.bf16 %v3364_v44, %v3360_v3 }
 0x497   : > { %v2506_v52 = vpop.permute.xlu0 %2505  ;;  %4263 = vmatprep.subr.bf16.mxu0 %v4262_v54 }
 0x498   : > { %v2534_v37 = vsel %vm446_vm3, %v2504_v13, %v2506_v52  ;;  %2598 = vst.msk [vmem:[#allocation6 + $0x1f8] sm:$0xff] %vm2353_vm13, %v2506_v52  ;;  %3965 = vmatmul.mubr.msk.f32.gmra.mrb[38].mxu1 %vm1323_vm11, %v5739_v7  ;;  %4265 = vmatpush1.bf16.msra.mxu0 %v4264_v41 }
 0x499   : > { %4267 = vmatprep.subr.bf16.mxu0 %v4266_v18  ;;  %3622 = vmatprep.mubr.f32.mxu1 %v4457_v61  ;;  %v4288_v23 = vpack.c.bf16 %v2534_v37, %v2527_v5 }
 0x49b   : > { %v2724_v6 = vpop.permute.xlu0 %2723 }
 0x49c   : > { %v2753_v60 = vsel %vm558_vm4, %v5703_v27, %v2724_v6  ;;  %4269 = vmatpush1.bf16.msra.mxu0 %v4268_v63 }
 0x49d   : > { %v4270_v19 = vpack.c.bf16 %v2753_v60, %v2746_v46 }
 0x49f   : > { %v2726_v62 = vpop.permute.xlu0 %2725  ;;  %v3356_v15 = vld [vmem:[#allocation6 + $0x1f8] sm:$0xff]  ;;  %4271 = vmatprep.subr.bf16.mxu0 %v4270_v19 }
 0x4a0   : > { %v2754_v0 = vsel %vm558_vm4, %v2724_v6, %v2726_v62  ;;  %2818 = vst.msk [vmem:[#allocation6 + $0x2f8] sm:$0xff] %vm2353_vm13, %v2726_v62  ;;  %v4286_v2 = vpack.c.bf16 %v3356_v15, %v3352_v35  ;;  %4273 = vmatpush1.bf16.msra.mxu0 %v4272_v26 }
 0x4a1   : > { %v4296_v53 = vpack.c.bf16 %v2754_v0, %v2747_v30 }
 0x4a2   : > { %4287 = vmatprep.subr.bf16.mxu1 %v4286_v2 }
 0x4a3   : > { %4289 = vmatpush1.bf16.msra.mxu1 %v4288_v23  ;;  %3982 = vmatmul.mubr.msk.f32.vlgmr.msra.gmra.mrb[40].mxu0 %vm1323_vm11, %v5630_v21 }
 0x4a4   : > { %4291 = vmatprep.subr.bf16.mxu1 %v4290_v20  ;;  %3515 = vmatprep.mubr.f32.mxu0 %v4457_v61 }
 0x4a7   : > { %4293 = vmatpush1.bf16.msra.mxu1 %v4292_v38  ;;  %v3372_v14 = vld [vmem:[#allocation6 + $0x2f8] sm:$0xff]  ;;  %3983 = vmatmul.mubr.msk.f32.gmra.mrb[42].mxu0 %vm1323_vm11, %v5648_v48 }
 0x4a8   : > { %v4294_v12 = vpack.c.bf16 %v3372_v14, %v3368_v42  ;;  %3521 = vmatprep.mubr.f32.mxu0 %v4457_v61 }
 0x4aa   : > { %4295 = vmatprep.subr.bf16.mxu1 %v4294_v12 }
 0x4ab   : > { %4297 = vmatpush1.bf16.msra.mxu1 %v4296_v53  ;;  %3984 = vmatmul.mubr.msk.f32.gmra.mrb[44].mxu0 %vm1323_vm11, %v5665_v50 }
 0x4ac   : > { %3527 = vmatprep.mubr.f32.mxu0 %v4457_v61 }
 0x4ae   : > { %3990 = vmatmul.mubr.msk.f32.vlgmr.msra.gmra.mrb[40].mxu1 %vm1323_vm11, %v5630_v21  ;;  %v2886_v21 = vpop.permute.xlu1 %2885 }
 0x4af   : > { %3628 = vmatprep.mubr.f32.mxu1 %v4457_v61  ;;  %3985 = vmatmul.mubr.msk.f32.gmra.mrb[46].mxu0 %vm1323_vm11, %v5679_v57 }
 0x4b0   : > { %3533 = vmatprep.mubr.f32.mxu0 %v4457_v61 }
 0x4b2   : > { %3991 = vmatmul.mubr.msk.f32.gmra.mrb[42].mxu1 %vm1323_vm11, %v5648_v48 }
 0x4b3   : > { %3634 = vmatprep.mubr.f32.mxu1 %v4457_v61  ;;  %3986 = vmatmul.mubr.msk.f32.gmra.mrb[48].mxu0 %vm1323_vm11, %v5694_v56 }
 0x4b4   : > { %3539 = vmatprep.mubr.f32.mxu0 %v4457_v61 }
 0x4b6   : > { %3992 = vmatmul.mubr.msk.f32.gmra.mrb[44].mxu1 %vm1323_vm11, %v5665_v50 }
 0x4b7   : > { %3640 = vmatprep.mubr.f32.mxu1 %v4457_v61  ;;  %3987 = vmatmul.mubr.msk.f32.gmra.mrb[50].mxu0 %vm1323_vm11, %v5709_v29 }
 0x4b8   : > { %3545 = vmatprep.mubr.f32.mxu0 %v4457_v61 }
 0x4ba   : > { %3993 = vmatmul.mubr.msk.f32.gmra.mrb[46].mxu1 %vm1323_vm11, %v5679_v57 }
 0x4bb   : > { %3646 = vmatprep.mubr.f32.mxu1 %v4457_v61  ;;  %3988 = vmatmul.mubr.msk.f32.gmra.mrb[52].mxu0 %vm1323_vm11, %v5726_v36 }
 0x4bc   : > { %3551 = vmatprep.mubr.f32.mxu0 %v4457_v61 }
 0x4be   : > { %3994 = vmatmul.mubr.msk.f32.gmra.mrb[48].mxu1 %vm1323_vm11, %v5694_v56  ;;  %v2891_v56 = vpop.permute.xlu0 %2890 }
 0x4bf   : > { %3652 = vmatprep.mubr.f32.mxu1 %v4457_v61  ;;  %3989 = vmatmul.mubr.msk.f32.gmra.mrb[54].mxu0 %vm1323_vm11, %v5739_v7 }
 0x4c2   : > { %3995 = vmatmul.mubr.msk.f32.gmra.mrb[50].mxu1 %vm1323_vm11, %v5709_v29  ;;  %v2896_v29 = vpop.permute.xlu1 %2895 }
 0x4c3   : > { %3658 = vmatprep.mubr.f32.mxu1 %v4457_v61 }
 0x4c6   : > { %3996 = vmatmul.mubr.msk.f32.gmra.mrb[52].mxu1 %vm1323_vm11, %v5726_v36  ;;  %v5837_v36 = vpop.permute.xlu0 %2900  ;;  %v5842_v33 = vpop.permute.xlu1 %2905 }
 0x4c7   : > { %3664 = vmatprep.mubr.f32.mxu1 %v4457_v61 }
 0x4ca   : > { %3997 = vmatmul.mubr.msk.f32.gmra.mrb[54].mxu1 %vm1323_vm11, %v5739_v7  ;;  %v5847_v41 = vpop.permute.xlu0 %2910  ;;  %v2916_v23 = vpop.permute.xlu1 %2915 }
 0x53e   : > { %v3013_v48 = vpop.f32.mrb[24].mxu0 }
 0x53f   : > { %v3014_v50 = vadd.f32 %v3013_v48, %v2886_v21  ;;  %v3015_v57 = vpop.f32.mrb[25].mxu0 }
 0x540   : > { %v3016_v9 = vadd.f32 %v3015_v57, %v2886_v21 }
 0x541   : > { %v3173_v16 = vmax.f32 %v3014_v50, 0.0 }
 0x542   : > { %v3174_v40 = vmax.f32 %v3016_v9, 0.0  ;;  %v3019_v22 = vpop.f32.mrb[26].mxu0 }
 0x543   : > { %v3020_v61 = vadd.f32 %v3019_v22, %v2891_v56  ;;  %v3021_v25 = vpop.f32.mrb[27].mxu0 }
 0x544   : > { %v4018_v1 = vpack.c.bf16 %v3174_v40, %v3173_v16  ;;  %v3022_v59 = vadd.f32 %v3021_v25, %v2891_v56 }
 0x545   : > { %v3177_v27 = vmax.f32 %v3020_v61, 0.0 }
 0x546   : > { %3301 = vst [vmem:[%s5834_s30] sm:$0xff] %v4018_v1  ;;  %v3178_v31 = vmax.f32 %v3022_v59, 0.0  ;;  %v3025_v32 = vpop.f32.mrb[28].mxu0 }
 0x547   : > { %v3026_v10 = vadd.f32 %v3025_v32, %v2896_v29  ;;  %v3027_v8 = vpop.f32.mrb[29].mxu0 }
 0x548   : > { %v4020_v55 = vpack.c.bf16 %v3178_v31, %v3177_v27  ;;  %v3028_v11 = vadd.f32 %v3027_v8, %v2896_v29 }
 0x549   : > { %v3181_v34 = vmax.f32 %v3026_v10, 0.0 }
 0x54a   : > { %3303 = vst [vmem:[%s5834_s30 + $0x20] sm:$0xff] %v4020_v55  ;;  %v3182_v4 = vmax.f32 %v3028_v11, 0.0  ;;  %v3031_v45 = vpop.f32.mrb[30].mxu0 }
 0x54b   : > { %v3032_v7 = vadd.f32 %v3031_v45, %v5837_v36  ;;  %v3033_v39 = vpop.f32.mrb[31].mxu0 }
 0x54c   : > { %v4022_v43 = vpack.c.bf16 %v3182_v4, %v3181_v34  ;;  %v3034_v51 = vadd.f32 %v3033_v39, %v5837_v36 }
 0x54d   : > { %v3185_v47 = vmax.f32 %v3032_v7, 0.0 }
 0x54e   : > { %3305 = vst [vmem:[%s5834_s30 + $0x40] sm:$0xff] %v4022_v43  ;;  %v3186_v28 = vmax.f32 %v3034_v51, 0.0  ;;  %v3037_v5 = vpop.f32.mrb[32].mxu0  ;;  %v3126_v17 = vpop.f32.mrb[24].mxu1 }
 0x54f   : > { %v3038_v58 = vadd.f32 %v3037_v5, %v5842_v33  ;;  %v3127_v24 = vadd.f32 %v3126_v17, %v2886_v21  ;;  %v3039_v46 = vpop.f32.mrb[33].mxu0  ;;  %v3128_v30 = vpop.f32.mrb[25].mxu1 }
 0x550   : > { %v4024_v13 = vpack.c.bf16 %v3186_v28, %v3185_v47  ;;  %v3040_v49 = vadd.f32 %v3039_v46, %v5842_v33  ;;  %v3129_v54 = vadd.f32 %v3128_v30, %v2886_v21 }
 0x551   : > { %v3189_v52 = vmax.f32 %v3038_v58, 0.0  ;;  %v3175_v18 = vmax.f32 %v3127_v24, 0.0 }
 0x552   : > { %3307 = vst [vmem:[%s5834_s30 + $0x60] sm:$0xff] %v4024_v13  ;;  %v3190_v37 = vmax.f32 %v3040_v49, 0.0  ;;  %v3176_v63 = vmax.f32 %v3129_v54, 0.0  ;;  %v3043_v6 = vpop.f32.mrb[34].mxu0  ;;  %v3132_v60 = vpop.f32.mrb[26].mxu1 }
 0x553   : > { %v3044_v19 = vadd.f32 %v3043_v6, %v5847_v41  ;;  %v3133_v26 = vadd.f32 %v3132_v60, %v2891_v56  ;;  %v3045_v62 = vpop.f32.mrb[35].mxu0  ;;  %v3134_v35 = vpop.f32.mrb[27].mxu1 }
 0x554   : > { %v4026_v15 = vpack.c.bf16 %v3190_v37, %v3189_v52  ;;  %v4019_v44 = vpack.c.bf16 %v3176_v63, %v3175_v18  ;;  %v3046_v0 = vadd.f32 %v3045_v62, %v5847_v41  ;;  %v3135_v2 = vadd.f32 %v3134_v35, %v2891_v56  ;;  %v2921_v56 = vpop.permute.xlu0 %2920 }
 0x555   : > { %v3193_v3 = vmax.f32 %v3044_v19, 0.0  ;;  %v3179_v20 = vmax.f32 %v3133_v26, 0.0 }
 0x556   : > { %3309 = vst [vmem:[%s5834_s30 + $0x80] sm:$0xff] %v4026_v15  ;;  %3302 = vst [vmem:[%s5834_s30 + $0x8] sm:$0xff] %v4019_v44  ;;  %v3194_v38 = vmax.f32 %v3046_v0, 0.0  ;;  %v3180_v42 = vmax.f32 %v3135_v2, 0.0  ;;  %v3049_v14 = vpop.f32.mrb[36].mxu0  ;;  %v3138_v12 = vpop.f32.mrb[28].mxu1 }
 0x557   : > { %v3050_v53 = vadd.f32 %v3049_v14, %v2916_v23  ;;  %v3139_v21 = vadd.f32 %v3138_v12, %v2896_v29  ;;  %v3051_v48 = vpop.f32.mrb[37].mxu0  ;;  %v3140_v50 = vpop.f32.mrb[29].mxu1 }
 0x558   : > { %v4028_v57 = vpack.c.bf16 %v3194_v38, %v3193_v3  ;;  %v4021_v9 = vpack.c.bf16 %v3180_v42, %v3179_v20  ;;  %v3052_v16 = vadd.f32 %v3051_v48, %v2916_v23  ;;  %v3141_v40 = vadd.f32 %v3140_v50, %v2896_v29  ;;  %v3384_v3 = vpop.permute.xlu1 %3383  ;;  %v3389_v12 = vpop.permute.xlu0 %3388 }
 0x559   : > { %v3197_v22 = vmax.f32 %v3050_v53, 0.0  ;;  %v3183_v61 = vmax.f32 %v3139_v21, 0.0 }
 0x55a   : > { %3311 = vst [vmem:[%s5834_s30 + $0xa0] sm:$0xff] %v4028_v57  ;;  %3304 = vst [vmem:[%s5834_s30 + $0x28] sm:$0xff] %v4021_v9  ;;  %v3198_v25 = vmax.f32 %v3052_v16, 0.0  ;;  %v3184_v1 = vmax.f32 %v3141_v40, 0.0  ;;  %v3055_v59 = vpop.f32.mrb[38].mxu0  ;;  %v3144_v27 = vpop.f32.mrb[30].mxu1 }
 0x55b   : > { %v3056_v31 = vadd.f32 %v3055_v59, %v2921_v56  ;;  %v3145_v32 = vadd.f32 %v3144_v27, %v5837_v36  ;;  %v3057_v10 = vpop.f32.mrb[39].mxu0  ;;  %v3146_v8 = vpop.f32.mrb[31].mxu1 }
 0x55c   : > { %v4030_v55 = vpack.c.bf16 %v3198_v25, %v3197_v22  ;;  %v4023_v11 = vpack.c.bf16 %v3184_v1, %v3183_v61  ;;  %v3058_v29 = vadd.f32 %v3057_v10, %v2921_v56  ;;  %v3147_v34 = vadd.f32 %v3146_v8, %v5837_v36  ;;  %v3394_v40 = vpop.permute.xlu1 %3393  ;;  %v3399_v27 = vpop.permute.xlu0 %3398 }
 0x55d   : > { %v3201_v4 = vmax.f32 %v3056_v31, 0.0  ;;  %v3187_v45 = vmax.f32 %v3145_v32, 0.0 }
 0x55e   : > { %3313 = vst [vmem:[%s5834_s30 + $0xc0] sm:$0xff] %v4030_v55  ;;  %3306 = vst [vmem:[%s5834_s30 + $0x48] sm:$0xff] %v4023_v11  ;;  %v3202_v7 = vmax.f32 %v3058_v29, 0.0  ;;  %v3188_v39 = vmax.f32 %v3147_v34, 0.0  ;;  %v3150_v43 = vpop.f32.mrb[32].mxu1 }
 0x55f   : > { %v3151_v51 = vadd.f32 %v3150_v43, %v5842_v33  ;;  %v3152_v47 = vpop.f32.mrb[33].mxu1 }
 0x560   : > { %v4032_v28 = vpack.c.bf16 %v3202_v7, %v3201_v4  ;;  %v4025_v5 = vpack.c.bf16 %v3188_v39, %v3187_v45  ;;  %v3153_v17 = vadd.f32 %v3152_v47, %v5842_v33  ;;  %v3404_v43 = vpop.permute.xlu1 %3403 }
 0x561   : > { %v3191_v58 = vmax.f32 %v3151_v51, 0.0 }
 0x562   : > { %3315 = vst [vmem:[%s5834_s30 + $0xe0] sm:$0xff] %v4032_v28  ;;  %3308 = vst [vmem:[%s5834_s30 + $0x68] sm:$0xff] %v4025_v5  ;;  %v3192_v36 = vmax.f32 %v3153_v17, 0.0 }
 0x563   : > { %v3156_v24 = vpop.f32.mrb[34].mxu1 }
 0x564   : > { %v4027_v46 = vpack.c.bf16 %v3192_v36, %v3191_v58  ;;  %v3157_v30 = vadd.f32 %v3156_v24, %v5847_v41  ;;  %v3158_v13 = vpop.f32.mrb[35].mxu1 }
 0x565   : > { %v3159_v49 = vadd.f32 %v3158_v13, %v5847_v41 }
 0x566   : > { %3310 = vst [vmem:[%s5834_s30 + $0x88] sm:$0xff] %v4027_v46  ;;  %v3195_v54 = vmax.f32 %v3157_v30, 0.0 }
 0x567   : > { %v3196_v52 = vmax.f32 %v3159_v49, 0.0  ;;  %v3162_v18 = vpop.f32.mrb[36].mxu1 }
 0x568   : > { %v3163_v37 = vadd.f32 %v3162_v18, %v2916_v23  ;;  %v3164_v33 = vpop.f32.mrb[37].mxu1 }
 0x569   : > { %v4029_v63 = vpack.c.bf16 %v3196_v52, %v3195_v54  ;;  %v3165_v6 = vadd.f32 %v3164_v33, %v2916_v23 }
 0x56a   : > { %v3199_v60 = vmax.f32 %v3163_v37, 0.0  ;;  %v3409_v37 = vpop.permute.xlu0 %3408 }
 0x56b   : > { %3312 = vst [vmem:[%s5834_s30 + $0xa8] sm:$0xff] %v4029_v63  ;;  %v3200_v19 = vmax.f32 %v3165_v6, 0.0  ;;  %v3168_v26 = vpop.f32.mrb[38].mxu1 }
 0x56c   : > { %v3169_v62 = vadd.f32 %v3168_v26, %v2921_v56  ;;  %v3170_v35 = vpop.f32.mrb[39].mxu1 }
 0x56d   : > { %v4031_v15 = vpack.c.bf16 %v3200_v19, %v3199_v60  ;;  %v3171_v44 = vadd.f32 %v3170_v35, %v2921_v56 }
 0x56e   : > { %v3203_v0 = vmax.f32 %v3169_v62, 0.0 }
 0x56f   : > { %3314 = vst [vmem:[%s5834_s30 + $0xc8] sm:$0xff] %v4031_v15  ;;  %v3204_v41 = vmax.f32 %v3171_v44, 0.0 }
 0x571   : > { %v4033_v2 = vpack.c.bf16 %v3204_v41, %v3203_v0 }
 0x573   : > { %3316 = vst [vmem:[%s5834_s30 + $0xe8] sm:$0xff] %v4033_v2 }
 0x576   : > { %v3511_v20 = vpop.f32.mrb[40].mxu0 }
 0x577   : > { %v3512_v38 = vadd.f32 %v3511_v20, %v3384_v3  ;;  %v3513_v42 = vpop.f32.mrb[41].mxu0  ;;  %v3414_v20 = vpop.permute.xlu1 %3413 }
 0x578   : > { %v3514_v14 = vadd.f32 %v3513_v42, %v3384_v3 }
 0x579   : > { %v3671_v23 = vmax.f32 %v3512_v38, 0.0 }
 0x57a   : > { %v3672_v53 = vmax.f32 %v3514_v14, 0.0  ;;  %v3517_v21 = vpop.f32.mrb[42].mxu0 }
 0x57b   : > { %v3518_v48 = vadd.f32 %v3517_v21, %v3389_v12  ;;  %v3519_v50 = vpop.f32.mrb[43].mxu0 }
 0x57c   : > { %v4034_v57 = vpack.c.bf16 %v3672_v53, %v3671_v23  ;;  %v3520_v9 = vadd.f32 %v3519_v50, %v3389_v12 }
 0x57d   : > { %v3675_v16 = vmax.f32 %v3518_v48, 0.0 }
 0x57e   : > { %3799 = vst [vmem:[%s5834_s30 + $0x10] sm:$0xff] %v4034_v57  ;;  %v3676_v56 = vmax.f32 %v3520_v9, 0.0  ;;  %v3523_v22 = vpop.f32.mrb[44].mxu0 }
 0x57f   : > { %v3524_v61 = vadd.f32 %v3523_v22, %v3394_v40  ;;  %v3525_v25 = vpop.f32.mrb[45].mxu0  ;;  %v3419_v22 = vpop.permute.xlu0 %3418 }
 0x580   : > { %v4036_v1 = vpack.c.bf16 %v3676_v56, %v3675_v16  ;;  %v3526_v59 = vadd.f32 %v3525_v25, %v3394_v40 }
 0x581   : > { %v3624_v31 = vpop.f32.mrb[40].mxu1  ;;  %v3679_v32 = vmax.f32 %v3524_v61, 0.0 }
 0x582   : > { %v3625_v10 = vadd.f32 %v3624_v31, %v3384_v3  ;;  %v3626_v8 = vpop.f32.mrb[41].mxu1  ;;  %3803 = vst [vmem:[%s5834_s30 + $0x30] sm:$0xff] %v4036_v1  ;;  %v3680_v55 = vmax.f32 %v3526_v59, 0.0  ;;  %v3529_v11 = vpop.f32.mrb[46].mxu0 }
 0x583   : > { %v3627_v29 = vadd.f32 %v3626_v8, %v3384_v3  ;;  %v3530_v34 = vadd.f32 %v3529_v11, %v3399_v27  ;;  %v3531_v4 = vpop.f32.mrb[47].mxu0 }
 0x584   : > { %v3673_v45 = vmax.f32 %v3625_v10, 0.0  ;;  %v4038_v7 = vpack.c.bf16 %v3680_v55, %v3679_v32  ;;  %v3532_v39 = vadd.f32 %v3531_v4, %v3399_v27 }
 0x585   : > { %v3674_v51 = vmax.f32 %v3627_v29, 0.0  ;;  %v3630_v47 = vpop.f32.mrb[42].mxu1  ;;  %v3683_v28 = vmax.f32 %v3530_v34, 0.0 }
 0x586   : > { %v3631_v17 = vadd.f32 %v3630_v47, %v3389_v12  ;;  %v3632_v58 = vpop.f32.mrb[43].mxu1  ;;  %3805 = vst [vmem:[%s5834_s30 + $0x50] sm:$0xff] %v4038_v7  ;;  %v3684_v36 = vmax.f32 %v3532_v39, 0.0  ;;  %v3535_v24 = vpop.f32.mrb[48].mxu0 }
 0x587   : > { %v4035_v46 = vpack.c.bf16 %v3674_v51, %v3673_v45  ;;  %v3633_v30 = vadd.f32 %v3632_v58, %v3389_v12  ;;  %v3536_v13 = vadd.f32 %v3535_v24, %v3404_v43  ;;  %v3537_v49 = vpop.f32.mrb[49].mxu0 }
 0x588   : > { %v3677_v54 = vmax.f32 %v3631_v17, 0.0  ;;  %v4040_v52 = vpack.c.bf16 %v3684_v36, %v3683_v28  ;;  %v3538_v18 = vadd.f32 %v3537_v49, %v3404_v43 }
 0x589   : > { %3802 = vst.msk [vmem:[%s5834_s30 + $0x18] sm:$0xff] %vm5873_vm15, %v4035_v46  ;;  %v3678_v33 = vmax.f32 %v3633_v30, 0.0  ;;  %v3636_v63 = vpop.f32.mrb[44].mxu1  ;;  %v3687_v6 = vmax.f32 %v3536_v13, 0.0 }
 0x58a   : > { %v3637_v60 = vadd.f32 %v3636_v63, %v3394_v40  ;;  %v3638_v19 = vpop.f32.mrb[45].mxu1  ;;  %3807 = vst [vmem:[%s5834_s30 + $0x70] sm:$0xff] %v4040_v52  ;;  %v3688_v26 = vmax.f32 %v3538_v18, 0.0  ;;  %v3541_v62 = vpop.f32.mrb[50].mxu0 }
 0x58b   : > { %v4037_v35 = vpack.c.bf16 %v3678_v33, %v3677_v54  ;;  %v3639_v15 = vadd.f32 %v3638_v19, %v3394_v40  ;;  %v3542_v44 = vadd.f32 %v3541_v62, %v3409_v37  ;;  %v3543_v0 = vpop.f32.mrb[51].mxu0 }
 0x58c   : > { %v3681_v41 = vmax.f32 %v3637_v60, 0.0  ;;  %v4042_v2 = vpack.c.bf16 %v3688_v26, %v3687_v6  ;;  %v3544_v3 = vadd.f32 %v3543_v0, %v3409_v37 }
 0x58d   : > { %3804 = vst.msk [vmem:[%s5834_s30 + $0x38] sm:$0xff] %vm5873_vm15, %v4037_v35  ;;  %v3682_v38 = vmax.f32 %v3639_v15, 0.0  ;;  %v3642_v42 = vpop.f32.mrb[46].mxu1  ;;  %v3691_v14 = vmax.f32 %v3542_v44, 0.0 }
 0x58e   : > { %v3643_v23 = vadd.f32 %v3642_v42, %v3399_v27  ;;  %v3644_v12 = vpop.f32.mrb[47].mxu1  ;;  %3809 = vst [vmem:[%s5834_s30 + $0x90] sm:$0xff] %v4042_v2  ;;  %v3692_v53 = vmax.f32 %v3544_v3, 0.0  ;;  %v3547_v21 = vpop.f32.mrb[52].mxu0 }
 0x58f   : > { %v4039_v48 = vpack.c.bf16 %v3682_v38, %v3681_v41  ;;  %v3645_v50 = vadd.f32 %v3644_v12, %v3399_v27  ;;  %v3548_v57 = vadd.f32 %v3547_v21, %v3414_v20  ;;  %v3549_v9 = vpop.f32.mrb[53].mxu0 }
 0x590   : > { %v3685_v16 = vmax.f32 %v3643_v23, 0.0  ;;  %v4044_v40 = vpack.c.bf16 %v3692_v53, %v3691_v14  ;;  %v3550_v56 = vadd.f32 %v3549_v9, %v3414_v20 }
 0x591   : > { %3806 = vst.msk [vmem:[%s5834_s30 + $0x58] sm:$0xff] %vm5873_vm15, %v4039_v48  ;;  %v3686_v61 = vmax.f32 %v3645_v50, 0.0  ;;  %v3648_v25 = vpop.f32.mrb[48].mxu1  ;;  %v3695_v1 = vmax.f32 %v3548_v57, 0.0 }
 0x592   : > { %v3649_v59 = vadd.f32 %v3648_v25, %v3404_v43  ;;  %v3650_v31 = vpop.f32.mrb[49].mxu1  ;;  %3811 = vst [vmem:[%s5834_s30 + $0xb0] sm:$0xff] %v4044_v40  ;;  %v3696_v32 = vmax.f32 %v3550_v56, 0.0  ;;  %v3553_v10 = vpop.f32.mrb[54].mxu0 }
 0x593   : > { %v4041_v27 = vpack.c.bf16 %v3686_v61, %v3685_v16  ;;  %v3651_v8 = vadd.f32 %v3650_v31, %v3404_v43  ;;  %v3554_v55 = vadd.f32 %v3553_v10, %v3419_v22  ;;  %v3555_v11 = vpop.f32.mrb[55].mxu0 }
 0x594   : > { %v3689_v29 = vmax.f32 %v3649_v59, 0.0  ;;  %v4046_v34 = vpack.c.bf16 %v3696_v32, %v3695_v1  ;;  %v3556_v4 = vadd.f32 %v3555_v11, %v3419_v22 }
 0x595   : > { %3808 = vst.msk [vmem:[%s5834_s30 + $0x78] sm:$0xff] %vm5873_vm15, %v4041_v27  ;;  %v3690_v45 = vmax.f32 %v3651_v8, 0.0  ;;  %v3654_v7 = vpop.f32.mrb[50].mxu1  ;;  %v3699_v39 = vmax.f32 %v3554_v55, 0.0 }
 0x596   : > { %v3655_v51 = vadd.f32 %v3654_v7, %v3409_v37  ;;  %v3656_v47 = vpop.f32.mrb[51].mxu1  ;;  %3813 = vst [vmem:[%s5834_s30 + $0xd0] sm:$0xff] %v4046_v34  ;;  %v3700_v28 = vmax.f32 %v3556_v4, 0.0 }
 0x597   : > { %v4043_v17 = vpack.c.bf16 %v3690_v45, %v3689_v29  ;;  %v3657_v43 = vadd.f32 %v3656_v47, %v3409_v37 }
 0x598   : > { %v3693_v58 = vmax.f32 %v3655_v51, 0.0  ;;  %v4048_v36 = vpack.c.bf16 %v3700_v28, %v3699_v39 }
 0x599   : > { %3810 = vst.msk [vmem:[%s5834_s30 + $0x98] sm:$0xff] %vm5873_vm15, %v4043_v17  ;;  %v3694_v24 = vmax.f32 %v3657_v43, 0.0  ;;  %v3660_v46 = vpop.f32.mrb[52].mxu1 }
 0x59a   : > { %v3661_v30 = vadd.f32 %v3660_v46, %v3414_v20  ;;  %v3662_v13 = vpop.f32.mrb[53].mxu1  ;;  %3815 = vst [vmem:[%s5834_s30 + $0xf0] sm:$0xff] %v4048_v36 }
 0x59b   : > { %v4045_v49 = vpack.c.bf16 %v3694_v24, %v3693_v58  ;;  %v3663_v54 = vadd.f32 %v3662_v13, %v3414_v20 }
 0x59c   : > { %v3697_v52 = vmax.f32 %v3661_v30, 0.0 }
 0x59d   : > { %3812 = vst.msk [vmem:[%s5834_s30 + $0xb8] sm:$0xff] %vm5873_vm15, %v4045_v49  ;;  %v3698_v18 = vmax.f32 %v3663_v54, 0.0  ;;  %v3666_v37 = vpop.f32.mrb[54].mxu1 }
 0x59e   : > { %v3667_v33 = vadd.f32 %v3666_v37, %v3419_v22  ;;  %v3668_v63 = vpop.f32.mrb[55].mxu1 }
 0x59f   : > { %v4047_v6 = vpack.c.bf16 %v3698_v18, %v3697_v52  ;;  %v3669_v60 = vadd.f32 %v3668_v63, %v3419_v22 }
 0x5a0   : > { %v3701_v19 = vmax.f32 %v3667_v33, 0.0 }
 0x5a1   : > { %3814 = vst.msk [vmem:[%s5834_s30 + $0xd8] sm:$0xff] %vm5873_vm15, %v4047_v6  ;;  %v3702_v26 = vmax.f32 %v3669_v60, 0.0 }
 0x5a3   : > { %v4049_v62 = vpack.c.bf16 %v3702_v26, %v3701_v19 }
 0x5a5   : > { %3816 = vst.msk [vmem:[%s5834_s30 + $0xf8] sm:$0xff] %vm5873_vm15, %v4049_v62 }
 0x5a6 PF: > { %s19_s24 = sadd.s32 1, %s4446_s24  }
 0x5a7   : > { %p16_p5 = scmp.ge.s32.totalorder %s19_s24, 4  }
 0x5a9   :  { %18 = sbr.rel (!%p16_p5) target bundleno = 2 (0x2), region = 91 }
 0x5b0   :  { %3838 = vsyncpa [#allocation8], 1 }
 0x5b1   :  { %3840 = vsyncpa [#allocation8 + $0x1], 1 }
 0x5b2   :  { %3841 = vsyncpa [#allocation10], 1 }

// kernel: creator_recognizer_forward.3
= control target key start
LH: loop header
LB: loop body
LE: loop exit
PB: predicated region body
PF: predicated region fallthrough
CT: control target
= control target key end

     0   :  { %s10720_s0 = inlined_call_operand.vmem [shape: bf16[2,63360], index: 0, kind: input, shape index: {}]   ;;  %s10721_s1 = inlined_call_operand.hbm [shape: s8[63360,128], index: 1, kind: input, shape index: {}]   ;;  %s10722_s2 = inlined_call_operand.hbm [shape: f32[1,128], index: 2, kind: input, shape index: {}]   ;;  %s10723_s3 = inlined_call_operand.hbm [shape: f32[1,128], index: 3, kind: input, shape index: {}]   ;;  %s10724_s4 = inlined_call_operand.vmem [shape: f32[128,1], index: 4, kind: input, shape index: {}]   ;;  %s10725_s5 = inlined_call_operand.<no memory space> [shape: f32[1,1], index: 5, kind: input, shape index: {}]   ;;  %s10726_s6 = inlined_call_operand.vmem [shape: f32[2,1], index: 6, kind: output, shape index: {0}]   ;;  %s10727_s7 = inlined_call_operand.vmem [shape: f32[2,1], index: 7, kind: output, shape index: {1}]  }
   0x1   :  { %v13_v0 = vstv %s10725_s5 }
   0x2   :  { %14 = vst [vmem:[#allocation3] sm:$0x1] %v13_v0 }
   0x3   :  { %15 = vsyncpa [#allocation5], 0 }
   0x4   :  { %17 = vsyncpa [#allocation5 + $0x1], 0 }
   0x5   :  { %18 = vsyncpa [#allocation7], 0  ;;  %s9266_s26 = smov 0   ;;  %s9268_s27 = smov 0  }
   0x6   :  { %s9270_s28 = smov 0   ;;  %s9272_s29 = smov 0  }
   0x7 LB: > { %s9285_s5 = sadd.s32 4294967295, %s9209_s29   ;;  %s9288_s30 = sadd.s32 1, %s9209_s29   ;;  %s9209_s29 = sphi %s9272_s29, %s10746_s29   ;;  %s9205_s28 = sphi %s9270_s28, %s10745_s28   ;;  %s9201_s27 = sphi %s9268_s27, %s10744_s27   ;;  %s9197_s26 = sphi %s9266_s26, %s10743_s26  }
   0x8   : > { %s54_s8 = ssub.s32 %s9209_s29, %s9288_s30  ;;  %s57_s9 = sadd.s32 1, %s9205_s28 }
   0x9   : > { %p55_p0 = scmp.eq.s32.totalorder %s54_s8, 0  ;;  %p64_p1 = scmp.ne.s32.totalorder %s9205_s28, %s9201_s27 }
   0xa   : > { %p65_p2 = scmp.eq.s32.totalorder %s9209_s29, 0  ;;  %p70_p3 = scmp.ne.s32.totalorder %s9201_s27, %s9197_s26 }
   0xb   : > { %s9298_s10 = scalar_select %p55_p0, %s9205_s28, %s57_s9  }
   0xc   : > { %p9300_p4 = por %p65_p2, %p64_p1  ;;  %p10728_p5 = scmp.eq.s32.totalorder %s9285_s5, 0 }
   0xd   : > { %p7064_p6 = scmp.ge.s32.totalorder %s9209_s29, 1  ;;  %p207_p7 = scmp.lt.s32.totalorder %s9209_s29, 4 }
   0xe   : > { %p9309_p8 = por %p10728_p5, %p70_p3  ;;  %s9211_s14 = smov [#allocation6]  }
   0xf   : > { %p9314_p10 = pnand %p7064_p6, %p207_p7  ;;  %s220_s15 = sshll.u32 %s9211_s14, 4  ;;  %s221_s15 = int_to_ptr.vmem [resolvable:$true] %s220_s15 }
  0x10   : > { %s10733_s12 = scalar_select %p9309_p8, 1, 0 }
  0x11   : > { %s10734_s13 = scalar_select %p9314_p10, 1, 0 }
  0x12   : > { %p9001_p11 = pneg %p9314_p10  ;;  %p9014_p12 = scmp.lt.s32.totalorder %s9209_s29, 3 }
  0x13   : > { %s9212_s17 = smov [#allocation8]   ;;  %s256_s20 = sand.u32 1, %s9205_s28  }
  0x14   : > { %p9323_p13 = pnand %p9001_p11, %p10728_p5  ;;  %s231_s18 = sshll.u32 %s9212_s17, 4  ;;  %s9333_s18 = int_to_ptr.vmem [resolvable:$true] %s231_s18 }
  0x15   : > { %p9329_p0 = pnand %p9014_p12, %p9300_p4  ;;  %s9085_s23 = scalar_lea.hbm %s10722_s2, 16 }
  0x16   : > { %p9086_p1 = scmp.ne.s32.totalorder %s10722_s2, %s9085_s23  ;;  %p9087_p2 = pneg %p9323_p13 }
  0x17   : > { %s10736_s19 = scalar_select %p9329_p0, 1, 0 }
  0x18   : > { %p9088_p3 = pnand %p9087_p2, %p9086_p1  ;;  %p9092_p6 = scmp.lt.u32.totalorder %s9085_s23, %s10722_s2 }
  0x1a   : > { %p9089_p4 = pneg %p9088_p3 }
  0x1c   : > { %p9094_p7 = pnand %p9092_p6, %p9089_p4 }
  0x1e   : > { %9097 = shalt.err (!%p9094_p7)
}
  0x1f   : > { %s9098_s9 = scalar_lea.vmem %s221_s15, 16  ;;  %s9105_s11 = scalar_lea.vmem %s221_s15, 32 }
  0x20   : > { %p9099_p11 = scmp.ne.s32.totalorder %s221_s15, %s9098_s9  ;;  %p9106_p5 = scmp.lt.s32.totalorder %s221_s15, %s221_s15 }
  0x21   : > { %p9107_p8 = scmp.lt.s32.totalorder %s9105_s11, %s9098_s9 }
  0x22   : > { %p9101_p12 = pnand %p9099_p11, %p9087_p2 }
  0x23   : > { %p9108_p10 = por %p9107_p8, %p9106_p5 }
  0x24   : > { %p9102_p9 = pneg %p9101_p12 }
  0x26   : > { %p9109_p0 = pnand %p9108_p10, %p9102_p9 }
  0x28   : > { %9112 = shalt.err (!%p9109_p0)
}
  0x29   : > { %9004 = dma.hbm_to_vmem [thread:$0]  (!%p9323_p13), %s10722_s2, 16, %s221_s15, [#allocation7]  }
  0x2a   : > { %s9113_s23 = scalar_lea.hbm %s10723_s3, 16 }
  0x2b   : > { %p9114_p1 = scmp.ne.s32.totalorder %s10723_s3, %s9113_s23  ;;  %p9120_p9 = scmp.lt.u32.totalorder %s9113_s23, %s10723_s3 }
  0x2d   : > { %p9116_p5 = pnand %p9114_p1, %p9087_p2 }
  0x2f   : > { %p9117_p8 = pneg %p9116_p5 }
  0x31   : > { %p9122_p10 = pnand %p9120_p9, %p9117_p8 }
  0x33   : > { %9125 = shalt.err (!%p9122_p10)
}
  0x34   : > { %s9126_s15 = scalar_lea.vmem %s9333_s18, 16  ;;  %s9133_s9 = scalar_lea.vmem %s9333_s18, 32 }
  0x35   : > { %p9127_p0 = scmp.ne.s32.totalorder %s9333_s18, %s9126_s15  ;;  %p9134_p6 = scmp.lt.s32.totalorder %s9333_s18, %s9333_s18 }
  0x36   : > { %p9135_p7 = scmp.lt.s32.totalorder %s9133_s9, %s9126_s15 }
  0x37   : > { %p9129_p3 = pnand %p9127_p0, %p9087_p2 }
  0x38   : > { %p9136_p11 = por %p9135_p7, %p9134_p6 }
  0x39   : > { %p9130_p4 = pneg %p9129_p3 }
  0x3b   : > { %p9137_p12 = pnand %p9136_p11, %p9130_p4 }
  0x3d   : > { %9140 = shalt.err (!%p9137_p12)
}
  0x3e   : > { %9007 = dma.hbm_to_vmem [thread:$0]  (!%p9323_p13), %s10723_s3, 16, %s9333_s18, [#allocation7]  }
  0x3f   : > { %s8989_s17 = smul.u32 5280, %s256_s20  ;;  %s9396_s26 = scalar_lea.sflag [#allocation5], %s256_s20 }
  0x40   : > { %s7079_s21 = smul.u32 84480, %s9209_s29  ;;  %p10737_p2 = scmp.ne.s32.totalorder %s10736_s19, 0 }
  0x41   : > { %s260_s16 = scalar_lea.vmem [#allocation4], %s8989_s17  ;;  %s9146_s15 = scalar_lea.hbm %s10721_s1, 253440 }
  0x42   : > { %s9390_s24 = scalar_lea.hbm %s10721_s1, %s7079_s21  ;;  %s267_s25 = sshll.u32 %s260_s16, 4  ;;  %s9392_s25 = int_to_ptr.vmem [resolvable:$true] %s267_s25 }
  0x43   : > { %s9141_s18 = scalar_lea.hbm %s9390_s24, 84480  ;;  %p9143_p1 = pneg %p10737_p2 }
  0x44   : > { %p9142_p13 = scmp.ne.s32.totalorder %s9390_s24, %s9141_s18  ;;  %p9147_p9 = scmp.lt.u32.totalorder %s9390_s24, %s10721_s1 }
  0x45   : > { %p9148_p10 = scmp.lt.u32.totalorder %s9146_s15, %s9141_s18  ;;  %p9150_p3 = scmp.lt.u32.totalorder %s9141_s18, %s9390_s24 }
  0x46   : > { %p9144_p5 = pnand %p9143_p1, %p9142_p13 }
  0x47   : > { %p9149_p0 = por %p9148_p10, %p9147_p9 }
  0x48   : > { %p9145_p8 = pneg %p9144_p5 }
  0x49   : > { %p9151_p4 = por %p9150_p3, %p9149_p0 }
  0x4b   : > { %p9152_p6 = pnand %p9151_p4, %p9145_p8 }
  0x4d   : > { %9155 = shalt.err (!%p9152_p6)
}
  0x4e   : > { %s9156_s20 = scalar_lea.vmem %s9392_s25, 84480  ;;  %s9213_s14 = smov [#allocation4]  }
  0x4f   : > { %p9157_p7 = scmp.ne.s32.totalorder %s9392_s25, %s9156_s20  ;;  %s9161_s17 = sshll.u32 %s9213_s14, 4  ;;  %s9162_s17 = int_to_ptr.vmem [resolvable:$false] %s9161_s17 }
  0x50   : > { %s9163_s21 = scalar_lea.vmem %s9162_s17, 168960  ;;  %p9164_p13 = scmp.lt.s32.totalorder %s9392_s25, %s9162_s17 }
  0x51   : > { %p9159_p11 = pnand %p9157_p7, %p9143_p1  ;;  %p9165_p5 = scmp.lt.s32.totalorder %s9163_s21, %s9156_s20 }
  0x53   : > { %p9160_p12 = pneg %p9159_p11  ;;  %p9166_p9 = por %p9165_p5, %p9164_p13 }
  0x55   : > { %p9167_p10 = pnand %p9166_p9, %p9160_p12 }
  0x57   : > { %9170 = shalt.err (!%p9167_p10)
}
  0x58   : > { %s9214_s22 = smov 128   ;;  %s9215_s23 = smov 8  }
  0x59   : > { %9011 = dma.hbm_to_vmem [thread:$0]  (!%p10737_p2), %s9390_s24, 84480, %s9392_s25, %s9396_s26, %s9214_s22, %s9214_s22, %s9215_s23  }
  0x5a   : > { %p10738_p1 = scmp.ne.s32.totalorder %s10734_s13, 0 }
  0x5b   : > { %s281_s16 = sand.u32 (!%p10738_p1), 1, %s9201_s27   ;;  %p10739_p8 = scmp.ne.s32.totalorder (!%p10738_p1), %s10733_s12, 0 }
  0x5c   : > { %279 = sbr.rel (%p10738_p1) target bundleno = 1937 (0x791), region = 44  ;;  %s282_s29 = scalar_lea.sflag (!%p10738_p1), [#allocation5], %s281_s16 }
  0x5d   : > { %s8990_s18 = smul.u32 (!%p10738_p1), 5280, %s281_s16 }
  0x5f   : > { %s9427_s8 = scalar_lea.vmem (!%p10738_p1), [#allocation4], %s8990_s18 }
  0x63   : > { %9188 = dma.done.wait (%p10739_p8), %s282_s29, 84480  }
  0x64   : > { %9190 = vsyncadd (%p10739_p8), %s282_s29, 4294882816  ;;  %p10740_p0 = scmp.eq.s32.totalorder %s9285_s5, 0 }
  0x66   : > { %9192 = dma.done.wait (%p10740_p0), [#allocation7], 32   ;;  %p10741_p2 = pmov %p10740_p0 }
  0x67   : > { %s323_s13 = smul.u32 165, %s9285_s5  ;;  %p10742_p4 = scmp.ne.s32.totalorder %s9285_s5, 0 }
  0x68   : > { %9194 = vsyncadd (%p10741_p2), [#allocation7], 4294967264  ;;  %v9216_v1 = vmov (!%p10742_p4), 0.0  }
  0x69   : > { %p324_p3 = scmp.lt.s32.totalorder %s323_s13, 494  ;;  %333 = sbr.rel (%p10742_p4) target bundleno = 112 (0x70), region = 60  ;;  %334 = vst [vmem:[#allocation2] sm:$0x3] (!%p10742_p4), %v9216_v1 }
  0x6b   : > { %s10748_s13 = smov (!%p324_p3, %s323_s13), 494 }
  0x6c   : > { %s9441_s25 = scalar_lea.vmem %s10720_s0, %s10748_s13 }
  0x70 PF: > { %v339_v2 = vld [vmem:[%s9427_s8 + $0x20] sm:$0xff]  ;;  %v340_v12 = vld [vmem:[%s9427_s8 + $0x28] sm:$0xff]  ;;  %v2362_v20 = vlaneseq  ;;  %v9217_v25 = vmov 1966171168   ;;  %v341_v28 = vld [vmem:[%s9427_s8 + $0x30] sm:$0xff]  ;;  %vm9219_vm0 = vmmov 0  }
  0x71   : > { %v347_v3 = vld [vmem:[%s9427_s8 + $0x60] sm:$0xff]  ;;  %v1003_v5 = vunpack.c.l.s8.bf16 %v339_v2  ;;  %v1004_v6 = vunpack.c.h.s8.bf16 %v339_v2  ;;  %v348_v13 = vld [vmem:[%s9427_s8 + $0x68] sm:$0xff]  ;;  %v1005_v16 = vunpack.c.l.s8.bf16 %v340_v12  ;;  %v1006_v23 = vunpack.c.h.s8.bf16 %v340_v12  ;;  %v349_v29 = vld [vmem:[%s9427_s8 + $0x70] sm:$0xff]  ;;  %p7073_p6 = scmp.ne.s32.totalorder %s9285_s5, 2 }
  0x72   : > { %v335_v4 = vld [vmem:[%s9427_s8] sm:$0xff]  ;;  %v1019_v7 = vunpack.c.l.s8.bf16 %v347_v3  ;;  %v1020_v8 = vunpack.c.h.s8.bf16 %v347_v3  ;;  %v1021_v17 = vunpack.c.l.s8.bf16 %v348_v13  ;;  %v336_v18 = vld [vmem:[%s9427_s8 + $0x8] sm:$0xff]  ;;  %v1022_v24 = vunpack.c.h.s8.bf16 %v348_v13  ;;  %v337_v36 = vld [vmem:[%s9427_s8 + $0x10] sm:$0xff] }
  0x73   : > { %v343_v9 = vld [vmem:[%s9427_s8 + $0x40] sm:$0xff]  ;;  %v995_v10 = vunpack.c.l.s8.bf16 %v335_v4  ;;  %7080 = vmatprep.subr.bf16.mxu0 %v1003_v5  ;;  %v996_v14 = vunpack.c.h.s8.bf16 %v335_v4  ;;  %v344_v19 = vld [vmem:[%s9427_s8 + $0x48] sm:$0xff]  ;;  %v997_v21 = vunpack.c.l.s8.bf16 %v336_v18  ;;  %v2360_v26 = vunpack.c.l.s4 %v9217_v25  ;;  %v345_v37 = vld [vmem:[%s9427_s8 + $0x50] sm:$0xff] }
  0x74   : > { %v1011_v11 = vunpack.c.l.s8.bf16 %v343_v9  ;;  %7102 = vmatprep.subr.bf16.mxu1 %v1019_v7  ;;  %v1012_v15 = vunpack.c.h.s8.bf16 %v343_v9  ;;  %v1013_v22 = vunpack.c.l.s8.bf16 %v344_v19  ;;  %v2363_v27 = vshrl.u32 %v2362_v20, 7  ;;  %v2316_v33 = vld [vmem:[%s9441_s25] sm:$0xff]  ;;  %v356_v13 = vld [vmem:[%s9427_s8 + $0xa8] sm:$0xff] }
  0x75   : > { %7081 = vmatpush3.bf16.msra.mxu0 %v995_v10  ;;  %v2361_v30 = vunpack.c.0.s8 %v2360_v26  ;;  %v998_v31 = vunpack.c.h.s8.bf16 %v336_v18  ;;  %v1014_v32 = vunpack.c.h.s8.bf16 %v344_v19  ;;  %v1007_v34 = vunpack.c.l.s8.bf16 %v341_v28  ;;  %v342_v45 = vld [vmem:[%s9427_s8 + $0x38] sm:$0xff]  ;;  %v355_v61 = vld [vmem:[%s9427_s8 + $0xa0] sm:$0xff]  ;;  %v352_v19 = vld [vmem:[%s9427_s8 + $0x88] sm:$0xff] }
  0x76   : > { %7103 = vmatpush3.bf16.msra.mxu1 %v1011_v11  ;;  %7082 = vmatprep.subr.bf16.mxu0 %v1004_v6  ;;  %v1023_v35 = vunpack.c.l.s8.bf16 %v349_v29  ;;  %v999_v40 = vunpack.c.l.s8.bf16 %v337_v36  ;;  %v1015_v41 = vunpack.c.l.s8.bf16 %v345_v37  ;;  %v1008_v42 = vunpack.c.h.s8.bf16 %v341_v28  ;;  %v350_v46 = vld [vmem:[%s9427_s8 + $0x78] sm:$0xff]  ;;  %v363_v62 = vld [vmem:[%s9427_s8 + $0xe0] sm:$0xff]  ;;  %v357_v26 = vld [vmem:[%s9427_s8 + $0xb0] sm:$0xff] }
  0x77   : > { %7104 = vmatprep.subr.bf16.mxu1 %v1020_v8  ;;  %v9458_v38 = vsub.s32 %v2361_v30, %v2363_v27  ;;  %v1024_v43 = vunpack.c.h.s8.bf16 %v349_v29  ;;  %v2358_v47 = vcombine.high %v2316_v33, %v2316_v33  ;;  %v1000_v49 = vunpack.c.h.s8.bf16 %v337_v36  ;;  %v338_v53 = vld [vmem:[%s9427_s8 + $0x18] sm:$0xff]  ;;  %v351_v4 = vld [vmem:[%s9427_s8 + $0x80] sm:$0xff]  ;;  %v365_v27 = vld [vmem:[%s9427_s8 + $0xf0] sm:$0xff] }
  0x78   : > { %v1016_v50 = vunpack.c.h.s8.bf16 %v345_v37  ;;  %v1009_v51 = vunpack.c.l.s8.bf16 %v342_v45  ;;  %v1025_v52 = vunpack.c.l.s8.bf16 %v350_v46  ;;  %v346_v54 = vld [vmem:[%s9427_s8 + $0x58] sm:$0xff]  ;;  %v1001_v57 = vunpack.c.l.s8.bf16 %v338_v53  ;;  %v359_v6 = vld [vmem:[%s9427_s8 + $0xc0] sm:$0xff] }
  0x79   : > { %7083 = vmatpush3.bf16.msra.mxu0 %v996_v14  ;;  %v2365_v39 = vrot.slane %v2316_v33, %v9458_v38  ;;  %v9467_v56 = vrot.slane %v2358_v47, %v9458_v38  ;;  %v1017_v58 = vunpack.c.l.s8.bf16 %v346_v54  ;;  %v1010_v59 = vunpack.c.h.s8.bf16 %v342_v45  ;;  %v364_v14 = vld [vmem:[%s9427_s8 + $0xe8] sm:$0xff]  ;;  %v361_v33 = vld [vmem:[%s9427_s8 + $0xd0] sm:$0xff]  ;;  %v354_v45 = vld [vmem:[%s9427_s8 + $0x98] sm:$0xff] }
  0x7a   : > { %7105 = vmatpush3.bf16.msra.mxu1 %v1012_v15  ;;  %7084 = vmatprep.subr.bf16.mxu0 %v1005_v16  ;;  %v1026_v60 = vunpack.c.h.s8.bf16 %v350_v46  ;;  %v1002_v1 = vunpack.c.h.s8.bf16 %v338_v53  ;;  %v1018_v2 = vunpack.c.h.s8.bf16 %v346_v54  ;;  %v1035_v3 = vunpack.c.l.s8.bf16 %v355_v61  ;;  %v362_v47 = vld [vmem:[%s9427_s8 + $0xd8] sm:$0xff]  ;;  %v371_v53 = vld [vmem:[%s9427_s8 + $0x120] sm:$0xff] }
  0x7b   : > { %7106 = vmatprep.subr.bf16.mxu1 %v1021_v17  ;;  %v2373_v44 = vcombine.high %v2365_v39, %v2365_v39  ;;  %v2374_v63 = vcombine.high %v9467_v56, %v9467_v56  ;;  %v2381_v0 = vrot.slane %v2365_v39, %v9458_v38  ;;  %v1051_v5 = vunpack.c.l.s8.bf16 %v363_v62  ;;  %v358_v39 = vld [vmem:[%s9427_s8 + $0xb8] sm:$0xff]  ;;  %v379_v54 = vld [vmem:[%s9427_s8 + $0x160] sm:$0xff] }
  0x7c   : > { %v1027_v9 = vunpack.c.l.s8.bf16 %v351_v4  ;;  %v1043_v10 = vunpack.c.l.s8.bf16 %v359_v6  ;;  %v1036_v11 = vunpack.c.h.s8.bf16 %v355_v61  ;;  %v1052_v12 = vunpack.c.h.s8.bf16 %v363_v62  ;;  %v367_v61 = vld [vmem:[%s9427_s8 + $0x100] sm:$0xff] }
  0x7d   : > { %7085 = vmatpush3.bf16.msra.mxu0 %v997_v21  ;;  %v2395_v48 = vrot.slane %v2373_v44, %v9458_v38  ;;  %v2402_v7 = vrot.slane %v2374_v63, %v9458_v38  ;;  %v2403_v8 = vcombine.high %v2381_v0, %v2381_v0  ;;  %v1028_v16 = vunpack.c.h.s8.bf16 %v351_v4  ;;  %v360_v21 = vld [vmem:[%s9427_s8 + $0xc8] sm:$0xff]  ;;  %v375_v63 = vld [vmem:[%s9427_s8 + $0x140] sm:$0xff] }
  0x7e   : > { %7107 = vmatpush3.bf16.msra.mxu1 %v1013_v22  ;;  %7086 = vmatprep.subr.bf16.mxu0 %v1006_v23  ;;  %v1044_v17 = vunpack.c.h.s8.bf16 %v359_v6  ;;  %v1037_v18 = vunpack.c.l.s8.bf16 %v356_v13  ;;  %v1053_v20 = vunpack.c.l.s8.bf16 %v364_v14  ;;  %v1029_v22 = vunpack.c.l.s8.bf16 %v352_v19  ;;  %v380_v6 = vld [vmem:[%s9427_s8 + $0x168] sm:$0xff] }
  0x7f   : > { %7108 = vmatprep.subr.bf16.mxu1 %v1022_v24  ;;  %v2405_v55 = vcombine.high %v2395_v48, %v2395_v48  ;;  %3574 = vmatprep.mubr.bf16.mxu0 %v2395_v48  ;;  %v2406_v15 = vcombine.high %v2402_v7, %v2402_v7  ;;  %v1045_v23 = vunpack.c.l.s8.bf16 %v360_v21  ;;  %v1038_v24 = vunpack.c.h.s8.bf16 %v356_v13  ;;  %v376_v13 = vld [vmem:[%s9427_s8 + $0x148] sm:$0xff] }
  0x80   : > { %v1054_v25 = vunpack.c.h.s8.bf16 %v364_v14  ;;  %v1030_v28 = vunpack.c.h.s8.bf16 %v352_v19  ;;  %v1046_v29 = vunpack.c.h.s8.bf16 %v360_v21  ;;  %v1039_v30 = vunpack.c.l.s8.bf16 %v357_v26  ;;  %v381_v19 = vld [vmem:[%s9427_s8 + $0x170] sm:$0xff] }
  0x81   : > { %7087 = vmatpush3.bf16.msra.mxu0 %v998_v31  ;;  %3614 = vmatprep.mubr.bf16.mxu1 %v2405_v55  ;;  %v353_v31 = vld [vmem:[%s9427_s8 + $0x90] sm:$0xff]  ;;  %v1040_v36 = vunpack.c.h.s8.bf16 %v357_v26  ;;  %v1056_v37 = vunpack.c.h.s8.bf16 %v365_v27  ;;  %v1041_v44 = vunpack.c.l.s8.bf16 %v358_v39  ;;  %v1083_v62 = vunpack.c.l.s8.bf16 %v379_v54 }
  0x82   : > { %7109 = vmatpush3.bf16.msra.mxu1 %v1014_v32  ;;  %7088 = vmatprep.subr.bf16.mxu0 %v1007_v34  ;;  %v1055_v32 = vunpack.c.l.s8.bf16 %v365_v27  ;;  %v1031_v34 = vunpack.c.l.s8.bf16 %v353_v31  ;;  %v1084_v4 = vunpack.c.h.s8.bf16 %v379_v54  ;;  %v1078_v21 = vunpack.c.h.s8.bf16 %v376_v13 }
  0x83   : > { %7110 = vmatprep.subr.bf16.mxu1 %v1023_v35  ;;  %v1047_v35 = vunpack.c.l.s8.bf16 %v361_v33  ;;  %vm9221_vm1 = vmmov (!%p7073_p6), 0   ;;  %vm6979_vm2 = vcmask (!%p7073_p6), 1024  }
  0x85   : > { %7089 = vmatpush3.bf16.msra.mxu0 %v999_v40  ;;  %v366_v40 = vld [vmem:[%s9427_s8 + $0xf8] sm:$0xff] }
  0x86   : > { %7111 = vmatpush3.bf16.msra.mxu1 %v1015_v41  ;;  %7090 = vmatprep.subr.bf16.mxu0 %v1008_v42  ;;  %v9488_v41 = vld [vmem:[%s9441_s25 + $0x8] sm:$0xff]  ;;  %v1032_v42 = vunpack.c.h.s8.bf16 %v353_v31  ;;  %v1057_v46 = vunpack.c.l.s8.bf16 %v366_v40  ;;  %v382_v31 = vld [vmem:[%s9427_s8 + $0x178] sm:$0xff] }
  0x87   : > { %7112 = vmatprep.subr.bf16.mxu1 %v1024_v43  ;;  %v1048_v43 = vunpack.c.h.s8.bf16 %v361_v33  ;;  %v9494_v48 = vrot.slane %v9488_v41, %v9458_v38 }
  0x89   : > { %7091 = vmatpush3.bf16.msra.mxu0 %v1000_v49  ;;  %v1033_v49 = vunpack.c.l.s8.bf16 %v354_v45  ;;  %v2422_v55 = vcombine.high %v9494_v48, %v9494_v48 }
  0x8a   : > { %7113 = vmatpush3.bf16.msra.mxu1 %v1016_v50  ;;  %7092 = vmatprep.subr.bf16.mxu0 %v1009_v51  ;;  %v1049_v50 = vunpack.c.l.s8.bf16 %v362_v47  ;;  %v1042_v51 = vunpack.c.h.s8.bf16 %v358_v39  ;;  %v378_v39 = vld [vmem:[%s9427_s8 + $0x158] sm:$0xff] }
  0x8b   : > { %7114 = vmatprep.subr.bf16.mxu1 %v1025_v52  ;;  %v1058_v52 = vunpack.c.h.s8.bf16 %v366_v40 }
  0x8d   : > { %7093 = vmatpush3.bf16.msra.mxu0 %v1001_v57  ;;  %v2388_v57 = vrot.slane %v9467_v56, %v9458_v38  ;;  %v1068_v56 = vunpack.c.h.s8.bf16 %v371_v53 }
  0x8e   : > { %7115 = vmatpush3.bf16.msra.mxu1 %v1017_v58  ;;  %7094 = vmatprep.subr.bf16.mxu0 %v1010_v59  ;;  %v1034_v58 = vunpack.c.h.s8.bf16 %v354_v45  ;;  %v1050_v59 = vunpack.c.h.s8.bf16 %v362_v47  ;;  %v387_v45 = vld [vmem:[%s9427_s8 + $0x1a0] sm:$0xff] }
  0x8f   : > { %7116 = vmatprep.subr.bf16.mxu1 %v1026_v60  ;;  %v1067_v60 = vunpack.c.l.s8.bf16 %v371_v53  ;;  %v383_v53 = vld [vmem:[%s9427_s8 + $0x180] sm:$0xff] }
  0x91   : > { %7095 = vmatpush3.bf16.msra.mxu0 %v1002_v1  ;;  %v2404_v1 = vcombine.high %v2388_v57, %v2388_v57 }
  0x92   : > { %7117 = vmatpush3.bf16.msra.mxu1 %v1018_v2  ;;  %7124 = vmatprep.subr.bf16.mxu0 %v1035_v3  ;;  %v1059_v2 = vunpack.c.l.s8.bf16 %v367_v61  ;;  %v1075_v3 = vunpack.c.l.s8.bf16 %v375_v63 }
  0x93   : > { %7146 = vmatprep.subr.bf16.mxu1 %v1051_v5  ;;  %v372_v5 = vld [vmem:[%s9427_s8 + $0x128] sm:$0xff] }
  0x94   : > { %3575 = vmatmul.mubr.bf16.vlgmr.msra.gmra.mrb[0].mxu0 %v2381_v0  ;;  %v2444_v0 = vrot.slane %v2422_v55, %v9458_v38  ;;  %v391_v55 = vld [vmem:[%s9427_s8 + $0x1c0] sm:$0xff] }
  0x95   : > { %3615 = vmatmul.mubr.bf16.vlgmr.msra.gmra.mrb[0].mxu1 %v2403_v8  ;;  %7125 = vmatpush3.bf16.msra.mxu0 %v1027_v9  ;;  %v1060_v8 = vunpack.c.h.s8.bf16 %v367_v61  ;;  %v1076_v9 = vunpack.c.h.s8.bf16 %v375_v63  ;;  %v396_v63 = vld [vmem:[%s9427_s8 + $0x1e8] sm:$0xff] }
  0x96   : > { %7147 = vmatpush3.bf16.msra.mxu1 %v1043_v10  ;;  %7126 = vmatprep.subr.bf16.mxu0 %v1036_v11  ;;  %v1069_v10 = vunpack.c.l.s8.bf16 %v372_v5  ;;  %v368_v11 = vld [vmem:[%s9427_s8 + $0x108] sm:$0xff] }
  0x97   : > { %7148 = vmatprep.subr.bf16.mxu1 %v1052_v12  ;;  %3654 = vmatprep.mubr.bf16.mxu0 %v2402_v7  ;;  %v2454_v7 = vcombine.high %v2444_v0, %v2444_v0  ;;  %v1085_v12 = vunpack.c.l.s8.bf16 %v380_v6  ;;  %v1061_v14 = vunpack.c.l.s8.bf16 %v368_v11 }
  0x98   : > { %3694 = vmatprep.mubr.bf16.mxu1 %v2406_v15  ;;  %v1077_v15 = vunpack.c.l.s8.bf16 %v376_v13 }
  0x99   : > { %7127 = vmatpush3.bf16.msra.mxu0 %v1028_v16  ;;  %v1070_v16 = vunpack.c.h.s8.bf16 %v372_v5  ;;  %v392_v5 = vld [vmem:[%s9427_s8 + $0x1c8] sm:$0xff] }
  0x9a   : > { %7149 = vmatpush3.bf16.msra.mxu1 %v1044_v17  ;;  %7128 = vmatprep.subr.bf16.mxu0 %v1037_v18  ;;  %v1086_v17 = vunpack.c.h.s8.bf16 %v380_v6  ;;  %v373_v18 = vld [vmem:[%s9427_s8 + $0x130] sm:$0xff]  ;;  %v1110_v13 = vunpack.c.h.s8.bf16 %v392_v5 }
  0x9b   : > { %7150 = vmatprep.subr.bf16.mxu1 %v1053_v20  ;;  %v1062_v20 = vunpack.c.h.s8.bf16 %v368_v11  ;;  %v397_v11 = vld [vmem:[%s9427_s8 + $0x1f0] sm:$0xff] }
  0x9d   : > { %7129 = vmatpush3.bf16.msra.mxu0 %v1029_v22  ;;  %v1071_v22 = vunpack.c.l.s8.bf16 %v373_v18 }
  0x9e   : > { %7151 = vmatpush3.bf16.msra.mxu1 %v1045_v23  ;;  %7130 = vmatprep.subr.bf16.mxu0 %v1038_v24  ;;  %v369_v23 = vld [vmem:[%s9427_s8 + $0x110] sm:$0xff]  ;;  %v1087_v24 = vunpack.c.l.s8.bf16 %v381_v19 }
  0x9f   : > { %7152 = vmatprep.subr.bf16.mxu1 %v1054_v25  ;;  %v377_v25 = vld [vmem:[%s9427_s8 + $0x150] sm:$0xff]  ;;  %v1063_v26 = vunpack.c.l.s8.bf16 %v369_v23  ;;  %v1064_v33 = vunpack.c.h.s8.bf16 %v369_v23  ;;  %v398_v23 = vld [vmem:[%s9427_s8 + $0x1f8] sm:$0xff] }
  0xa0   : > { %v1079_v27 = vunpack.c.l.s8.bf16 %v377_v25 }
  0xa1   : > { %7131 = vmatpush3.bf16.msra.mxu0 %v1030_v28  ;;  %v1072_v28 = vunpack.c.h.s8.bf16 %v373_v18 }
  0xa2   : > { %7153 = vmatpush3.bf16.msra.mxu1 %v1046_v29  ;;  %7132 = vmatprep.subr.bf16.mxu0 %v1039_v30  ;;  %v1088_v29 = vunpack.c.h.s8.bf16 %v381_v19  ;;  %v374_v30 = vld [vmem:[%s9427_s8 + $0x138] sm:$0xff] }
  0xa3   : > { %7154 = vmatprep.subr.bf16.mxu1 %v1055_v32  ;;  %v2407_v32 = vcombine.high %v9488_v41, %v9488_v41  ;;  %v1074_v41 = vunpack.c.h.s8.bf16 %v374_v30 }
  0xa5   : > { %7133 = vmatpush3.bf16.msra.mxu0 %v1031_v34  ;;  %v1080_v34 = vunpack.c.h.s8.bf16 %v377_v25  ;;  %v9520_v40 = vrot.slane %v2407_v32, %v9458_v38 }
  0xa6   : > { %7155 = vmatpush3.bf16.msra.mxu1 %v1047_v35  ;;  %7134 = vmatprep.subr.bf16.mxu0 %v1040_v36  ;;  %v1073_v35 = vunpack.c.l.s8.bf16 %v374_v30  ;;  %v370_v36 = vld [vmem:[%s9427_s8 + $0x118] sm:$0xff] }
  0xa7   : > { %7156 = vmatprep.subr.bf16.mxu1 %v1056_v37  ;;  %v1089_v37 = vunpack.c.l.s8.bf16 %v382_v31  ;;  %v2423_v47 = vcombine.high %v9520_v40, %v9520_v40  ;;  %v394_v30 = vld [vmem:[%s9427_s8 + $0x1d8] sm:$0xff] }
  0xa9   : > { %7135 = vmatpush3.bf16.msra.mxu0 %v1032_v42  ;;  %v1065_v42 = vunpack.c.l.s8.bf16 %v370_v36 }
  0xaa   : > { %7157 = vmatpush3.bf16.msra.mxu1 %v1048_v43  ;;  %7136 = vmatprep.subr.bf16.mxu0 %v1041_v44  ;;  %v1081_v43 = vunpack.c.l.s8.bf16 %v378_v39  ;;  %v1090_v44 = vunpack.c.h.s8.bf16 %v382_v31 }
  0xab   : > { %7158 = vmatprep.subr.bf16.mxu1 %v1057_v46  ;;  %v395_v46 = vld [vmem:[%s9427_s8 + $0x1e0] sm:$0xff] }
  0xac   : > { %v1115_v54 = vunpack.c.l.s8.bf16 %v395_v46  ;;  %v1116_v61 = vunpack.c.h.s8.bf16 %v395_v46 }
  0xad   : > { %7137 = vmatpush3.bf16.msra.mxu0 %v1033_v49  ;;  %v2430_v49 = vrot.slane %v9494_v48, %v9458_v38  ;;  %v1100_v48 = vunpack.c.h.s8.bf16 %v387_v45 }
  0xae   : > { %7159 = vmatpush3.bf16.msra.mxu1 %v1049_v50  ;;  %7138 = vmatprep.subr.bf16.mxu0 %v1042_v51  ;;  %v1066_v50 = vunpack.c.h.s8.bf16 %v370_v36  ;;  %v1082_v51 = vunpack.c.h.s8.bf16 %v378_v39  ;;  %v403_v36 = vld [vmem:[%s9427_s8 + $0x220] sm:$0xff] }
  0xaf   : > { %7160 = vmatprep.subr.bf16.mxu1 %v1058_v52  ;;  %v1099_v52 = vunpack.c.l.s8.bf16 %v387_v45  ;;  %v399_v45 = vld [vmem:[%s9427_s8 + $0x200] sm:$0xff] }
  0xb1   : > { %7139 = vmatpush3.bf16.msra.mxu0 %v1034_v58  ;;  %v2452_v58 = vcombine.high %v2430_v49, %v2430_v49 }
  0xb2   : > { %7161 = vmatpush3.bf16.msra.mxu1 %v1050_v59  ;;  %7168 = vmatprep.subr.bf16.mxu0 %v1067_v60  ;;  %v1091_v59 = vunpack.c.l.s8.bf16 %v383_v53  ;;  %v1107_v60 = vunpack.c.l.s8.bf16 %v391_v55 }
  0xb3   : > { %7190 = vmatprep.subr.bf16.mxu1 %v1083_v62  ;;  %v388_v62 = vld [vmem:[%s9427_s8 + $0x1a8] sm:$0xff] }
  0xb4   : > { %3655 = vmatmul.mubr.bf16.vlgmr.msra.gmra.mrb[4].mxu0 %v2388_v57  ;;  %v2451_v57 = vrot.slane %v2423_v47, %v9458_v38  ;;  %v407_v47 = vld [vmem:[%s9427_s8 + $0x240] sm:$0xff] }
  0xb5   : > { %3695 = vmatmul.mubr.bf16.vlgmr.msra.gmra.mrb[4].mxu1 %v2404_v1  ;;  %7169 = vmatpush3.bf16.msra.mxu0 %v1059_v2  ;;  %v1092_v1 = vunpack.c.h.s8.bf16 %v383_v53  ;;  %v1108_v2 = vunpack.c.h.s8.bf16 %v391_v55  ;;  %v412_v55 = vld [vmem:[%s9427_s8 + $0x268] sm:$0xff] }
  0xb6   : > { %7191 = vmatpush3.bf16.msra.mxu1 %v1075_v3  ;;  %7170 = vmatprep.subr.bf16.mxu0 %v1068_v56  ;;  %v1101_v3 = vunpack.c.l.s8.bf16 %v388_v62  ;;  %v384_v56 = vld [vmem:[%s9427_s8 + $0x188] sm:$0xff] }
  0xb7   : > { %7192 = vmatprep.subr.bf16.mxu1 %v1084_v4  ;;  %3734 = vmatprep.mubr.bf16.mxu0 %v2444_v0  ;;  %v2455_v0 = vcombine.high %v2451_v57, %v2451_v57  ;;  %v1117_v4 = vunpack.c.l.s8.bf16 %v396_v63  ;;  %v1093_v6 = vunpack.c.l.s8.bf16 %v384_v56 }
  0xb8   : > { %3774 = vmatprep.mubr.bf16.mxu1 %v2454_v7  ;;  %v1109_v7 = vunpack.c.l.s8.bf16 %v392_v5 }
  0xb9   : > { %7171 = vmatpush3.bf16.msra.mxu0 %v1060_v8  ;;  %v1102_v8 = vunpack.c.h.s8.bf16 %v388_v62  ;;  %v408_v62 = vld [vmem:[%s9427_s8 + $0x248] sm:$0xff] }
  0xba   : > { %7193 = vmatpush3.bf16.msra.mxu1 %v1076_v9  ;;  %7172 = vmatprep.subr.bf16.mxu0 %v1069_v10  ;;  %v1118_v9 = vunpack.c.h.s8.bf16 %v396_v63  ;;  %v389_v10 = vld [vmem:[%s9427_s8 + $0x1b0] sm:$0xff]  ;;  %v1142_v5 = vunpack.c.h.s8.bf16 %v408_v62 }
  0xbb   : > { %7194 = vmatprep.subr.bf16.mxu1 %v1085_v12  ;;  %v1094_v12 = vunpack.c.h.s8.bf16 %v384_v56  ;;  %v413_v56 = vld [vmem:[%s9427_s8 + $0x270] sm:$0xff] }
  0xbd   : > { %7173 = vmatpush3.bf16.msra.mxu0 %v1061_v14  ;;  %v1103_v14 = vunpack.c.l.s8.bf16 %v389_v10 }
  0xbe   : > { %7195 = vmatpush3.bf16.msra.mxu1 %v1077_v15  ;;  %7174 = vmatprep.subr.bf16.mxu0 %v1070_v16  ;;  %v385_v15 = vld [vmem:[%s9427_s8 + $0x190] sm:$0xff]  ;;  %v1119_v16 = vunpack.c.l.s8.bf16 %v397_v11 }
  0xbf   : > { %7196 = vmatprep.subr.bf16.mxu1 %v1086_v17  ;;  %v393_v17 = vld [vmem:[%s9427_s8 + $0x1d0] sm:$0xff]  ;;  %v1095_v18 = vunpack.c.l.s8.bf16 %v385_v15  ;;  %v1096_v25 = vunpack.c.h.s8.bf16 %v385_v15  ;;  %v414_v15 = vld [vmem:[%s9427_s8 + $0x278] sm:$0xff] }
  0xc0   : > { %v1111_v19 = vunpack.c.l.s8.bf16 %v393_v17 }
  0xc1   : > { %7175 = vmatpush3.bf16.msra.mxu0 %v1062_v20  ;;  %v1104_v20 = vunpack.c.h.s8.bf16 %v389_v10 }
  0xc2   : > { %7197 = vmatpush3.bf16.msra.mxu1 %v1078_v21  ;;  %7176 = vmatprep.subr.bf16.mxu0 %v1071_v22  ;;  %v1120_v21 = vunpack.c.h.s8.bf16 %v397_v11  ;;  %v390_v22 = vld [vmem:[%s9427_s8 + $0x1b8] sm:$0xff] }
  0xc3   : > { %7198 = vmatprep.subr.bf16.mxu1 %v1087_v24  ;;  %v9542_v24 = vld [vmem:[%s9441_s25 + $0x10] sm:$0xff] }
  0xc4   : > { %v9548_v31 = vrot.slane %v9542_v24, %v9458_v38 }
  0xc5   : > { %7177 = vmatpush3.bf16.msra.mxu0 %v1063_v26  ;;  %v1112_v26 = vunpack.c.h.s8.bf16 %v393_v17 }
  0xc6   : > { %7199 = vmatpush3.bf16.msra.mxu1 %v1079_v27  ;;  %7178 = vmatprep.subr.bf16.mxu0 %v1072_v28  ;;  %v1105_v27 = vunpack.c.l.s8.bf16 %v390_v22  ;;  %v386_v28 = vld [vmem:[%s9427_s8 + $0x198] sm:$0xff]  ;;  %v2471_v39 = vcombine.high %v9548_v31, %v9548_v31 }
  0xc7   : > { %7200 = vmatprep.subr.bf16.mxu1 %v1088_v29  ;;  %v1121_v29 = vunpack.c.l.s8.bf16 %v398_v23  ;;  %v1097_v32 = vunpack.c.l.s8.bf16 %v386_v28 }
  0xc9   : > { %7179 = vmatpush3.bf16.msra.mxu0 %v1064_v33  ;;  %v1113_v33 = vunpack.c.l.s8.bf16 %v394_v30 }
  0xca   : > { %7201 = vmatpush3.bf16.msra.mxu1 %v1080_v34  ;;  %7180 = vmatprep.subr.bf16.mxu0 %v1073_v35  ;;  %v1106_v34 = vunpack.c.h.s8.bf16 %v390_v22  ;;  %v1122_v35 = vunpack.c.h.s8.bf16 %v398_v23  ;;  %v410_v22 = vld [vmem:[%s9427_s8 + $0x258] sm:$0xff] }
  0xcb   : > { %7202 = vmatprep.subr.bf16.mxu1 %v1089_v37  ;;  %v411_v37 = vld [vmem:[%s9427_s8 + $0x260] sm:$0xff] }
  0xcc   : > { %v1147_v46 = vunpack.c.l.s8.bf16 %v411_v37  ;;  %v1148_v53 = vunpack.c.h.s8.bf16 %v411_v37 }
  0xcd   : > { %7181 = vmatpush3.bf16.msra.mxu0 %v1065_v42  ;;  %v2437_v42 = vrot.slane %v9520_v40, %v9458_v38  ;;  %v1132_v40 = vunpack.c.h.s8.bf16 %v403_v36 }
  0xce   : > { %7203 = vmatpush3.bf16.msra.mxu1 %v1081_v43  ;;  %7182 = vmatprep.subr.bf16.mxu0 %v1074_v41  ;;  %v1098_v43 = vunpack.c.h.s8.bf16 %v386_v28  ;;  %v1114_v41 = vunpack.c.h.s8.bf16 %v394_v30  ;;  %v419_v28 = vld [vmem:[%s9427_s8 + $0x2a0] sm:$0xff] }
  0xcf   : > { %7204 = vmatprep.subr.bf16.mxu1 %v1090_v44  ;;  %v1131_v44 = vunpack.c.l.s8.bf16 %v403_v36  ;;  %v415_v36 = vld [vmem:[%s9427_s8 + $0x280] sm:$0xff] }
  0xd1   : > { %7183 = vmatpush3.bf16.msra.mxu0 %v1066_v50  ;;  %v2453_v50 = vcombine.high %v2437_v42, %v2437_v42 }
  0xd2   : > { %7205 = vmatpush3.bf16.msra.mxu1 %v1082_v51  ;;  %7212 = vmatprep.subr.bf16.mxu0 %v1099_v52  ;;  %v1123_v51 = vunpack.c.l.s8.bf16 %v399_v45  ;;  %v1139_v52 = vunpack.c.l.s8.bf16 %v407_v47 }
  0xd3   : > { %7234 = vmatprep.subr.bf16.mxu1 %v1115_v54  ;;  %v404_v54 = vld [vmem:[%s9427_s8 + $0x228] sm:$0xff] }
  0xd4   : > { %3735 = vmatmul.mubr.bf16.vlgmr.msra.gmra.mrb[8].mxu0 %v2430_v49  ;;  %v2493_v49 = vrot.slane %v2471_v39, %v9458_v38  ;;  %v423_v39 = vld [vmem:[%s9427_s8 + $0x2c0] sm:$0xff] }
  0xd5   : > { %3775 = vmatmul.mubr.bf16.vlgmr.msra.gmra.mrb[8].mxu1 %v2452_v58  ;;  %7213 = vmatpush3.bf16.msra.mxu0 %v1091_v59  ;;  %v1124_v58 = vunpack.c.h.s8.bf16 %v399_v45  ;;  %v1140_v59 = vunpack.c.h.s8.bf16 %v407_v47  ;;  %v428_v47 = vld [vmem:[%s9427_s8 + $0x2e8] sm:$0xff] }
  0xd6   : > { %7235 = vmatpush3.bf16.msra.mxu1 %v1107_v60  ;;  %7214 = vmatprep.subr.bf16.mxu0 %v1100_v48  ;;  %v1133_v60 = vunpack.c.l.s8.bf16 %v404_v54  ;;  %v400_v48 = vld [vmem:[%s9427_s8 + $0x208] sm:$0xff] }
  0xd7   : > { %7236 = vmatprep.subr.bf16.mxu1 %v1116_v61  ;;  %3814 = vmatprep.mubr.bf16.mxu0 %v2451_v57  ;;  %v2503_v57 = vcombine.high %v2493_v49, %v2493_v49  ;;  %v1149_v61 = vunpack.c.l.s8.bf16 %v412_v55  ;;  %v1125_v63 = vunpack.c.l.s8.bf16 %v400_v48 }
  0xd8   : > { %3854 = vmatprep.mubr.bf16.mxu1 %v2455_v0  ;;  %v1141_v0 = vunpack.c.l.s8.bf16 %v408_v62 }
  0xd9   : > { %7215 = vmatpush3.bf16.msra.mxu0 %v1092_v1  ;;  %v1134_v1 = vunpack.c.h.s8.bf16 %v404_v54  ;;  %v424_v54 = vld [vmem:[%s9427_s8 + $0x2c8] sm:$0xff] }
  0xda   : > { %7237 = vmatpush3.bf16.msra.mxu1 %v1108_v2  ;;  %7216 = vmatprep.subr.bf16.mxu0 %v1101_v3  ;;  %v1150_v2 = vunpack.c.h.s8.bf16 %v412_v55  ;;  %v405_v3 = vld [vmem:[%s9427_s8 + $0x230] sm:$0xff]  ;;  %v1174_v62 = vunpack.c.h.s8.bf16 %v424_v54 }
  0xdb   : > { %7238 = vmatprep.subr.bf16.mxu1 %v1117_v4  ;;  %v1126_v4 = vunpack.c.h.s8.bf16 %v400_v48  ;;  %v429_v48 = vld [vmem:[%s9427_s8 + $0x2f0] sm:$0xff] }
  0xdd   : > { %7217 = vmatpush3.bf16.msra.mxu0 %v1093_v6  ;;  %v1135_v6 = vunpack.c.l.s8.bf16 %v405_v3 }
  0xde   : > { %7239 = vmatpush3.bf16.msra.mxu1 %v1109_v7  ;;  %7218 = vmatprep.subr.bf16.mxu0 %v1102_v8  ;;  %v401_v7 = vld [vmem:[%s9427_s8 + $0x210] sm:$0xff]  ;;  %v1151_v8 = vunpack.c.l.s8.bf16 %v413_v56 }
  0xdf   : > { %7240 = vmatprep.subr.bf16.mxu1 %v1118_v9  ;;  %v409_v9 = vld [vmem:[%s9427_s8 + $0x250] sm:$0xff]  ;;  %v1127_v10 = vunpack.c.l.s8.bf16 %v401_v7  ;;  %v1128_v17 = vunpack.c.h.s8.bf16 %v401_v7  ;;  %v430_v7 = vld [vmem:[%s9427_s8 + $0x2f8] sm:$0xff] }
  0xe0   : > { %v1143_v11 = vunpack.c.l.s8.bf16 %v409_v9 }
  0xe1   : > { %7219 = vmatpush3.bf16.msra.mxu0 %v1094_v12  ;;  %v1136_v12 = vunpack.c.h.s8.bf16 %v405_v3 }
  0xe2   : > { %7241 = vmatpush3.bf16.msra.mxu1 %v1110_v13  ;;  %7220 = vmatprep.subr.bf16.mxu0 %v1103_v14  ;;  %v1152_v13 = vunpack.c.h.s8.bf16 %v413_v56  ;;  %v406_v14 = vld [vmem:[%s9427_s8 + $0x238] sm:$0xff] }
  0xe3   : > { %7242 = vmatprep.subr.bf16.mxu1 %v1119_v16  ;;  %v2456_v16 = vcombine.high %v9542_v24, %v9542_v24  ;;  %v1138_v24 = vunpack.c.h.s8.bf16 %v406_v14 }
  0xe5   : > { %7221 = vmatpush3.bf16.msra.mxu0 %v1095_v18  ;;  %v1144_v18 = vunpack.c.h.s8.bf16 %v409_v9  ;;  %v9574_v23 = vrot.slane %v2456_v16, %v9458_v38 }
  0xe6   : > { %7243 = vmatpush3.bf16.msra.mxu1 %v1111_v19  ;;  %7222 = vmatprep.subr.bf16.mxu0 %v1104_v20  ;;  %v1137_v19 = vunpack.c.l.s8.bf16 %v406_v14  ;;  %v402_v20 = vld [vmem:[%s9427_s8 + $0x218] sm:$0xff] }
  0xe7   : > { %7244 = vmatprep.subr.bf16.mxu1 %v1120_v21  ;;  %v1153_v21 = vunpack.c.l.s8.bf16 %v414_v15  ;;  %v2472_v30 = vcombine.high %v9574_v23, %v9574_v23  ;;  %v426_v14 = vld [vmem:[%s9427_s8 + $0x2d8] sm:$0xff] }
  0xe9   : > { %7223 = vmatpush3.bf16.msra.mxu0 %v1096_v25  ;;  %v1129_v25 = vunpack.c.l.s8.bf16 %v402_v20 }
  0xea   : > { %7245 = vmatpush3.bf16.msra.mxu1 %v1112_v26  ;;  %7224 = vmatprep.subr.bf16.mxu0 %v1105_v27  ;;  %v1145_v26 = vunpack.c.l.s8.bf16 %v410_v22  ;;  %v1154_v27 = vunpack.c.h.s8.bf16 %v414_v15 }
  0xeb   : > { %7246 = vmatprep.subr.bf16.mxu1 %v1121_v29  ;;  %v427_v29 = vld [vmem:[%s9427_s8 + $0x2e0] sm:$0xff] }
  0xec   : > { %v1179_v37 = vunpack.c.l.s8.bf16 %v427_v29  ;;  %v1180_v45 = vunpack.c.h.s8.bf16 %v427_v29 }
  0xed   : > { %7225 = vmatpush3.bf16.msra.mxu0 %v1097_v32  ;;  %v2479_v32 = vrot.slane %v9548_v31, %v9458_v38  ;;  %v1164_v31 = vunpack.c.h.s8.bf16 %v419_v28 }
  0xee   : > { %7247 = vmatpush3.bf16.msra.mxu1 %v1113_v33  ;;  %7226 = vmatprep.subr.bf16.mxu0 %v1106_v34  ;;  %v1130_v33 = vunpack.c.h.s8.bf16 %v402_v20  ;;  %v1146_v34 = vunpack.c.h.s8.bf16 %v410_v22  ;;  %v435_v20 = vld [vmem:[%s9427_s8 + $0x320] sm:$0xff] }
  0xef   : > { %7248 = vmatprep.subr.bf16.mxu1 %v1122_v35  ;;  %v1163_v35 = vunpack.c.l.s8.bf16 %v419_v28  ;;  %v431_v28 = vld [vmem:[%s9427_s8 + $0x300] sm:$0xff] }
  0xf1   : > { %7227 = vmatpush3.bf16.msra.mxu0 %v1098_v43  ;;  %v2501_v43 = vcombine.high %v2479_v32, %v2479_v32 }
  0xf2   : > { %7249 = vmatpush3.bf16.msra.mxu1 %v1114_v41  ;;  %7256 = vmatprep.subr.bf16.mxu0 %v1131_v44  ;;  %v1155_v41 = vunpack.c.l.s8.bf16 %v415_v36  ;;  %v1171_v44 = vunpack.c.l.s8.bf16 %v423_v39 }
  0xf3   : > { %7278 = vmatprep.subr.bf16.mxu1 %v1147_v46  ;;  %v420_v46 = vld [vmem:[%s9427_s8 + $0x2a8] sm:$0xff] }
  0xf4   : > { %3815 = vmatmul.mubr.bf16.vlgmr.msra.gmra.mrb[12].mxu0 %v2437_v42  ;;  %v2500_v42 = vrot.slane %v2472_v30, %v9458_v38  ;;  %v439_v30 = vld [vmem:[%s9427_s8 + $0x340] sm:$0xff] }
  0xf5   : > { %3855 = vmatmul.mubr.bf16.vlgmr.msra.gmra.mrb[12].mxu1 %v2453_v50  ;;  %7257 = vmatpush3.bf16.msra.mxu0 %v1123_v51  ;;  %v1156_v50 = vunpack.c.h.s8.bf16 %v415_v36  ;;  %v1172_v51 = vunpack.c.h.s8.bf16 %v423_v39  ;;  %v444_v39 = vld [vmem:[%s9427_s8 + $0x368] sm:$0xff] }
  0xf6   : > { %7279 = vmatpush3.bf16.msra.mxu1 %v1139_v52  ;;  %7258 = vmatprep.subr.bf16.mxu0 %v1132_v40  ;;  %v1165_v52 = vunpack.c.l.s8.bf16 %v420_v46  ;;  %v416_v40 = vld [vmem:[%s9427_s8 + $0x288] sm:$0xff] }
  0xf7   : > { %7280 = vmatprep.subr.bf16.mxu1 %v1148_v53  ;;  %3894 = vmatprep.mubr.bf16.mxu0 %v2493_v49  ;;  %v2504_v49 = vcombine.high %v2500_v42, %v2500_v42  ;;  %v1181_v53 = vunpack.c.l.s8.bf16 %v428_v47  ;;  %v1157_v55 = vunpack.c.l.s8.bf16 %v416_v40 }
  0xf8   : > { %3934 = vmatprep.mubr.bf16.mxu1 %v2503_v57  ;;  %v1173_v57 = vunpack.c.l.s8.bf16 %v424_v54 }
  0xf9   : > { %7259 = vmatpush3.bf16.msra.mxu0 %v1124_v58  ;;  %v1166_v58 = vunpack.c.h.s8.bf16 %v420_v46  ;;  %v440_v46 = vld [vmem:[%s9427_s8 + $0x348] sm:$0xff] }
  0xfa   : > { %7281 = vmatpush3.bf16.msra.mxu1 %v1140_v59  ;;  %7260 = vmatprep.subr.bf16.mxu0 %v1133_v60  ;;  %v1182_v59 = vunpack.c.h.s8.bf16 %v428_v47  ;;  %v421_v60 = vld [vmem:[%s9427_s8 + $0x2b0] sm:$0xff]  ;;  %v1206_v54 = vunpack.c.h.s8.bf16 %v440_v46 }
  0xfb   : > { %7282 = vmatprep.subr.bf16.mxu1 %v1149_v61  ;;  %v1158_v61 = vunpack.c.h.s8.bf16 %v416_v40  ;;  %v445_v40 = vld [vmem:[%s9427_s8 + $0x370] sm:$0xff] }
  0xfd   : > { %7261 = vmatpush3.bf16.msra.mxu0 %v1125_v63  ;;  %v1167_v63 = vunpack.c.l.s8.bf16 %v421_v60 }
  0xfe   : > { %7283 = vmatpush3.bf16.msra.mxu1 %v1141_v0  ;;  %7262 = vmatprep.subr.bf16.mxu0 %v1134_v1  ;;  %v417_v0 = vld [vmem:[%s9427_s8 + $0x290] sm:$0xff]  ;;  %v1183_v1 = vunpack.c.l.s8.bf16 %v429_v48 }
  0xff   : > { %7284 = vmatprep.subr.bf16.mxu1 %v1150_v2  ;;  %v425_v2 = vld [vmem:[%s9427_s8 + $0x2d0] sm:$0xff]  ;;  %v1159_v3 = vunpack.c.l.s8.bf16 %v417_v0  ;;  %v1160_v9 = vunpack.c.h.s8.bf16 %v417_v0  ;;  %v446_v0 = vld [vmem:[%s9427_s8 + $0x378] sm:$0xff] }
 0x100   : > { %v1175_v56 = vunpack.c.l.s8.bf16 %v425_v2 }
 0x101   : > { %7263 = vmatpush3.bf16.msra.mxu0 %v1126_v4  ;;  %v1168_v4 = vunpack.c.h.s8.bf16 %v421_v60 }
 0x102   : > { %7285 = vmatpush3.bf16.msra.mxu1 %v1142_v5  ;;  %7264 = vmatprep.subr.bf16.mxu0 %v1135_v6  ;;  %v1184_v5 = vunpack.c.h.s8.bf16 %v429_v48  ;;  %v422_v6 = vld [vmem:[%s9427_s8 + $0x2b8] sm:$0xff] }
 0x103   : > { %7286 = vmatprep.subr.bf16.mxu1 %v1151_v8  ;;  %v9596_v8 = vld [vmem:[%s9441_s25 + $0x18] sm:$0xff] }
 0x104   : > { %v9602_v15 = vrot.slane %v9596_v8, %v9458_v38 }
 0x105   : > { %7265 = vmatpush3.bf16.msra.mxu0 %v1127_v10  ;;  %v1176_v10 = vunpack.c.h.s8.bf16 %v425_v2 }
 0x106   : > { %7287 = vmatpush3.bf16.msra.mxu1 %v1143_v11  ;;  %7266 = vmatprep.subr.bf16.mxu0 %v1136_v12  ;;  %v1169_v11 = vunpack.c.l.s8.bf16 %v422_v6  ;;  %v418_v12 = vld [vmem:[%s9427_s8 + $0x298] sm:$0xff]  ;;  %v2520_v22 = vcombine.high %v9602_v15, %v9602_v15 }
 0x107   : > { %7288 = vmatprep.subr.bf16.mxu1 %v1152_v13  ;;  %v1185_v13 = vunpack.c.l.s8.bf16 %v430_v7  ;;  %v1161_v16 = vunpack.c.l.s8.bf16 %v418_v12 }
 0x109   : > { %7267 = vmatpush3.bf16.msra.mxu0 %v1128_v17  ;;  %v1177_v17 = vunpack.c.l.s8.bf16 %v426_v14 }
 0x10a   : > { %7289 = vmatpush3.bf16.msra.mxu1 %v1144_v18  ;;  %7268 = vmatprep.subr.bf16.mxu0 %v1137_v19  ;;  %v1170_v18 = vunpack.c.h.s8.bf16 %v422_v6  ;;  %v1186_v19 = vunpack.c.h.s8.bf16 %v430_v7  ;;  %v442_v6 = vld [vmem:[%s9427_s8 + $0x358] sm:$0xff] }
 0x10b   : > { %7290 = vmatprep.subr.bf16.mxu1 %v1153_v21  ;;  %v443_v21 = vld [vmem:[%s9427_s8 + $0x360] sm:$0xff] }
 0x10c   : > { %v1211_v29 = vunpack.c.l.s8.bf16 %v443_v21  ;;  %v1212_v36 = vunpack.c.h.s8.bf16 %v443_v21 }
 0x10d   : > { %7269 = vmatpush3.bf16.msra.mxu0 %v1129_v25  ;;  %v2486_v25 = vrot.slane %v9574_v23, %v9458_v38  ;;  %v1196_v23 = vunpack.c.h.s8.bf16 %v435_v20 }
 0x10e   : > { %7291 = vmatpush3.bf16.msra.mxu1 %v1145_v26  ;;  %7270 = vmatprep.subr.bf16.mxu0 %v1138_v24  ;;  %v1162_v26 = vunpack.c.h.s8.bf16 %v418_v12  ;;  %v1178_v24 = vunpack.c.h.s8.bf16 %v426_v14  ;;  %v451_v12 = vld [vmem:[%s9427_s8 + $0x3a0] sm:$0xff] }
 0x10f   : > { %7292 = vmatprep.subr.bf16.mxu1 %v1154_v27  ;;  %v1195_v27 = vunpack.c.l.s8.bf16 %v435_v20  ;;  %v447_v20 = vld [vmem:[%s9427_s8 + $0x380] sm:$0xff] }
 0x111   : > { %7271 = vmatpush3.bf16.msra.mxu0 %v1130_v33  ;;  %v2502_v33 = vcombine.high %v2486_v25, %v2486_v25 }
 0x112   : > { %7293 = vmatpush3.bf16.msra.mxu1 %v1146_v34  ;;  %7300 = vmatprep.subr.bf16.mxu0 %v1163_v35  ;;  %v1187_v34 = vunpack.c.l.s8.bf16 %v431_v28  ;;  %v1203_v35 = vunpack.c.l.s8.bf16 %v439_v30 }
 0x113   : > { %7322 = vmatprep.subr.bf16.mxu1 %v1179_v37  ;;  %v436_v37 = vld [vmem:[%s9427_s8 + $0x328] sm:$0xff] }
 0x114   : > { %3895 = vmatmul.mubr.bf16.vlgmr.msra.gmra.mrb[16].mxu0 %v2479_v32  ;;  %v2542_v32 = vrot.slane %v2520_v22, %v9458_v38  ;;  %v455_v22 = vld [vmem:[%s9427_s8 + $0x3c0] sm:$0xff] }
 0x115   : > { %3935 = vmatmul.mubr.bf16.vlgmr.msra.gmra.mrb[16].mxu1 %v2501_v43  ;;  %7301 = vmatpush3.bf16.msra.mxu0 %v1155_v41  ;;  %v1188_v43 = vunpack.c.h.s8.bf16 %v431_v28  ;;  %v1204_v41 = vunpack.c.h.s8.bf16 %v439_v30  ;;  %v460_v30 = vld [vmem:[%s9427_s8 + $0x3e8] sm:$0xff] }
 0x116   : > { %7323 = vmatpush3.bf16.msra.mxu1 %v1171_v44  ;;  %7302 = vmatprep.subr.bf16.mxu0 %v1164_v31  ;;  %v1197_v44 = vunpack.c.l.s8.bf16 %v436_v37  ;;  %v432_v31 = vld [vmem:[%s9427_s8 + $0x308] sm:$0xff] }
 0x117   : > { %7324 = vmatprep.subr.bf16.mxu1 %v1180_v45  ;;  %3974 = vmatprep.mubr.bf16.mxu0 %v2500_v42  ;;  %v2552_v42 = vcombine.high %v2542_v32, %v2542_v32  ;;  %v1213_v45 = vunpack.c.l.s8.bf16 %v444_v39  ;;  %v1189_v47 = vunpack.c.l.s8.bf16 %v432_v31 }
 0x118   : > { %4014 = vmatprep.mubr.bf16.mxu1 %v2504_v49  ;;  %v1205_v49 = vunpack.c.l.s8.bf16 %v440_v46 }
 0x119   : > { %7303 = vmatpush3.bf16.msra.mxu0 %v1156_v50  ;;  %v1198_v50 = vunpack.c.h.s8.bf16 %v436_v37  ;;  %v456_v37 = vld [vmem:[%s9427_s8 + $0x3c8] sm:$0xff] }
 0x11a   : > { %7325 = vmatpush3.bf16.msra.mxu1 %v1172_v51  ;;  %7304 = vmatprep.subr.bf16.mxu0 %v1165_v52  ;;  %v1214_v51 = vunpack.c.h.s8.bf16 %v444_v39  ;;  %v437_v52 = vld [vmem:[%s9427_s8 + $0x330] sm:$0xff]  ;;  %v1238_v46 = vunpack.c.h.s8.bf16 %v456_v37 }
 0x11b   : > { %7326 = vmatprep.subr.bf16.mxu1 %v1181_v53  ;;  %v1190_v53 = vunpack.c.h.s8.bf16 %v432_v31  ;;  %v461_v31 = vld [vmem:[%s9427_s8 + $0x3f0] sm:$0xff] }
 0x11d   : > { %7305 = vmatpush3.bf16.msra.mxu0 %v1157_v55  ;;  %v1199_v55 = vunpack.c.l.s8.bf16 %v437_v52 }
 0x11e   : > { %7327 = vmatpush3.bf16.msra.mxu1 %v1173_v57  ;;  %7306 = vmatprep.subr.bf16.mxu0 %v1166_v58  ;;  %v433_v57 = vld [vmem:[%s9427_s8 + $0x310] sm:$0xff]  ;;  %v1215_v58 = vunpack.c.l.s8.bf16 %v445_v40 }
 0x11f   : > { %7328 = vmatprep.subr.bf16.mxu1 %v1182_v59  ;;  %v441_v59 = vld [vmem:[%s9427_s8 + $0x350] sm:$0xff]  ;;  %v1191_v60 = vunpack.c.l.s8.bf16 %v433_v57  ;;  %v1192_v2 = vunpack.c.h.s8.bf16 %v433_v57  ;;  %v462_v57 = vld [vmem:[%s9427_s8 + $0x3f8] sm:$0xff] }
 0x120   : > { %v1207_v48 = vunpack.c.l.s8.bf16 %v441_v59 }
 0x121   : > { %7307 = vmatpush3.bf16.msra.mxu0 %v1158_v61  ;;  %v1200_v61 = vunpack.c.h.s8.bf16 %v437_v52 }
 0x122   : > { %7329 = vmatpush3.bf16.msra.mxu1 %v1174_v62  ;;  %7308 = vmatprep.subr.bf16.mxu0 %v1167_v63  ;;  %v1216_v62 = vunpack.c.h.s8.bf16 %v445_v40  ;;  %v438_v63 = vld [vmem:[%s9427_s8 + $0x338] sm:$0xff] }
 0x123   : > { %7330 = vmatprep.subr.bf16.mxu1 %v1183_v1  ;;  %v2505_v1 = vcombine.high %v9596_v8, %v9596_v8  ;;  %v1202_v8 = vunpack.c.h.s8.bf16 %v438_v63 }
 0x125   : > { %7309 = vmatpush3.bf16.msra.mxu0 %v1159_v3  ;;  %v1208_v3 = vunpack.c.h.s8.bf16 %v441_v59  ;;  %v9628_v7 = vrot.slane %v2505_v1, %v9458_v38 }
 0x126   : > { %7331 = vmatpush3.bf16.msra.mxu1 %v1175_v56  ;;  %7310 = vmatprep.subr.bf16.mxu0 %v1168_v4  ;;  %v1201_v56 = vunpack.c.l.s8.bf16 %v438_v63  ;;  %v434_v4 = vld [vmem:[%s9427_s8 + $0x318] sm:$0xff] }
 0x127   : > { %7332 = vmatprep.subr.bf16.mxu1 %v1184_v5  ;;  %v1217_v5 = vunpack.c.l.s8.bf16 %v446_v0  ;;  %v2521_v14 = vcombine.high %v9628_v7, %v9628_v7  ;;  %v458_v63 = vld [vmem:[%s9427_s8 + $0x3d8] sm:$0xff] }
 0x129   : > { %7311 = vmatpush3.bf16.msra.mxu0 %v1160_v9  ;;  %v1193_v9 = vunpack.c.l.s8.bf16 %v434_v4 }
 0x12a   : > { %7333 = vmatpush3.bf16.msra.mxu1 %v1176_v10  ;;  %7312 = vmatprep.subr.bf16.mxu0 %v1169_v11  ;;  %v1209_v10 = vunpack.c.l.s8.bf16 %v442_v6  ;;  %v1218_v11 = vunpack.c.h.s8.bf16 %v446_v0 }
 0x12b   : > { %7334 = vmatprep.subr.bf16.mxu1 %v1185_v13  ;;  %v459_v13 = vld [vmem:[%s9427_s8 + $0x3e0] sm:$0xff] }
 0x12c   : > { %v1243_v21 = vunpack.c.l.s8.bf16 %v459_v13  ;;  %v1244_v28 = vunpack.c.h.s8.bf16 %v459_v13  ;;  %v1250_v13 = vunpack.c.h.s8.bf16 %v462_v57 }
 0x12d   : > { %7313 = vmatpush3.bf16.msra.mxu0 %v1161_v16  ;;  %v2528_v16 = vrot.slane %v9602_v15, %v9458_v38  ;;  %v1228_v15 = vunpack.c.h.s8.bf16 %v451_v12 }
 0x12e   : > { %7335 = vmatpush3.bf16.msra.mxu1 %v1177_v17  ;;  %7314 = vmatprep.subr.bf16.mxu0 %v1170_v18  ;;  %v1194_v17 = vunpack.c.h.s8.bf16 %v434_v4  ;;  %v1210_v18 = vunpack.c.h.s8.bf16 %v442_v6 }
 0x12f   : > { %7336 = vmatprep.subr.bf16.mxu1 %v1186_v19  ;;  %v1227_v19 = vunpack.c.l.s8.bf16 %v451_v12 }
 0x131   : > { %7315 = vmatpush3.bf16.msra.mxu0 %v1162_v26  ;;  %v2550_v26 = vcombine.high %v2528_v16, %v2528_v16 }
 0x132   : > { %7337 = vmatpush3.bf16.msra.mxu1 %v1178_v24  ;;  %7344 = vmatprep.subr.bf16.mxu0 %v1195_v27  ;;  %v1219_v24 = vunpack.c.l.s8.bf16 %v447_v20  ;;  %v1235_v27 = vunpack.c.l.s8.bf16 %v455_v22 }
 0x133   : > { %7366 = vmatprep.subr.bf16.mxu1 %v1211_v29  ;;  %v452_v29 = vld [vmem:[%s9427_s8 + $0x3a8] sm:$0xff] }
 0x134   : > { %3975 = vmatmul.mubr.bf16.vlgmr.msra.gmra.mrb[20].mxu0 %v2486_v25  ;;  %v2549_v25 = vrot.slane %v2521_v14, %v9458_v38 }
 0x135   : > { %4015 = vmatmul.mubr.bf16.vlgmr.msra.gmra.mrb[20].mxu1 %v2502_v33  ;;  %7345 = vmatpush3.bf16.msra.mxu0 %v1187_v34  ;;  %v1220_v33 = vunpack.c.h.s8.bf16 %v447_v20  ;;  %v1236_v34 = vunpack.c.h.s8.bf16 %v455_v22  ;;  %v2535_v20 = vrot.slane %v9628_v7, %v9458_v38  ;;  %v1242_v22 = vunpack.c.h.s8.bf16 %v458_v63 }
 0x136   : > { %7367 = vmatpush3.bf16.msra.mxu1 %v1203_v35  ;;  %7346 = vmatprep.subr.bf16.mxu0 %v1196_v23  ;;  %v1229_v35 = vunpack.c.l.s8.bf16 %v452_v29  ;;  %v448_v23 = vld [vmem:[%s9427_s8 + $0x388] sm:$0xff] }
 0x137   : > { %7368 = vmatprep.subr.bf16.mxu1 %v1212_v36  ;;  %4054 = vmatprep.mubr.bf16.mxu0 %v2542_v32  ;;  %v2553_v32 = vcombine.high %v2549_v25, %v2549_v25  ;;  %v1245_v36 = vunpack.c.l.s8.bf16 %v460_v30  ;;  %v1221_v39 = vunpack.c.l.s8.bf16 %v448_v23 }
 0x138   : > { %4094 = vmatprep.mubr.bf16.mxu1 %v2552_v42  ;;  %v1237_v42 = vunpack.c.l.s8.bf16 %v456_v37 }
 0x139   : > { %7347 = vmatpush3.bf16.msra.mxu0 %v1188_v43  ;;  %v1230_v43 = vunpack.c.h.s8.bf16 %v452_v29 }
 0x13a   : > { %7369 = vmatpush3.bf16.msra.mxu1 %v1204_v41  ;;  %7348 = vmatprep.subr.bf16.mxu0 %v1197_v44  ;;  %v1246_v41 = vunpack.c.h.s8.bf16 %v460_v30  ;;  %v453_v44 = vld [vmem:[%s9427_s8 + $0x3b0] sm:$0xff] }
 0x13b   : > { %7370 = vmatprep.subr.bf16.mxu1 %v1213_v45  ;;  %v1222_v45 = vunpack.c.h.s8.bf16 %v448_v23 }
 0x13d   : > { %7349 = vmatpush3.bf16.msra.mxu0 %v1189_v47  ;;  %v1231_v47 = vunpack.c.l.s8.bf16 %v453_v44 }
 0x13e   : > { %7371 = vmatpush3.bf16.msra.mxu1 %v1205_v49  ;;  %7350 = vmatprep.subr.bf16.mxu0 %v1198_v50  ;;  %v449_v49 = vld [vmem:[%s9427_s8 + $0x390] sm:$0xff]  ;;  %v1247_v50 = vunpack.c.l.s8.bf16 %v461_v31 }
 0x13f   : > { %7372 = vmatprep.subr.bf16.mxu1 %v1214_v51  ;;  %v457_v51 = vld [vmem:[%s9427_s8 + $0x3d0] sm:$0xff]  ;;  %v1223_v52 = vunpack.c.l.s8.bf16 %v449_v49  ;;  %v1224_v59 = vunpack.c.h.s8.bf16 %v449_v49 }
 0x140   : > { %v1239_v40 = vunpack.c.l.s8.bf16 %v457_v51 }
 0x141   : > { %7351 = vmatpush3.bf16.msra.mxu0 %v1190_v53  ;;  %v1232_v53 = vunpack.c.h.s8.bf16 %v453_v44 }
 0x142   : > { %7373 = vmatpush3.bf16.msra.mxu1 %v1206_v54  ;;  %7352 = vmatprep.subr.bf16.mxu0 %v1199_v55  ;;  %v1248_v54 = vunpack.c.h.s8.bf16 %v461_v31  ;;  %v454_v55 = vld [vmem:[%s9427_s8 + $0x3b8] sm:$0xff] }
 0x143   : > { %7374 = vmatprep.subr.bf16.mxu1 %v1215_v58  ;;  %v9650_v58 = vld [vmem:[%s9441_s25 + $0x20] sm:$0xff]  ;;  %v1234_v12 = vunpack.c.h.s8.bf16 %v454_v55 }
 0x145   : > { %7353 = vmatpush3.bf16.msra.mxu0 %v1191_v60  ;;  %v1240_v60 = vunpack.c.h.s8.bf16 %v457_v51 }
 0x146   : > { %7375 = vmatpush3.bf16.msra.mxu1 %v1207_v48  ;;  %7354 = vmatprep.subr.bf16.mxu0 %v1200_v61  ;;  %v1233_v48 = vunpack.c.l.s8.bf16 %v454_v55  ;;  %v450_v61 = vld [vmem:[%s9427_s8 + $0x398] sm:$0xff] }
 0x147   : > { %7376 = vmatprep.subr.bf16.mxu1 %v1216_v62  ;;  %v1249_v62 = vunpack.c.l.s8.bf16 %v462_v57 }
 0x149   : > { %7355 = vmatpush3.bf16.msra.mxu0 %v1192_v2  ;;  %v9656_v2 = vrot.slane %v9650_v58, %v9458_v38 }
 0x14a   : > { %7377 = vmatpush3.bf16.msra.mxu1 %v1208_v3  ;;  %7356 = vmatprep.subr.bf16.mxu0 %v1201_v56 }
 0x14b   : > { %7378 = vmatprep.subr.bf16.mxu1 %v1217_v5 }
 0x14d   : > { %7357 = vmatpush3.bf16.msra.mxu0 %v1193_v9  ;;  %v1225_v9 = vunpack.c.l.s8.bf16 %v450_v61 }
 0x14e   : > { %7379 = vmatpush3.bf16.msra.mxu1 %v1209_v10  ;;  %7358 = vmatprep.subr.bf16.mxu0 %v1202_v8  ;;  %v1241_v10 = vunpack.c.l.s8.bf16 %v458_v63 }
 0x14f   : > { %7380 = vmatprep.subr.bf16.mxu1 %v1218_v11 }
 0x151   : > { %7359 = vmatpush3.bf16.msra.mxu0 %v1194_v17  ;;  %v467_v17 = vld [vmem:[%s9427_s8 + $0x420] sm:$0xff] }
 0x152   : > { %7381 = vmatpush3.bf16.msra.mxu1 %v1210_v18  ;;  %7388 = vmatprep.subr.bf16.mxu0 %v1227_v19  ;;  %v475_v18 = vld [vmem:[%s9427_s8 + $0x460] sm:$0xff]  ;;  %v2569_v19 = vcombine.high %v9656_v2, %v9656_v2  ;;  %v1260_v7 = vunpack.c.h.s8.bf16 %v467_v17 }
 0x153   : > { %7410 = vmatprep.subr.bf16.mxu1 %v1243_v21  ;;  %v1226_v21 = vunpack.c.h.s8.bf16 %v450_v61  ;;  %v2554_v61 = vcombine.high %v9650_v58, %v9650_v58 }
 0x154   : > { %4055 = vmatmul.mubr.bf16.vlgmr.msra.gmra.mrb[24].mxu0 %v2528_v16 }
 0x155   : > { %4095 = vmatmul.mubr.bf16.vlgmr.msra.gmra.mrb[24].mxu1 %v2550_v26  ;;  %7389 = vmatpush3.bf16.msra.mxu0 %v1219_v24  ;;  %v463_v26 = vld [vmem:[%s9427_s8 + $0x400] sm:$0xff]  ;;  %v1275_v24 = vunpack.c.l.s8.bf16 %v475_v18 }
 0x156   : > { %7411 = vmatpush3.bf16.msra.mxu1 %v1235_v27  ;;  %7390 = vmatprep.subr.bf16.mxu0 %v1228_v15  ;;  %v471_v27 = vld [vmem:[%s9427_s8 + $0x440] sm:$0xff]  ;;  %v2591_v15 = vrot.slane %v2569_v19, %v9458_v38  ;;  %v1251_v29 = vunpack.c.l.s8.bf16 %v463_v26  ;;  %v1252_v23 = vunpack.c.h.s8.bf16 %v463_v26 }
 0x157   : > { %7412 = vmatprep.subr.bf16.mxu1 %v1244_v28  ;;  %4134 = vmatprep.mubr.bf16.mxu0 %v2549_v25  ;;  %v1259_v25 = vunpack.c.l.s8.bf16 %v467_v17  ;;  %v2551_v28 = vcombine.high %v2535_v20, %v2535_v20  ;;  %v1267_v30 = vunpack.c.l.s8.bf16 %v471_v27 }
 0x158   : > { %4174 = vmatprep.mubr.bf16.mxu1 %v2553_v32  ;;  %v1276_v32 = vunpack.c.h.s8.bf16 %v475_v18 }
 0x159   : > { %7391 = vmatpush3.bf16.msra.mxu0 %v1220_v33  ;;  %v468_v33 = vld [vmem:[%s9427_s8 + $0x428] sm:$0xff] }
 0x15a   : > { %7413 = vmatpush3.bf16.msra.mxu1 %v1236_v34  ;;  %7392 = vmatprep.subr.bf16.mxu0 %v1229_v35  ;;  %v476_v34 = vld [vmem:[%s9427_s8 + $0x468] sm:$0xff]  ;;  %v2601_v35 = vcombine.high %v2591_v15, %v2591_v15  ;;  %v1261_v37 = vunpack.c.l.s8.bf16 %v468_v33  ;;  %v1262_v31 = vunpack.c.h.s8.bf16 %v468_v33 }
 0x15b   : > { %7414 = vmatprep.subr.bf16.mxu1 %v1245_v36  ;;  %v1268_v36 = vunpack.c.h.s8.bf16 %v471_v27 }
 0x15d   : > { %7393 = vmatpush3.bf16.msra.mxu0 %v1221_v39  ;;  %v464_v39 = vld [vmem:[%s9427_s8 + $0x408] sm:$0xff] }
 0x15e   : > { %7415 = vmatpush3.bf16.msra.mxu1 %v1237_v42  ;;  %7394 = vmatprep.subr.bf16.mxu0 %v1230_v43  ;;  %v1277_v42 = vunpack.c.l.s8.bf16 %v476_v34  ;;  %v472_v43 = vld [vmem:[%s9427_s8 + $0x448] sm:$0xff]  ;;  %v1254_v49 = vunpack.c.h.s8.bf16 %v464_v39 }
 0x15f   : > { %7416 = vmatprep.subr.bf16.mxu1 %v1246_v41  ;;  %v1253_v41 = vunpack.c.l.s8.bf16 %v464_v39  ;;  %v1269_v44 = vunpack.c.l.s8.bf16 %v472_v43 }
 0x161   : > { %7395 = vmatpush3.bf16.msra.mxu0 %v1222_v45  ;;  %v1278_v45 = vunpack.c.h.s8.bf16 %v476_v34 }
 0x162   : > { %7417 = vmatpush3.bf16.msra.mxu1 %v1238_v46  ;;  %7396 = vmatprep.subr.bf16.mxu0 %v1231_v47  ;;  %v469_v46 = vld [vmem:[%s9427_s8 + $0x430] sm:$0xff] }
 0x163   : > { %7418 = vmatprep.subr.bf16.mxu1 %v1247_v50  ;;  %v477_v47 = vld [vmem:[%s9427_s8 + $0x470] sm:$0xff]  ;;  %v1270_v50 = vunpack.c.h.s8.bf16 %v472_v43  ;;  %v1263_v51 = vunpack.c.l.s8.bf16 %v469_v46  ;;  %v1264_v57 = vunpack.c.h.s8.bf16 %v469_v46 }
 0x165   : > { %7397 = vmatpush3.bf16.msra.mxu0 %v1223_v52  ;;  %v465_v52 = vld [vmem:[%s9427_s8 + $0x410] sm:$0xff] }
 0x166   : > { %7419 = vmatpush3.bf16.msra.mxu1 %v1239_v40  ;;  %7398 = vmatprep.subr.bf16.mxu0 %v1232_v53  ;;  %v1279_v40 = vunpack.c.l.s8.bf16 %v477_v47  ;;  %v473_v53 = vld [vmem:[%s9427_s8 + $0x450] sm:$0xff] }
 0x167   : > { %7420 = vmatprep.subr.bf16.mxu1 %v1248_v54  ;;  %v7096_v0 = vpop.f32.mrb[0].mxu0  ;;  %v1255_v54 = vunpack.c.l.s8.bf16 %v465_v52  ;;  %v1271_v55 = vunpack.c.l.s8.bf16 %v473_v53  ;;  %v1272_v63 = vunpack.c.h.s8.bf16 %v473_v53 }
 0x168   : > { %v7118_v1 = vpop.f32.mrb[0].mxu1  ;;  %v7097_v3 = vpop.f32.mrb[1].mxu0 }
 0x169   : > { %v7119_v56 = vpop.f32.mrb[1].mxu1  ;;  %v7098_v4 = vadd.f32 %v7097_v3, %v7096_v0  ;;  %v7099_v6 = vpop.f32.mrb[2].mxu0  ;;  %7399 = vmatpush3.bf16.msra.mxu0 %v1224_v59  ;;  %v1280_v59 = vunpack.c.h.s8.bf16 %v477_v47 }
 0x16a   : > { %v7120_v5 = vadd.f32 %v7119_v56, %v7118_v1  ;;  %7421 = vmatpush3.bf16.msra.mxu1 %v1240_v60  ;;  %v7121_v8 = vpop.f32.mrb[2].mxu1  ;;  %v7100_v11 = vpop.f32.mrb[3].mxu0  ;;  %7400 = vmatprep.subr.bf16.mxu0 %v1233_v48  ;;  %v470_v60 = vld [vmem:[%s9427_s8 + $0x438] sm:$0xff]  ;;  %v9684_v6 = vrot.slane %v2554_v61, %v9458_v38 }
 0x16b   : > { %7422 = vmatprep.subr.bf16.mxu1 %v1249_v62  ;;  %v7122_v14 = vpop.f32.mrb[3].mxu1  ;;  %v478_v48 = vld [vmem:[%s9427_s8 + $0x478] sm:$0xff]  ;;  %v1256_v62 = vunpack.c.h.s8.bf16 %v465_v52  ;;  %v1265_v0 = vunpack.c.l.s8.bf16 %v470_v60  ;;  %v1266_v18 = vunpack.c.h.s8.bf16 %v470_v60  ;;  %v493_v52 = vld [vmem:[%s9427_s8 + $0x4f0] sm:$0xff] }
 0x16c   : > { %v9658_v16 = vadd.f32 %v7120_v5, %v7098_v4  ;;  %v466_v1 = vld [vmem:[%s9427_s8 + $0x418] sm:$0xff]  ;;  %v1281_v3 = vunpack.c.l.s8.bf16 %v478_v48  ;;  %v1282_v19 = vunpack.c.h.s8.bf16 %v478_v48  ;;  %v2570_v26 = vcombine.high %v9684_v6, %v9684_v6 }
 0x16d   : > { %7401 = vmatpush3.bf16.msra.mxu0 %v1225_v9  ;;  %v474_v56 = vld [vmem:[%s9427_s8 + $0x458] sm:$0xff] }
 0x16e   : > { %7423 = vmatpush3.bf16.msra.mxu1 %v1241_v10  ;;  %7402 = vmatprep.subr.bf16.mxu0 %v1234_v12  ;;  %v1257_v12 = vunpack.c.l.s8.bf16 %v466_v1 }
 0x16f   : > { %7424 = vmatprep.subr.bf16.mxu1 %v1250_v13  ;;  %v1273_v13 = vunpack.c.l.s8.bf16 %v474_v56 }
 0x171   : > { %7403 = vmatpush3.bf16.msra.mxu0 %v1226_v21 }
 0x172   : > { %7425 = vmatpush3.bf16.msra.mxu1 %v1242_v22  ;;  %7432 = vmatprep.subr.bf16.mxu0 %v1259_v25  ;;  %v483_v22 = vld [vmem:[%s9427_s8 + $0x4a0] sm:$0xff] }
 0x173   : > { %7454 = vmatprep.subr.bf16.mxu1 %v1275_v24  ;;  %v491_v25 = vld [vmem:[%s9427_s8 + $0x4e0] sm:$0xff]  ;;  %v2577_v24 = vrot.slane %v9656_v2, %v9458_v38 }
 0x174   : > { %4135 = vmatmul.mubr.bf16.vlgmr.msra.gmra.mrb[28].mxu0 %v2535_v20 }
 0x175   : > { %4175 = vmatmul.mubr.bf16.vlgmr.msra.gmra.mrb[28].mxu1 %v2551_v28  ;;  %7433 = vmatpush3.bf16.msra.mxu0 %v1251_v29  ;;  %v1274_v28 = vunpack.c.h.s8.bf16 %v474_v56  ;;  %v1291_v29 = vunpack.c.l.s8.bf16 %v483_v22  ;;  %v2599_v33 = vcombine.high %v2577_v24, %v2577_v24 }
 0x176   : > { %7455 = vmatpush3.bf16.msra.mxu1 %v1267_v30  ;;  %7434 = vmatprep.subr.bf16.mxu0 %v1260_v7  ;;  %v1307_v30 = vunpack.c.l.s8.bf16 %v491_v25  ;;  %v487_v7 = vld [vmem:[%s9427_s8 + $0x4c0] sm:$0xff] }
 0x177   : > { %7456 = vmatprep.subr.bf16.mxu1 %v1276_v32  ;;  %4214 = vmatprep.mubr.bf16.mxu0 %v2591_v15  ;;  %v1258_v15 = vunpack.c.h.s8.bf16 %v466_v1  ;;  %v2598_v32 = vrot.slane %v2570_v26, %v9458_v38  ;;  %v1299_v34 = vunpack.c.l.s8.bf16 %v487_v7  ;;  %v1300_v43 = vunpack.c.h.s8.bf16 %v487_v7  ;;  %v9709_v1 = vld [vmem:[%s9441_s25 + $0x28] sm:$0xff] }
 0x178   : > { %4254 = vmatprep.mubr.bf16.mxu1 %v2601_v35  ;;  %v1292_v35 = vunpack.c.h.s8.bf16 %v483_v22 }
 0x179   : > { %7435 = vmatpush3.bf16.msra.mxu0 %v1252_v23  ;;  %v1308_v23 = vunpack.c.h.s8.bf16 %v491_v25  ;;  %v2602_v39 = vcombine.high %v2598_v32, %v2598_v32 }
 0x17a   : > { %7457 = vmatpush3.bf16.msra.mxu1 %v1268_v36  ;;  %7436 = vmatprep.subr.bf16.mxu0 %v1261_v37  ;;  %v484_v36 = vld [vmem:[%s9427_s8 + $0x4a8] sm:$0xff] }
 0x17b   : > { %7458 = vmatprep.subr.bf16.mxu1 %v1277_v42  ;;  %v492_v37 = vld [vmem:[%s9427_s8 + $0x4e8] sm:$0xff] }
 0x17d   : > { %7437 = vmatpush3.bf16.msra.mxu0 %v1253_v41  ;;  %v1293_v41 = vunpack.c.l.s8.bf16 %v484_v36 }
 0x17e   : > { %7459 = vmatpush3.bf16.msra.mxu1 %v1269_v44  ;;  %7438 = vmatprep.subr.bf16.mxu0 %v1262_v31  ;;  %v480_v44 = vld [vmem:[%s9427_s8 + $0x488] sm:$0xff]  ;;  %v1309_v31 = vunpack.c.l.s8.bf16 %v492_v37 }
 0x17f   : > { %7460 = vmatprep.subr.bf16.mxu1 %v1278_v45  ;;  %v488_v45 = vld [vmem:[%s9427_s8 + $0x4c8] sm:$0xff]  ;;  %v1285_v46 = vunpack.c.l.s8.bf16 %v480_v44 }
 0x180   : > { %v1301_v47 = vunpack.c.l.s8.bf16 %v488_v45  ;;  %v1302_v53 = vunpack.c.h.s8.bf16 %v488_v45 }
 0x181   : > { %7439 = vmatpush3.bf16.msra.mxu0 %v1254_v49  ;;  %v1294_v49 = vunpack.c.h.s8.bf16 %v484_v36 }
 0x182   : > { %7461 = vmatpush3.bf16.msra.mxu1 %v1270_v50  ;;  %7440 = vmatprep.subr.bf16.mxu0 %v1263_v51  ;;  %v1310_v50 = vunpack.c.h.s8.bf16 %v492_v37  ;;  %v485_v51 = vld [vmem:[%s9427_s8 + $0x4b0] sm:$0xff] }
 0x183   : > { %7462 = vmatprep.subr.bf16.mxu1 %v1279_v40  ;;  %v1286_v40 = vunpack.c.h.s8.bf16 %v480_v44  ;;  %v1296_v61 = vunpack.c.h.s8.bf16 %v485_v51 }
 0x185   : > { %7441 = vmatpush3.bf16.msra.mxu0 %v1255_v54  ;;  %v1295_v54 = vunpack.c.l.s8.bf16 %v485_v51 }
 0x186   : > { %7463 = vmatpush3.bf16.msra.mxu1 %v1271_v55  ;;  %7442 = vmatprep.subr.bf16.mxu0 %v1264_v57  ;;  %v481_v55 = vld [vmem:[%s9427_s8 + $0x490] sm:$0xff]  ;;  %v1311_v57 = vunpack.c.l.s8.bf16 %v493_v52 }
 0x187   : > { %7464 = vmatprep.subr.bf16.mxu1 %v1280_v59  ;;  %v7140_v4 = vpop.f32.mrb[4].mxu0  ;;  %v489_v59 = vld [vmem:[%s9427_s8 + $0x4d0] sm:$0xff]  ;;  %v1287_v60 = vunpack.c.l.s8.bf16 %v481_v55 }
 0x188   : > { %v7162_v5 = vpop.f32.mrb[4].mxu1  ;;  %v7141_v9 = vpop.f32.mrb[5].mxu0  ;;  %v1303_v48 = vunpack.c.l.s8.bf16 %v489_v59  ;;  %v1304_v56 = vunpack.c.h.s8.bf16 %v489_v59 }
 0x189   : > { %v7163_v10 = vpop.f32.mrb[5].mxu1  ;;  %v7142_v8 = vadd.f32 %v7141_v9, %v7140_v4  ;;  %v7143_v58 = vpop.f32.mrb[6].mxu0  ;;  %7443 = vmatpush3.bf16.msra.mxu0 %v1256_v62  ;;  %v1312_v62 = vunpack.c.h.s8.bf16 %v493_v52 }
 0x18a   : > { %v7164_v11 = vadd.f32 %v7163_v10, %v7162_v5  ;;  %7465 = vmatpush3.bf16.msra.mxu1 %v1272_v63  ;;  %v7165_v14 = vpop.f32.mrb[6].mxu1  ;;  %v7144_v17 = vpop.f32.mrb[7].mxu0  ;;  %7444 = vmatprep.subr.bf16.mxu0 %v1265_v0  ;;  %v486_v63 = vld [vmem:[%s9427_s8 + $0x4b8] sm:$0xff] }
 0x18b   : > { %7466 = vmatprep.subr.bf16.mxu1 %v1281_v3  ;;  %v7166_v20 = vpop.f32.mrb[7].mxu1  ;;  %v3657_v21 = vadd.f32 %v7142_v8, %v9658_v16  ;;  %v479_v16 = vld [vmem:[%s9427_s8 + $0x480] sm:$0xff]  ;;  %v494_v0 = vld [vmem:[%s9427_s8 + $0x4f8] sm:$0xff]  ;;  %v1288_v3 = vunpack.c.h.s8.bf16 %v481_v55  ;;  %v1297_v4 = vunpack.c.l.s8.bf16 %v486_v63  ;;  %v1298_v25 = vunpack.c.h.s8.bf16 %v486_v63  ;;  %v509_v55 = vld [vmem:[%s9427_s8 + $0x570] sm:$0xff] }
 0x18c   : > { %v1283_v2 = vunpack.c.l.s8.bf16 %v479_v16  ;;  %v1284_v42 = vunpack.c.h.s8.bf16 %v479_v16  ;;  %v482_v5 = vld [vmem:[%s9427_s8 + $0x498] sm:$0xff]  ;;  %v1313_v9 = vunpack.c.l.s8.bf16 %v494_v0  ;;  %v1314_v26 = vunpack.c.h.s8.bf16 %v494_v0 }
 0x18d   : > { %v9693_v27 = vadd.f32 %v7164_v11, %v3657_v21  ;;  %7445 = vmatpush3.bf16.msra.mxu0 %v1257_v12  ;;  %v490_v10 = vld [vmem:[%s9427_s8 + $0x4d8] sm:$0xff]  ;;  %v9715_v11 = vrot.slane %v9709_v1, %v9458_v38 }
 0x18e   : > { %7467 = vmatpush3.bf16.msra.mxu1 %v1273_v13  ;;  %7446 = vmatprep.subr.bf16.mxu0 %v1266_v18  ;;  %v1305_v20 = vunpack.c.l.s8.bf16 %v490_v10 }
 0x18f   : > { %7468 = vmatprep.subr.bf16.mxu1 %v1282_v19  ;;  %v1289_v19 = vunpack.c.l.s8.bf16 %v482_v5  ;;  %v2618_v16 = vcombine.high %v9715_v11, %v9715_v11 }
 0x191   : > { %7447 = vmatpush3.bf16.msra.mxu0 %v1258_v15 }
 0x192   : > { %7469 = vmatpush3.bf16.msra.mxu1 %v1274_v28  ;;  %7476 = vmatprep.subr.bf16.mxu0 %v1291_v29  ;;  %v499_v28 = vld [vmem:[%s9427_s8 + $0x520] sm:$0xff] }
 0x193   : > { %7498 = vmatprep.subr.bf16.mxu1 %v1307_v30  ;;  %v507_v29 = vld [vmem:[%s9427_s8 + $0x560] sm:$0xff]  ;;  %v2584_v30 = vrot.slane %v9684_v6, %v9458_v38 }
 0x194   : > { %4215 = vmatmul.mubr.bf16.vlgmr.msra.gmra.mrb[32].mxu0 %v2577_v24 }
 0x195   : > { %4255 = vmatmul.mubr.bf16.vlgmr.msra.gmra.mrb[32].mxu1 %v2599_v33  ;;  %7477 = vmatpush3.bf16.msra.mxu0 %v1283_v2  ;;  %v1306_v33 = vunpack.c.h.s8.bf16 %v490_v10  ;;  %v1323_v2 = vunpack.c.l.s8.bf16 %v499_v28  ;;  %v2600_v36 = vcombine.high %v2584_v30, %v2584_v30 }
 0x196   : > { %7499 = vmatpush3.bf16.msra.mxu1 %v1299_v34  ;;  %7478 = vmatprep.subr.bf16.mxu0 %v1292_v35  ;;  %v1339_v34 = vunpack.c.l.s8.bf16 %v507_v29  ;;  %v503_v35 = vld [vmem:[%s9427_s8 + $0x540] sm:$0xff] }
 0x197   : > { %7500 = vmatprep.subr.bf16.mxu1 %v1308_v23  ;;  %4294 = vmatprep.mubr.bf16.mxu0 %v2598_v32  ;;  %v1290_v32 = vunpack.c.h.s8.bf16 %v482_v5  ;;  %v2640_v23 = vrot.slane %v2618_v16, %v9458_v38  ;;  %v1331_v37 = vunpack.c.l.s8.bf16 %v503_v35  ;;  %v1332_v45 = vunpack.c.h.s8.bf16 %v503_v35  ;;  %v510_v5 = vld [vmem:[%s9427_s8 + $0x578] sm:$0xff] }
 0x198   : > { %4334 = vmatprep.mubr.bf16.mxu1 %v2602_v39  ;;  %v1324_v39 = vunpack.c.h.s8.bf16 %v499_v28  ;;  %v1346_v16 = vunpack.c.h.s8.bf16 %v510_v5 }
 0x199   : > { %7479 = vmatpush3.bf16.msra.mxu0 %v1284_v42  ;;  %v1340_v42 = vunpack.c.h.s8.bf16 %v507_v29  ;;  %v2650_v44 = vcombine.high %v2640_v23, %v2640_v23 }
 0x19a   : > { %7501 = vmatpush3.bf16.msra.mxu1 %v1300_v43  ;;  %7480 = vmatprep.subr.bf16.mxu0 %v1293_v41  ;;  %v500_v43 = vld [vmem:[%s9427_s8 + $0x528] sm:$0xff] }
 0x19b   : > { %7502 = vmatprep.subr.bf16.mxu1 %v1309_v31  ;;  %v508_v41 = vld [vmem:[%s9427_s8 + $0x568] sm:$0xff] }
 0x19d   : > { %7481 = vmatpush3.bf16.msra.mxu0 %v1285_v46  ;;  %v1325_v46 = vunpack.c.l.s8.bf16 %v500_v43 }
 0x19e   : > { %7503 = vmatpush3.bf16.msra.mxu1 %v1301_v47  ;;  %7482 = vmatprep.subr.bf16.mxu0 %v1294_v49  ;;  %v496_v47 = vld [vmem:[%s9427_s8 + $0x508] sm:$0xff]  ;;  %v1341_v49 = vunpack.c.l.s8.bf16 %v508_v41 }
 0x19f   : > { %7504 = vmatprep.subr.bf16.mxu1 %v1310_v50  ;;  %v504_v50 = vld [vmem:[%s9427_s8 + $0x548] sm:$0xff]  ;;  %v1317_v51 = vunpack.c.l.s8.bf16 %v496_v47 }
 0x1a0   : > { %v1333_v52 = vunpack.c.l.s8.bf16 %v504_v50  ;;  %v1334_v59 = vunpack.c.h.s8.bf16 %v504_v50 }
 0x1a1   : > { %7483 = vmatpush3.bf16.msra.mxu0 %v1286_v40  ;;  %v1326_v40 = vunpack.c.h.s8.bf16 %v500_v43 }
 0x1a2   : > { %7505 = vmatpush3.bf16.msra.mxu1 %v1302_v53  ;;  %7484 = vmatprep.subr.bf16.mxu0 %v1295_v54  ;;  %v1342_v53 = vunpack.c.h.s8.bf16 %v508_v41  ;;  %v501_v54 = vld [vmem:[%s9427_s8 + $0x530] sm:$0xff] }
 0x1a3   : > { %7506 = vmatprep.subr.bf16.mxu1 %v1311_v57  ;;  %v1318_v57 = vunpack.c.h.s8.bf16 %v496_v47 }
 0x1a5   : > { %7485 = vmatpush3.bf16.msra.mxu0 %v1287_v60  ;;  %v1327_v60 = vunpack.c.l.s8.bf16 %v501_v54 }
 0x1a6   : > { %7507 = vmatpush3.bf16.msra.mxu1 %v1303_v48  ;;  %7486 = vmatprep.subr.bf16.mxu0 %v1296_v61  ;;  %v497_v48 = vld [vmem:[%s9427_s8 + $0x510] sm:$0xff]  ;;  %v1343_v61 = vunpack.c.l.s8.bf16 %v509_v55 }
 0x1a7   : > { %7508 = vmatprep.subr.bf16.mxu1 %v1312_v62  ;;  %v7184_v8 = vpop.f32.mrb[8].mxu0  ;;  %v505_v62 = vld [vmem:[%s9427_s8 + $0x550] sm:$0xff]  ;;  %v1319_v63 = vunpack.c.l.s8.bf16 %v497_v48  ;;  %v1320_v10 = vunpack.c.h.s8.bf16 %v497_v48 }
 0x1a8   : > { %v7206_v58 = vpop.f32.mrb[8].mxu1  ;;  %v7185_v12 = vpop.f32.mrb[9].mxu0  ;;  %v1335_v0 = vunpack.c.l.s8.bf16 %v505_v62  ;;  %v525_v48 = vld [vmem:[%s9427_s8 + $0x5f0] sm:$0xff] }
 0x1a9   : > { %v7207_v13 = vpop.f32.mrb[9].mxu1  ;;  %v7186_v14 = vadd.f32 %v7185_v12, %v7184_v8  ;;  %v7187_v17 = vpop.f32.mrb[10].mxu0  ;;  %7487 = vmatpush3.bf16.msra.mxu0 %v1288_v3  ;;  %v1328_v3 = vunpack.c.h.s8.bf16 %v501_v54  ;;  %v1336_v8 = vunpack.c.h.s8.bf16 %v505_v62  ;;  %v498_v12 = vld [vmem:[%s9427_s8 + $0x518] sm:$0xff] }
 0x1aa   : > { %v7208_v18 = vadd.f32 %v7207_v13, %v7206_v58  ;;  %7509 = vmatpush3.bf16.msra.mxu1 %v1304_v56  ;;  %v7209_v21 = vpop.f32.mrb[10].mxu1  ;;  %v7188_v22 = vpop.f32.mrb[11].mxu0  ;;  %7488 = vmatprep.subr.bf16.mxu0 %v1297_v4  ;;  %v1344_v56 = vunpack.c.h.s8.bf16 %v509_v55  ;;  %v502_v4 = vld [vmem:[%s9427_s8 + $0x538] sm:$0xff]  ;;  %v1345_v13 = vunpack.c.l.s8.bf16 %v510_v5 }
 0x1ab   : > { %7510 = vmatprep.subr.bf16.mxu1 %v1313_v9  ;;  %v7210_v24 = vpop.f32.mrb[11].mxu1  ;;  %v3737_v15 = vadd.f32 %v7186_v14, %v9693_v27  ;;  %v495_v27 = vld [vmem:[%s9427_s8 + $0x500] sm:$0xff]  ;;  %v2603_v9 = vcombine.high %v9709_v1, %v9709_v1  ;;  %v1329_v58 = vunpack.c.l.s8.bf16 %v502_v4  ;;  %v506_v14 = vld [vmem:[%s9427_s8 + $0x558] sm:$0xff]  ;;  %v1330_v29 = vunpack.c.h.s8.bf16 %v502_v4 }
 0x1ac   : > { %v1315_v6 = vunpack.c.l.s8.bf16 %v495_v27  ;;  %v1316_v31 = vunpack.c.h.s8.bf16 %v495_v27  ;;  %v1337_v24 = vunpack.c.l.s8.bf16 %v506_v14 }
 0x1ad   : > { %v9724_v7 = vadd.f32 %v7208_v18, %v3737_v15  ;;  %7489 = vmatpush3.bf16.msra.mxu0 %v1289_v19  ;;  %v9744_v19 = vrot.slane %v2603_v9, %v9458_v38 }
 0x1ae   : > { %7511 = vmatpush3.bf16.msra.mxu1 %v1305_v20  ;;  %7490 = vmatprep.subr.bf16.mxu0 %v1298_v25 }
 0x1af   : > { %7512 = vmatprep.subr.bf16.mxu1 %v1314_v26  ;;  %v1321_v26 = vunpack.c.l.s8.bf16 %v498_v12  ;;  %v2619_v27 = vcombine.high %v9744_v19, %v9744_v19 }
 0x1b1   : > { %7491 = vmatpush3.bf16.msra.mxu0 %v1290_v32 }
 0x1b2   : > { %7513 = vmatpush3.bf16.msra.mxu1 %v1306_v33  ;;  %7520 = vmatprep.subr.bf16.mxu0 %v1323_v2  ;;  %v515_v33 = vld [vmem:[%s9427_s8 + $0x5a0] sm:$0xff] }
 0x1b3   : > { %7542 = vmatprep.subr.bf16.mxu1 %v1339_v34  ;;  %v523_v2 = vld [vmem:[%s9427_s8 + $0x5e0] sm:$0xff]  ;;  %v2626_v34 = vrot.slane %v9715_v11, %v9458_v38 }
 0x1b4   : > { %4295 = vmatmul.mubr.bf16.vlgmr.msra.gmra.mrb[36].mxu0 %v2584_v30 }
 0x1b5   : > { %4335 = vmatmul.mubr.bf16.vlgmr.msra.gmra.mrb[36].mxu1 %v2600_v36  ;;  %7521 = vmatpush3.bf16.msra.mxu0 %v1315_v6  ;;  %v1338_v36 = vunpack.c.h.s8.bf16 %v506_v14  ;;  %v1355_v6 = vunpack.c.l.s8.bf16 %v515_v33  ;;  %v2648_v43 = vcombine.high %v2626_v34, %v2626_v34 }
 0x1b6   : > { %7543 = vmatpush3.bf16.msra.mxu1 %v1331_v37  ;;  %7522 = vmatprep.subr.bf16.mxu0 %v1324_v39  ;;  %v1371_v37 = vunpack.c.l.s8.bf16 %v523_v2  ;;  %v519_v39 = vld [vmem:[%s9427_s8 + $0x5c0] sm:$0xff] }
 0x1b7   : > { %7544 = vmatprep.subr.bf16.mxu1 %v1340_v42  ;;  %4374 = vmatprep.mubr.bf16.mxu0 %v2640_v23  ;;  %v1322_v23 = vunpack.c.h.s8.bf16 %v498_v12  ;;  %v2647_v42 = vrot.slane %v2619_v27, %v9458_v38  ;;  %v1363_v41 = vunpack.c.l.s8.bf16 %v519_v39  ;;  %v1364_v50 = vunpack.c.h.s8.bf16 %v519_v39  ;;  %v9769_v12 = vld [vmem:[%s9441_s25 + $0x30] sm:$0xff] }
 0x1b8   : > { %4414 = vmatprep.mubr.bf16.mxu1 %v2650_v44  ;;  %v1356_v44 = vunpack.c.h.s8.bf16 %v515_v33 }
 0x1b9   : > { %7523 = vmatpush3.bf16.msra.mxu0 %v1316_v31  ;;  %v1372_v31 = vunpack.c.h.s8.bf16 %v523_v2  ;;  %v2651_v47 = vcombine.high %v2647_v42, %v2647_v42 }
 0x1ba   : > { %7545 = vmatpush3.bf16.msra.mxu1 %v1332_v45  ;;  %7524 = vmatprep.subr.bf16.mxu0 %v1325_v46  ;;  %v516_v45 = vld [vmem:[%s9427_s8 + $0x5a8] sm:$0xff] }
 0x1bb   : > { %7546 = vmatprep.subr.bf16.mxu1 %v1341_v49  ;;  %v524_v46 = vld [vmem:[%s9427_s8 + $0x5e8] sm:$0xff] }
 0x1bd   : > { %7525 = vmatpush3.bf16.msra.mxu0 %v1317_v51  ;;  %v1357_v51 = vunpack.c.l.s8.bf16 %v516_v45 }
 0x1be   : > { %7547 = vmatpush3.bf16.msra.mxu1 %v1333_v52  ;;  %7526 = vmatprep.subr.bf16.mxu0 %v1326_v40  ;;  %v512_v52 = vld [vmem:[%s9427_s8 + $0x588] sm:$0xff]  ;;  %v1373_v40 = vunpack.c.l.s8.bf16 %v524_v46 }
 0x1bf   : > { %7548 = vmatprep.subr.bf16.mxu1 %v1342_v53  ;;  %v520_v53 = vld [vmem:[%s9427_s8 + $0x5c8] sm:$0xff]  ;;  %v1349_v54 = vunpack.c.l.s8.bf16 %v512_v52 }
 0x1c0   : > { %v1365_v55 = vunpack.c.l.s8.bf16 %v520_v53  ;;  %v1366_v62 = vunpack.c.h.s8.bf16 %v520_v53 }
 0x1c1   : > { %7527 = vmatpush3.bf16.msra.mxu0 %v1318_v57  ;;  %v1358_v57 = vunpack.c.h.s8.bf16 %v516_v45 }
 0x1c2   : > { %7549 = vmatpush3.bf16.msra.mxu1 %v1334_v59  ;;  %7528 = vmatprep.subr.bf16.mxu0 %v1327_v60  ;;  %v1374_v59 = vunpack.c.h.s8.bf16 %v524_v46  ;;  %v517_v60 = vld [vmem:[%s9427_s8 + $0x5b0] sm:$0xff] }
 0x1c3   : > { %7550 = vmatprep.subr.bf16.mxu1 %v1343_v61  ;;  %v1350_v61 = vunpack.c.h.s8.bf16 %v512_v52  ;;  %v1360_v9 = vunpack.c.h.s8.bf16 %v517_v60 }
 0x1c5   : > { %7529 = vmatpush3.bf16.msra.mxu0 %v1319_v63  ;;  %v1359_v63 = vunpack.c.l.s8.bf16 %v517_v60 }
 0x1c6   : > { %7551 = vmatpush3.bf16.msra.mxu1 %v1335_v0  ;;  %7530 = vmatprep.subr.bf16.mxu0 %v1328_v3  ;;  %v513_v0 = vld [vmem:[%s9427_s8 + $0x590] sm:$0xff]  ;;  %v1375_v3 = vunpack.c.l.s8.bf16 %v525_v48 }
 0x1c7   : > { %7552 = vmatprep.subr.bf16.mxu1 %v1344_v56  ;;  %v7228_v17 = vpop.f32.mrb[12].mxu0  ;;  %v521_v56 = vld [vmem:[%s9427_s8 + $0x5d0] sm:$0xff]  ;;  %v1351_v4 = vunpack.c.l.s8.bf16 %v513_v0 }
 0x1c8   : > { %v7250_v18 = vpop.f32.mrb[12].mxu1  ;;  %v7229_v20 = vpop.f32.mrb[13].mxu0  ;;  %v1367_v5 = vunpack.c.l.s8.bf16 %v521_v56  ;;  %v1368_v14 = vunpack.c.h.s8.bf16 %v521_v56 }
 0x1c9   : > { %v7251_v21 = vpop.f32.mrb[13].mxu1  ;;  %v7230_v22 = vadd.f32 %v7229_v20, %v7228_v17  ;;  %v7231_v1 = vpop.f32.mrb[14].mxu0  ;;  %7531 = vmatpush3.bf16.msra.mxu0 %v1320_v10  ;;  %v1376_v10 = vunpack.c.h.s8.bf16 %v525_v48 }
 0x1ca   : > { %v7252_v25 = vadd.f32 %v7251_v21, %v7250_v18  ;;  %7553 = vmatpush3.bf16.msra.mxu1 %v1336_v8  ;;  %v7253_v15 = vpop.f32.mrb[14].mxu1  ;;  %v7232_v28 = vpop.f32.mrb[15].mxu0  ;;  %7532 = vmatprep.subr.bf16.mxu0 %v1329_v58  ;;  %v518_v8 = vld [vmem:[%s9427_s8 + $0x5b8] sm:$0xff] }
 0x1cb   : > { %7554 = vmatprep.subr.bf16.mxu1 %v1345_v13  ;;  %v7254_v30 = vpop.f32.mrb[15].mxu1  ;;  %v3817_v32 = vadd.f32 %v7230_v22, %v9724_v7  ;;  %v511_v7 = vld [vmem:[%s9427_s8 + $0x580] sm:$0xff]  ;;  %v526_v58 = vld [vmem:[%s9427_s8 + $0x5f8] sm:$0xff]  ;;  %v1352_v13 = vunpack.c.h.s8.bf16 %v513_v0  ;;  %v1361_v17 = vunpack.c.l.s8.bf16 %v518_v8  ;;  %v1362_v2 = vunpack.c.h.s8.bf16 %v518_v8  ;;  %v541_v0 = vld [vmem:[%s9427_s8 + $0x670] sm:$0xff] }
 0x1cc   : > { %v1347_v11 = vunpack.c.l.s8.bf16 %v511_v7  ;;  %v1348_v49 = vunpack.c.h.s8.bf16 %v511_v7  ;;  %v514_v18 = vld [vmem:[%s9427_s8 + $0x598] sm:$0xff]  ;;  %v1377_v20 = vunpack.c.l.s8.bf16 %v526_v58  ;;  %v1378_v27 = vunpack.c.h.s8.bf16 %v526_v58 }
 0x1cd   : > { %v9753_v35 = vadd.f32 %v7252_v25, %v3817_v32  ;;  %7533 = vmatpush3.bf16.msra.mxu0 %v1321_v26  ;;  %v522_v21 = vld [vmem:[%s9427_s8 + $0x5d8] sm:$0xff]  ;;  %v9775_v25 = vrot.slane %v9769_v12, %v9458_v38 }
 0x1ce   : > { %7555 = vmatpush3.bf16.msra.mxu1 %v1337_v24  ;;  %7534 = vmatprep.subr.bf16.mxu0 %v1330_v29  ;;  %v1369_v30 = vunpack.c.l.s8.bf16 %v522_v21 }
 0x1cf   : > { %7556 = vmatprep.subr.bf16.mxu1 %v1346_v16  ;;  %v1353_v16 = vunpack.c.l.s8.bf16 %v514_v18  ;;  %v2667_v7 = vcombine.high %v9775_v25, %v9775_v25 }
 0x1d1   : > { %7535 = vmatpush3.bf16.msra.mxu0 %v1322_v23 }
 0x1d2   : > { %7557 = vmatpush3.bf16.msra.mxu1 %v1338_v36  ;;  %7564 = vmatprep.subr.bf16.mxu0 %v1355_v6  ;;  %v531_v36 = vld [vmem:[%s9427_s8 + $0x620] sm:$0xff] }
 0x1d3   : > { %7586 = vmatprep.subr.bf16.mxu1 %v1371_v37  ;;  %v539_v6 = vld [vmem:[%s9427_s8 + $0x660] sm:$0xff]  ;;  %v2633_v37 = vrot.slane %v9744_v19, %v9458_v38 }
 0x1d4   : > { %4375 = vmatmul.mubr.bf16.vlgmr.msra.gmra.mrb[40].mxu0 %v2626_v34 }
 0x1d5   : > { %4415 = vmatmul.mubr.bf16.vlgmr.msra.gmra.mrb[40].mxu1 %v2648_v43  ;;  %7565 = vmatpush3.bf16.msra.mxu0 %v1347_v11  ;;  %v1370_v43 = vunpack.c.h.s8.bf16 %v522_v21  ;;  %v1387_v11 = vunpack.c.l.s8.bf16 %v531_v36  ;;  %v2649_v45 = vcombine.high %v2633_v37, %v2633_v37 }
 0x1d6   : > { %7587 = vmatpush3.bf16.msra.mxu1 %v1363_v41  ;;  %7566 = vmatprep.subr.bf16.mxu0 %v1356_v44  ;;  %v1403_v41 = vunpack.c.l.s8.bf16 %v539_v6  ;;  %v535_v44 = vld [vmem:[%s9427_s8 + $0x640] sm:$0xff] }
 0x1d7   : > { %7588 = vmatprep.subr.bf16.mxu1 %v1372_v31  ;;  %4454 = vmatprep.mubr.bf16.mxu0 %v2647_v42  ;;  %v1354_v42 = vunpack.c.h.s8.bf16 %v514_v18  ;;  %v2689_v31 = vrot.slane %v2667_v7, %v9458_v38  ;;  %v1395_v46 = vunpack.c.l.s8.bf16 %v535_v44  ;;  %v1396_v53 = vunpack.c.h.s8.bf16 %v535_v44  ;;  %v542_v18 = vld [vmem:[%s9427_s8 + $0x678] sm:$0xff] }
 0x1d8   : > { %4494 = vmatprep.mubr.bf16.mxu1 %v2651_v47  ;;  %v1388_v47 = vunpack.c.h.s8.bf16 %v531_v36  ;;  %v1410_v7 = vunpack.c.h.s8.bf16 %v542_v18 }
 0x1d9   : > { %7567 = vmatpush3.bf16.msra.mxu0 %v1348_v49  ;;  %v1404_v49 = vunpack.c.h.s8.bf16 %v539_v6  ;;  %v2699_v52 = vcombine.high %v2689_v31, %v2689_v31 }
 0x1da   : > { %7589 = vmatpush3.bf16.msra.mxu1 %v1364_v50  ;;  %7568 = vmatprep.subr.bf16.mxu0 %v1357_v51  ;;  %v532_v50 = vld [vmem:[%s9427_s8 + $0x628] sm:$0xff] }
 0x1db   : > { %7590 = vmatprep.subr.bf16.mxu1 %v1373_v40  ;;  %v540_v51 = vld [vmem:[%s9427_s8 + $0x668] sm:$0xff] }
 0x1dd   : > { %7569 = vmatpush3.bf16.msra.mxu0 %v1349_v54  ;;  %v1389_v54 = vunpack.c.l.s8.bf16 %v532_v50 }
 0x1de   : > { %7591 = vmatpush3.bf16.msra.mxu1 %v1365_v55  ;;  %7570 = vmatprep.subr.bf16.mxu0 %v1358_v57  ;;  %v528_v55 = vld [vmem:[%s9427_s8 + $0x608] sm:$0xff]  ;;  %v1405_v57 = vunpack.c.l.s8.bf16 %v540_v51 }
 0x1df   : > { %7592 = vmatprep.subr.bf16.mxu1 %v1374_v59  ;;  %v536_v59 = vld [vmem:[%s9427_s8 + $0x648] sm:$0xff]  ;;  %v1381_v60 = vunpack.c.l.s8.bf16 %v528_v55 }
 0x1e0   : > { %v1397_v48 = vunpack.c.l.s8.bf16 %v536_v59  ;;  %v1398_v56 = vunpack.c.h.s8.bf16 %v536_v59 }
 0x1e1   : > { %7571 = vmatpush3.bf16.msra.mxu0 %v1350_v61  ;;  %v1390_v61 = vunpack.c.h.s8.bf16 %v532_v50 }
 0x1e2   : > { %7593 = vmatpush3.bf16.msra.mxu1 %v1366_v62  ;;  %7572 = vmatprep.subr.bf16.mxu0 %v1359_v63  ;;  %v1406_v62 = vunpack.c.h.s8.bf16 %v540_v51  ;;  %v533_v63 = vld [vmem:[%s9427_s8 + $0x630] sm:$0xff] }
 0x1e3   : > { %7594 = vmatprep.subr.bf16.mxu1 %v1375_v3  ;;  %v1382_v3 = vunpack.c.h.s8.bf16 %v528_v55 }
 0x1e5   : > { %7573 = vmatpush3.bf16.msra.mxu0 %v1351_v4  ;;  %v1391_v4 = vunpack.c.l.s8.bf16 %v533_v63 }
 0x1e6   : > { %7595 = vmatpush3.bf16.msra.mxu1 %v1367_v5  ;;  %7574 = vmatprep.subr.bf16.mxu0 %v1360_v9  ;;  %v529_v5 = vld [vmem:[%s9427_s8 + $0x610] sm:$0xff]  ;;  %v1407_v9 = vunpack.c.l.s8.bf16 %v541_v0 }
 0x1e7   : > { %7596 = vmatprep.subr.bf16.mxu1 %v1376_v10  ;;  %v7272_v22 = vpop.f32.mrb[16].mxu0  ;;  %v537_v10 = vld [vmem:[%s9427_s8 + $0x650] sm:$0xff]  ;;  %v1383_v8 = vunpack.c.l.s8.bf16 %v529_v5  ;;  %v1384_v21 = vunpack.c.h.s8.bf16 %v529_v5 }
 0x1e8   : > { %v7294_v1 = vpop.f32.mrb[16].mxu1  ;;  %v7273_v26 = vpop.f32.mrb[17].mxu0  ;;  %v1399_v58 = vunpack.c.l.s8.bf16 %v537_v10  ;;  %v557_v5 = vld [vmem:[%s9427_s8 + $0x6f0] sm:$0xff] }
 0x1e9   : > { %v7295_v24 = vpop.f32.mrb[17].mxu1  ;;  %v7274_v15 = vadd.f32 %v7273_v26, %v7272_v22  ;;  %v7275_v28 = vpop.f32.mrb[18].mxu0  ;;  %7575 = vmatpush3.bf16.msra.mxu0 %v1352_v13  ;;  %v1392_v13 = vunpack.c.h.s8.bf16 %v533_v63  ;;  %v1400_v22 = vunpack.c.h.s8.bf16 %v537_v10  ;;  %v530_v26 = vld [vmem:[%s9427_s8 + $0x618] sm:$0xff] }
 0x1ea   : > { %v7296_v29 = vadd.f32 %v7295_v24, %v7294_v1  ;;  %7597 = vmatpush3.bf16.msra.mxu1 %v1368_v14  ;;  %v7297_v32 = vpop.f32.mrb[18].mxu1  ;;  %v7276_v33 = vpop.f32.mrb[19].mxu0  ;;  %7576 = vmatprep.subr.bf16.mxu0 %v1361_v17  ;;  %v1408_v14 = vunpack.c.h.s8.bf16 %v541_v0  ;;  %v534_v17 = vld [vmem:[%s9427_s8 + $0x638] sm:$0xff]  ;;  %v1409_v24 = vunpack.c.l.s8.bf16 %v542_v18 }
 0x1eb   : > { %7598 = vmatprep.subr.bf16.mxu1 %v1377_v20  ;;  %v7298_v34 = vpop.f32.mrb[19].mxu1  ;;  %v3897_v23 = vadd.f32 %v7274_v15, %v9753_v35  ;;  %v527_v35 = vld [vmem:[%s9427_s8 + $0x600] sm:$0xff]  ;;  %v2652_v20 = vcombine.high %v9769_v12, %v9769_v12  ;;  %v1393_v1 = vunpack.c.l.s8.bf16 %v534_v17  ;;  %v538_v15 = vld [vmem:[%s9427_s8 + $0x658] sm:$0xff]  ;;  %v1394_v6 = vunpack.c.h.s8.bf16 %v534_v17 }
 0x1ec   : > { %v1379_v19 = vunpack.c.l.s8.bf16 %v527_v35  ;;  %v1380_v40 = vunpack.c.h.s8.bf16 %v527_v35  ;;  %v1401_v34 = vunpack.c.l.s8.bf16 %v538_v15 }
 0x1ed   : > { %v9784_v39 = vadd.f32 %v7296_v29, %v3897_v23  ;;  %7577 = vmatpush3.bf16.msra.mxu0 %v1353_v16  ;;  %v9804_v16 = vrot.slane %v2652_v20, %v9458_v38 }
 0x1ee   : > { %7599 = vmatpush3.bf16.msra.mxu1 %v1369_v30  ;;  %7578 = vmatprep.subr.bf16.mxu0 %v1362_v2 }
 0x1ef   : > { %7600 = vmatprep.subr.bf16.mxu1 %v1378_v27  ;;  %v1385_v27 = vunpack.c.l.s8.bf16 %v530_v26  ;;  %v2668_v35 = vcombine.high %v9804_v16, %v9804_v16 }
 0x1f1   : > { %7579 = vmatpush3.bf16.msra.mxu0 %v1354_v42 }
 0x1f2   : > { %7601 = vmatpush3.bf16.msra.mxu1 %v1370_v43  ;;  %7608 = vmatprep.subr.bf16.mxu0 %v1387_v11  ;;  %v547_v43 = vld [vmem:[%s9427_s8 + $0x6a0] sm:$0xff] }
 0x1f3   : > { %7630 = vmatprep.subr.bf16.mxu1 %v1403_v41  ;;  %v555_v11 = vld [vmem:[%s9427_s8 + $0x6e0] sm:$0xff]  ;;  %v2675_v41 = vrot.slane %v9775_v25, %v9458_v38 }
 0x1f4   : > { %4455 = vmatmul.mubr.bf16.vlgmr.msra.gmra.mrb[44].mxu0 %v2633_v37 }
 0x1f5   : > { %4495 = vmatmul.mubr.bf16.vlgmr.msra.gmra.mrb[44].mxu1 %v2649_v45  ;;  %7609 = vmatpush3.bf16.msra.mxu0 %v1379_v19  ;;  %v1402_v45 = vunpack.c.h.s8.bf16 %v538_v15  ;;  %v1419_v19 = vunpack.c.l.s8.bf16 %v547_v43  ;;  %v2697_v50 = vcombine.high %v2675_v41, %v2675_v41 }
 0x1f6   : > { %7631 = vmatpush3.bf16.msra.mxu1 %v1395_v46  ;;  %7610 = vmatprep.subr.bf16.mxu0 %v1388_v47  ;;  %v1435_v46 = vunpack.c.l.s8.bf16 %v555_v11  ;;  %v551_v47 = vld [vmem:[%s9427_s8 + $0x6c0] sm:$0xff] }
 0x1f7   : > { %7632 = vmatprep.subr.bf16.mxu1 %v1404_v49  ;;  %4534 = vmatprep.mubr.bf16.mxu0 %v2689_v31  ;;  %v1386_v31 = vunpack.c.h.s8.bf16 %v530_v26  ;;  %v2696_v49 = vrot.slane %v2668_v35, %v9458_v38  ;;  %v1427_v51 = vunpack.c.l.s8.bf16 %v551_v47  ;;  %v1428_v59 = vunpack.c.h.s8.bf16 %v551_v47  ;;  %v9829_v26 = vld [vmem:[%s9441_s25 + $0x38] sm:$0xff] }
 0x1f8   : > { %4574 = vmatprep.mubr.bf16.mxu1 %v2699_v52  ;;  %v1420_v52 = vunpack.c.h.s8.bf16 %v547_v43 }
 0x1f9   : > { %7611 = vmatpush3.bf16.msra.mxu0 %v1380_v40  ;;  %v1436_v40 = vunpack.c.h.s8.bf16 %v555_v11  ;;  %v2700_v55 = vcombine.high %v2696_v49, %v2696_v49 }
 0x1fa   : > { %7633 = vmatpush3.bf16.msra.mxu1 %v1396_v53  ;;  %7612 = vmatprep.subr.bf16.mxu0 %v1389_v54  ;;  %v548_v53 = vld [vmem:[%s9427_s8 + $0x6a8] sm:$0xff] }
 0x1fb   : > { %7634 = vmatprep.subr.bf16.mxu1 %v1405_v57  ;;  %v556_v54 = vld [vmem:[%s9427_s8 + $0x6e8] sm:$0xff] }
 0x1fd   : > { %7613 = vmatpush3.bf16.msra.mxu0 %v1381_v60  ;;  %v1421_v60 = vunpack.c.l.s8.bf16 %v548_v53 }
 0x1fe   : > { %7635 = vmatpush3.bf16.msra.mxu1 %v1397_v48  ;;  %7614 = vmatprep.subr.bf16.mxu0 %v1390_v61  ;;  %v544_v48 = vld [vmem:[%s9427_s8 + $0x688] sm:$0xff]  ;;  %v1437_v61 = vunpack.c.l.s8.bf16 %v556_v54 }
 0x1ff   : > { %7636 = vmatprep.subr.bf16.mxu1 %v1406_v62  ;;  %v552_v62 = vld [vmem:[%s9427_s8 + $0x6c8] sm:$0xff]  ;;  %v1413_v63 = vunpack.c.l.s8.bf16 %v544_v48 }
 0x200   : > { %v1429_v0 = vunpack.c.l.s8.bf16 %v552_v62  ;;  %v1430_v10 = vunpack.c.h.s8.bf16 %v552_v62 }
 0x201   : > { %7615 = vmatpush3.bf16.msra.mxu0 %v1382_v3  ;;  %v1422_v3 = vunpack.c.h.s8.bf16 %v548_v53 }
 0x202   : > { %7637 = vmatpush3.bf16.msra.mxu1 %v1398_v56  ;;  %7616 = vmatprep.subr.bf16.mxu0 %v1391_v4  ;;  %v1438_v56 = vunpack.c.h.s8.bf16 %v556_v54  ;;  %v549_v4 = vld [vmem:[%s9427_s8 + $0x6b0] sm:$0xff] }
 0x203   : > { %7638 = vmatprep.subr.bf16.mxu1 %v1407_v9  ;;  %v1414_v9 = vunpack.c.h.s8.bf16 %v544_v48  ;;  %v1424_v20 = vunpack.c.h.s8.bf16 %v549_v4 }
 0x205   : > { %7617 = vmatpush3.bf16.msra.mxu0 %v1383_v8  ;;  %v1423_v8 = vunpack.c.l.s8.bf16 %v549_v4 }
 0x206   : > { %7639 = vmatpush3.bf16.msra.mxu1 %v1399_v58  ;;  %7618 = vmatprep.subr.bf16.mxu0 %v1392_v13  ;;  %v545_v58 = vld [vmem:[%s9427_s8 + $0x690] sm:$0xff]  ;;  %v1439_v13 = vunpack.c.l.s8.bf16 %v557_v5 }
 0x207   : > { %7640 = vmatprep.subr.bf16.mxu1 %v1408_v14  ;;  %v7316_v28 = vpop.f32.mrb[20].mxu0  ;;  %v553_v14 = vld [vmem:[%s9427_s8 + $0x6d0] sm:$0xff]  ;;  %v1415_v17 = vunpack.c.l.s8.bf16 %v545_v58 }
 0x208   : > { %v7338_v29 = vpop.f32.mrb[20].mxu1  ;;  %v7317_v30 = vpop.f32.mrb[21].mxu0  ;;  %v1431_v18 = vunpack.c.l.s8.bf16 %v553_v14  ;;  %v1432_v15 = vunpack.c.h.s8.bf16 %v553_v14 }
 0x209   : > { %v7339_v32 = vpop.f32.mrb[21].mxu1  ;;  %v7318_v33 = vadd.f32 %v7317_v30, %v7316_v28  ;;  %v7319_v12 = vpop.f32.mrb[22].mxu0  ;;  %7619 = vmatpush3.bf16.msra.mxu0 %v1384_v21  ;;  %v1440_v21 = vunpack.c.h.s8.bf16 %v557_v5 }
 0x20a   : > { %v7340_v2 = vadd.f32 %v7339_v32, %v7338_v29  ;;  %7641 = vmatpush3.bf16.msra.mxu1 %v1400_v22  ;;  %v7341_v23 = vpop.f32.mrb[22].mxu1  ;;  %v7320_v36 = vpop.f32.mrb[23].mxu0  ;;  %7620 = vmatprep.subr.bf16.mxu0 %v1393_v1  ;;  %v550_v22 = vld [vmem:[%s9427_s8 + $0x6b8] sm:$0xff] }
 0x20b   : > { %7642 = vmatprep.subr.bf16.mxu1 %v1409_v24  ;;  %v7342_v37 = vpop.f32.mrb[23].mxu1  ;;  %v3977_v42 = vadd.f32 %v7318_v33, %v9784_v39  ;;  %v543_v39 = vld [vmem:[%s9427_s8 + $0x680] sm:$0xff]  ;;  %v558_v1 = vld [vmem:[%s9427_s8 + $0x6f8] sm:$0xff]  ;;  %v1416_v24 = vunpack.c.h.s8.bf16 %v545_v58  ;;  %v1425_v28 = vunpack.c.l.s8.bf16 %v550_v22  ;;  %v1426_v11 = vunpack.c.h.s8.bf16 %v550_v22  ;;  %v573_v58 = vld [vmem:[%s9427_s8 + $0x770] sm:$0xff] }
 0x20c   : > { %v1411_v25 = vunpack.c.l.s8.bf16 %v543_v39  ;;  %v1412_v57 = vunpack.c.h.s8.bf16 %v543_v39  ;;  %v546_v29 = vld [vmem:[%s9427_s8 + $0x698] sm:$0xff]  ;;  %v1441_v30 = vunpack.c.l.s8.bf16 %v558_v1  ;;  %v1442_v35 = vunpack.c.h.s8.bf16 %v558_v1 }
 0x20d   : > { %v9813_v44 = vadd.f32 %v7340_v2, %v3977_v42  ;;  %7621 = vmatpush3.bf16.msra.mxu0 %v1385_v27  ;;  %v554_v32 = vld [vmem:[%s9427_s8 + $0x6d8] sm:$0xff]  ;;  %v9835_v2 = vrot.slane %v9829_v26, %v9458_v38 }
 0x20e   : > { %7643 = vmatpush3.bf16.msra.mxu1 %v1401_v34  ;;  %7622 = vmatprep.subr.bf16.mxu0 %v1394_v6  ;;  %v1433_v37 = vunpack.c.l.s8.bf16 %v554_v32 }
 0x20f   : > { %7644 = vmatprep.subr.bf16.mxu1 %v1410_v7  ;;  %v1417_v7 = vunpack.c.l.s8.bf16 %v546_v29  ;;  %v2716_v39 = vcombine.high %v9835_v2, %v9835_v2 }
 0x211   : > { %7623 = vmatpush3.bf16.msra.mxu0 %v1386_v31 }
 0x212   : > { %7645 = vmatpush3.bf16.msra.mxu1 %v1402_v45  ;;  %7652 = vmatprep.subr.bf16.mxu0 %v1419_v19  ;;  %v563_v45 = vld [vmem:[%s9427_s8 + $0x720] sm:$0xff] }
 0x213   : > { %7674 = vmatprep.subr.bf16.mxu1 %v1435_v46  ;;  %v571_v19 = vld [vmem:[%s9427_s8 + $0x760] sm:$0xff]  ;;  %v2682_v46 = vrot.slane %v9804_v16, %v9458_v38 }
 0x214   : > { %4535 = vmatmul.mubr.bf16.vlgmr.msra.gmra.mrb[48].mxu0 %v2675_v41 }
 0x215   : > { %4575 = vmatmul.mubr.bf16.vlgmr.msra.gmra.mrb[48].mxu1 %v2697_v50  ;;  %7653 = vmatpush3.bf16.msra.mxu0 %v1411_v25  ;;  %v1434_v50 = vunpack.c.h.s8.bf16 %v554_v32  ;;  %v1451_v25 = vunpack.c.l.s8.bf16 %v563_v45  ;;  %v2698_v53 = vcombine.high %v2682_v46, %v2682_v46 }
 0x216   : > { %7675 = vmatpush3.bf16.msra.mxu1 %v1427_v51  ;;  %7654 = vmatprep.subr.bf16.mxu0 %v1420_v52  ;;  %v1467_v51 = vunpack.c.l.s8.bf16 %v571_v19  ;;  %v567_v52 = vld [vmem:[%s9427_s8 + $0x740] sm:$0xff] }
 0x217   : > { %7676 = vmatprep.subr.bf16.mxu1 %v1436_v40  ;;  %4614 = vmatprep.mubr.bf16.mxu0 %v2696_v49  ;;  %v1418_v49 = vunpack.c.h.s8.bf16 %v546_v29  ;;  %v2738_v40 = vrot.slane %v2716_v39, %v9458_v38  ;;  %v1459_v54 = vunpack.c.l.s8.bf16 %v567_v52  ;;  %v1460_v62 = vunpack.c.h.s8.bf16 %v567_v52  ;;  %v574_v29 = vld [vmem:[%s9427_s8 + $0x778] sm:$0xff] }
 0x218   : > { %4654 = vmatprep.mubr.bf16.mxu1 %v2700_v55  ;;  %v1452_v55 = vunpack.c.h.s8.bf16 %v563_v45  ;;  %v1474_v39 = vunpack.c.h.s8.bf16 %v574_v29 }
 0x219   : > { %7655 = vmatpush3.bf16.msra.mxu0 %v1412_v57  ;;  %v1468_v57 = vunpack.c.h.s8.bf16 %v571_v19  ;;  %v2748_v48 = vcombine.high %v2738_v40, %v2738_v40 }
 0x21a   : > { %7677 = vmatpush3.bf16.msra.mxu1 %v1428_v59  ;;  %7656 = vmatprep.subr.bf16.mxu0 %v1421_v60  ;;  %v564_v59 = vld [vmem:[%s9427_s8 + $0x728] sm:$0xff] }
 0x21b   : > { %7678 = vmatprep.subr.bf16.mxu1 %v1437_v61  ;;  %v572_v60 = vld [vmem:[%s9427_s8 + $0x768] sm:$0xff] }
 0x21d   : > { %7657 = vmatpush3.bf16.msra.mxu0 %v1413_v63  ;;  %v1453_v63 = vunpack.c.l.s8.bf16 %v564_v59 }
 0x21e   : > { %7679 = vmatpush3.bf16.msra.mxu1 %v1429_v0  ;;  %7658 = vmatprep.subr.bf16.mxu0 %v1422_v3  ;;  %v560_v0 = vld [vmem:[%s9427_s8 + $0x708] sm:$0xff]  ;;  %v1469_v3 = vunpack.c.l.s8.bf16 %v572_v60 }
 0x21f   : > { %7680 = vmatprep.subr.bf16.mxu1 %v1438_v56  ;;  %v568_v56 = vld [vmem:[%s9427_s8 + $0x748] sm:$0xff]  ;;  %v1445_v4 = vunpack.c.l.s8.bf16 %v560_v0 }
 0x220   : > { %v1461_v5 = vunpack.c.l.s8.bf16 %v568_v56  ;;  %v1462_v14 = vunpack.c.h.s8.bf16 %v568_v56 }
 0x221   : > { %7659 = vmatpush3.bf16.msra.mxu0 %v1414_v9  ;;  %v1454_v9 = vunpack.c.h.s8.bf16 %v564_v59 }
 0x222   : > { %7681 = vmatpush3.bf16.msra.mxu1 %v1430_v10  ;;  %7660 = vmatprep.subr.bf16.mxu0 %v1423_v8  ;;  %v1470_v10 = vunpack.c.h.s8.bf16 %v572_v60  ;;  %v565_v8 = vld [vmem:[%s9427_s8 + $0x730] sm:$0xff] }
 0x223   : > { %7682 = vmatprep.subr.bf16.mxu1 %v1439_v13  ;;  %v1446_v13 = vunpack.c.h.s8.bf16 %v560_v0 }
 0x225   : > { %7661 = vmatpush3.bf16.msra.mxu0 %v1415_v17  ;;  %v1455_v17 = vunpack.c.l.s8.bf16 %v565_v8 }
 0x226   : > { %7683 = vmatpush3.bf16.msra.mxu1 %v1431_v18  ;;  %7662 = vmatprep.subr.bf16.mxu0 %v1424_v20  ;;  %v561_v18 = vld [vmem:[%s9427_s8 + $0x710] sm:$0xff]  ;;  %v1471_v20 = vunpack.c.l.s8.bf16 %v573_v58 }
 0x227   : > { %7684 = vmatprep.subr.bf16.mxu1 %v1440_v21  ;;  %v7360_v33 = vpop.f32.mrb[24].mxu0  ;;  %v569_v21 = vld [vmem:[%s9427_s8 + $0x750] sm:$0xff]  ;;  %v1447_v22 = vunpack.c.l.s8.bf16 %v561_v18  ;;  %v1448_v32 = vunpack.c.h.s8.bf16 %v561_v18 }
 0x228   : > { %v7382_v12 = vpop.f32.mrb[24].mxu1  ;;  %v7361_v27 = vpop.f32.mrb[25].mxu0  ;;  %v1463_v1 = vunpack.c.l.s8.bf16 %v569_v21  ;;  %v589_v18 = vld [vmem:[%s9427_s8 + $0x7f0] sm:$0xff] }
 0x229   : > { %v7383_v34 = vpop.f32.mrb[25].mxu1  ;;  %v7362_v23 = vadd.f32 %v7361_v27, %v7360_v33  ;;  %v7363_v36 = vpop.f32.mrb[26].mxu0  ;;  %7663 = vmatpush3.bf16.msra.mxu0 %v1416_v24  ;;  %v1456_v24 = vunpack.c.h.s8.bf16 %v565_v8  ;;  %v1464_v33 = vunpack.c.h.s8.bf16 %v569_v21  ;;  %v562_v27 = vld [vmem:[%s9427_s8 + $0x718] sm:$0xff] }
 0x22a   : > { %v7384_v6 = vadd.f32 %v7383_v34, %v7382_v12  ;;  %7685 = vmatpush3.bf16.msra.mxu1 %v1432_v15  ;;  %v7385_v42 = vpop.f32.mrb[26].mxu1  ;;  %v7364_v43 = vpop.f32.mrb[27].mxu0  ;;  %7664 = vmatprep.subr.bf16.mxu0 %v1425_v28  ;;  %v1472_v15 = vunpack.c.h.s8.bf16 %v573_v58  ;;  %v566_v28 = vld [vmem:[%s9427_s8 + $0x738] sm:$0xff]  ;;  %v1473_v34 = vunpack.c.l.s8.bf16 %v574_v29 }
 0x22b   : > { %7686 = vmatprep.subr.bf16.mxu1 %v1441_v30  ;;  %v7386_v41 = vpop.f32.mrb[27].mxu1  ;;  %v4057_v31 = vadd.f32 %v7362_v23, %v9813_v44  ;;  %v559_v44 = vld [vmem:[%s9427_s8 + $0x700] sm:$0xff]  ;;  %v2701_v30 = vcombine.high %v9829_v26, %v9829_v26  ;;  %v1457_v12 = vunpack.c.l.s8.bf16 %v566_v28  ;;  %v570_v23 = vld [vmem:[%s9427_s8 + $0x758] sm:$0xff]  ;;  %v1458_v19 = vunpack.c.h.s8.bf16 %v566_v28 }
 0x22c   : > { %v1443_v16 = vunpack.c.l.s8.bf16 %v559_v44  ;;  %v1444_v61 = vunpack.c.h.s8.bf16 %v559_v44  ;;  %v1465_v41 = vunpack.c.l.s8.bf16 %v570_v23 }
 0x22d   : > { %v9844_v47 = vadd.f32 %v7384_v6, %v4057_v31  ;;  %7665 = vmatpush3.bf16.msra.mxu0 %v1417_v7  ;;  %v9864_v7 = vrot.slane %v2701_v30, %v9458_v38 }
 0x22e   : > { %7687 = vmatpush3.bf16.msra.mxu1 %v1433_v37  ;;  %7666 = vmatprep.subr.bf16.mxu0 %v1426_v11 }
 0x22f   : > { %7688 = vmatprep.subr.bf16.mxu1 %v1442_v35  ;;  %v1449_v35 = vunpack.c.l.s8.bf16 %v562_v27  ;;  %v2717_v44 = vcombine.high %v9864_v7, %v9864_v7 }
 0x231   : > { %7667 = vmatpush3.bf16.msra.mxu0 %v1418_v49 }
 0x232   : > { %7689 = vmatpush3.bf16.msra.mxu1 %v1434_v50  ;;  %7696 = vmatprep.subr.bf16.mxu0 %v1451_v25  ;;  %v579_v50 = vld [vmem:[%s9427_s8 + $0x7a0] sm:$0xff] }
 0x233   : > { %7718 = vmatprep.subr.bf16.mxu1 %v1467_v51  ;;  %v587_v25 = vld [vmem:[%s9427_s8 + $0x7e0] sm:$0xff]  ;;  %v2724_v51 = vrot.slane %v9835_v2, %v9458_v38 }
 0x234   : > { %4615 = vmatmul.mubr.bf16.vlgmr.msra.gmra.mrb[52].mxu0 %v2682_v46 }
 0x235   : > { %4655 = vmatmul.mubr.bf16.vlgmr.msra.gmra.mrb[52].mxu1 %v2698_v53  ;;  %7697 = vmatpush3.bf16.msra.mxu0 %v1443_v16  ;;  %v1466_v53 = vunpack.c.h.s8.bf16 %v570_v23  ;;  %v1483_v16 = vunpack.c.l.s8.bf16 %v579_v50  ;;  %v2746_v59 = vcombine.high %v2724_v51, %v2724_v51 }
 0x236   : > { %7719 = vmatpush3.bf16.msra.mxu1 %v1459_v54  ;;  %7698 = vmatprep.subr.bf16.mxu0 %v1452_v55  ;;  %v1499_v54 = vunpack.c.l.s8.bf16 %v587_v25  ;;  %v583_v55 = vld [vmem:[%s9427_s8 + $0x7c0] sm:$0xff] }
 0x237   : > { %7720 = vmatprep.subr.bf16.mxu1 %v1468_v57  ;;  %4694 = vmatprep.mubr.bf16.mxu0 %v2738_v40  ;;  %v1450_v40 = vunpack.c.h.s8.bf16 %v562_v27  ;;  %v2745_v57 = vrot.slane %v2717_v44, %v9458_v38  ;;  %v1491_v60 = vunpack.c.l.s8.bf16 %v583_v55  ;;  %v1492_v56 = vunpack.c.h.s8.bf16 %v583_v55  ;;  %v9889_v27 = vld [vmem:[%s9441_s25 + $0x40] sm:$0xff] }
 0x238   : > { %4734 = vmatprep.mubr.bf16.mxu1 %v2748_v48  ;;  %v1484_v48 = vunpack.c.h.s8.bf16 %v579_v50 }
 0x239   : > { %7699 = vmatpush3.bf16.msra.mxu0 %v1444_v61  ;;  %v1500_v61 = vunpack.c.h.s8.bf16 %v587_v25  ;;  %v2749_v0 = vcombine.high %v2745_v57, %v2745_v57 }
 0x23a   : > { %7721 = vmatpush3.bf16.msra.mxu1 %v1460_v62  ;;  %7700 = vmatprep.subr.bf16.mxu0 %v1453_v63  ;;  %v580_v62 = vld [vmem:[%s9427_s8 + $0x7a8] sm:$0xff] }
 0x23b   : > { %7722 = vmatprep.subr.bf16.mxu1 %v1469_v3  ;;  %v588_v63 = vld [vmem:[%s9427_s8 + $0x7e8] sm:$0xff] }
 0x23d   : > { %7701 = vmatpush3.bf16.msra.mxu0 %v1445_v4  ;;  %v1485_v4 = vunpack.c.l.s8.bf16 %v580_v62 }
 0x23e   : > { %7723 = vmatpush3.bf16.msra.mxu1 %v1461_v5  ;;  %7702 = vmatprep.subr.bf16.mxu0 %v1454_v9  ;;  %v576_v5 = vld [vmem:[%s9427_s8 + $0x788] sm:$0xff]  ;;  %v1501_v9 = vunpack.c.l.s8.bf16 %v588_v63 }
 0x23f   : > { %7724 = vmatprep.subr.bf16.mxu1 %v1470_v10  ;;  %v584_v10 = vld [vmem:[%s9427_s8 + $0x7c8] sm:$0xff]  ;;  %v1477_v8 = vunpack.c.l.s8.bf16 %v576_v5 }
 0x240   : > { %v1493_v58 = vunpack.c.l.s8.bf16 %v584_v10  ;;  %v1494_v21 = vunpack.c.h.s8.bf16 %v584_v10 }
 0x241   : > { %7703 = vmatpush3.bf16.msra.mxu0 %v1446_v13  ;;  %v1486_v13 = vunpack.c.h.s8.bf16 %v580_v62 }
 0x242   : > { %7725 = vmatpush3.bf16.msra.mxu1 %v1462_v14  ;;  %7704 = vmatprep.subr.bf16.mxu0 %v1455_v17  ;;  %v1502_v14 = vunpack.c.h.s8.bf16 %v588_v63  ;;  %v581_v17 = vld [vmem:[%s9427_s8 + $0x7b0] sm:$0xff] }
 0x243   : > { %7726 = vmatprep.subr.bf16.mxu1 %v1471_v20  ;;  %v1478_v20 = vunpack.c.h.s8.bf16 %v576_v5  ;;  %v1488_v30 = vunpack.c.h.s8.bf16 %v581_v17 }
 0x245   : > { %7705 = vmatpush3.bf16.msra.mxu0 %v1447_v22  ;;  %v1487_v22 = vunpack.c.l.s8.bf16 %v581_v17 }
 0x246   : > { %7727 = vmatpush3.bf16.msra.mxu1 %v1463_v1  ;;  %7706 = vmatprep.subr.bf16.mxu0 %v1456_v24  ;;  %v577_v1 = vld [vmem:[%s9427_s8 + $0x790] sm:$0xff]  ;;  %v1503_v24 = vunpack.c.l.s8.bf16 %v589_v18 }
 0x247   : > { %7728 = vmatprep.subr.bf16.mxu1 %v1472_v15  ;;  %v7404_v36 = vpop.f32.mrb[28].mxu0  ;;  %v585_v15 = vld [vmem:[%s9427_s8 + $0x7d0] sm:$0xff]  ;;  %v1479_v28 = vunpack.c.l.s8.bf16 %v577_v1 }
 0x248   : > { %v7426_v6 = vpop.f32.mrb[28].mxu1  ;;  %v7405_v37 = vpop.f32.mrb[29].mxu0  ;;  %v1495_v29 = vunpack.c.l.s8.bf16 %v585_v15  ;;  %v1496_v23 = vunpack.c.h.s8.bf16 %v585_v15 }
 0x249   : > { %v7427_v42 = vpop.f32.mrb[29].mxu1  ;;  %v7406_v43 = vadd.f32 %v7405_v37, %v7404_v36  ;;  %v7407_v26 = vpop.f32.mrb[30].mxu0  ;;  %7707 = vmatpush3.bf16.msra.mxu0 %v1448_v32  ;;  %v1504_v32 = vunpack.c.h.s8.bf16 %v589_v18 }
 0x24a   : > { %v7428_v11 = vadd.f32 %v7427_v42, %v7426_v6  ;;  %7729 = vmatpush3.bf16.msra.mxu1 %v1464_v33  ;;  %v7429_v31 = vpop.f32.mrb[30].mxu1  ;;  %v7408_v45 = vpop.f32.mrb[31].mxu0  ;;  %7708 = vmatprep.subr.bf16.mxu0 %v1457_v12  ;;  %v582_v33 = vld [vmem:[%s9427_s8 + $0x7b8] sm:$0xff] }
 0x24b   : > { %7730 = vmatprep.subr.bf16.mxu1 %v1473_v34  ;;  %v7430_v46 = vpop.f32.mrb[31].mxu1  ;;  %v4137_v49 = vadd.f32 %v7406_v43, %v9844_v47  ;;  %v575_v47 = vld [vmem:[%s9427_s8 + $0x780] sm:$0xff]  ;;  %v590_v12 = vld [vmem:[%s9427_s8 + $0x7f8] sm:$0xff]  ;;  %v1480_v34 = vunpack.c.h.s8.bf16 %v577_v1  ;;  %v1489_v36 = vunpack.c.l.s8.bf16 %v582_v33  ;;  %v1490_v25 = vunpack.c.h.s8.bf16 %v582_v33  ;;  %v605_v1 = vld [vmem:[%s9427_s8 + $0x870] sm:$0xff] }
 0x24c   : > { %v1475_v2 = vunpack.c.l.s8.bf16 %v575_v47  ;;  %v1476_v3 = vunpack.c.h.s8.bf16 %v575_v47  ;;  %v578_v6 = vld [vmem:[%s9427_s8 + $0x798] sm:$0xff]  ;;  %v1505_v37 = vunpack.c.l.s8.bf16 %v590_v12  ;;  %v1506_v44 = vunpack.c.h.s8.bf16 %v590_v12 }
 0x24d   : > { %v9873_v52 = vadd.f32 %v7428_v11, %v4137_v49  ;;  %7709 = vmatpush3.bf16.msra.mxu0 %v1449_v35  ;;  %v586_v42 = vld [vmem:[%s9427_s8 + $0x7d8] sm:$0xff]  ;;  %v9895_v11 = vrot.slane %v9889_v27, %v9458_v38 }
 0x24e   : > { %7731 = vmatpush3.bf16.msra.mxu1 %v1465_v41  ;;  %7710 = vmatprep.subr.bf16.mxu0 %v1458_v19  ;;  %v1497_v46 = vunpack.c.l.s8.bf16 %v586_v42 }
 0x24f   : > { %7732 = vmatprep.subr.bf16.mxu1 %v1474_v39  ;;  %v1481_v39 = vunpack.c.l.s8.bf16 %v578_v6  ;;  %v2765_v47 = vcombine.high %v9895_v11, %v9895_v11 }
 0x251   : > { %7711 = vmatpush3.bf16.msra.mxu0 %v1450_v40 }
 0x252   : > { %7733 = vmatpush3.bf16.msra.mxu1 %v1466_v53  ;;  %7740 = vmatprep.subr.bf16.mxu0 %v1483_v16  ;;  %v595_v53 = vld [vmem:[%s9427_s8 + $0x820] sm:$0xff] }
 0x253   : > { %7762 = vmatprep.subr.bf16.mxu1 %v1499_v54  ;;  %v603_v16 = vld [vmem:[%s9427_s8 + $0x860] sm:$0xff]  ;;  %v2731_v54 = vrot.slane %v9864_v7, %v9458_v38 }
 0x254   : > { %4695 = vmatmul.mubr.bf16.vlgmr.msra.gmra.mrb[56].mxu0 %v2724_v51 }
 0x255   : > { %4735 = vmatmul.mubr.bf16.vlgmr.msra.gmra.mrb[56].mxu1 %v2746_v59  ;;  %7741 = vmatpush3.bf16.msra.mxu0 %v1475_v2  ;;  %v1498_v59 = vunpack.c.h.s8.bf16 %v586_v42  ;;  %v1515_v2 = vunpack.c.l.s8.bf16 %v595_v53  ;;  %v2747_v62 = vcombine.high %v2731_v54, %v2731_v54 }
 0x256   : > { %7763 = vmatpush3.bf16.msra.mxu1 %v1491_v60  ;;  %7742 = vmatprep.subr.bf16.mxu0 %v1484_v48  ;;  %v1531_v60 = vunpack.c.l.s8.bf16 %v603_v16  ;;  %v599_v48 = vld [vmem:[%s9427_s8 + $0x840] sm:$0xff] }
 0x257   : > { %7764 = vmatprep.subr.bf16.mxu1 %v1500_v61  ;;  %4774 = vmatprep.mubr.bf16.mxu0 %v2745_v57  ;;  %v1482_v57 = vunpack.c.h.s8.bf16 %v578_v6  ;;  %v2787_v61 = vrot.slane %v2765_v47, %v9458_v38  ;;  %v1523_v63 = vunpack.c.l.s8.bf16 %v599_v48  ;;  %v1524_v10 = vunpack.c.h.s8.bf16 %v599_v48  ;;  %v606_v6 = vld [vmem:[%s9427_s8 + $0x878] sm:$0xff] }
 0x258   : > { %4814 = vmatprep.mubr.bf16.mxu1 %v2749_v0  ;;  %v1516_v0 = vunpack.c.h.s8.bf16 %v595_v53  ;;  %v1538_v47 = vunpack.c.h.s8.bf16 %v606_v6 }
 0x259   : > { %7743 = vmatpush3.bf16.msra.mxu0 %v1476_v3  ;;  %v1532_v3 = vunpack.c.h.s8.bf16 %v603_v16  ;;  %v2797_v5 = vcombine.high %v2787_v61, %v2787_v61 }
 0x25a   : > { %7765 = vmatpush3.bf16.msra.mxu1 %v1492_v56  ;;  %7744 = vmatprep.subr.bf16.mxu0 %v1485_v4  ;;  %v596_v56 = vld [vmem:[%s9427_s8 + $0x828] sm:$0xff] }
 0x25b   : > { %7766 = vmatprep.subr.bf16.mxu1 %v1501_v9  ;;  %v604_v4 = vld [vmem:[%s9427_s8 + $0x868] sm:$0xff] }
 0x25d   : > { %7745 = vmatpush3.bf16.msra.mxu0 %v1477_v8  ;;  %v1517_v8 = vunpack.c.l.s8.bf16 %v596_v56 }
 0x25e   : > { %7767 = vmatpush3.bf16.msra.mxu1 %v1493_v58  ;;  %7746 = vmatprep.subr.bf16.mxu0 %v1486_v13  ;;  %v592_v58 = vld [vmem:[%s9427_s8 + $0x808] sm:$0xff]  ;;  %v1533_v13 = vunpack.c.l.s8.bf16 %v604_v4 }
 0x25f   : > { %7768 = vmatprep.subr.bf16.mxu1 %v1502_v14  ;;  %v600_v14 = vld [vmem:[%s9427_s8 + $0x848] sm:$0xff]  ;;  %v1509_v17 = vunpack.c.l.s8.bf16 %v592_v58 }
 0x260   : > { %v1525_v18 = vunpack.c.l.s8.bf16 %v600_v14  ;;  %v1526_v15 = vunpack.c.h.s8.bf16 %v600_v14 }
 0x261   : > { %7747 = vmatpush3.bf16.msra.mxu0 %v1478_v20  ;;  %v1518_v20 = vunpack.c.h.s8.bf16 %v596_v56 }
 0x262   : > { %7769 = vmatpush3.bf16.msra.mxu1 %v1494_v21  ;;  %7748 = vmatprep.subr.bf16.mxu0 %v1487_v22  ;;  %v1534_v21 = vunpack.c.h.s8.bf16 %v604_v4  ;;  %v597_v22 = vld [vmem:[%s9427_s8 + $0x830] sm:$0xff] }
 0x263   : > { %7770 = vmatprep.subr.bf16.mxu1 %v1503_v24  ;;  %v1510_v24 = vunpack.c.h.s8.bf16 %v592_v58 }
 0x265   : > { %7749 = vmatpush3.bf16.msra.mxu0 %v1479_v28  ;;  %v1519_v28 = vunpack.c.l.s8.bf16 %v597_v22 }
 0x266   : > { %7771 = vmatpush3.bf16.msra.mxu1 %v1495_v29  ;;  %7750 = vmatprep.subr.bf16.mxu0 %v1488_v30  ;;  %v593_v29 = vld [vmem:[%s9427_s8 + $0x810] sm:$0xff]  ;;  %v1535_v30 = vunpack.c.l.s8.bf16 %v605_v1 }
 0x267   : > { %7772 = vmatprep.subr.bf16.mxu1 %v1504_v32  ;;  %v7448_v43 = vpop.f32.mrb[32].mxu0  ;;  %v601_v32 = vld [vmem:[%s9427_s8 + $0x850] sm:$0xff]  ;;  %v1511_v33 = vunpack.c.l.s8.bf16 %v593_v29  ;;  %v1512_v42 = vunpack.c.h.s8.bf16 %v593_v29 }
 0x268   : > { %v7470_v26 = vpop.f32.mrb[32].mxu1  ;;  %v7449_v35 = vpop.f32.mrb[33].mxu0  ;;  %v1527_v12 = vunpack.c.l.s8.bf16 %v601_v32  ;;  %v621_v29 = vld [vmem:[%s9427_s8 + $0x8f0] sm:$0xff] }
 0x269   : > { %v7471_v41 = vpop.f32.mrb[33].mxu1  ;;  %v7450_v31 = vadd.f32 %v7449_v35, %v7448_v43  ;;  %v7451_v45 = vpop.f32.mrb[34].mxu0  ;;  %7751 = vmatpush3.bf16.msra.mxu0 %v1480_v34  ;;  %v1520_v34 = vunpack.c.h.s8.bf16 %v597_v22  ;;  %v1528_v43 = vunpack.c.h.s8.bf16 %v601_v32  ;;  %v594_v35 = vld [vmem:[%s9427_s8 + $0x818] sm:$0xff] }
 0x26a   : > { %v7472_v19 = vadd.f32 %v7471_v41, %v7470_v26  ;;  %7773 = vmatpush3.bf16.msra.mxu1 %v1496_v23  ;;  %v7473_v49 = vpop.f32.mrb[34].mxu1  ;;  %v7452_v50 = vpop.f32.mrb[35].mxu0  ;;  %7752 = vmatprep.subr.bf16.mxu0 %v1489_v36  ;;  %v1536_v23 = vunpack.c.h.s8.bf16 %v605_v1  ;;  %v598_v36 = vld [vmem:[%s9427_s8 + $0x838] sm:$0xff]  ;;  %v1537_v41 = vunpack.c.l.s8.bf16 %v606_v6 }
 0x26b   : > { %7774 = vmatprep.subr.bf16.mxu1 %v1505_v37  ;;  %v7474_v51 = vpop.f32.mrb[35].mxu1  ;;  %v4217_v40 = vadd.f32 %v7450_v31, %v9873_v52  ;;  %v591_v52 = vld [vmem:[%s9427_s8 + $0x800] sm:$0xff]  ;;  %v2750_v37 = vcombine.high %v9889_v27, %v9889_v27  ;;  %v1521_v26 = vunpack.c.l.s8.bf16 %v598_v36  ;;  %v602_v31 = vld [vmem:[%s9427_s8 + $0x858] sm:$0xff]  ;;  %v1522_v16 = vunpack.c.h.s8.bf16 %v598_v36 }
 0x26c   : > { %v1507_v7 = vunpack.c.l.s8.bf16 %v591_v52  ;;  %v1508_v9 = vunpack.c.h.s8.bf16 %v591_v52  ;;  %v1529_v51 = vunpack.c.l.s8.bf16 %v602_v31 }
 0x26d   : > { %v9904_v55 = vadd.f32 %v7472_v19, %v4217_v40  ;;  %7753 = vmatpush3.bf16.msra.mxu0 %v1481_v39  ;;  %v9924_v39 = vrot.slane %v2750_v37, %v9458_v38 }
 0x26e   : > { %7775 = vmatpush3.bf16.msra.mxu1 %v1497_v46  ;;  %7754 = vmatprep.subr.bf16.mxu0 %v1490_v25 }
 0x26f   : > { %7776 = vmatprep.subr.bf16.mxu1 %v1506_v44  ;;  %v1513_v44 = vunpack.c.l.s8.bf16 %v594_v35  ;;  %v2766_v52 = vcombine.high %v9924_v39, %v9924_v39 }
 0x271   : > { %7755 = vmatpush3.bf16.msra.mxu0 %v1482_v57 }
 0x272   : > { %7777 = vmatpush3.bf16.msra.mxu1 %v1498_v59  ;;  %7784 = vmatprep.subr.bf16.mxu0 %v1515_v2  ;;  %v611_v59 = vld [vmem:[%s9427_s8 + $0x8a0] sm:$0xff] }
 0x273   : > { %7806 = vmatprep.subr.bf16.mxu1 %v1531_v60  ;;  %v619_v2 = vld [vmem:[%s9427_s8 + $0x8e0] sm:$0xff]  ;;  %v2773_v60 = vrot.slane %v9895_v11, %v9458_v38 }
 0x274   : > { %4775 = vmatmul.mubr.bf16.vlgmr.msra.gmra.mrb[60].mxu0 %v2731_v54 }
 0x275   : > { %4815 = vmatmul.mubr.bf16.vlgmr.msra.gmra.mrb[60].mxu1 %v2747_v62  ;;  %7785 = vmatpush3.bf16.msra.mxu0 %v1507_v7  ;;  %v1530_v62 = vunpack.c.h.s8.bf16 %v602_v31  ;;  %v1547_v7 = vunpack.c.l.s8.bf16 %v611_v59  ;;  %v2795_v56 = vcombine.high %v2773_v60, %v2773_v60 }
 0x276   : > { %7807 = vmatpush3.bf16.msra.mxu1 %v1523_v63  ;;  %7786 = vmatprep.subr.bf16.mxu0 %v1516_v0  ;;  %v1563_v63 = vunpack.c.l.s8.bf16 %v619_v2  ;;  %v615_v0 = vld [vmem:[%s9427_s8 + $0x8c0] sm:$0xff] }
 0x277   : > { %7808 = vmatprep.subr.bf16.mxu1 %v1532_v3  ;;  %4854 = vmatprep.mubr.bf16.mxu0 %v2787_v61  ;;  %v1514_v61 = vunpack.c.h.s8.bf16 %v594_v35  ;;  %v2794_v3 = vrot.slane %v2766_v52, %v9458_v38  ;;  %v1555_v4 = vunpack.c.l.s8.bf16 %v615_v0  ;;  %v1556_v14 = vunpack.c.h.s8.bf16 %v615_v0  ;;  %v9949_v35 = vld [vmem:[%s9441_s25 + $0x48] sm:$0xff] }
 0x278   : > { %4894 = vmatprep.mubr.bf16.mxu1 %v2797_v5  ;;  %v1548_v5 = vunpack.c.h.s8.bf16 %v611_v59 }
 0x279   : > { %7787 = vmatpush3.bf16.msra.mxu0 %v1508_v9  ;;  %v1564_v9 = vunpack.c.h.s8.bf16 %v619_v2  ;;  %v2798_v58 = vcombine.high %v2794_v3, %v2794_v3 }
 0x27a   : > { %7809 = vmatpush3.bf16.msra.mxu1 %v1524_v10  ;;  %7788 = vmatprep.subr.bf16.mxu0 %v1517_v8  ;;  %v612_v10 = vld [vmem:[%s9427_s8 + $0x8a8] sm:$0xff] }
 0x27b   : > { %7810 = vmatprep.subr.bf16.mxu1 %v1533_v13  ;;  %v620_v8 = vld [vmem:[%s9427_s8 + $0x8e8] sm:$0xff] }
 0x27d   : > { %7789 = vmatpush3.bf16.msra.mxu0 %v1509_v17  ;;  %v1549_v17 = vunpack.c.l.s8.bf16 %v612_v10 }
 0x27e   : > { %7811 = vmatpush3.bf16.msra.mxu1 %v1525_v18  ;;  %7790 = vmatprep.subr.bf16.mxu0 %v1518_v20  ;;  %v608_v18 = vld [vmem:[%s9427_s8 + $0x888] sm:$0xff]  ;;  %v1565_v20 = vunpack.c.l.s8.bf16 %v620_v8 }
 0x27f   : > { %7812 = vmatprep.subr.bf16.mxu1 %v1534_v21  ;;  %v616_v21 = vld [vmem:[%s9427_s8 + $0x8c8] sm:$0xff]  ;;  %v1541_v22 = vunpack.c.l.s8.bf16 %v608_v18 }
 0x280   : > { %v1557_v1 = vunpack.c.l.s8.bf16 %v616_v21  ;;  %v1558_v32 = vunpack.c.h.s8.bf16 %v616_v21 }
 0x281   : > { %7791 = vmatpush3.bf16.msra.mxu0 %v1510_v24  ;;  %v1550_v24 = vunpack.c.h.s8.bf16 %v612_v10 }
 0x282   : > { %7813 = vmatpush3.bf16.msra.mxu1 %v1526_v15  ;;  %7792 = vmatprep.subr.bf16.mxu0 %v1519_v28  ;;  %v1566_v15 = vunpack.c.h.s8.bf16 %v620_v8  ;;  %v613_v28 = vld [vmem:[%s9427_s8 + $0x8b0] sm:$0xff] }
 0x283   : > { %7814 = vmatprep.subr.bf16.mxu1 %v1535_v30  ;;  %v1542_v30 = vunpack.c.h.s8.bf16 %v608_v18  ;;  %v1552_v37 = vunpack.c.h.s8.bf16 %v613_v28 }
 0x285   : > { %7793 = vmatpush3.bf16.msra.mxu0 %v1511_v33  ;;  %v1551_v33 = vunpack.c.l.s8.bf16 %v613_v28 }
 0x286   : > { %7815 = vmatpush3.bf16.msra.mxu1 %v1527_v12  ;;  %7794 = vmatprep.subr.bf16.mxu0 %v1520_v34  ;;  %v609_v12 = vld [vmem:[%s9427_s8 + $0x890] sm:$0xff]  ;;  %v1567_v34 = vunpack.c.l.s8.bf16 %v621_v29 }
 0x287   : > { %7816 = vmatprep.subr.bf16.mxu1 %v1536_v23  ;;  %v7492_v45 = vpop.f32.mrb[36].mxu0  ;;  %v617_v23 = vld [vmem:[%s9427_s8 + $0x8d0] sm:$0xff]  ;;  %v1543_v36 = vunpack.c.l.s8.bf16 %v609_v12 }
 0x288   : > { %v7514_v19 = vpop.f32.mrb[36].mxu1  ;;  %v7493_v46 = vpop.f32.mrb[37].mxu0  ;;  %v1559_v6 = vunpack.c.l.s8.bf16 %v617_v23  ;;  %v1560_v31 = vunpack.c.h.s8.bf16 %v617_v23 }
 0x289   : > { %v7515_v49 = vpop.f32.mrb[37].mxu1  ;;  %v7494_v50 = vadd.f32 %v7493_v46, %v7492_v45  ;;  %v7495_v27 = vpop.f32.mrb[38].mxu0  ;;  %7795 = vmatpush3.bf16.msra.mxu0 %v1512_v42  ;;  %v1568_v42 = vunpack.c.h.s8.bf16 %v621_v29 }
 0x28a   : > { %v7516_v25 = vadd.f32 %v7515_v49, %v7514_v19  ;;  %7817 = vmatpush3.bf16.msra.mxu1 %v1528_v43  ;;  %v7517_v40 = vpop.f32.mrb[38].mxu1  ;;  %v7496_v53 = vpop.f32.mrb[39].mxu0  ;;  %7796 = vmatprep.subr.bf16.mxu0 %v1521_v26  ;;  %v614_v43 = vld [vmem:[%s9427_s8 + $0x8b8] sm:$0xff] }
 0x28b   : > { %7818 = vmatprep.subr.bf16.mxu1 %v1537_v41  ;;  %v7518_v54 = vpop.f32.mrb[39].mxu1  ;;  %v4297_v57 = vadd.f32 %v7494_v50, %v9904_v55  ;;  %v607_v55 = vld [vmem:[%s9427_s8 + $0x880] sm:$0xff]  ;;  %v622_v26 = vld [vmem:[%s9427_s8 + $0x8f8] sm:$0xff]  ;;  %v1544_v41 = vunpack.c.h.s8.bf16 %v609_v12  ;;  %v1553_v45 = vunpack.c.l.s8.bf16 %v614_v43  ;;  %v1554_v2 = vunpack.c.h.s8.bf16 %v614_v43  ;;  %v637_v12 = vld [vmem:[%s9427_s8 + $0x970] sm:$0xff] }
 0x28c   : > { %v1539_v11 = vunpack.c.l.s8.bf16 %v607_v55  ;;  %v1540_v13 = vunpack.c.h.s8.bf16 %v607_v55  ;;  %v610_v19 = vld [vmem:[%s9427_s8 + $0x898] sm:$0xff]  ;;  %v1569_v46 = vunpack.c.l.s8.bf16 %v622_v26  ;;  %v1570_v52 = vunpack.c.h.s8.bf16 %v622_v26 }
 0x28d   : > { %v9933_v48 = vadd.f32 %v7516_v25, %v4297_v57  ;;  %7797 = vmatpush3.bf16.msra.mxu0 %v1513_v44  ;;  %v618_v49 = vld [vmem:[%s9427_s8 + $0x8d8] sm:$0xff]  ;;  %v9955_v25 = vrot.slane %v9949_v35, %v9458_v38 }
 0x28e   : > { %7819 = vmatpush3.bf16.msra.mxu1 %v1529_v51  ;;  %7798 = vmatprep.subr.bf16.mxu0 %v1522_v16  ;;  %v1561_v54 = vunpack.c.l.s8.bf16 %v618_v49 }
 0x28f   : > { %7820 = vmatprep.subr.bf16.mxu1 %v1538_v47  ;;  %v1545_v47 = vunpack.c.l.s8.bf16 %v610_v19  ;;  %v2814_v55 = vcombine.high %v9955_v25, %v9955_v25 }
 0x291   : > { %7799 = vmatpush3.bf16.msra.mxu0 %v1514_v61 }
 0x292   : > { %7821 = vmatpush3.bf16.msra.mxu1 %v1530_v62  ;;  %7828 = vmatprep.subr.bf16.mxu0 %v1547_v7  ;;  %v627_v62 = vld [vmem:[%s9427_s8 + $0x920] sm:$0xff] }
 0x293   : > { %7850 = vmatprep.subr.bf16.mxu1 %v1563_v63  ;;  %v635_v7 = vld [vmem:[%s9427_s8 + $0x960] sm:$0xff]  ;;  %v2780_v63 = vrot.slane %v9924_v39, %v9458_v38 }
 0x294   : > { %4855 = vmatmul.mubr.bf16.vlgmr.msra.gmra.mrb[64].mxu0 %v2773_v60 }
 0x295   : > { %4895 = vmatmul.mubr.bf16.vlgmr.msra.gmra.mrb[64].mxu1 %v2795_v56  ;;  %7829 = vmatpush3.bf16.msra.mxu0 %v1539_v11  ;;  %v1562_v56 = vunpack.c.h.s8.bf16 %v618_v49  ;;  %v1579_v11 = vunpack.c.l.s8.bf16 %v627_v62  ;;  %v2796_v10 = vcombine.high %v2780_v63, %v2780_v63 }
 0x296   : > { %7851 = vmatpush3.bf16.msra.mxu1 %v1555_v4  ;;  %7830 = vmatprep.subr.bf16.mxu0 %v1548_v5  ;;  %v1595_v4 = vunpack.c.l.s8.bf16 %v635_v7  ;;  %v631_v5 = vld [vmem:[%s9427_s8 + $0x940] sm:$0xff] }
 0x297   : > { %7852 = vmatprep.subr.bf16.mxu1 %v1564_v9  ;;  %4934 = vmatprep.mubr.bf16.mxu0 %v2794_v3  ;;  %v1546_v3 = vunpack.c.h.s8.bf16 %v610_v19  ;;  %v2836_v9 = vrot.slane %v2814_v55, %v9458_v38  ;;  %v1587_v8 = vunpack.c.l.s8.bf16 %v631_v5  ;;  %v1588_v21 = vunpack.c.h.s8.bf16 %v631_v5  ;;  %v638_v19 = vld [vmem:[%s9427_s8 + $0x978] sm:$0xff] }
 0x298   : > { %4974 = vmatprep.mubr.bf16.mxu1 %v2798_v58  ;;  %v1580_v58 = vunpack.c.h.s8.bf16 %v627_v62  ;;  %v1602_v55 = vunpack.c.h.s8.bf16 %v638_v19 }
 0x299   : > { %7831 = vmatpush3.bf16.msra.mxu0 %v1540_v13  ;;  %v1596_v13 = vunpack.c.h.s8.bf16 %v635_v7  ;;  %v2846_v18 = vcombine.high %v2836_v9, %v2836_v9 }
 0x29a   : > { %7853 = vmatpush3.bf16.msra.mxu1 %v1556_v14  ;;  %7832 = vmatprep.subr.bf16.mxu0 %v1549_v17  ;;  %v628_v14 = vld [vmem:[%s9427_s8 + $0x928] sm:$0xff] }
 0x29b   : > { %7854 = vmatprep.subr.bf16.mxu1 %v1565_v20  ;;  %v636_v17 = vld [vmem:[%s9427_s8 + $0x968] sm:$0xff] }
 0x29d   : > { %7833 = vmatpush3.bf16.msra.mxu0 %v1541_v22  ;;  %v1581_v22 = vunpack.c.l.s8.bf16 %v628_v14 }
 0x29e   : > { %7855 = vmatpush3.bf16.msra.mxu1 %v1557_v1  ;;  %7834 = vmatprep.subr.bf16.mxu0 %v1550_v24  ;;  %v624_v1 = vld [vmem:[%s9427_s8 + $0x908] sm:$0xff]  ;;  %v1597_v24 = vunpack.c.l.s8.bf16 %v636_v17 }
 0x29f   : > { %7856 = vmatprep.subr.bf16.mxu1 %v1566_v15  ;;  %v632_v15 = vld [vmem:[%s9427_s8 + $0x948] sm:$0xff]  ;;  %v1573_v28 = vunpack.c.l.s8.bf16 %v624_v1 }
 0x2a0   : > { %v1589_v29 = vunpack.c.l.s8.bf16 %v632_v15  ;;  %v1590_v23 = vunpack.c.h.s8.bf16 %v632_v15 }
 0x2a1   : > { %7835 = vmatpush3.bf16.msra.mxu0 %v1542_v30  ;;  %v1582_v30 = vunpack.c.h.s8.bf16 %v628_v14 }
 0x2a2   : > { %7857 = vmatpush3.bf16.msra.mxu1 %v1558_v32  ;;  %7836 = vmatprep.subr.bf16.mxu0 %v1551_v33  ;;  %v1598_v32 = vunpack.c.h.s8.bf16 %v636_v17  ;;  %v629_v33 = vld [vmem:[%s9427_s8 + $0x930] sm:$0xff] }
 0x2a3   : > { %7858 = vmatprep.subr.bf16.mxu1 %v1567_v34  ;;  %v1574_v34 = vunpack.c.h.s8.bf16 %v624_v1 }
 0x2a5   : > { %7837 = vmatpush3.bf16.msra.mxu0 %v1543_v36  ;;  %v1583_v36 = vunpack.c.l.s8.bf16 %v629_v33 }
 0x2a6   : > { %7859 = vmatpush3.bf16.msra.mxu1 %v1559_v6  ;;  %7838 = vmatprep.subr.bf16.mxu0 %v1552_v37  ;;  %v625_v6 = vld [vmem:[%s9427_s8 + $0x910] sm:$0xff]  ;;  %v1599_v37 = vunpack.c.l.s8.bf16 %v637_v12 }
 0x2a7   : > { %7860 = vmatprep.subr.bf16.mxu1 %v1568_v42  ;;  %v7536_v50 = vpop.f32.mrb[40].mxu0  ;;  %v633_v42 = vld [vmem:[%s9427_s8 + $0x950] sm:$0xff]  ;;  %v1575_v43 = vunpack.c.l.s8.bf16 %v625_v6  ;;  %v1576_v49 = vunpack.c.h.s8.bf16 %v625_v6 }
 0x2a8   : > { %v7558_v27 = vpop.f32.mrb[40].mxu1  ;;  %v7537_v44 = vpop.f32.mrb[41].mxu0  ;;  %v1591_v26 = vunpack.c.l.s8.bf16 %v633_v42  ;;  %v653_v6 = vld [vmem:[%s9427_s8 + $0x9f0] sm:$0xff] }
 0x2a9   : > { %v7559_v51 = vpop.f32.mrb[41].mxu1  ;;  %v7538_v40 = vadd.f32 %v7537_v44, %v7536_v50  ;;  %v7539_v53 = vpop.f32.mrb[42].mxu0  ;;  %7839 = vmatpush3.bf16.msra.mxu0 %v1544_v41  ;;  %v1584_v41 = vunpack.c.h.s8.bf16 %v629_v33  ;;  %v1592_v50 = vunpack.c.h.s8.bf16 %v633_v42  ;;  %v626_v44 = vld [vmem:[%s9427_s8 + $0x918] sm:$0xff] }
 0x2aa   : > { %v7560_v16 = vadd.f32 %v7559_v51, %v7558_v27  ;;  %7861 = vmatpush3.bf16.msra.mxu1 %v1560_v31  ;;  %v7561_v57 = vpop.f32.mrb[42].mxu1  ;;  %v7540_v59 = vpop.f32.mrb[43].mxu0  ;;  %7840 = vmatprep.subr.bf16.mxu0 %v1553_v45  ;;  %v1600_v31 = vunpack.c.h.s8.bf16 %v637_v12  ;;  %v630_v45 = vld [vmem:[%s9427_s8 + $0x938] sm:$0xff]  ;;  %v1601_v51 = vunpack.c.l.s8.bf16 %v638_v19 }
 0x2ab   : > { %7862 = vmatprep.subr.bf16.mxu1 %v1569_v46  ;;  %v7562_v60 = vpop.f32.mrb[43].mxu1  ;;  %v4377_v61 = vadd.f32 %v7538_v40, %v9933_v48  ;;  %v623_v48 = vld [vmem:[%s9427_s8 + $0x900] sm:$0xff]  ;;  %v2799_v46 = vcombine.high %v9949_v35, %v9949_v35  ;;  %v1585_v27 = vunpack.c.l.s8.bf16 %v630_v45  ;;  %v634_v40 = vld [vmem:[%s9427_s8 + $0x958] sm:$0xff]  ;;  %v1586_v7 = vunpack.c.h.s8.bf16 %v630_v45 }
 0x2ac   : > { %v1571_v39 = vunpack.c.l.s8.bf16 %v623_v48  ;;  %v1572_v20 = vunpack.c.h.s8.bf16 %v623_v48  ;;  %v1593_v60 = vunpack.c.l.s8.bf16 %v634_v40 }
 0x2ad   : > { %v9964_v0 = vadd.f32 %v7560_v16, %v4377_v61  ;;  %7841 = vmatpush3.bf16.msra.mxu0 %v1545_v47  ;;  %v9984_v47 = vrot.slane %v2799_v46, %v9458_v38 }
 0x2ae   : > { %7863 = vmatpush3.bf16.msra.mxu1 %v1561_v54  ;;  %7842 = vmatprep.subr.bf16.mxu0 %v1554_v2 }
 0x2af   : > { %7864 = vmatprep.subr.bf16.mxu1 %v1570_v52  ;;  %v1577_v52 = vunpack.c.l.s8.bf16 %v626_v44  ;;  %v2815_v48 = vcombine.high %v9984_v47, %v9984_v47 }
 0x2b1   : > { %7843 = vmatpush3.bf16.msra.mxu0 %v1546_v3 }
 0x2b2   : > { %7865 = vmatpush3.bf16.msra.mxu1 %v1562_v56  ;;  %7872 = vmatprep.subr.bf16.mxu0 %v1579_v11  ;;  %v643_v56 = vld [vmem:[%s9427_s8 + $0x9a0] sm:$0xff] }
 0x2b3   : > { %7894 = vmatprep.subr.bf16.mxu1 %v1595_v4  ;;  %v651_v11 = vld [vmem:[%s9427_s8 + $0x9e0] sm:$0xff]  ;;  %v2822_v4 = vrot.slane %v9955_v25, %v9458_v38 }
 0x2b4   : > { %4935 = vmatmul.mubr.bf16.vlgmr.msra.gmra.mrb[68].mxu0 %v2780_v63 }
 0x2b5   : > { %4975 = vmatmul.mubr.bf16.vlgmr.msra.gmra.mrb[68].mxu1 %v2796_v10  ;;  %7873 = vmatpush3.bf16.msra.mxu0 %v1571_v39  ;;  %v1594_v10 = vunpack.c.h.s8.bf16 %v634_v40  ;;  %v1611_v39 = vunpack.c.l.s8.bf16 %v643_v56  ;;  %v2844_v14 = vcombine.high %v2822_v4, %v2822_v4 }
 0x2b6   : > { %7895 = vmatpush3.bf16.msra.mxu1 %v1587_v8  ;;  %7874 = vmatprep.subr.bf16.mxu0 %v1580_v58  ;;  %v1627_v8 = vunpack.c.l.s8.bf16 %v651_v11  ;;  %v647_v58 = vld [vmem:[%s9427_s8 + $0x9c0] sm:$0xff] }
 0x2b7   : > { %7896 = vmatprep.subr.bf16.mxu1 %v1596_v13  ;;  %5014 = vmatprep.mubr.bf16.mxu0 %v2836_v9  ;;  %v1578_v9 = vunpack.c.h.s8.bf16 %v626_v44  ;;  %v2843_v13 = vrot.slane %v2815_v48, %v9458_v38  ;;  %v1619_v17 = vunpack.c.l.s8.bf16 %v647_v58  ;;  %v1620_v15 = vunpack.c.h.s8.bf16 %v647_v58  ;;  %v10009_v44 = vld [vmem:[%s9441_s25 + $0x50] sm:$0xff] }
 0x2b8   : > { %5054 = vmatprep.mubr.bf16.mxu1 %v2846_v18  ;;  %v1612_v18 = vunpack.c.h.s8.bf16 %v643_v56 }
 0x2b9   : > { %7875 = vmatpush3.bf16.msra.mxu0 %v1572_v20  ;;  %v1628_v20 = vunpack.c.h.s8.bf16 %v651_v11  ;;  %v2847_v1 = vcombine.high %v2843_v13, %v2843_v13 }
 0x2ba   : > { %7897 = vmatpush3.bf16.msra.mxu1 %v1588_v21  ;;  %7876 = vmatprep.subr.bf16.mxu0 %v1581_v22  ;;  %v644_v21 = vld [vmem:[%s9427_s8 + $0x9a8] sm:$0xff] }
 0x2bb   : > { %7898 = vmatprep.subr.bf16.mxu1 %v1597_v24  ;;  %v652_v22 = vld [vmem:[%s9427_s8 + $0x9e8] sm:$0xff] }
 0x2bd   : > { %7877 = vmatpush3.bf16.msra.mxu0 %v1573_v28  ;;  %v1613_v28 = vunpack.c.l.s8.bf16 %v644_v21 }
 0x2be   : > { %7899 = vmatpush3.bf16.msra.mxu1 %v1589_v29  ;;  %7878 = vmatprep.subr.bf16.mxu0 %v1582_v30  ;;  %v640_v29 = vld [vmem:[%s9427_s8 + $0x988] sm:$0xff]  ;;  %v1629_v30 = vunpack.c.l.s8.bf16 %v652_v22 }
 0x2bf   : > { %7900 = vmatprep.subr.bf16.mxu1 %v1598_v32  ;;  %v648_v32 = vld [vmem:[%s9427_s8 + $0x9c8] sm:$0xff]  ;;  %v1605_v33 = vunpack.c.l.s8.bf16 %v640_v29 }
 0x2c0   : > { %v1621_v12 = vunpack.c.l.s8.bf16 %v648_v32  ;;  %v1622_v42 = vunpack.c.h.s8.bf16 %v648_v32 }
 0x2c1   : > { %7879 = vmatpush3.bf16.msra.mxu0 %v1574_v34  ;;  %v1614_v34 = vunpack.c.h.s8.bf16 %v644_v21 }
 0x2c2   : > { %7901 = vmatpush3.bf16.msra.mxu1 %v1590_v23  ;;  %7880 = vmatprep.subr.bf16.mxu0 %v1583_v36  ;;  %v1630_v23 = vunpack.c.h.s8.bf16 %v652_v22  ;;  %v645_v36 = vld [vmem:[%s9427_s8 + $0x9b0] sm:$0xff] }
 0x2c3   : > { %7902 = vmatprep.subr.bf16.mxu1 %v1599_v37  ;;  %v1606_v37 = vunpack.c.h.s8.bf16 %v640_v29  ;;  %v1616_v46 = vunpack.c.h.s8.bf16 %v645_v36 }
 0x2c5   : > { %7881 = vmatpush3.bf16.msra.mxu0 %v1575_v43  ;;  %v1615_v43 = vunpack.c.l.s8.bf16 %v645_v36 }
 0x2c6   : > { %7903 = vmatpush3.bf16.msra.mxu1 %v1591_v26  ;;  %7882 = vmatprep.subr.bf16.mxu0 %v1584_v41  ;;  %v641_v26 = vld [vmem:[%s9427_s8 + $0x990] sm:$0xff]  ;;  %v1631_v41 = vunpack.c.l.s8.bf16 %v653_v6 }
 0x2c7   : > { %7904 = vmatprep.subr.bf16.mxu1 %v1600_v31  ;;  %v7580_v53 = vpop.f32.mrb[44].mxu0  ;;  %v649_v31 = vld [vmem:[%s9427_s8 + $0x9d0] sm:$0xff]  ;;  %v1607_v45 = vunpack.c.l.s8.bf16 %v641_v26 }
 0x2c8   : > { %v7602_v16 = vpop.f32.mrb[44].mxu1  ;;  %v7581_v54 = vpop.f32.mrb[45].mxu0  ;;  %v1623_v19 = vunpack.c.l.s8.bf16 %v649_v31  ;;  %v1624_v40 = vunpack.c.h.s8.bf16 %v649_v31 }
 0x2c9   : > { %v7603_v57 = vpop.f32.mrb[45].mxu1  ;;  %v7582_v59 = vadd.f32 %v7581_v54, %v7580_v53  ;;  %v7583_v35 = vpop.f32.mrb[46].mxu0  ;;  %7883 = vmatpush3.bf16.msra.mxu0 %v1576_v49  ;;  %v1632_v49 = vunpack.c.h.s8.bf16 %v653_v6 }
 0x2ca   : > { %v7604_v2 = vadd.f32 %v7603_v57, %v7602_v16  ;;  %7905 = vmatpush3.bf16.msra.mxu1 %v1592_v50  ;;  %v7605_v61 = vpop.f32.mrb[46].mxu1  ;;  %v7584_v62 = vpop.f32.mrb[47].mxu0  ;;  %7884 = vmatprep.subr.bf16.mxu0 %v1585_v27  ;;  %v646_v50 = vld [vmem:[%s9427_s8 + $0x9b8] sm:$0xff] }
 0x2cb   : > { %7906 = vmatprep.subr.bf16.mxu1 %v1601_v51  ;;  %v7606_v63 = vpop.f32.mrb[47].mxu1  ;;  %v4457_v3 = vadd.f32 %v7582_v59, %v9964_v0  ;;  %v639_v0 = vld [vmem:[%s9427_s8 + $0x980] sm:$0xff]  ;;  %v654_v27 = vld [vmem:[%s9427_s8 + $0x9f8] sm:$0xff]  ;;  %v1608_v51 = vunpack.c.h.s8.bf16 %v641_v26  ;;  %v1617_v53 = vunpack.c.l.s8.bf16 %v646_v50  ;;  %v1618_v11 = vunpack.c.h.s8.bf16 %v646_v50  ;;  %v669_v26 = vld [vmem:[%s9427_s8 + $0xa70] sm:$0xff] }
 0x2cc   : > { %v1603_v25 = vunpack.c.l.s8.bf16 %v639_v0  ;;  %v1604_v24 = vunpack.c.h.s8.bf16 %v639_v0  ;;  %v642_v16 = vld [vmem:[%s9427_s8 + $0x998] sm:$0xff]  ;;  %v1633_v54 = vunpack.c.l.s8.bf16 %v654_v27  ;;  %v1634_v48 = vunpack.c.h.s8.bf16 %v654_v27 }
 0x2cd   : > { %v9993_v5 = vadd.f32 %v7604_v2, %v4457_v3  ;;  %7885 = vmatpush3.bf16.msra.mxu0 %v1577_v52  ;;  %v650_v57 = vld [vmem:[%s9427_s8 + $0x9d8] sm:$0xff]  ;;  %v10015_v2 = vrot.slane %v10009_v44, %v9458_v38 }
 0x2ce   : > { %7907 = vmatpush3.bf16.msra.mxu1 %v1593_v60  ;;  %7886 = vmatprep.subr.bf16.mxu0 %v1586_v7  ;;  %v1625_v63 = vunpack.c.l.s8.bf16 %v650_v57 }
 0x2cf   : > { %7908 = vmatprep.subr.bf16.mxu1 %v1602_v55  ;;  %v1609_v55 = vunpack.c.l.s8.bf16 %v642_v16  ;;  %v2863_v0 = vcombine.high %v10015_v2, %v10015_v2 }
 0x2d1   : > { %7887 = vmatpush3.bf16.msra.mxu0 %v1578_v9 }
 0x2d2   : > { %7909 = vmatpush3.bf16.msra.mxu1 %v1594_v10  ;;  %7916 = vmatprep.subr.bf16.mxu0 %v1611_v39  ;;  %v659_v10 = vld [vmem:[%s9427_s8 + $0xa20] sm:$0xff] }
 0x2d3   : > { %7938 = vmatprep.subr.bf16.mxu1 %v1627_v8  ;;  %v667_v39 = vld [vmem:[%s9427_s8 + $0xa60] sm:$0xff]  ;;  %v2829_v8 = vrot.slane %v9984_v47, %v9458_v38 }
 0x2d4   : > { %5015 = vmatmul.mubr.bf16.vlgmr.msra.gmra.mrb[72].mxu0 %v2822_v4 }
 0x2d5   : > { %5055 = vmatmul.mubr.bf16.vlgmr.msra.gmra.mrb[72].mxu1 %v2844_v14  ;;  %7917 = vmatpush3.bf16.msra.mxu0 %v1603_v25  ;;  %v1626_v14 = vunpack.c.h.s8.bf16 %v650_v57  ;;  %v1643_v25 = vunpack.c.l.s8.bf16 %v659_v10  ;;  %v2845_v21 = vcombine.high %v2829_v8, %v2829_v8 }
 0x2d6   : > { %7939 = vmatpush3.bf16.msra.mxu1 %v1619_v17  ;;  %7918 = vmatprep.subr.bf16.mxu0 %v1612_v18  ;;  %v1659_v17 = vunpack.c.l.s8.bf16 %v667_v39  ;;  %v663_v18 = vld [vmem:[%s9427_s8 + $0xa40] sm:$0xff] }
 0x2d7   : > { %7940 = vmatprep.subr.bf16.mxu1 %v1628_v20  ;;  %5094 = vmatprep.mubr.bf16.mxu0 %v2843_v13  ;;  %v1610_v13 = vunpack.c.h.s8.bf16 %v642_v16  ;;  %v2885_v20 = vrot.slane %v2863_v0, %v9458_v38  ;;  %v1651_v22 = vunpack.c.l.s8.bf16 %v663_v18  ;;  %v1652_v32 = vunpack.c.h.s8.bf16 %v663_v18  ;;  %v670_v16 = vld [vmem:[%s9427_s8 + $0xa78] sm:$0xff] }
 0x2d8   : > { %5134 = vmatprep.mubr.bf16.mxu1 %v2847_v1  ;;  %v1644_v1 = vunpack.c.h.s8.bf16 %v659_v10  ;;  %v1666_v0 = vunpack.c.h.s8.bf16 %v670_v16 }
 0x2d9   : > { %7919 = vmatpush3.bf16.msra.mxu0 %v1604_v24  ;;  %v1660_v24 = vunpack.c.h.s8.bf16 %v667_v39  ;;  %v2895_v29 = vcombine.high %v2885_v20, %v2885_v20 }
 0x2da   : > { %7941 = vmatpush3.bf16.msra.mxu1 %v1620_v15  ;;  %7920 = vmatprep.subr.bf16.mxu0 %v1613_v28  ;;  %v660_v15 = vld [vmem:[%s9427_s8 + $0xa28] sm:$0xff] }
 0x2db   : > { %7942 = vmatprep.subr.bf16.mxu1 %v1629_v30  ;;  %v668_v28 = vld [vmem:[%s9427_s8 + $0xa68] sm:$0xff] }
 0x2dd   : > { %7921 = vmatpush3.bf16.msra.mxu0 %v1605_v33  ;;  %v1645_v33 = vunpack.c.l.s8.bf16 %v660_v15 }
 0x2de   : > { %7943 = vmatpush3.bf16.msra.mxu1 %v1621_v12  ;;  %7922 = vmatprep.subr.bf16.mxu0 %v1614_v34  ;;  %v656_v12 = vld [vmem:[%s9427_s8 + $0xa08] sm:$0xff]  ;;  %v1661_v34 = vunpack.c.l.s8.bf16 %v668_v28 }
 0x2df   : > { %7944 = vmatprep.subr.bf16.mxu1 %v1630_v23  ;;  %v664_v23 = vld [vmem:[%s9427_s8 + $0xa48] sm:$0xff]  ;;  %v1637_v36 = vunpack.c.l.s8.bf16 %v656_v12 }
 0x2e0   : > { %v1653_v6 = vunpack.c.l.s8.bf16 %v664_v23  ;;  %v1654_v31 = vunpack.c.h.s8.bf16 %v664_v23 }
 0x2e1   : > { %7923 = vmatpush3.bf16.msra.mxu0 %v1606_v37  ;;  %v1646_v37 = vunpack.c.h.s8.bf16 %v660_v15 }
 0x2e2   : > { %7945 = vmatpush3.bf16.msra.mxu1 %v1622_v42  ;;  %7924 = vmatprep.subr.bf16.mxu0 %v1615_v43  ;;  %v1662_v42 = vunpack.c.h.s8.bf16 %v668_v28  ;;  %v661_v43 = vld [vmem:[%s9427_s8 + $0xa30] sm:$0xff] }
 0x2e3   : > { %7946 = vmatprep.subr.bf16.mxu1 %v1631_v41  ;;  %v1638_v41 = vunpack.c.h.s8.bf16 %v656_v12 }
 0x2e5   : > { %7925 = vmatpush3.bf16.msra.mxu0 %v1607_v45  ;;  %v1647_v45 = vunpack.c.l.s8.bf16 %v661_v43 }
 0x2e6   : > { %7947 = vmatpush3.bf16.msra.mxu1 %v1623_v19  ;;  %7926 = vmatprep.subr.bf16.mxu0 %v1616_v46  ;;  %v657_v19 = vld [vmem:[%s9427_s8 + $0xa10] sm:$0xff]  ;;  %v1663_v46 = vunpack.c.l.s8.bf16 %v669_v26 }
 0x2e7   : > { %7948 = vmatprep.subr.bf16.mxu1 %v1632_v49  ;;  %v7624_v59 = vpop.f32.mrb[48].mxu0  ;;  %v665_v49 = vld [vmem:[%s9427_s8 + $0xa50] sm:$0xff]  ;;  %v1639_v50 = vunpack.c.l.s8.bf16 %v657_v19  ;;  %v1640_v57 = vunpack.c.h.s8.bf16 %v657_v19 }
 0x2e8   : > { %v7646_v35 = vpop.f32.mrb[48].mxu1  ;;  %v7625_v52 = vpop.f32.mrb[49].mxu0  ;;  %v1655_v27 = vunpack.c.l.s8.bf16 %v665_v49  ;;  %v685_v19 = vld [vmem:[%s9427_s8 + $0xaf0] sm:$0xff] }
 0x2e9   : > { %v7647_v60 = vpop.f32.mrb[49].mxu1  ;;  %v7626_v61 = vadd.f32 %v7625_v52, %v7624_v59  ;;  %v7627_v62 = vpop.f32.mrb[50].mxu0  ;;  %7927 = vmatpush3.bf16.msra.mxu0 %v1608_v51  ;;  %v1648_v51 = vunpack.c.h.s8.bf16 %v661_v43  ;;  %v1656_v59 = vunpack.c.h.s8.bf16 %v665_v49  ;;  %v658_v52 = vld [vmem:[%s9427_s8 + $0xa18] sm:$0xff] }
 0x2ea   : > { %v7648_v7 = vadd.f32 %v7647_v60, %v7646_v35  ;;  %7949 = vmatpush3.bf16.msra.mxu1 %v1624_v40  ;;  %v7649_v3 = vpop.f32.mrb[50].mxu1  ;;  %v7628_v56 = vpop.f32.mrb[51].mxu0  ;;  %7928 = vmatprep.subr.bf16.mxu0 %v1617_v53  ;;  %v1664_v40 = vunpack.c.h.s8.bf16 %v669_v26  ;;  %v662_v53 = vld [vmem:[%s9427_s8 + $0xa38] sm:$0xff]  ;;  %v1665_v60 = vunpack.c.l.s8.bf16 %v670_v16 }
 0x2eb   : > { %7950 = vmatprep.subr.bf16.mxu1 %v1633_v54  ;;  %v7650_v4 = vpop.f32.mrb[51].mxu1  ;;  %v4537_v9 = vadd.f32 %v7626_v61, %v9993_v5  ;;  %v655_v5 = vld [vmem:[%s9427_s8 + $0xa00] sm:$0xff]  ;;  %v2848_v54 = vcombine.high %v10009_v44, %v10009_v44  ;;  %v1649_v35 = vunpack.c.l.s8.bf16 %v662_v53  ;;  %v666_v61 = vld [vmem:[%s9427_s8 + $0xa58] sm:$0xff]  ;;  %v1650_v39 = vunpack.c.h.s8.bf16 %v662_v53 }
 0x2ec   : > { %v1635_v47 = vunpack.c.l.s8.bf16 %v655_v5  ;;  %v1636_v30 = vunpack.c.h.s8.bf16 %v655_v5  ;;  %v1657_v4 = vunpack.c.l.s8.bf16 %v666_v61 }
 0x2ed   : > { %v10024_v58 = vadd.f32 %v7648_v7, %v4537_v9  ;;  %7929 = vmatpush3.bf16.msra.mxu0 %v1609_v55  ;;  %v10044_v55 = vrot.slane %v2848_v54, %v9458_v38 }
 0x2ee   : > { %7951 = vmatpush3.bf16.msra.mxu1 %v1625_v63  ;;  %7930 = vmatprep.subr.bf16.mxu0 %v1618_v11 }
 0x2ef   : > { %7952 = vmatprep.subr.bf16.mxu1 %v1634_v48  ;;  %v1641_v48 = vunpack.c.l.s8.bf16 %v658_v52  ;;  %v2864_v5 = vcombine.high %v10044_v55, %v10044_v55 }
 0x2f1   : > { %7931 = vmatpush3.bf16.msra.mxu0 %v1610_v13 }
 0x2f2   : > { %7953 = vmatpush3.bf16.msra.mxu1 %v1626_v14  ;;  %7960 = vmatprep.subr.bf16.mxu0 %v1643_v25  ;;  %v675_v14 = vld [vmem:[%s9427_s8 + $0xaa0] sm:$0xff] }
 0x2f3   : > { %7982 = vmatprep.subr.bf16.mxu1 %v1659_v17  ;;  %v683_v25 = vld [vmem:[%s9427_s8 + $0xae0] sm:$0xff]  ;;  %v2871_v17 = vrot.slane %v10015_v2, %v9458_v38 }
 0x2f4   : > { %5095 = vmatmul.mubr.bf16.vlgmr.msra.gmra.mrb[76].mxu0 %v2829_v8 }
 0x2f5   : > { %5135 = vmatmul.mubr.bf16.vlgmr.msra.gmra.mrb[76].mxu1 %v2845_v21  ;;  %7961 = vmatpush3.bf16.msra.mxu0 %v1635_v47  ;;  %v1658_v21 = vunpack.c.h.s8.bf16 %v666_v61  ;;  %v1675_v47 = vunpack.c.l.s8.bf16 %v675_v14  ;;  %v2893_v15 = vcombine.high %v2871_v17, %v2871_v17 }
 0x2f6   : > { %7983 = vmatpush3.bf16.msra.mxu1 %v1651_v22  ;;  %7962 = vmatprep.subr.bf16.mxu0 %v1644_v1  ;;  %v1691_v22 = vunpack.c.l.s8.bf16 %v683_v25  ;;  %v679_v1 = vld [vmem:[%s9427_s8 + $0xac0] sm:$0xff] }
 0x2f7   : > { %7984 = vmatprep.subr.bf16.mxu1 %v1660_v24  ;;  %5174 = vmatprep.mubr.bf16.mxu0 %v2885_v20  ;;  %v1642_v20 = vunpack.c.h.s8.bf16 %v658_v52  ;;  %v2892_v24 = vrot.slane %v2864_v5, %v9458_v38  ;;  %v1683_v28 = vunpack.c.l.s8.bf16 %v679_v1  ;;  %v1684_v23 = vunpack.c.h.s8.bf16 %v679_v1  ;;  %v10069_v52 = vld [vmem:[%s9441_s25 + $0x58] sm:$0xff] }
 0x2f8   : > { %5214 = vmatprep.mubr.bf16.mxu1 %v2895_v29  ;;  %v1676_v29 = vunpack.c.h.s8.bf16 %v675_v14 }
 0x2f9   : > { %7963 = vmatpush3.bf16.msra.mxu0 %v1636_v30  ;;  %v1692_v30 = vunpack.c.h.s8.bf16 %v683_v25  ;;  %v2896_v12 = vcombine.high %v2892_v24, %v2892_v24 }
 0x2fa   : > { %7985 = vmatpush3.bf16.msra.mxu1 %v1652_v32  ;;  %7964 = vmatprep.subr.bf16.mxu0 %v1645_v33  ;;  %v676_v32 = vld [vmem:[%s9427_s8 + $0xaa8] sm:$0xff] }
 0x2fb   : > { %7986 = vmatprep.subr.bf16.mxu1 %v1661_v34  ;;  %v684_v33 = vld [vmem:[%s9427_s8 + $0xae8] sm:$0xff] }
 0x2fd   : > { %7965 = vmatpush3.bf16.msra.mxu0 %v1637_v36  ;;  %v1677_v36 = vunpack.c.l.s8.bf16 %v676_v32 }
 0x2fe   : > { %7987 = vmatpush3.bf16.msra.mxu1 %v1653_v6  ;;  %7966 = vmatprep.subr.bf16.mxu0 %v1646_v37  ;;  %v672_v6 = vld [vmem:[%s9427_s8 + $0xa88] sm:$0xff]  ;;  %v1693_v37 = vunpack.c.l.s8.bf16 %v684_v33 }
 0x2ff   : > { %7988 = vmatprep.subr.bf16.mxu1 %v1662_v42  ;;  %v680_v42 = vld [vmem:[%s9427_s8 + $0xac8] sm:$0xff]  ;;  %v1669_v43 = vunpack.c.l.s8.bf16 %v672_v6 }
 0x300   : > { %v1685_v26 = vunpack.c.l.s8.bf16 %v680_v42  ;;  %v1686_v49 = vunpack.c.h.s8.bf16 %v680_v42 }
 0x301   : > { %7967 = vmatpush3.bf16.msra.mxu0 %v1638_v41  ;;  %v1678_v41 = vunpack.c.h.s8.bf16 %v676_v32 }
 0x302   : > { %7989 = vmatpush3.bf16.msra.mxu1 %v1654_v31  ;;  %7968 = vmatprep.subr.bf16.mxu0 %v1647_v45  ;;  %v1694_v31 = vunpack.c.h.s8.bf16 %v684_v33  ;;  %v677_v45 = vld [vmem:[%s9427_s8 + $0xab0] sm:$0xff] }
 0x303   : > { %7990 = vmatprep.subr.bf16.mxu1 %v1663_v46  ;;  %v1670_v46 = vunpack.c.h.s8.bf16 %v672_v6  ;;  %v1680_v54 = vunpack.c.h.s8.bf16 %v677_v45 }
 0x305   : > { %7969 = vmatpush3.bf16.msra.mxu0 %v1639_v50  ;;  %v1679_v50 = vunpack.c.l.s8.bf16 %v677_v45 }
 0x306   : > { %7991 = vmatpush3.bf16.msra.mxu1 %v1655_v27  ;;  %7970 = vmatprep.subr.bf16.mxu0 %v1648_v51  ;;  %v673_v27 = vld [vmem:[%s9427_s8 + $0xa90] sm:$0xff]  ;;  %v1695_v51 = vunpack.c.l.s8.bf16 %v685_v19 }
 0x307   : > { %7992 = vmatprep.subr.bf16.mxu1 %v1664_v40  ;;  %v7668_v62 = vpop.f32.mrb[52].mxu0  ;;  %v681_v40 = vld [vmem:[%s9427_s8 + $0xad0] sm:$0xff]  ;;  %v1671_v53 = vunpack.c.l.s8.bf16 %v673_v27 }
 0x308   : > { %v7690_v7 = vpop.f32.mrb[52].mxu1  ;;  %v7669_v63 = vpop.f32.mrb[53].mxu0  ;;  %v1687_v16 = vunpack.c.l.s8.bf16 %v681_v40  ;;  %v1688_v61 = vunpack.c.h.s8.bf16 %v681_v40 }
 0x309   : > { %v7691_v3 = vpop.f32.mrb[53].mxu1  ;;  %v7670_v56 = vadd.f32 %v7669_v63, %v7668_v62  ;;  %v7671_v44 = vpop.f32.mrb[54].mxu0  ;;  %7971 = vmatpush3.bf16.msra.mxu0 %v1640_v57  ;;  %v1696_v57 = vunpack.c.h.s8.bf16 %v685_v19 }
 0x30a   : > { %v7692_v11 = vadd.f32 %v7691_v3, %v7690_v7  ;;  %7993 = vmatpush3.bf16.msra.mxu1 %v1656_v59  ;;  %v7693_v9 = vpop.f32.mrb[54].mxu1  ;;  %v7672_v10 = vpop.f32.mrb[55].mxu0  ;;  %7972 = vmatprep.subr.bf16.mxu0 %v1649_v35  ;;  %v678_v59 = vld [vmem:[%s9427_s8 + $0xab8] sm:$0xff] }
 0x30b   : > { %7994 = vmatprep.subr.bf16.mxu1 %v1665_v60  ;;  %v7694_v8 = vpop.f32.mrb[55].mxu1  ;;  %v4617_v13 = vadd.f32 %v7670_v56, %v10024_v58  ;;  %v671_v58 = vld [vmem:[%s9427_s8 + $0xa80] sm:$0xff]  ;;  %v686_v35 = vld [vmem:[%s9427_s8 + $0xaf8] sm:$0xff]  ;;  %v1672_v60 = vunpack.c.h.s8.bf16 %v673_v27  ;;  %v1681_v62 = vunpack.c.l.s8.bf16 %v678_v59  ;;  %v1682_v25 = vunpack.c.h.s8.bf16 %v678_v59  ;;  %v701_v27 = vld [vmem:[%s9427_s8 + $0xb70] sm:$0xff] }
 0x30c   : > { %v1667_v2 = vunpack.c.l.s8.bf16 %v671_v58  ;;  %v1668_v34 = vunpack.c.h.s8.bf16 %v671_v58  ;;  %v674_v7 = vld [vmem:[%s9427_s8 + $0xa98] sm:$0xff]  ;;  %v1697_v63 = vunpack.c.l.s8.bf16 %v686_v35  ;;  %v1698_v5 = vunpack.c.h.s8.bf16 %v686_v35 }
 0x30d   : > { %v10053_v18 = vadd.f32 %v7692_v11, %v4617_v13  ;;  %7973 = vmatpush3.bf16.msra.mxu0 %v1641_v48  ;;  %v682_v3 = vld [vmem:[%s9427_s8 + $0xad8] sm:$0xff]  ;;  %v10075_v11 = vrot.slane %v10069_v52, %v9458_v38 }
 0x30e   : > { %7995 = vmatpush3.bf16.msra.mxu1 %v1657_v4  ;;  %7974 = vmatprep.subr.bf16.mxu0 %v1650_v39  ;;  %v1689_v8 = vunpack.c.l.s8.bf16 %v682_v3 }
 0x30f   : > { %7996 = vmatprep.subr.bf16.mxu1 %v1666_v0  ;;  %v1673_v0 = vunpack.c.l.s8.bf16 %v674_v7  ;;  %v2912_v58 = vcombine.high %v10075_v11, %v10075_v11 }
 0x311   : > { %7975 = vmatpush3.bf16.msra.mxu0 %v1642_v20 }
 0x312   : > { %7997 = vmatpush3.bf16.msra.mxu1 %v1658_v21  ;;  %8004 = vmatprep.subr.bf16.mxu0 %v1675_v47  ;;  %v691_v21 = vld [vmem:[%s9427_s8 + $0xb20] sm:$0xff] }
 0x313   : > { %8026 = vmatprep.subr.bf16.mxu1 %v1691_v22  ;;  %v699_v47 = vld [vmem:[%s9427_s8 + $0xb60] sm:$0xff]  ;;  %v2878_v22 = vrot.slane %v10044_v55, %v9458_v38 }
 0x314   : > { %5175 = vmatmul.mubr.bf16.vlgmr.msra.gmra.mrb[80].mxu0 %v2871_v17 }
 0x315   : > { %5215 = vmatmul.mubr.bf16.vlgmr.msra.gmra.mrb[80].mxu1 %v2893_v15  ;;  %8005 = vmatpush3.bf16.msra.mxu0 %v1667_v2  ;;  %v1690_v15 = vunpack.c.h.s8.bf16 %v682_v3  ;;  %v1707_v2 = vunpack.c.l.s8.bf16 %v691_v21  ;;  %v2894_v32 = vcombine.high %v2878_v22, %v2878_v22 }
 0x316   : > { %8027 = vmatpush3.bf16.msra.mxu1 %v1683_v28  ;;  %8006 = vmatprep.subr.bf16.mxu0 %v1676_v29  ;;  %v1723_v28 = vunpack.c.l.s8.bf16 %v699_v47  ;;  %v695_v29 = vld [vmem:[%s9427_s8 + $0xb40] sm:$0xff] }
 0x317   : > { %8028 = vmatprep.subr.bf16.mxu1 %v1692_v30  ;;  %5254 = vmatprep.mubr.bf16.mxu0 %v2892_v24  ;;  %v1674_v24 = vunpack.c.h.s8.bf16 %v674_v7  ;;  %v2934_v30 = vrot.slane %v2912_v58, %v9458_v38  ;;  %v1715_v33 = vunpack.c.l.s8.bf16 %v695_v29  ;;  %v1716_v42 = vunpack.c.h.s8.bf16 %v695_v29  ;;  %v702_v7 = vld [vmem:[%s9427_s8 + $0xb78] sm:$0xff] }
 0x318   : > { %5294 = vmatprep.mubr.bf16.mxu1 %v2896_v12  ;;  %v1708_v12 = vunpack.c.h.s8.bf16 %v691_v21  ;;  %v1730_v58 = vunpack.c.h.s8.bf16 %v702_v7 }
 0x319   : > { %8007 = vmatpush3.bf16.msra.mxu0 %v1668_v34  ;;  %v1724_v34 = vunpack.c.h.s8.bf16 %v699_v47  ;;  %v2944_v6 = vcombine.high %v2934_v30, %v2934_v30 }
 0x31a   : > { %8029 = vmatpush3.bf16.msra.mxu1 %v1684_v23  ;;  %8008 = vmatprep.subr.bf16.mxu0 %v1677_v36  ;;  %v692_v23 = vld [vmem:[%s9427_s8 + $0xb28] sm:$0xff] }
 0x31b   : > { %8030 = vmatprep.subr.bf16.mxu1 %v1693_v37  ;;  %v700_v36 = vld [vmem:[%s9427_s8 + $0xb68] sm:$0xff] }
 0x31d   : > { %8009 = vmatpush3.bf16.msra.mxu0 %v1669_v43  ;;  %v1709_v43 = vunpack.c.l.s8.bf16 %v692_v23 }
 0x31e   : > { %8031 = vmatpush3.bf16.msra.mxu1 %v1685_v26  ;;  %8010 = vmatprep.subr.bf16.mxu0 %v1678_v41  ;;  %v688_v26 = vld [vmem:[%s9427_s8 + $0xb08] sm:$0xff]  ;;  %v1725_v41 = vunpack.c.l.s8.bf16 %v700_v36 }
 0x31f   : > { %8032 = vmatprep.subr.bf16.mxu1 %v1694_v31  ;;  %v696_v31 = vld [vmem:[%s9427_s8 + $0xb48] sm:$0xff]  ;;  %v1701_v45 = vunpack.c.l.s8.bf16 %v688_v26 }
 0x320   : > { %v1717_v19 = vunpack.c.l.s8.bf16 %v696_v31  ;;  %v1718_v40 = vunpack.c.h.s8.bf16 %v696_v31 }
 0x321   : > { %8011 = vmatpush3.bf16.msra.mxu0 %v1670_v46  ;;  %v1710_v46 = vunpack.c.h.s8.bf16 %v692_v23 }
 0x322   : > { %8033 = vmatpush3.bf16.msra.mxu1 %v1686_v49  ;;  %8012 = vmatprep.subr.bf16.mxu0 %v1679_v50  ;;  %v1726_v49 = vunpack.c.h.s8.bf16 %v700_v36  ;;  %v693_v50 = vld [vmem:[%s9427_s8 + $0xb30] sm:$0xff] }
 0x323   : > { %8034 = vmatprep.subr.bf16.mxu1 %v1695_v51  ;;  %v1702_v51 = vunpack.c.h.s8.bf16 %v688_v26 }
 0x325   : > { %8013 = vmatpush3.bf16.msra.mxu0 %v1671_v53  ;;  %v1711_v53 = vunpack.c.l.s8.bf16 %v693_v50 }
 0x326   : > { %8035 = vmatpush3.bf16.msra.mxu1 %v1687_v16  ;;  %8014 = vmatprep.subr.bf16.mxu0 %v1680_v54  ;;  %v689_v16 = vld [vmem:[%s9427_s8 + $0xb10] sm:$0xff]  ;;  %v1727_v54 = vunpack.c.l.s8.bf16 %v701_v27 }
 0x327   : > { %8036 = vmatprep.subr.bf16.mxu1 %v1696_v57  ;;  %v7712_v56 = vpop.f32.mrb[56].mxu0  ;;  %v697_v57 = vld [vmem:[%s9427_s8 + $0xb50] sm:$0xff]  ;;  %v1703_v59 = vunpack.c.l.s8.bf16 %v689_v16  ;;  %v1704_v3 = vunpack.c.h.s8.bf16 %v689_v16 }
 0x328   : > { %v7734_v44 = vpop.f32.mrb[56].mxu1  ;;  %v7713_v48 = vpop.f32.mrb[57].mxu0  ;;  %v1719_v35 = vunpack.c.l.s8.bf16 %v697_v57  ;;  %v717_v16 = vld [vmem:[%s9427_s8 + $0xbf0] sm:$0xff] }
 0x329   : > { %v7735_v4 = vpop.f32.mrb[57].mxu1  ;;  %v7714_v9 = vadd.f32 %v7713_v48, %v7712_v56  ;;  %v7715_v10 = vpop.f32.mrb[58].mxu0  ;;  %8015 = vmatpush3.bf16.msra.mxu0 %v1672_v60  ;;  %v1712_v60 = vunpack.c.h.s8.bf16 %v693_v50  ;;  %v1720_v56 = vunpack.c.h.s8.bf16 %v697_v57  ;;  %v690_v48 = vld [vmem:[%s9427_s8 + $0xb18] sm:$0xff] }
 0x32a   : > { %v7736_v39 = vadd.f32 %v7735_v4, %v7734_v44  ;;  %8037 = vmatpush3.bf16.msra.mxu1 %v1688_v61  ;;  %v7737_v13 = vpop.f32.mrb[58].mxu1  ;;  %v7716_v14 = vpop.f32.mrb[59].mxu0  ;;  %8016 = vmatprep.subr.bf16.mxu0 %v1681_v62  ;;  %v1728_v61 = vunpack.c.h.s8.bf16 %v701_v27  ;;  %v694_v62 = vld [vmem:[%s9427_s8 + $0xb38] sm:$0xff]  ;;  %v1729_v4 = vunpack.c.l.s8.bf16 %v702_v7 }
 0x32b   : > { %8038 = vmatprep.subr.bf16.mxu1 %v1697_v63  ;;  %v7738_v17 = vpop.f32.mrb[59].mxu1  ;;  %v4697_v20 = vadd.f32 %v7714_v9, %v10053_v18  ;;  %v687_v18 = vld [vmem:[%s9427_s8 + $0xb00] sm:$0xff]  ;;  %v2897_v63 = vcombine.high %v10069_v52, %v10069_v52  ;;  %v1713_v44 = vunpack.c.l.s8.bf16 %v694_v62  ;;  %v698_v9 = vld [vmem:[%s9427_s8 + $0xb58] sm:$0xff]  ;;  %v1714_v47 = vunpack.c.h.s8.bf16 %v694_v62 }
 0x32c   : > { %v1699_v55 = vunpack.c.l.s8.bf16 %v687_v18  ;;  %v1700_v37 = vunpack.c.h.s8.bf16 %v687_v18  ;;  %v1721_v17 = vunpack.c.l.s8.bf16 %v698_v9 }
 0x32d   : > { %v10084_v1 = vadd.f32 %v7736_v39, %v4697_v20  ;;  %8017 = vmatpush3.bf16.msra.mxu0 %v1673_v0  ;;  %v10104_v0 = vrot.slane %v2897_v63, %v9458_v38 }
 0x32e   : > { %8039 = vmatpush3.bf16.msra.mxu1 %v1689_v8  ;;  %8018 = vmatprep.subr.bf16.mxu0 %v1682_v25 }
 0x32f   : > { %8040 = vmatprep.subr.bf16.mxu1 %v1698_v5  ;;  %v1705_v5 = vunpack.c.l.s8.bf16 %v690_v48  ;;  %v2913_v18 = vcombine.high %v10104_v0, %v10104_v0 }
 0x331   : > { %8019 = vmatpush3.bf16.msra.mxu0 %v1674_v24 }
 0x332   : > { %8041 = vmatpush3.bf16.msra.mxu1 %v1690_v15  ;;  %8048 = vmatprep.subr.bf16.mxu0 %v1707_v2  ;;  %v707_v15 = vld [vmem:[%s9427_s8 + $0xba0] sm:$0xff] }
 0x333   : > { %8070 = vmatprep.subr.bf16.mxu1 %v1723_v28  ;;  %v715_v2 = vld [vmem:[%s9427_s8 + $0xbe0] sm:$0xff]  ;;  %v2920_v28 = vrot.slane %v10075_v11, %v9458_v38 }
 0x334   : > { %5255 = vmatmul.mubr.bf16.vlgmr.msra.gmra.mrb[84].mxu0 %v2878_v22 }
 0x335   : > { %5295 = vmatmul.mubr.bf16.vlgmr.msra.gmra.mrb[84].mxu1 %v2894_v32  ;;  %8049 = vmatpush3.bf16.msra.mxu0 %v1699_v55  ;;  %v1722_v32 = vunpack.c.h.s8.bf16 %v698_v9  ;;  %v1739_v55 = vunpack.c.l.s8.bf16 %v707_v15  ;;  %v2942_v23 = vcombine.high %v2920_v28, %v2920_v28 }
 0x336   : > { %8071 = vmatpush3.bf16.msra.mxu1 %v1715_v33  ;;  %8050 = vmatprep.subr.bf16.mxu0 %v1708_v12  ;;  %v1755_v33 = vunpack.c.l.s8.bf16 %v715_v2  ;;  %v711_v12 = vld [vmem:[%s9427_s8 + $0xbc0] sm:$0xff] }
 0x337   : > { %8072 = vmatprep.subr.bf16.mxu1 %v1724_v34  ;;  %5334 = vmatprep.mubr.bf16.mxu0 %v2934_v30  ;;  %v1706_v30 = vunpack.c.h.s8.bf16 %v690_v48  ;;  %v2941_v34 = vrot.slane %v2913_v18, %v9458_v38  ;;  %v1747_v36 = vunpack.c.l.s8.bf16 %v711_v12  ;;  %v1748_v31 = vunpack.c.h.s8.bf16 %v711_v12  ;;  %v10129_v48 = vld [vmem:[%s9441_s25 + $0x60] sm:$0xff] }
 0x338   : > { %5374 = vmatprep.mubr.bf16.mxu1 %v2944_v6  ;;  %v1740_v6 = vunpack.c.h.s8.bf16 %v707_v15 }
 0x339   : > { %8051 = vmatpush3.bf16.msra.mxu0 %v1700_v37  ;;  %v1756_v37 = vunpack.c.h.s8.bf16 %v715_v2  ;;  %v2945_v26 = vcombine.high %v2941_v34, %v2941_v34 }
 0x33a   : > { %8073 = vmatpush3.bf16.msra.mxu1 %v1716_v42  ;;  %8052 = vmatprep.subr.bf16.mxu0 %v1709_v43  ;;  %v708_v42 = vld [vmem:[%s9427_s8 + $0xba8] sm:$0xff] }
 0x33b   : > { %8074 = vmatprep.subr.bf16.mxu1 %v1725_v41  ;;  %v716_v43 = vld [vmem:[%s9427_s8 + $0xbe8] sm:$0xff] }
 0x33d   : > { %8053 = vmatpush3.bf16.msra.mxu0 %v1701_v45  ;;  %v1741_v45 = vunpack.c.l.s8.bf16 %v708_v42 }
 0x33e   : > { %8075 = vmatpush3.bf16.msra.mxu1 %v1717_v19  ;;  %8054 = vmatprep.subr.bf16.mxu0 %v1710_v46  ;;  %v704_v19 = vld [vmem:[%s9427_s8 + $0xb88] sm:$0xff]  ;;  %v1757_v46 = vunpack.c.l.s8.bf16 %v716_v43 }
 0x33f   : > { %8076 = vmatprep.subr.bf16.mxu1 %v1726_v49  ;;  %v712_v49 = vld [vmem:[%s9427_s8 + $0xbc8] sm:$0xff]  ;;  %v1733_v50 = vunpack.c.l.s8.bf16 %v704_v19 }
 0x340   : > { %v1749_v27 = vunpack.c.l.s8.bf16 %v712_v49  ;;  %v1750_v57 = vunpack.c.h.s8.bf16 %v712_v49 }
 0x341   : > { %8055 = vmatpush3.bf16.msra.mxu0 %v1702_v51  ;;  %v1742_v51 = vunpack.c.h.s8.bf16 %v708_v42 }
 0x342   : > { %8077 = vmatpush3.bf16.msra.mxu1 %v1718_v40  ;;  %8056 = vmatprep.subr.bf16.mxu0 %v1711_v53  ;;  %v1758_v40 = vunpack.c.h.s8.bf16 %v716_v43  ;;  %v709_v53 = vld [vmem:[%s9427_s8 + $0xbb0] sm:$0xff] }
 0x343   : > { %8078 = vmatprep.subr.bf16.mxu1 %v1727_v54  ;;  %v1734_v54 = vunpack.c.h.s8.bf16 %v704_v19  ;;  %v1744_v63 = vunpack.c.h.s8.bf16 %v709_v53 }
 0x345   : > { %8057 = vmatpush3.bf16.msra.mxu0 %v1703_v59  ;;  %v1743_v59 = vunpack.c.l.s8.bf16 %v709_v53 }
 0x346   : > { %8079 = vmatpush3.bf16.msra.mxu1 %v1719_v35  ;;  %8058 = vmatprep.subr.bf16.mxu0 %v1712_v60  ;;  %v705_v35 = vld [vmem:[%s9427_s8 + $0xb90] sm:$0xff]  ;;  %v1759_v60 = vunpack.c.l.s8.bf16 %v717_v16 }
 0x347   : > { %8080 = vmatprep.subr.bf16.mxu1 %v1728_v61  ;;  %v7756_v10 = vpop.f32.mrb[60].mxu0  ;;  %v713_v61 = vld [vmem:[%s9427_s8 + $0xbd0] sm:$0xff]  ;;  %v1735_v62 = vunpack.c.l.s8.bf16 %v705_v35 }
 0x348   : > { %v7778_v39 = vpop.f32.mrb[60].mxu1  ;;  %v7757_v8 = vpop.f32.mrb[61].mxu0  ;;  %v1751_v7 = vunpack.c.l.s8.bf16 %v713_v61  ;;  %v1752_v9 = vunpack.c.h.s8.bf16 %v713_v61 }
 0x349   : > { %v7779_v13 = vpop.f32.mrb[61].mxu1  ;;  %v7758_v14 = vadd.f32 %v7757_v8, %v7756_v10  ;;  %v7759_v52 = vpop.f32.mrb[62].mxu0  ;;  %8059 = vmatpush3.bf16.msra.mxu0 %v1704_v3  ;;  %v1760_v3 = vunpack.c.h.s8.bf16 %v717_v16 }
 0x34a   : > { %v7780_v25 = vadd.f32 %v7779_v13, %v7778_v39  ;;  %8081 = vmatpush3.bf16.msra.mxu1 %v1720_v56  ;;  %v7781_v20 = vpop.f32.mrb[62].mxu1  ;;  %v7760_v21 = vpop.f32.mrb[63].mxu0  ;;  %8060 = vmatprep.subr.bf16.mxu0 %v1713_v44  ;;  %v710_v56 = vld [vmem:[%s9427_s8 + $0xbb8] sm:$0xff] }
 0x34b   : > { %8082 = vmatprep.subr.bf16.mxu1 %v1729_v4  ;;  %v7782_v22 = vpop.f32.mrb[63].mxu1  ;;  %v4777_v24 = vadd.f32 %v7758_v14, %v10084_v1  ;;  %v703_v1 = vld [vmem:[%s9427_s8 + $0xb80] sm:$0xff]  ;;  %v718_v44 = vld [vmem:[%s9427_s8 + $0xbf8] sm:$0xff]  ;;  %v1736_v4 = vunpack.c.h.s8.bf16 %v705_v35  ;;  %v1745_v10 = vunpack.c.l.s8.bf16 %v710_v56  ;;  %v1746_v2 = vunpack.c.h.s8.bf16 %v710_v56  ;;  %v733_v35 = vld [vmem:[%s9427_s8 + $0xc70] sm:$0xff] }
 0x34c   : > { %v1731_v11 = vunpack.c.l.s8.bf16 %v703_v1  ;;  %v1732_v41 = vunpack.c.h.s8.bf16 %v703_v1  ;;  %v706_v39 = vld [vmem:[%s9427_s8 + $0xb98] sm:$0xff]  ;;  %v1761_v8 = vunpack.c.l.s8.bf16 %v718_v44  ;;  %v1762_v18 = vunpack.c.h.s8.bf16 %v718_v44 }
 0x34d   : > { %v10113_v29 = vadd.f32 %v7780_v25, %v4777_v24  ;;  %8061 = vmatpush3.bf16.msra.mxu0 %v1705_v5  ;;  %v714_v13 = vld [vmem:[%s9427_s8 + $0xbd8] sm:$0xff]  ;;  %v10135_v25 = vrot.slane %v10129_v48, %v9458_v38 }
 0x34e   : > { %8083 = vmatpush3.bf16.msra.mxu1 %v1721_v17  ;;  %8062 = vmatprep.subr.bf16.mxu0 %v1714_v47  ;;  %v1753_v22 = vunpack.c.l.s8.bf16 %v714_v13 }
 0x34f   : > { %8084 = vmatprep.subr.bf16.mxu1 %v1730_v58  ;;  %v1737_v58 = vunpack.c.l.s8.bf16 %v706_v39  ;;  %v2961_v1 = vcombine.high %v10135_v25, %v10135_v25 }
 0x351   : > { %8063 = vmatpush3.bf16.msra.mxu0 %v1706_v30 }
 0x352   : > { %8085 = vmatpush3.bf16.msra.mxu1 %v1722_v32  ;;  %8092 = vmatprep.subr.bf16.mxu0 %v1739_v55  ;;  %v723_v32 = vld [vmem:[%s9427_s8 + $0xc20] sm:$0xff] }
 0x353   : > { %8114 = vmatprep.subr.bf16.mxu1 %v1755_v33  ;;  %v731_v55 = vld [vmem:[%s9427_s8 + $0xc60] sm:$0xff]  ;;  %v2927_v33 = vrot.slane %v10104_v0, %v9458_v38 }
 0x354   : > { %5335 = vmatmul.mubr.bf16.vlgmr.msra.gmra.mrb[88].mxu0 %v2920_v28 }
 0x355   : > { %5375 = vmatmul.mubr.bf16.vlgmr.msra.gmra.mrb[88].mxu1 %v2942_v23  ;;  %8093 = vmatpush3.bf16.msra.mxu0 %v1731_v11  ;;  %v1754_v23 = vunpack.c.h.s8.bf16 %v714_v13  ;;  %v1771_v11 = vunpack.c.l.s8.bf16 %v723_v32  ;;  %v2943_v42 = vcombine.high %v2927_v33, %v2927_v33 }
 0x356   : > { %8115 = vmatpush3.bf16.msra.mxu1 %v1747_v36  ;;  %8094 = vmatprep.subr.bf16.mxu0 %v1740_v6  ;;  %v1787_v36 = vunpack.c.l.s8.bf16 %v731_v55  ;;  %v727_v6 = vld [vmem:[%s9427_s8 + $0xc40] sm:$0xff] }
 0x357   : > { %8116 = vmatprep.subr.bf16.mxu1 %v1756_v37  ;;  %5414 = vmatprep.mubr.bf16.mxu0 %v2941_v34  ;;  %v1738_v34 = vunpack.c.h.s8.bf16 %v706_v39  ;;  %v2983_v37 = vrot.slane %v2961_v1, %v9458_v38  ;;  %v1779_v43 = vunpack.c.l.s8.bf16 %v727_v6  ;;  %v1780_v49 = vunpack.c.h.s8.bf16 %v727_v6  ;;  %v734_v39 = vld [vmem:[%s9427_s8 + $0xc78] sm:$0xff] }
 0x358   : > { %5454 = vmatprep.mubr.bf16.mxu1 %v2945_v26  ;;  %v1772_v26 = vunpack.c.h.s8.bf16 %v723_v32  ;;  %v1794_v1 = vunpack.c.h.s8.bf16 %v734_v39 }
 0x359   : > { %8095 = vmatpush3.bf16.msra.mxu0 %v1732_v41  ;;  %v1788_v41 = vunpack.c.h.s8.bf16 %v731_v55  ;;  %v2993_v19 = vcombine.high %v2983_v37, %v2983_v37 }
 0x35a   : > { %8117 = vmatpush3.bf16.msra.mxu1 %v1748_v31  ;;  %8096 = vmatprep.subr.bf16.mxu0 %v1741_v45  ;;  %v724_v31 = vld [vmem:[%s9427_s8 + $0xc28] sm:$0xff] }
 0x35b   : > { %8118 = vmatprep.subr.bf16.mxu1 %v1757_v46  ;;  %v732_v45 = vld [vmem:[%s9427_s8 + $0xc68] sm:$0xff] }
 0x35d   : > { %8097 = vmatpush3.bf16.msra.mxu0 %v1733_v50  ;;  %v1773_v50 = vunpack.c.l.s8.bf16 %v724_v31 }
 0x35e   : > { %8119 = vmatpush3.bf16.msra.mxu1 %v1749_v27  ;;  %8098 = vmatprep.subr.bf16.mxu0 %v1742_v51  ;;  %v720_v27 = vld [vmem:[%s9427_s8 + $0xc08] sm:$0xff]  ;;  %v1789_v51 = vunpack.c.l.s8.bf16 %v732_v45 }
 0x35f   : > { %8120 = vmatprep.subr.bf16.mxu1 %v1758_v40  ;;  %v728_v40 = vld [vmem:[%s9427_s8 + $0xc48] sm:$0xff]  ;;  %v1765_v53 = vunpack.c.l.s8.bf16 %v720_v27 }
 0x360   : > { %v1781_v16 = vunpack.c.l.s8.bf16 %v728_v40  ;;  %v1782_v61 = vunpack.c.h.s8.bf16 %v728_v40 }
 0x361   : > { %8099 = vmatpush3.bf16.msra.mxu0 %v1734_v54  ;;  %v1774_v54 = vunpack.c.h.s8.bf16 %v724_v31 }
 0x362   : > { %8121 = vmatpush3.bf16.msra.mxu1 %v1750_v57  ;;  %8100 = vmatprep.subr.bf16.mxu0 %v1743_v59  ;;  %v1790_v57 = vunpack.c.h.s8.bf16 %v732_v45  ;;  %v725_v59 = vld [vmem:[%s9427_s8 + $0xc30] sm:$0xff] }
 0x363   : > { %8122 = vmatprep.subr.bf16.mxu1 %v1759_v60  ;;  %v1766_v60 = vunpack.c.h.s8.bf16 %v720_v27 }
 0x365   : > { %8101 = vmatpush3.bf16.msra.mxu0 %v1735_v62  ;;  %v1775_v62 = vunpack.c.l.s8.bf16 %v725_v59 }
 0x366   : > { %8123 = vmatpush3.bf16.msra.mxu1 %v1751_v7  ;;  %8102 = vmatprep.subr.bf16.mxu0 %v1744_v63  ;;  %v721_v7 = vld [vmem:[%s9427_s8 + $0xc10] sm:$0xff]  ;;  %v1791_v63 = vunpack.c.l.s8.bf16 %v733_v35 }
 0x367   : > { %8124 = vmatprep.subr.bf16.mxu1 %v1760_v3  ;;  %v7800_v14 = vpop.f32.mrb[64].mxu0  ;;  %v729_v3 = vld [vmem:[%s9427_s8 + $0xc50] sm:$0xff]  ;;  %v1767_v56 = vunpack.c.l.s8.bf16 %v721_v7  ;;  %v1768_v13 = vunpack.c.h.s8.bf16 %v721_v7 }
 0x368   : > { %v7822_v52 = vpop.f32.mrb[64].mxu1  ;;  %v7801_v5 = vpop.f32.mrb[65].mxu0  ;;  %v1783_v44 = vunpack.c.l.s8.bf16 %v729_v3  ;;  %v749_v7 = vld [vmem:[%s9427_s8 + $0xcf0] sm:$0xff] }
 0x369   : > { %v7823_v17 = vpop.f32.mrb[65].mxu1  ;;  %v7802_v20 = vadd.f32 %v7801_v5, %v7800_v14  ;;  %v7803_v21 = vpop.f32.mrb[66].mxu0  ;;  %8103 = vmatpush3.bf16.msra.mxu0 %v1736_v4  ;;  %v1776_v4 = vunpack.c.h.s8.bf16 %v725_v59  ;;  %v1784_v14 = vunpack.c.h.s8.bf16 %v729_v3  ;;  %v722_v5 = vld [vmem:[%s9427_s8 + $0xc18] sm:$0xff] }
 0x36a   : > { %v7824_v47 = vadd.f32 %v7823_v17, %v7822_v52  ;;  %8125 = vmatpush3.bf16.msra.mxu1 %v1752_v9  ;;  %v7825_v24 = vpop.f32.mrb[66].mxu1  ;;  %v7804_v15 = vpop.f32.mrb[67].mxu0  ;;  %8104 = vmatprep.subr.bf16.mxu0 %v1745_v10  ;;  %v1792_v9 = vunpack.c.h.s8.bf16 %v733_v35  ;;  %v726_v10 = vld [vmem:[%s9427_s8 + $0xc38] sm:$0xff]  ;;  %v1793_v17 = vunpack.c.l.s8.bf16 %v734_v39 }
 0x36b   : > { %8126 = vmatprep.subr.bf16.mxu1 %v1761_v8  ;;  %v7826_v28 = vpop.f32.mrb[67].mxu1  ;;  %v4857_v30 = vadd.f32 %v7802_v20, %v10113_v29  ;;  %v719_v29 = vld [vmem:[%s9427_s8 + $0xc00] sm:$0xff]  ;;  %v2946_v8 = vcombine.high %v10129_v48, %v10129_v48  ;;  %v1777_v52 = vunpack.c.l.s8.bf16 %v726_v10  ;;  %v730_v20 = vld [vmem:[%s9427_s8 + $0xc58] sm:$0xff]  ;;  %v1778_v55 = vunpack.c.h.s8.bf16 %v726_v10 }
 0x36c   : > { %v1763_v0 = vunpack.c.l.s8.bf16 %v719_v29  ;;  %v1764_v46 = vunpack.c.h.s8.bf16 %v719_v29  ;;  %v1785_v28 = vunpack.c.l.s8.bf16 %v730_v20 }
 0x36d   : > { %v10144_v12 = vadd.f32 %v7824_v47, %v4857_v30  ;;  %8105 = vmatpush3.bf16.msra.mxu0 %v1737_v58  ;;  %v10164_v58 = vrot.slane %v2946_v8, %v9458_v38 }
 0x36e   : > { %8127 = vmatpush3.bf16.msra.mxu1 %v1753_v22  ;;  %8106 = vmatprep.subr.bf16.mxu0 %v1746_v2 }
 0x36f   : > { %8128 = vmatprep.subr.bf16.mxu1 %v1762_v18  ;;  %v1769_v18 = vunpack.c.l.s8.bf16 %v722_v5  ;;  %v2962_v29 = vcombine.high %v10164_v58, %v10164_v58 }
 0x371   : > { %8107 = vmatpush3.bf16.msra.mxu0 %v1738_v34 }
 0x372   : > { %8129 = vmatpush3.bf16.msra.mxu1 %v1754_v23  ;;  %8136 = vmatprep.subr.bf16.mxu0 %v1771_v11  ;;  %v739_v23 = vld [vmem:[%s9427_s8 + $0xca0] sm:$0xff] }
 0x373   : > { %8158 = vmatprep.subr.bf16.mxu1 %v1787_v36  ;;  %v747_v11 = vld [vmem:[%s9427_s8 + $0xce0] sm:$0xff]  ;;  %v2969_v36 = vrot.slane %v10135_v25, %v9458_v38 }
 0x374   : > { %5415 = vmatmul.mubr.bf16.vlgmr.msra.gmra.mrb[92].mxu0 %v2927_v33 }
 0x375   : > { %5455 = vmatmul.mubr.bf16.vlgmr.msra.gmra.mrb[92].mxu1 %v2943_v42  ;;  %8137 = vmatpush3.bf16.msra.mxu0 %v1763_v0  ;;  %v1786_v42 = vunpack.c.h.s8.bf16 %v730_v20  ;;  %v1803_v0 = vunpack.c.l.s8.bf16 %v739_v23  ;;  %v2991_v31 = vcombine.high %v2969_v36, %v2969_v36 }
 0x376   : > { %8159 = vmatpush3.bf16.msra.mxu1 %v1779_v43  ;;  %8138 = vmatprep.subr.bf16.mxu0 %v1772_v26  ;;  %v1819_v43 = vunpack.c.l.s8.bf16 %v747_v11  ;;  %v743_v26 = vld [vmem:[%s9427_s8 + $0xcc0] sm:$0xff] }
 0x377   : > { %8160 = vmatprep.subr.bf16.mxu1 %v1788_v41  ;;  %5494 = vmatprep.mubr.bf16.mxu0 %v2983_v37  ;;  %v1770_v37 = vunpack.c.h.s8.bf16 %v722_v5  ;;  %v2990_v41 = vrot.slane %v2962_v29, %v9458_v38  ;;  %v1811_v45 = vunpack.c.l.s8.bf16 %v743_v26  ;;  %v1812_v40 = vunpack.c.h.s8.bf16 %v743_v26  ;;  %v10189_v5 = vld [vmem:[%s9441_s25 + $0x68] sm:$0xff] }
 0x378   : > { %5534 = vmatprep.mubr.bf16.mxu1 %v2993_v19  ;;  %v1804_v19 = vunpack.c.h.s8.bf16 %v739_v23 }
 0x379   : > { %8139 = vmatpush3.bf16.msra.mxu0 %v1764_v46  ;;  %v1820_v46 = vunpack.c.h.s8.bf16 %v747_v11  ;;  %v2994_v27 = vcombine.high %v2990_v41, %v2990_v41 }
 0x37a   : > { %8161 = vmatpush3.bf16.msra.mxu1 %v1780_v49  ;;  %8140 = vmatprep.subr.bf16.mxu0 %v1773_v50  ;;  %v740_v49 = vld [vmem:[%s9427_s8 + $0xca8] sm:$0xff] }
 0x37b   : > { %8162 = vmatprep.subr.bf16.mxu1 %v1789_v51  ;;  %v748_v50 = vld [vmem:[%s9427_s8 + $0xce8] sm:$0xff] }
 0x37d   : > { %8141 = vmatpush3.bf16.msra.mxu0 %v1765_v53  ;;  %v1805_v53 = vunpack.c.l.s8.bf16 %v740_v49 }
 0x37e   : > { %8163 = vmatpush3.bf16.msra.mxu1 %v1781_v16  ;;  %8142 = vmatprep.subr.bf16.mxu0 %v1774_v54  ;;  %v736_v16 = vld [vmem:[%s9427_s8 + $0xc88] sm:$0xff]  ;;  %v1821_v54 = vunpack.c.l.s8.bf16 %v748_v50 }
 0x37f   : > { %8164 = vmatprep.subr.bf16.mxu1 %v1790_v57  ;;  %v744_v57 = vld [vmem:[%s9427_s8 + $0xcc8] sm:$0xff]  ;;  %v1797_v59 = vunpack.c.l.s8.bf16 %v736_v16 }
 0x380   : > { %v1813_v35 = vunpack.c.l.s8.bf16 %v744_v57  ;;  %v1814_v3 = vunpack.c.h.s8.bf16 %v744_v57 }
 0x381   : > { %8143 = vmatpush3.bf16.msra.mxu0 %v1766_v60  ;;  %v1806_v60 = vunpack.c.h.s8.bf16 %v740_v49 }
 0x382   : > { %8165 = vmatpush3.bf16.msra.mxu1 %v1782_v61  ;;  %8144 = vmatprep.subr.bf16.mxu0 %v1775_v62  ;;  %v1822_v61 = vunpack.c.h.s8.bf16 %v748_v50  ;;  %v741_v62 = vld [vmem:[%s9427_s8 + $0xcb0] sm:$0xff] }
 0x383   : > { %8166 = vmatprep.subr.bf16.mxu1 %v1791_v63  ;;  %v1798_v63 = vunpack.c.h.s8.bf16 %v736_v16  ;;  %v1808_v8 = vunpack.c.h.s8.bf16 %v741_v62 }
 0x385   : > { %8145 = vmatpush3.bf16.msra.mxu0 %v1767_v56  ;;  %v1807_v56 = vunpack.c.l.s8.bf16 %v741_v62 }
 0x386   : > { %8167 = vmatpush3.bf16.msra.mxu1 %v1783_v44  ;;  %8146 = vmatprep.subr.bf16.mxu0 %v1776_v4  ;;  %v737_v44 = vld [vmem:[%s9427_s8 + $0xc90] sm:$0xff]  ;;  %v1823_v4 = vunpack.c.l.s8.bf16 %v749_v7 }
 0x387   : > { %8168 = vmatprep.subr.bf16.mxu1 %v1792_v9  ;;  %v7844_v21 = vpop.f32.mrb[68].mxu0  ;;  %v745_v9 = vld [vmem:[%s9427_s8 + $0xcd0] sm:$0xff]  ;;  %v1799_v10 = vunpack.c.l.s8.bf16 %v737_v44 }
 0x388   : > { %v7866_v47 = vpop.f32.mrb[68].mxu1  ;;  %v7845_v22 = vpop.f32.mrb[69].mxu0  ;;  %v1815_v39 = vunpack.c.l.s8.bf16 %v745_v9  ;;  %v1816_v20 = vunpack.c.h.s8.bf16 %v745_v9 }
 0x389   : > { %v7867_v24 = vpop.f32.mrb[69].mxu1  ;;  %v7846_v15 = vadd.f32 %v7845_v22, %v7844_v21  ;;  %v7847_v48 = vpop.f32.mrb[70].mxu0  ;;  %8147 = vmatpush3.bf16.msra.mxu0 %v1768_v13  ;;  %v1824_v13 = vunpack.c.h.s8.bf16 %v749_v7 }
 0x38a   : > { %v7868_v2 = vadd.f32 %v7867_v24, %v7866_v47  ;;  %8169 = vmatpush3.bf16.msra.mxu1 %v1784_v14  ;;  %v7869_v30 = vpop.f32.mrb[70].mxu1  ;;  %v7848_v32 = vpop.f32.mrb[71].mxu0  ;;  %8148 = vmatprep.subr.bf16.mxu0 %v1777_v52  ;;  %v742_v14 = vld [vmem:[%s9427_s8 + $0xcb8] sm:$0xff] }
 0x38b   : > { %8170 = vmatprep.subr.bf16.mxu1 %v1793_v17  ;;  %v7870_v33 = vpop.f32.mrb[71].mxu1  ;;  %v4937_v34 = vadd.f32 %v7846_v15, %v10144_v12  ;;  %v735_v12 = vld [vmem:[%s9427_s8 + $0xc80] sm:$0xff]  ;;  %v750_v52 = vld [vmem:[%s9427_s8 + $0xcf8] sm:$0xff]  ;;  %v1800_v17 = vunpack.c.h.s8.bf16 %v737_v44  ;;  %v1809_v21 = vunpack.c.l.s8.bf16 %v742_v14  ;;  %v1810_v11 = vunpack.c.h.s8.bf16 %v742_v14  ;;  %v765_v44 = vld [vmem:[%s9427_s8 + $0xd70] sm:$0xff] }
 0x38c   : > { %v1795_v25 = vunpack.c.l.s8.bf16 %v735_v12  ;;  %v1796_v51 = vunpack.c.h.s8.bf16 %v735_v12  ;;  %v738_v47 = vld [vmem:[%s9427_s8 + $0xc98] sm:$0xff]  ;;  %v1825_v22 = vunpack.c.l.s8.bf16 %v750_v52  ;;  %v1826_v29 = vunpack.c.h.s8.bf16 %v750_v52 }
 0x38d   : > { %v10173_v6 = vadd.f32 %v7868_v2, %v4937_v34  ;;  %8149 = vmatpush3.bf16.msra.mxu0 %v1769_v18  ;;  %v746_v24 = vld [vmem:[%s9427_s8 + $0xcd8] sm:$0xff]  ;;  %v10195_v2 = vrot.slane %v10189_v5, %v9458_v38 }
 0x38e   : > { %8171 = vmatpush3.bf16.msra.mxu1 %v1785_v28  ;;  %8150 = vmatprep.subr.bf16.mxu0 %v1778_v55  ;;  %v1817_v33 = vunpack.c.l.s8.bf16 %v746_v24 }
 0x38f   : > { %8172 = vmatprep.subr.bf16.mxu1 %v1794_v1  ;;  %v1801_v1 = vunpack.c.l.s8.bf16 %v738_v47  ;;  %v3010_v12 = vcombine.high %v10195_v2, %v10195_v2 }
 0x391   : > { %8151 = vmatpush3.bf16.msra.mxu0 %v1770_v37 }
 0x392   : > { %8173 = vmatpush3.bf16.msra.mxu1 %v1786_v42  ;;  %8180 = vmatprep.subr.bf16.mxu0 %v1803_v0  ;;  %v755_v42 = vld [vmem:[%s9427_s8 + $0xd20] sm:$0xff] }
 0x393   : > { %8202 = vmatprep.subr.bf16.mxu1 %v1819_v43  ;;  %v763_v0 = vld [vmem:[%s9427_s8 + $0xd60] sm:$0xff]  ;;  %v2976_v43 = vrot.slane %v10164_v58, %v9458_v38 }
 0x394   : > { %5495 = vmatmul.mubr.bf16.vlgmr.msra.gmra.mrb[96].mxu0 %v2969_v36 }
 0x395   : > { %5535 = vmatmul.mubr.bf16.vlgmr.msra.gmra.mrb[96].mxu1 %v2991_v31  ;;  %8181 = vmatpush3.bf16.msra.mxu0 %v1795_v25  ;;  %v1818_v31 = vunpack.c.h.s8.bf16 %v746_v24  ;;  %v1835_v25 = vunpack.c.l.s8.bf16 %v755_v42  ;;  %v2992_v49 = vcombine.high %v2976_v43, %v2976_v43 }
 0x396   : > { %8203 = vmatpush3.bf16.msra.mxu1 %v1811_v45  ;;  %8182 = vmatprep.subr.bf16.mxu0 %v1804_v19  ;;  %v1851_v45 = vunpack.c.l.s8.bf16 %v763_v0  ;;  %v759_v19 = vld [vmem:[%s9427_s8 + $0xd40] sm:$0xff] }
 0x397   : > { %8204 = vmatprep.subr.bf16.mxu1 %v1820_v46  ;;  %5574 = vmatprep.mubr.bf16.mxu0 %v2990_v41  ;;  %v1802_v41 = vunpack.c.h.s8.bf16 %v738_v47  ;;  %v3032_v46 = vrot.slane %v3010_v12, %v9458_v38  ;;  %v1843_v50 = vunpack.c.l.s8.bf16 %v759_v19  ;;  %v1844_v57 = vunpack.c.h.s8.bf16 %v759_v19  ;;  %v766_v47 = vld [vmem:[%s9427_s8 + $0xd78] sm:$0xff] }
 0x398   : > { %5614 = vmatprep.mubr.bf16.mxu1 %v2994_v27  ;;  %v1836_v27 = vunpack.c.h.s8.bf16 %v755_v42  ;;  %v1858_v12 = vunpack.c.h.s8.bf16 %v766_v47 }
 0x399   : > { %8183 = vmatpush3.bf16.msra.mxu0 %v1796_v51  ;;  %v1852_v51 = vunpack.c.h.s8.bf16 %v763_v0  ;;  %v3042_v16 = vcombine.high %v3032_v46, %v3032_v46 }
 0x39a   : > { %8205 = vmatpush3.bf16.msra.mxu1 %v1812_v40  ;;  %8184 = vmatprep.subr.bf16.mxu0 %v1805_v53  ;;  %v756_v40 = vld [vmem:[%s9427_s8 + $0xd28] sm:$0xff] }
 0x39b   : > { %8206 = vmatprep.subr.bf16.mxu1 %v1821_v54  ;;  %v764_v53 = vld [vmem:[%s9427_s8 + $0xd68] sm:$0xff] }
 0x39d   : > { %8185 = vmatpush3.bf16.msra.mxu0 %v1797_v59  ;;  %v1837_v59 = vunpack.c.l.s8.bf16 %v756_v40 }
 0x39e   : > { %8207 = vmatpush3.bf16.msra.mxu1 %v1813_v35  ;;  %8186 = vmatprep.subr.bf16.mxu0 %v1806_v60  ;;  %v752_v35 = vld [vmem:[%s9427_s8 + $0xd08] sm:$0xff]  ;;  %v1853_v60 = vunpack.c.l.s8.bf16 %v764_v53 }
 0x39f   : > { %8208 = vmatprep.subr.bf16.mxu1 %v1822_v61  ;;  %v760_v61 = vld [vmem:[%s9427_s8 + $0xd48] sm:$0xff]  ;;  %v1829_v62 = vunpack.c.l.s8.bf16 %v752_v35 }
 0x3a0   : > { %v1845_v7 = vunpack.c.l.s8.bf16 %v760_v61  ;;  %v1846_v9 = vunpack.c.h.s8.bf16 %v760_v61 }
 0x3a1   : > { %8187 = vmatpush3.bf16.msra.mxu0 %v1798_v63  ;;  %v1838_v63 = vunpack.c.h.s8.bf16 %v756_v40 }
 0x3a2   : > { %8209 = vmatpush3.bf16.msra.mxu1 %v1814_v3  ;;  %8188 = vmatprep.subr.bf16.mxu0 %v1807_v56  ;;  %v1854_v3 = vunpack.c.h.s8.bf16 %v764_v53  ;;  %v757_v56 = vld [vmem:[%s9427_s8 + $0xd30] sm:$0xff] }
 0x3a3   : > { %8210 = vmatprep.subr.bf16.mxu1 %v1823_v4  ;;  %v1830_v4 = vunpack.c.h.s8.bf16 %v752_v35 }
 0x3a5   : > { %8189 = vmatpush3.bf16.msra.mxu0 %v1799_v10  ;;  %v1839_v10 = vunpack.c.l.s8.bf16 %v757_v56 }
 0x3a6   : > { %8211 = vmatpush3.bf16.msra.mxu1 %v1815_v39  ;;  %8190 = vmatprep.subr.bf16.mxu0 %v1808_v8  ;;  %v753_v39 = vld [vmem:[%s9427_s8 + $0xd10] sm:$0xff]  ;;  %v1855_v8 = vunpack.c.l.s8.bf16 %v765_v44 }
 0x3a7   : > { %8212 = vmatprep.subr.bf16.mxu1 %v1824_v13  ;;  %v7888_v15 = vpop.f32.mrb[72].mxu0  ;;  %v761_v13 = vld [vmem:[%s9427_s8 + $0xd50] sm:$0xff]  ;;  %v1831_v14 = vunpack.c.l.s8.bf16 %v753_v39  ;;  %v1832_v24 = vunpack.c.h.s8.bf16 %v753_v39 }
 0x3a8   : > { %v7910_v48 = vpop.f32.mrb[72].mxu1  ;;  %v7889_v18 = vpop.f32.mrb[73].mxu0  ;;  %v1847_v52 = vunpack.c.l.s8.bf16 %v761_v13  ;;  %v781_v39 = vld [vmem:[%s9427_s8 + $0xdf0] sm:$0xff] }
 0x3a9   : > { %v7911_v28 = vpop.f32.mrb[73].mxu1  ;;  %v7890_v30 = vadd.f32 %v7889_v18, %v7888_v15  ;;  %v7891_v32 = vpop.f32.mrb[74].mxu0  ;;  %8191 = vmatpush3.bf16.msra.mxu0 %v1800_v17  ;;  %v1840_v17 = vunpack.c.h.s8.bf16 %v757_v56  ;;  %v1848_v15 = vunpack.c.h.s8.bf16 %v761_v13  ;;  %v754_v18 = vld [vmem:[%s9427_s8 + $0xd18] sm:$0xff] }
 0x3aa   : > { %v7912_v55 = vadd.f32 %v7911_v28, %v7910_v48  ;;  %8213 = vmatpush3.bf16.msra.mxu1 %v1816_v20  ;;  %v7913_v34 = vpop.f32.mrb[74].mxu1  ;;  %v7892_v23 = vpop.f32.mrb[75].mxu0  ;;  %8192 = vmatprep.subr.bf16.mxu0 %v1809_v21  ;;  %v1856_v20 = vunpack.c.h.s8.bf16 %v765_v44  ;;  %v758_v21 = vld [vmem:[%s9427_s8 + $0xd38] sm:$0xff]  ;;  %v1857_v28 = vunpack.c.l.s8.bf16 %v766_v47 }
 0x3ab   : > { %8214 = vmatprep.subr.bf16.mxu1 %v1825_v22  ;;  %v7914_v36 = vpop.f32.mrb[75].mxu1  ;;  %v5017_v37 = vadd.f32 %v7890_v30, %v10173_v6  ;;  %v751_v6 = vld [vmem:[%s9427_s8 + $0xd00] sm:$0xff]  ;;  %v2995_v22 = vcombine.high %v10189_v5, %v10189_v5  ;;  %v1841_v48 = vunpack.c.l.s8.bf16 %v758_v21  ;;  %v762_v30 = vld [vmem:[%s9427_s8 + $0xd58] sm:$0xff]  ;;  %v1842_v0 = vunpack.c.h.s8.bf16 %v758_v21 }
 0x3ac   : > { %v1827_v58 = vunpack.c.l.s8.bf16 %v751_v6  ;;  %v1828_v54 = vunpack.c.h.s8.bf16 %v751_v6  ;;  %v1849_v36 = vunpack.c.l.s8.bf16 %v762_v30 }
 0x3ad   : > { %v10204_v26 = vadd.f32 %v7912_v55, %v5017_v37  ;;  %8193 = vmatpush3.bf16.msra.mxu0 %v1801_v1  ;;  %v10224_v1 = vrot.slane %v2995_v22, %v9458_v38 }
 0x3ae   : > { %8215 = vmatpush3.bf16.msra.mxu1 %v1817_v33  ;;  %8194 = vmatprep.subr.bf16.mxu0 %v1810_v11 }
 0x3af   : > { %8216 = vmatprep.subr.bf16.mxu1 %v1826_v29  ;;  %v1833_v29 = vunpack.c.l.s8.bf16 %v754_v18  ;;  %v3011_v6 = vcombine.high %v10224_v1, %v10224_v1 }
 0x3b1   : > { %8195 = vmatpush3.bf16.msra.mxu0 %v1802_v41 }
 0x3b2   : > { %8217 = vmatpush3.bf16.msra.mxu1 %v1818_v31  ;;  %8224 = vmatprep.subr.bf16.mxu0 %v1835_v25  ;;  %v771_v31 = vld [vmem:[%s9427_s8 + $0xda0] sm:$0xff] }
 0x3b3   : > { %8246 = vmatprep.subr.bf16.mxu1 %v1851_v45  ;;  %v779_v25 = vld [vmem:[%s9427_s8 + $0xde0] sm:$0xff]  ;;  %v3018_v45 = vrot.slane %v10195_v2, %v9458_v38 }
 0x3b4   : > { %5575 = vmatmul.mubr.bf16.vlgmr.msra.gmra.mrb[100].mxu0 %v2976_v43 }
 0x3b5   : > { %5615 = vmatmul.mubr.bf16.vlgmr.msra.gmra.mrb[100].mxu1 %v2992_v49  ;;  %8225 = vmatpush3.bf16.msra.mxu0 %v1827_v58  ;;  %v1850_v49 = vunpack.c.h.s8.bf16 %v762_v30  ;;  %v1867_v58 = vunpack.c.l.s8.bf16 %v771_v31  ;;  %v3040_v40 = vcombine.high %v3018_v45, %v3018_v45 }
 0x3b6   : > { %8247 = vmatpush3.bf16.msra.mxu1 %v1843_v50  ;;  %8226 = vmatprep.subr.bf16.mxu0 %v1836_v27  ;;  %v1883_v50 = vunpack.c.l.s8.bf16 %v779_v25  ;;  %v775_v27 = vld [vmem:[%s9427_s8 + $0xdc0] sm:$0xff] }
 0x3b7   : > { %8248 = vmatprep.subr.bf16.mxu1 %v1852_v51  ;;  %5654 = vmatprep.mubr.bf16.mxu0 %v3032_v46  ;;  %v1834_v46 = vunpack.c.h.s8.bf16 %v754_v18  ;;  %v3039_v51 = vrot.slane %v3011_v6, %v9458_v38  ;;  %v1875_v53 = vunpack.c.l.s8.bf16 %v775_v27  ;;  %v1876_v61 = vunpack.c.h.s8.bf16 %v775_v27  ;;  %v10249_v18 = vld [vmem:[%s9441_s25 + $0x70] sm:$0xff] }
 0x3b8   : > { %5694 = vmatprep.mubr.bf16.mxu1 %v3042_v16  ;;  %v1868_v16 = vunpack.c.h.s8.bf16 %v771_v31 }
 0x3b9   : > { %8227 = vmatpush3.bf16.msra.mxu0 %v1828_v54  ;;  %v1884_v54 = vunpack.c.h.s8.bf16 %v779_v25  ;;  %v3043_v35 = vcombine.high %v3039_v51, %v3039_v51 }
 0x3ba   : > { %8249 = vmatpush3.bf16.msra.mxu1 %v1844_v57  ;;  %8228 = vmatprep.subr.bf16.mxu0 %v1837_v59  ;;  %v772_v57 = vld [vmem:[%s9427_s8 + $0xda8] sm:$0xff] }
 0x3bb   : > { %8250 = vmatprep.subr.bf16.mxu1 %v1853_v60  ;;  %v780_v59 = vld [vmem:[%s9427_s8 + $0xde8] sm:$0xff] }
 0x3bd   : > { %8229 = vmatpush3.bf16.msra.mxu0 %v1829_v62  ;;  %v1869_v62 = vunpack.c.l.s8.bf16 %v772_v57 }
 0x3be   : > { %8251 = vmatpush3.bf16.msra.mxu1 %v1845_v7  ;;  %8230 = vmatprep.subr.bf16.mxu0 %v1838_v63  ;;  %v768_v7 = vld [vmem:[%s9427_s8 + $0xd88] sm:$0xff]  ;;  %v1885_v63 = vunpack.c.l.s8.bf16 %v780_v59 }
 0x3bf   : > { %8252 = vmatprep.subr.bf16.mxu1 %v1854_v3  ;;  %v776_v3 = vld [vmem:[%s9427_s8 + $0xdc8] sm:$0xff]  ;;  %v1861_v56 = vunpack.c.l.s8.bf16 %v768_v7 }
 0x3c0   : > { %v1877_v44 = vunpack.c.l.s8.bf16 %v776_v3  ;;  %v1878_v13 = vunpack.c.h.s8.bf16 %v776_v3 }
 0x3c1   : > { %8231 = vmatpush3.bf16.msra.mxu0 %v1830_v4  ;;  %v1870_v4 = vunpack.c.h.s8.bf16 %v772_v57 }
 0x3c2   : > { %8253 = vmatpush3.bf16.msra.mxu1 %v1846_v9  ;;  %8232 = vmatprep.subr.bf16.mxu0 %v1839_v10  ;;  %v1886_v9 = vunpack.c.h.s8.bf16 %v780_v59  ;;  %v773_v10 = vld [vmem:[%s9427_s8 + $0xdb0] sm:$0xff] }
 0x3c3   : > { %8254 = vmatprep.subr.bf16.mxu1 %v1855_v8  ;;  %v1862_v8 = vunpack.c.h.s8.bf16 %v768_v7  ;;  %v1872_v22 = vunpack.c.h.s8.bf16 %v773_v10 }
 0x3c5   : > { %8233 = vmatpush3.bf16.msra.mxu0 %v1831_v14  ;;  %v1871_v14 = vunpack.c.l.s8.bf16 %v773_v10 }
 0x3c6   : > { %8255 = vmatpush3.bf16.msra.mxu1 %v1847_v52  ;;  %8234 = vmatprep.subr.bf16.mxu0 %v1840_v17  ;;  %v769_v52 = vld [vmem:[%s9427_s8 + $0xd90] sm:$0xff]  ;;  %v1887_v17 = vunpack.c.l.s8.bf16 %v781_v39 }
 0x3c7   : > { %8256 = vmatprep.subr.bf16.mxu1 %v1856_v20  ;;  %v7932_v32 = vpop.f32.mrb[76].mxu0  ;;  %v777_v20 = vld [vmem:[%s9427_s8 + $0xdd0] sm:$0xff]  ;;  %v1863_v21 = vunpack.c.l.s8.bf16 %v769_v52 }
 0x3c8   : > { %v7954_v55 = vpop.f32.mrb[76].mxu1  ;;  %v7933_v33 = vpop.f32.mrb[77].mxu0  ;;  %v1879_v47 = vunpack.c.l.s8.bf16 %v777_v20  ;;  %v1880_v30 = vunpack.c.h.s8.bf16 %v777_v20 }
 0x3c9   : > { %v7955_v34 = vpop.f32.mrb[77].mxu1  ;;  %v7934_v23 = vadd.f32 %v7933_v33, %v7932_v32  ;;  %v7935_v5 = vpop.f32.mrb[78].mxu0  ;;  %8235 = vmatpush3.bf16.msra.mxu0 %v1832_v24  ;;  %v1888_v24 = vunpack.c.h.s8.bf16 %v781_v39 }
 0x3ca   : > { %v7956_v11 = vadd.f32 %v7955_v34, %v7954_v55  ;;  %8257 = vmatpush3.bf16.msra.mxu1 %v1848_v15  ;;  %v7957_v37 = vpop.f32.mrb[78].mxu1  ;;  %v7936_v42 = vpop.f32.mrb[79].mxu0  ;;  %8236 = vmatprep.subr.bf16.mxu0 %v1841_v48  ;;  %v774_v15 = vld [vmem:[%s9427_s8 + $0xdb8] sm:$0xff] }
 0x3cb   : > { %8258 = vmatprep.subr.bf16.mxu1 %v1857_v28  ;;  %v7958_v43 = vpop.f32.mrb[79].mxu1  ;;  %v5097_v41 = vadd.f32 %v7934_v23, %v10204_v26  ;;  %v767_v26 = vld [vmem:[%s9427_s8 + $0xd80] sm:$0xff]  ;;  %v782_v48 = vld [vmem:[%s9427_s8 + $0xdf8] sm:$0xff]  ;;  %v1864_v28 = vunpack.c.h.s8.bf16 %v769_v52  ;;  %v1873_v32 = vunpack.c.l.s8.bf16 %v774_v15  ;;  %v1874_v25 = vunpack.c.h.s8.bf16 %v774_v15  ;;  %v797_v52 = vld [vmem:[%s9427_s8 + $0xe70] sm:$0xff] }
 0x3cc   : > { %v1859_v2 = vunpack.c.l.s8.bf16 %v767_v26  ;;  %v1860_v60 = vunpack.c.h.s8.bf16 %v767_v26  ;;  %v770_v55 = vld [vmem:[%s9427_s8 + $0xd98] sm:$0xff]  ;;  %v1889_v33 = vunpack.c.l.s8.bf16 %v782_v48  ;;  %v1890_v6 = vunpack.c.h.s8.bf16 %v782_v48 }
 0x3cd   : > { %v10233_v19 = vadd.f32 %v7956_v11, %v5097_v41  ;;  %8237 = vmatpush3.bf16.msra.mxu0 %v1833_v29  ;;  %v778_v34 = vld [vmem:[%s9427_s8 + $0xdd8] sm:$0xff]  ;;  %v10255_v11 = vrot.slane %v10249_v18, %v9458_v38 }
 0x3ce   : > { %8259 = vmatpush3.bf16.msra.mxu1 %v1849_v36  ;;  %8238 = vmatprep.subr.bf16.mxu0 %v1842_v0  ;;  %v1881_v43 = vunpack.c.l.s8.bf16 %v778_v34 }
 0x3cf   : > { %8260 = vmatprep.subr.bf16.mxu1 %v1858_v12  ;;  %v1865_v12 = vunpack.c.l.s8.bf16 %v770_v55  ;;  %v3059_v26 = vcombine.high %v10255_v11, %v10255_v11 }
 0x3d1   : > { %8239 = vmatpush3.bf16.msra.mxu0 %v1834_v46 }
 0x3d2   : > { %8261 = vmatpush3.bf16.msra.mxu1 %v1850_v49  ;;  %8268 = vmatprep.subr.bf16.mxu0 %v1867_v58  ;;  %v787_v49 = vld [vmem:[%s9427_s8 + $0xe20] sm:$0xff] }
 0x3d3   : > { %8290 = vmatprep.subr.bf16.mxu1 %v1883_v50  ;;  %v795_v58 = vld [vmem:[%s9427_s8 + $0xe60] sm:$0xff]  ;;  %v3025_v50 = vrot.slane %v10224_v1, %v9458_v38 }
 0x3d4   : > { %5655 = vmatmul.mubr.bf16.vlgmr.msra.gmra.mrb[104].mxu0 %v3018_v45 }
 0x3d5   : > { %5695 = vmatmul.mubr.bf16.vlgmr.msra.gmra.mrb[104].mxu1 %v3040_v40  ;;  %8269 = vmatpush3.bf16.msra.mxu0 %v1859_v2  ;;  %v1882_v40 = vunpack.c.h.s8.bf16 %v778_v34  ;;  %v1899_v2 = vunpack.c.l.s8.bf16 %v787_v49  ;;  %v3041_v57 = vcombine.high %v3025_v50, %v3025_v50 }
 0x3d6   : > { %8291 = vmatpush3.bf16.msra.mxu1 %v1875_v53  ;;  %8270 = vmatprep.subr.bf16.mxu0 %v1868_v16  ;;  %v1915_v53 = vunpack.c.l.s8.bf16 %v795_v58  ;;  %v791_v16 = vld [vmem:[%s9427_s8 + $0xe40] sm:$0xff] }
 0x3d7   : > { %8292 = vmatprep.subr.bf16.mxu1 %v1884_v54  ;;  %5734 = vmatprep.mubr.bf16.mxu0 %v3039_v51  ;;  %v1866_v51 = vunpack.c.h.s8.bf16 %v770_v55  ;;  %v3081_v54 = vrot.slane %v3059_v26, %v9458_v38  ;;  %v1907_v59 = vunpack.c.l.s8.bf16 %v791_v16  ;;  %v1908_v3 = vunpack.c.h.s8.bf16 %v791_v16  ;;  %v798_v55 = vld [vmem:[%s9427_s8 + $0xe78] sm:$0xff] }
 0x3d8   : > { %5774 = vmatprep.mubr.bf16.mxu1 %v3043_v35  ;;  %v1900_v35 = vunpack.c.h.s8.bf16 %v787_v49  ;;  %v1922_v26 = vunpack.c.h.s8.bf16 %v798_v55 }
 0x3d9   : > { %8271 = vmatpush3.bf16.msra.mxu0 %v1860_v60  ;;  %v1916_v60 = vunpack.c.h.s8.bf16 %v795_v58  ;;  %v3091_v7 = vcombine.high %v3081_v54, %v3081_v54 }
 0x3da   : > { %8293 = vmatpush3.bf16.msra.mxu1 %v1876_v61  ;;  %8272 = vmatprep.subr.bf16.mxu0 %v1869_v62  ;;  %v788_v61 = vld [vmem:[%s9427_s8 + $0xe28] sm:$0xff] }
 0x3db   : > { %8294 = vmatprep.subr.bf16.mxu1 %v1885_v63  ;;  %v796_v62 = vld [vmem:[%s9427_s8 + $0xe68] sm:$0xff] }
 0x3dd   : > { %8273 = vmatpush3.bf16.msra.mxu0 %v1861_v56  ;;  %v1901_v56 = vunpack.c.l.s8.bf16 %v788_v61 }
 0x3de   : > { %8295 = vmatpush3.bf16.msra.mxu1 %v1877_v44  ;;  %8274 = vmatprep.subr.bf16.mxu0 %v1870_v4  ;;  %v784_v44 = vld [vmem:[%s9427_s8 + $0xe08] sm:$0xff]  ;;  %v1917_v4 = vunpack.c.l.s8.bf16 %v796_v62 }
 0x3df   : > { %8296 = vmatprep.subr.bf16.mxu1 %v1886_v9  ;;  %v792_v9 = vld [vmem:[%s9427_s8 + $0xe48] sm:$0xff]  ;;  %v1893_v10 = vunpack.c.l.s8.bf16 %v784_v44 }
 0x3e0   : > { %v1909_v39 = vunpack.c.l.s8.bf16 %v792_v9  ;;  %v1910_v20 = vunpack.c.h.s8.bf16 %v792_v9 }
 0x3e1   : > { %8275 = vmatpush3.bf16.msra.mxu0 %v1862_v8  ;;  %v1902_v8 = vunpack.c.h.s8.bf16 %v788_v61 }
 0x3e2   : > { %8297 = vmatpush3.bf16.msra.mxu1 %v1878_v13  ;;  %8276 = vmatprep.subr.bf16.mxu0 %v1871_v14  ;;  %v1918_v13 = vunpack.c.h.s8.bf16 %v796_v62  ;;  %v789_v14 = vld [vmem:[%s9427_s8 + $0xe30] sm:$0xff] }
 0x3e3   : > { %8298 = vmatprep.subr.bf16.mxu1 %v1887_v17  ;;  %v1894_v17 = vunpack.c.h.s8.bf16 %v784_v44 }
 0x3e5   : > { %8277 = vmatpush3.bf16.msra.mxu0 %v1863_v21  ;;  %v1903_v21 = vunpack.c.l.s8.bf16 %v789_v14 }
 0x3e6   : > { %8299 = vmatpush3.bf16.msra.mxu1 %v1879_v47  ;;  %8278 = vmatprep.subr.bf16.mxu0 %v1872_v22  ;;  %v785_v47 = vld [vmem:[%s9427_s8 + $0xe10] sm:$0xff]  ;;  %v1919_v22 = vunpack.c.l.s8.bf16 %v797_v52 }
 0x3e7   : > { %8300 = vmatprep.subr.bf16.mxu1 %v1888_v24  ;;  %v7976_v23 = vpop.f32.mrb[80].mxu0  ;;  %v793_v24 = vld [vmem:[%s9427_s8 + $0xe50] sm:$0xff]  ;;  %v1895_v15 = vunpack.c.l.s8.bf16 %v785_v47  ;;  %v1896_v34 = vunpack.c.h.s8.bf16 %v785_v47 }
 0x3e8   : > { %v7998_v5 = vpop.f32.mrb[80].mxu1  ;;  %v7977_v29 = vpop.f32.mrb[81].mxu0  ;;  %v1911_v48 = vunpack.c.l.s8.bf16 %v793_v24  ;;  %v813_v47 = vld [vmem:[%s9427_s8 + $0xef0] sm:$0xff] }
 0x3e9   : > { %v7999_v36 = vpop.f32.mrb[81].mxu1  ;;  %v7978_v37 = vadd.f32 %v7977_v29, %v7976_v23  ;;  %v7979_v42 = vpop.f32.mrb[82].mxu0  ;;  %8279 = vmatpush3.bf16.msra.mxu0 %v1864_v28  ;;  %v1904_v28 = vunpack.c.h.s8.bf16 %v789_v14  ;;  %v1912_v23 = vunpack.c.h.s8.bf16 %v793_v24  ;;  %v786_v29 = vld [vmem:[%s9427_s8 + $0xe18] sm:$0xff] }
 0x3ea   : > { %v8000_v0 = vadd.f32 %v7999_v36, %v7998_v5  ;;  %8301 = vmatpush3.bf16.msra.mxu1 %v1880_v30  ;;  %v8001_v41 = vpop.f32.mrb[82].mxu1  ;;  %v7980_v31 = vpop.f32.mrb[83].mxu0  ;;  %8280 = vmatprep.subr.bf16.mxu0 %v1873_v32  ;;  %v1920_v30 = vunpack.c.h.s8.bf16 %v797_v52  ;;  %v790_v32 = vld [vmem:[%s9427_s8 + $0xe38] sm:$0xff]  ;;  %v1921_v36 = vunpack.c.l.s8.bf16 %v798_v55 }
 0x3eb   : > { %8302 = vmatprep.subr.bf16.mxu1 %v1889_v33  ;;  %v8002_v45 = vpop.f32.mrb[83].mxu1  ;;  %v5177_v46 = vadd.f32 %v7978_v37, %v10233_v19  ;;  %v783_v19 = vld [vmem:[%s9427_s8 + $0xe00] sm:$0xff]  ;;  %v3044_v33 = vcombine.high %v10249_v18, %v10249_v18  ;;  %v1905_v5 = vunpack.c.l.s8.bf16 %v790_v32  ;;  %v794_v37 = vld [vmem:[%s9427_s8 + $0xe58] sm:$0xff]  ;;  %v1906_v58 = vunpack.c.h.s8.bf16 %v790_v32 }
 0x3ec   : > { %v1891_v1 = vunpack.c.l.s8.bf16 %v783_v19  ;;  %v1892_v63 = vunpack.c.h.s8.bf16 %v783_v19  ;;  %v1913_v45 = vunpack.c.l.s8.bf16 %v794_v37 }
 0x3ed   : > { %v10264_v27 = vadd.f32 %v8000_v0, %v5177_v46  ;;  %8281 = vmatpush3.bf16.msra.mxu0 %v1865_v12  ;;  %v10284_v12 = vrot.slane %v3044_v33, %v9458_v38 }
 0x3ee   : > { %8303 = vmatpush3.bf16.msra.mxu1 %v1881_v43  ;;  %8282 = vmatprep.subr.bf16.mxu0 %v1874_v25 }
 0x3ef   : > { %8304 = vmatprep.subr.bf16.mxu1 %v1890_v6  ;;  %v1897_v6 = vunpack.c.l.s8.bf16 %v786_v29  ;;  %v3060_v19 = vcombine.high %v10284_v12, %v10284_v12 }
 0x3f1   : > { %8283 = vmatpush3.bf16.msra.mxu0 %v1866_v51 }
 0x3f2   : > { %8305 = vmatpush3.bf16.msra.mxu1 %v1882_v40  ;;  %8312 = vmatprep.subr.bf16.mxu0 %v1899_v2  ;;  %v803_v40 = vld [vmem:[%s9427_s8 + $0xea0] sm:$0xff] }
 0x3f3   : > { %8334 = vmatprep.subr.bf16.mxu1 %v1915_v53  ;;  %v811_v2 = vld [vmem:[%s9427_s8 + $0xee0] sm:$0xff]  ;;  %v3067_v53 = vrot.slane %v10255_v11, %v9458_v38 }
 0x3f4   : > { %5735 = vmatmul.mubr.bf16.vlgmr.msra.gmra.mrb[108].mxu0 %v3025_v50 }
 0x3f5   : > { %5775 = vmatmul.mubr.bf16.vlgmr.msra.gmra.mrb[108].mxu1 %v3041_v57  ;;  %8313 = vmatpush3.bf16.msra.mxu0 %v1891_v1  ;;  %v1914_v57 = vunpack.c.h.s8.bf16 %v794_v37  ;;  %v1931_v1 = vunpack.c.l.s8.bf16 %v803_v40  ;;  %v3089_v61 = vcombine.high %v3067_v53, %v3067_v53 }
 0x3f6   : > { %8335 = vmatpush3.bf16.msra.mxu1 %v1907_v59  ;;  %8314 = vmatprep.subr.bf16.mxu0 %v1900_v35  ;;  %v1947_v59 = vunpack.c.l.s8.bf16 %v811_v2  ;;  %v807_v35 = vld [vmem:[%s9427_s8 + $0xec0] sm:$0xff] }
 0x3f7   : > { %8336 = vmatprep.subr.bf16.mxu1 %v1916_v60  ;;  %5814 = vmatprep.mubr.bf16.mxu0 %v3081_v54  ;;  %v1898_v54 = vunpack.c.h.s8.bf16 %v786_v29  ;;  %v3088_v60 = vrot.slane %v3060_v19, %v9458_v38  ;;  %v1939_v62 = vunpack.c.l.s8.bf16 %v807_v35  ;;  %v1940_v9 = vunpack.c.h.s8.bf16 %v807_v35  ;;  %v10309_v29 = vld [vmem:[%s9441_s25 + $0x78] sm:$0xff] }
 0x3f8   : > { %5854 = vmatprep.mubr.bf16.mxu1 %v3091_v7  ;;  %v1932_v7 = vunpack.c.h.s8.bf16 %v803_v40 }
 0x3f9   : > { %8315 = vmatpush3.bf16.msra.mxu0 %v1892_v63  ;;  %v1948_v63 = vunpack.c.h.s8.bf16 %v811_v2  ;;  %v3092_v44 = vcombine.high %v3088_v60, %v3088_v60 }
 0x3fa   : > { %8337 = vmatpush3.bf16.msra.mxu1 %v1908_v3  ;;  %8316 = vmatprep.subr.bf16.mxu0 %v1901_v56  ;;  %v804_v3 = vld [vmem:[%s9427_s8 + $0xea8] sm:$0xff] }
 0x3fb   : > { %8338 = vmatprep.subr.bf16.mxu1 %v1917_v4  ;;  %v812_v56 = vld [vmem:[%s9427_s8 + $0xee8] sm:$0xff] }
 0x3fd   : > { %8317 = vmatpush3.bf16.msra.mxu0 %v1893_v10  ;;  %v1933_v10 = vunpack.c.l.s8.bf16 %v804_v3 }
 0x3fe   : > { %8339 = vmatpush3.bf16.msra.mxu1 %v1909_v39  ;;  %8318 = vmatprep.subr.bf16.mxu0 %v1902_v8  ;;  %v800_v39 = vld [vmem:[%s9427_s8 + $0xe88] sm:$0xff]  ;;  %v1949_v8 = vunpack.c.l.s8.bf16 %v812_v56 }
 0x3ff   : > { %8340 = vmatprep.subr.bf16.mxu1 %v1918_v13  ;;  %v808_v13 = vld [vmem:[%s9427_s8 + $0xec8] sm:$0xff]  ;;  %v1925_v14 = vunpack.c.l.s8.bf16 %v800_v39 }
 0x400   : > { %v1941_v52 = vunpack.c.l.s8.bf16 %v808_v13  ;;  %v1942_v24 = vunpack.c.h.s8.bf16 %v808_v13 }
 0x401   : > { %8319 = vmatpush3.bf16.msra.mxu0 %v1894_v17  ;;  %v1934_v17 = vunpack.c.h.s8.bf16 %v804_v3 }
 0x402   : > { %8341 = vmatpush3.bf16.msra.mxu1 %v1910_v20  ;;  %8320 = vmatprep.subr.bf16.mxu0 %v1903_v21  ;;  %v1950_v20 = vunpack.c.h.s8.bf16 %v812_v56  ;;  %v805_v21 = vld [vmem:[%s9427_s8 + $0xeb0] sm:$0xff] }
 0x403   : > { %8342 = vmatprep.subr.bf16.mxu1 %v1919_v22  ;;  %v1926_v22 = vunpack.c.h.s8.bf16 %v800_v39  ;;  %v1936_v33 = vunpack.c.h.s8.bf16 %v805_v21 }
 0x405   : > { %8321 = vmatpush3.bf16.msra.mxu0 %v1895_v15  ;;  %v1935_v15 = vunpack.c.l.s8.bf16 %v805_v21 }
 0x406   : > { %8343 = vmatpush3.bf16.msra.mxu1 %v1911_v48  ;;  %8322 = vmatprep.subr.bf16.mxu0 %v1904_v28  ;;  %v801_v48 = vld [vmem:[%s9427_s8 + $0xe90] sm:$0xff]  ;;  %v1951_v28 = vunpack.c.l.s8.bf16 %v813_v47 }
 0x407   : > { %8344 = vmatprep.subr.bf16.mxu1 %v1920_v30  ;;  %v8020_v42 = vpop.f32.mrb[84].mxu0  ;;  %v809_v30 = vld [vmem:[%s9427_s8 + $0xed0] sm:$0xff]  ;;  %v1927_v32 = vunpack.c.l.s8.bf16 %v801_v48 }
 0x408   : > { %v8042_v0 = vpop.f32.mrb[84].mxu1  ;;  %v8021_v43 = vpop.f32.mrb[85].mxu0  ;;  %v1943_v55 = vunpack.c.l.s8.bf16 %v809_v30  ;;  %v1944_v37 = vunpack.c.h.s8.bf16 %v809_v30 }
 0x409   : > { %v8043_v41 = vpop.f32.mrb[85].mxu1  ;;  %v8022_v31 = vadd.f32 %v8021_v43, %v8020_v42  ;;  %v8023_v18 = vpop.f32.mrb[86].mxu0  ;;  %8323 = vmatpush3.bf16.msra.mxu0 %v1896_v34  ;;  %v1952_v34 = vunpack.c.h.s8.bf16 %v813_v47 }
 0x40a   : > { %v8044_v25 = vadd.f32 %v8043_v41, %v8042_v0  ;;  %8345 = vmatpush3.bf16.msra.mxu1 %v1912_v23  ;;  %v8045_v46 = vpop.f32.mrb[86].mxu1  ;;  %v8024_v49 = vpop.f32.mrb[87].mxu0  ;;  %8324 = vmatprep.subr.bf16.mxu0 %v1905_v5  ;;  %v806_v23 = vld [vmem:[%s9427_s8 + $0xeb8] sm:$0xff] }
 0x40b   : > { %8346 = vmatprep.subr.bf16.mxu1 %v1921_v36  ;;  %v8046_v50 = vpop.f32.mrb[87].mxu1  ;;  %v5257_v51 = vadd.f32 %v8022_v31, %v10264_v27  ;;  %v799_v27 = vld [vmem:[%s9427_s8 + $0xe80] sm:$0xff]  ;;  %v814_v5 = vld [vmem:[%s9427_s8 + $0xef8] sm:$0xff]  ;;  %v1928_v36 = vunpack.c.h.s8.bf16 %v801_v48  ;;  %v1937_v42 = vunpack.c.l.s8.bf16 %v806_v23  ;;  %v1938_v2 = vunpack.c.h.s8.bf16 %v806_v23  ;;  %v829_v48 = vld [vmem:[%s9427_s8 + $0xf70] sm:$0xff] }
 0x40c   : > { %v1923_v11 = vunpack.c.l.s8.bf16 %v799_v27  ;;  %v1924_v4 = vunpack.c.h.s8.bf16 %v799_v27  ;;  %v802_v0 = vld [vmem:[%s9427_s8 + $0xe98] sm:$0xff]  ;;  %v1953_v43 = vunpack.c.l.s8.bf16 %v814_v5  ;;  %v1954_v19 = vunpack.c.h.s8.bf16 %v814_v5 }
 0x40d   : > { %v10293_v16 = vadd.f32 %v8044_v25, %v5257_v51  ;;  %8325 = vmatpush3.bf16.msra.mxu0 %v1897_v6  ;;  %v810_v41 = vld [vmem:[%s9427_s8 + $0xed8] sm:$0xff]  ;;  %v10315_v25 = vrot.slane %v10309_v29, %v9458_v38 }
 0x40e   : > { %8347 = vmatpush3.bf16.msra.mxu1 %v1913_v45  ;;  %8326 = vmatprep.subr.bf16.mxu0 %v1906_v58  ;;  %v1945_v50 = vunpack.c.l.s8.bf16 %v810_v41 }
 0x40f   : > { %8348 = vmatprep.subr.bf16.mxu1 %v1922_v26  ;;  %v1929_v26 = vunpack.c.l.s8.bf16 %v802_v0  ;;  %v3108_v27 = vcombine.high %v10315_v25, %v10315_v25 }
 0x411   : > { %8327 = vmatpush3.bf16.msra.mxu0 %v1898_v54 }
 0x412   : > { %8349 = vmatpush3.bf16.msra.mxu1 %v1914_v57  ;;  %8356 = vmatprep.subr.bf16.mxu0 %v1931_v1  ;;  %v819_v57 = vld [vmem:[%s9427_s8 + $0xf20] sm:$0xff] }
 0x413   : > { %8378 = vmatprep.subr.bf16.mxu1 %v1947_v59  ;;  %v827_v1 = vld [vmem:[%s9427_s8 + $0xf60] sm:$0xff]  ;;  %v3074_v59 = vrot.slane %v10284_v12, %v9458_v38 }
 0x414   : > { %5815 = vmatmul.mubr.bf16.vlgmr.msra.gmra.mrb[112].mxu0 %v3067_v53 }
 0x415   : > { %5855 = vmatmul.mubr.bf16.vlgmr.msra.gmra.mrb[112].mxu1 %v3089_v61  ;;  %8357 = vmatpush3.bf16.msra.mxu0 %v1923_v11  ;;  %v1946_v61 = vunpack.c.h.s8.bf16 %v810_v41  ;;  %v1963_v11 = vunpack.c.l.s8.bf16 %v819_v57  ;;  %v3090_v3 = vcombine.high %v3074_v59, %v3074_v59 }
 0x416   : > { %8379 = vmatpush3.bf16.msra.mxu1 %v1939_v62  ;;  %8358 = vmatprep.subr.bf16.mxu0 %v1932_v7  ;;  %v1979_v62 = vunpack.c.l.s8.bf16 %v827_v1  ;;  %v823_v7 = vld [vmem:[%s9427_s8 + $0xf40] sm:$0xff] }
 0x417   : > { %8380 = vmatprep.subr.bf16.mxu1 %v1948_v63  ;;  %5894 = vmatprep.mubr.bf16.mxu0 %v3088_v60  ;;  %v1930_v60 = vunpack.c.h.s8.bf16 %v802_v0  ;;  %v3130_v63 = vrot.slane %v3108_v27, %v9458_v38  ;;  %v1971_v56 = vunpack.c.l.s8.bf16 %v823_v7  ;;  %v1972_v13 = vunpack.c.h.s8.bf16 %v823_v7  ;;  %v830_v0 = vld [vmem:[%s9427_s8 + $0xf78] sm:$0xff] }
 0x418   : > { %5934 = vmatprep.mubr.bf16.mxu1 %v3092_v44  ;;  %v1964_v44 = vunpack.c.h.s8.bf16 %v819_v57  ;;  %v1986_v27 = vunpack.c.h.s8.bf16 %v830_v0 }
 0x419   : > { %8359 = vmatpush3.bf16.msra.mxu0 %v1924_v4  ;;  %v1980_v4 = vunpack.c.h.s8.bf16 %v827_v1  ;;  %v3140_v39 = vcombine.high %v3130_v63, %v3130_v63 }
 0x41a   : > { %8381 = vmatpush3.bf16.msra.mxu1 %v1940_v9  ;;  %8360 = vmatprep.subr.bf16.mxu0 %v1933_v10  ;;  %v820_v9 = vld [vmem:[%s9427_s8 + $0xf28] sm:$0xff] }
 0x41b   : > { %8382 = vmatprep.subr.bf16.mxu1 %v1949_v8  ;;  %v828_v10 = vld [vmem:[%s9427_s8 + $0xf68] sm:$0xff] }
 0x41d   : > { %8361 = vmatpush3.bf16.msra.mxu0 %v1925_v14  ;;  %v1965_v14 = vunpack.c.l.s8.bf16 %v820_v9 }
 0x41e   : > { %8383 = vmatpush3.bf16.msra.mxu1 %v1941_v52  ;;  %8362 = vmatprep.subr.bf16.mxu0 %v1934_v17  ;;  %v816_v52 = vld [vmem:[%s9427_s8 + $0xf08] sm:$0xff]  ;;  %v1981_v17 = vunpack.c.l.s8.bf16 %v828_v10 }
 0x41f   : > { %8384 = vmatprep.subr.bf16.mxu1 %v1950_v20  ;;  %v824_v20 = vld [vmem:[%s9427_s8 + $0xf48] sm:$0xff]  ;;  %v1957_v21 = vunpack.c.l.s8.bf16 %v816_v52 }
 0x420   : > { %v1973_v47 = vunpack.c.l.s8.bf16 %v824_v20  ;;  %v1974_v30 = vunpack.c.h.s8.bf16 %v824_v20 }
 0x421   : > { %8363 = vmatpush3.bf16.msra.mxu0 %v1926_v22  ;;  %v1966_v22 = vunpack.c.h.s8.bf16 %v820_v9 }
 0x422   : > { %8385 = vmatpush3.bf16.msra.mxu1 %v1942_v24  ;;  %8364 = vmatprep.subr.bf16.mxu0 %v1935_v15  ;;  %v1982_v24 = vunpack.c.h.s8.bf16 %v828_v10  ;;  %v821_v15 = vld [vmem:[%s9427_s8 + $0xf30] sm:$0xff] }
 0x423   : > { %8386 = vmatprep.subr.bf16.mxu1 %v1951_v28  ;;  %v1958_v28 = vunpack.c.h.s8.bf16 %v816_v52 }
 0x425   : > { %8365 = vmatpush3.bf16.msra.mxu0 %v1927_v32  ;;  %v1967_v32 = vunpack.c.l.s8.bf16 %v821_v15 }
 0x426   : > { %8387 = vmatpush3.bf16.msra.mxu1 %v1943_v55  ;;  %8366 = vmatprep.subr.bf16.mxu0 %v1936_v33  ;;  %v817_v55 = vld [vmem:[%s9427_s8 + $0xf10] sm:$0xff]  ;;  %v1983_v33 = vunpack.c.l.s8.bf16 %v829_v48 }
 0x427   : > { %8388 = vmatprep.subr.bf16.mxu1 %v1952_v34  ;;  %v8064_v31 = vpop.f32.mrb[88].mxu0  ;;  %v825_v34 = vld [vmem:[%s9427_s8 + $0xf50] sm:$0xff]  ;;  %v1959_v23 = vunpack.c.l.s8.bf16 %v817_v55  ;;  %v1960_v41 = vunpack.c.h.s8.bf16 %v817_v55 }
 0x428   : > { %v8086_v18 = vpop.f32.mrb[88].mxu1  ;;  %v8065_v6 = vpop.f32.mrb[89].mxu0  ;;  %v1975_v5 = vunpack.c.l.s8.bf16 %v825_v34  ;;  %v845_v55 = vld [vmem:[%s9427_s8 + $0xff0] sm:$0xff] }
 0x429   : > { %v8087_v45 = vpop.f32.mrb[89].mxu1  ;;  %v8066_v46 = vadd.f32 %v8065_v6, %v8064_v31  ;;  %v8067_v49 = vpop.f32.mrb[90].mxu0  ;;  %8367 = vmatpush3.bf16.msra.mxu0 %v1928_v36  ;;  %v1968_v36 = vunpack.c.h.s8.bf16 %v821_v15  ;;  %v1976_v31 = vunpack.c.h.s8.bf16 %v825_v34  ;;  %v818_v6 = vld [vmem:[%s9427_s8 + $0xf18] sm:$0xff] }
 0x42a   : > { %v8088_v58 = vadd.f32 %v8087_v45, %v8086_v18  ;;  %8389 = vmatpush3.bf16.msra.mxu1 %v1944_v37  ;;  %v8089_v51 = vpop.f32.mrb[90].mxu1  ;;  %v8068_v40 = vpop.f32.mrb[91].mxu0  ;;  %8368 = vmatprep.subr.bf16.mxu0 %v1937_v42  ;;  %v1984_v37 = vunpack.c.h.s8.bf16 %v829_v48  ;;  %v822_v42 = vld [vmem:[%s9427_s8 + $0xf38] sm:$0xff]  ;;  %v1985_v45 = vunpack.c.l.s8.bf16 %v830_v0 }
 0x42b   : > { %8390 = vmatprep.subr.bf16.mxu1 %v1953_v43  ;;  %v8090_v53 = vpop.f32.mrb[91].mxu1  ;;  %v5337_v54 = vadd.f32 %v8066_v46, %v10293_v16  ;;  %v815_v16 = vld [vmem:[%s9427_s8 + $0xf00] sm:$0xff]  ;;  %v3093_v43 = vcombine.high %v10309_v29, %v10309_v29  ;;  %v1969_v18 = vunpack.c.l.s8.bf16 %v822_v42  ;;  %v826_v46 = vld [vmem:[%s9427_s8 + $0xf58] sm:$0xff]  ;;  %v1970_v1 = vunpack.c.h.s8.bf16 %v822_v42 }
 0x42c   : > { %v1955_v12 = vunpack.c.l.s8.bf16 %v815_v16  ;;  %v1956_v8 = vunpack.c.h.s8.bf16 %v815_v16  ;;  %v1977_v53 = vunpack.c.l.s8.bf16 %v826_v46 }
 0x42d   : > { %v10324_v35 = vadd.f32 %v8088_v58, %v5337_v54  ;;  %8369 = vmatpush3.bf16.msra.mxu0 %v1929_v26  ;;  %v10344_v26 = vrot.slane %v3093_v43, %v9458_v38 }
 0x42e   : > { %8391 = vmatpush3.bf16.msra.mxu1 %v1945_v50  ;;  %8370 = vmatprep.subr.bf16.mxu0 %v1938_v2 }
 0x42f   : > { %8392 = vmatprep.subr.bf16.mxu1 %v1954_v19  ;;  %v1961_v19 = vunpack.c.l.s8.bf16 %v818_v6  ;;  %v3109_v16 = vcombine.high %v10344_v26, %v10344_v26 }
 0x431   : > { %8371 = vmatpush3.bf16.msra.mxu0 %v1930_v60 }
 0x432   : > { %8393 = vmatpush3.bf16.msra.mxu1 %v1946_v61  ;;  %8400 = vmatprep.subr.bf16.mxu0 %v1963_v11  ;;  %v835_v61 = vld [vmem:[%s9427_s8 + $0xfa0] sm:$0xff] }
 0x433   : > { %8422 = vmatprep.subr.bf16.mxu1 %v1979_v62  ;;  %v843_v11 = vld [vmem:[%s9427_s8 + $0xfe0] sm:$0xff]  ;;  %v3116_v62 = vrot.slane %v10315_v25, %v9458_v38 }
 0x434   : > { %5895 = vmatmul.mubr.bf16.vlgmr.msra.gmra.mrb[116].mxu0 %v3074_v59 }
 0x435   : > { %5935 = vmatmul.mubr.bf16.vlgmr.msra.gmra.mrb[116].mxu1 %v3090_v3  ;;  %8401 = vmatpush3.bf16.msra.mxu0 %v1955_v12  ;;  %v1978_v3 = vunpack.c.h.s8.bf16 %v826_v46  ;;  %v1995_v12 = vunpack.c.l.s8.bf16 %v835_v61  ;;  %v3138_v9 = vcombine.high %v3116_v62, %v3116_v62 }
 0x436   : > { %8423 = vmatpush3.bf16.msra.mxu1 %v1971_v56  ;;  %8402 = vmatprep.subr.bf16.mxu0 %v1964_v44  ;;  %v2011_v56 = vunpack.c.l.s8.bf16 %v843_v11  ;;  %v839_v44 = vld [vmem:[%s9427_s8 + $0xfc0] sm:$0xff] }
 0x437   : > { %8424 = vmatprep.subr.bf16.mxu1 %v1980_v4  ;;  %5974 = vmatprep.mubr.bf16.mxu0 %v3130_v63  ;;  %v1962_v63 = vunpack.c.h.s8.bf16 %v818_v6  ;;  %v3137_v4 = vrot.slane %v3109_v16, %v9458_v38  ;;  %v2003_v10 = vunpack.c.l.s8.bf16 %v839_v44  ;;  %v2004_v20 = vunpack.c.h.s8.bf16 %v839_v44  ;;  %v10369_v6 = vld [vmem:[%s9441_s25 + $0x80] sm:$0xff] }
 0x438   : > { %6014 = vmatprep.mubr.bf16.mxu1 %v3140_v39  ;;  %v1996_v39 = vunpack.c.h.s8.bf16 %v835_v61 }
 0x439   : > { %8403 = vmatpush3.bf16.msra.mxu0 %v1956_v8  ;;  %v2012_v8 = vunpack.c.h.s8.bf16 %v843_v11  ;;  %v3141_v52 = vcombine.high %v3137_v4, %v3137_v4 }
 0x43a   : > { %8425 = vmatpush3.bf16.msra.mxu1 %v1972_v13  ;;  %8404 = vmatprep.subr.bf16.mxu0 %v1965_v14  ;;  %v836_v13 = vld [vmem:[%s9427_s8 + $0xfa8] sm:$0xff] }
 0x43b   : > { %8426 = vmatprep.subr.bf16.mxu1 %v1981_v17  ;;  %v844_v14 = vld [vmem:[%s9427_s8 + $0xfe8] sm:$0xff] }
 0x43d   : > { %8405 = vmatpush3.bf16.msra.mxu0 %v1957_v21  ;;  %v1997_v21 = vunpack.c.l.s8.bf16 %v836_v13 }
 0x43e   : > { %8427 = vmatpush3.bf16.msra.mxu1 %v1973_v47  ;;  %8406 = vmatprep.subr.bf16.mxu0 %v1966_v22  ;;  %v832_v47 = vld [vmem:[%s9427_s8 + $0xf88] sm:$0xff]  ;;  %v2013_v22 = vunpack.c.l.s8.bf16 %v844_v14 }
 0x43f   : > { %8428 = vmatprep.subr.bf16.mxu1 %v1982_v24  ;;  %v840_v24 = vld [vmem:[%s9427_s8 + $0xfc8] sm:$0xff]  ;;  %v1989_v15 = vunpack.c.l.s8.bf16 %v832_v47 }
 0x440   : > { %v2005_v48 = vunpack.c.l.s8.bf16 %v840_v24  ;;  %v2006_v34 = vunpack.c.h.s8.bf16 %v840_v24 }
 0x441   : > { %8407 = vmatpush3.bf16.msra.mxu0 %v1958_v28  ;;  %v1998_v28 = vunpack.c.h.s8.bf16 %v836_v13 }
 0x442   : > { %8429 = vmatpush3.bf16.msra.mxu1 %v1974_v30  ;;  %8408 = vmatprep.subr.bf16.mxu0 %v1967_v32  ;;  %v2014_v30 = vunpack.c.h.s8.bf16 %v844_v14  ;;  %v837_v32 = vld [vmem:[%s9427_s8 + $0xfb0] sm:$0xff] }
 0x443   : > { %8430 = vmatprep.subr.bf16.mxu1 %v1983_v33  ;;  %v1990_v33 = vunpack.c.h.s8.bf16 %v832_v47  ;;  %v2000_v43 = vunpack.c.h.s8.bf16 %v837_v32 }
 0x445   : > { %8409 = vmatpush3.bf16.msra.mxu0 %v1959_v23  ;;  %v1999_v23 = vunpack.c.l.s8.bf16 %v837_v32 }
 0x446   : > { %8431 = vmatpush3.bf16.msra.mxu1 %v1975_v5  ;;  %8410 = vmatprep.subr.bf16.mxu0 %v1968_v36  ;;  %v833_v5 = vld [vmem:[%s9427_s8 + $0xf90] sm:$0xff]  ;;  %v2015_v36 = vunpack.c.l.s8.bf16 %v845_v55 }
 0x447   : > { %8432 = vmatprep.subr.bf16.mxu1 %v1984_v37  ;;  %v8108_v49 = vpop.f32.mrb[92].mxu0  ;;  %v841_v37 = vld [vmem:[%s9427_s8 + $0xfd0] sm:$0xff]  ;;  %v1991_v42 = vunpack.c.l.s8.bf16 %v833_v5 }
 0x448   : > { %v8130_v58 = vpop.f32.mrb[92].mxu1  ;;  %v8109_v50 = vpop.f32.mrb[93].mxu0  ;;  %v2007_v0 = vunpack.c.l.s8.bf16 %v841_v37  ;;  %v2008_v46 = vunpack.c.h.s8.bf16 %v841_v37 }
 0x449   : > { %v8131_v51 = vpop.f32.mrb[93].mxu1  ;;  %v8110_v40 = vadd.f32 %v8109_v50, %v8108_v49  ;;  %v8111_v29 = vpop.f32.mrb[94].mxu0  ;;  %8411 = vmatpush3.bf16.msra.mxu0 %v1960_v41  ;;  %v2016_v41 = vunpack.c.h.s8.bf16 %v845_v55 }
 0x44a   : > { %v8132_v2 = vadd.f32 %v8131_v51, %v8130_v58  ;;  %8433 = vmatpush3.bf16.msra.mxu1 %v1976_v31  ;;  %v8133_v54 = vpop.f32.mrb[94].mxu1  ;;  %v8112_v57 = vpop.f32.mrb[95].mxu0  ;;  %8412 = vmatprep.subr.bf16.mxu0 %v1969_v18  ;;  %v838_v31 = vld [vmem:[%s9427_s8 + $0xfb8] sm:$0xff] }
 0x44b   : > { %8434 = vmatprep.subr.bf16.mxu1 %v1985_v45  ;;  %v8134_v59 = vpop.f32.mrb[95].mxu1  ;;  %v5417_v60 = vadd.f32 %v8110_v40, %v10324_v35  ;;  %v831_v35 = vld [vmem:[%s9427_s8 + $0xf80] sm:$0xff]  ;;  %v846_v18 = vld [vmem:[%s9427_s8 + $0xff8] sm:$0xff]  ;;  %v1992_v45 = vunpack.c.h.s8.bf16 %v833_v5  ;;  %v2001_v49 = vunpack.c.l.s8.bf16 %v838_v31  ;;  %v2002_v11 = vunpack.c.h.s8.bf16 %v838_v31  ;;  %v861_v5 = vld [vmem:[%s9427_s8 + $0x1070] sm:$0xff] }
 0x44c   : > { %v1987_v25 = vunpack.c.l.s8.bf16 %v831_v35  ;;  %v1988_v17 = vunpack.c.h.s8.bf16 %v831_v35  ;;  %v834_v58 = vld [vmem:[%s9427_s8 + $0xf98] sm:$0xff]  ;;  %v2017_v50 = vunpack.c.l.s8.bf16 %v846_v18  ;;  %v2018_v16 = vunpack.c.h.s8.bf16 %v846_v18 }
 0x44d   : > { %v10353_v7 = vadd.f32 %v8132_v2, %v5417_v60  ;;  %8413 = vmatpush3.bf16.msra.mxu0 %v1961_v19  ;;  %v842_v51 = vld [vmem:[%s9427_s8 + $0xfd8] sm:$0xff]  ;;  %v10375_v2 = vrot.slane %v10369_v6, %v9458_v38 }
 0x44e   : > { %8435 = vmatpush3.bf16.msra.mxu1 %v1977_v53  ;;  %8414 = vmatprep.subr.bf16.mxu0 %v1970_v1  ;;  %v2009_v59 = vunpack.c.l.s8.bf16 %v842_v51 }
 0x44f   : > { %8436 = vmatprep.subr.bf16.mxu1 %v1986_v27  ;;  %v1993_v27 = vunpack.c.l.s8.bf16 %v834_v58  ;;  %v3157_v35 = vcombine.high %v10375_v2, %v10375_v2 }
 0x451   : > { %8415 = vmatpush3.bf16.msra.mxu0 %v1962_v63 }
 0x452   : > { %8437 = vmatpush3.bf16.msra.mxu1 %v1978_v3  ;;  %8444 = vmatprep.subr.bf16.mxu0 %v1995_v12  ;;  %v851_v3 = vld [vmem:[%s9427_s8 + $0x1020] sm:$0xff] }
 0x453   : > { %8466 = vmatprep.subr.bf16.mxu1 %v2011_v56  ;;  %v859_v12 = vld [vmem:[%s9427_s8 + $0x1060] sm:$0xff]  ;;  %v3123_v56 = vrot.slane %v10344_v26, %v9458_v38 }
 0x454   : > { %5975 = vmatmul.mubr.bf16.vlgmr.msra.gmra.mrb[120].mxu0 %v3116_v62 }
 0x455   : > { %6015 = vmatmul.mubr.bf16.vlgmr.msra.gmra.mrb[120].mxu1 %v3138_v9  ;;  %8445 = vmatpush3.bf16.msra.mxu0 %v1987_v25  ;;  %v2010_v9 = vunpack.c.h.s8.bf16 %v842_v51  ;;  %v2027_v25 = vunpack.c.l.s8.bf16 %v851_v3  ;;  %v3139_v13 = vcombine.high %v3123_v56, %v3123_v56 }
 0x456   : > { %8467 = vmatpush3.bf16.msra.mxu1 %v2003_v10  ;;  %8446 = vmatprep.subr.bf16.mxu0 %v1996_v39  ;;  %v2043_v10 = vunpack.c.l.s8.bf16 %v859_v12  ;;  %v855_v39 = vld [vmem:[%s9427_s8 + $0x1040] sm:$0xff] }
 0x457   : > { %8468 = vmatprep.subr.bf16.mxu1 %v2012_v8  ;;  %6054 = vmatprep.mubr.bf16.mxu0 %v3137_v4  ;;  %v1994_v4 = vunpack.c.h.s8.bf16 %v834_v58  ;;  %v3179_v8 = vrot.slane %v3157_v35, %v9458_v38  ;;  %v2035_v14 = vunpack.c.l.s8.bf16 %v855_v39  ;;  %v2036_v24 = vunpack.c.h.s8.bf16 %v855_v39  ;;  %v862_v58 = vld [vmem:[%s9427_s8 + $0x1078] sm:$0xff] }
 0x458   : > { %6094 = vmatprep.mubr.bf16.mxu1 %v3141_v52  ;;  %v2028_v52 = vunpack.c.h.s8.bf16 %v851_v3  ;;  %v2050_v35 = vunpack.c.h.s8.bf16 %v862_v58 }
 0x459   : > { %8447 = vmatpush3.bf16.msra.mxu0 %v1988_v17  ;;  %v2044_v17 = vunpack.c.h.s8.bf16 %v859_v12  ;;  %v3189_v47 = vcombine.high %v3179_v8, %v3179_v8 }
 0x45a   : > { %8469 = vmatpush3.bf16.msra.mxu1 %v2004_v20  ;;  %8448 = vmatprep.subr.bf16.mxu0 %v1997_v21  ;;  %v852_v20 = vld [vmem:[%s9427_s8 + $0x1028] sm:$0xff] }
 0x45b   : > { %8470 = vmatprep.subr.bf16.mxu1 %v2013_v22  ;;  %v860_v21 = vld [vmem:[%s9427_s8 + $0x1068] sm:$0xff] }
 0x45d   : > { %8449 = vmatpush3.bf16.msra.mxu0 %v1989_v15  ;;  %v2029_v15 = vunpack.c.l.s8.bf16 %v852_v20 }
 0x45e   : > { %8471 = vmatpush3.bf16.msra.mxu1 %v2005_v48  ;;  %8450 = vmatprep.subr.bf16.mxu0 %v1998_v28  ;;  %v848_v48 = vld [vmem:[%s9427_s8 + $0x1008] sm:$0xff]  ;;  %v2045_v28 = vunpack.c.l.s8.bf16 %v860_v21 }
 0x45f   : > { %8472 = vmatprep.subr.bf16.mxu1 %v2014_v30  ;;  %v856_v30 = vld [vmem:[%s9427_s8 + $0x1048] sm:$0xff]  ;;  %v2021_v32 = vunpack.c.l.s8.bf16 %v848_v48 }
 0x460   : > { %v2037_v55 = vunpack.c.l.s8.bf16 %v856_v30  ;;  %v2038_v37 = vunpack.c.h.s8.bf16 %v856_v30 }
 0x461   : > { %8451 = vmatpush3.bf16.msra.mxu0 %v1990_v33  ;;  %v2030_v33 = vunpack.c.h.s8.bf16 %v852_v20 }
 0x462   : > { %8473 = vmatpush3.bf16.msra.mxu1 %v2006_v34  ;;  %8452 = vmatprep.subr.bf16.mxu0 %v1999_v23  ;;  %v2046_v34 = vunpack.c.h.s8.bf16 %v860_v21  ;;  %v853_v23 = vld [vmem:[%s9427_s8 + $0x1030] sm:$0xff] }
 0x463   : > { %8474 = vmatprep.subr.bf16.mxu1 %v2015_v36  ;;  %v2022_v36 = vunpack.c.h.s8.bf16 %v848_v48 }
 0x465   : > { %8453 = vmatpush3.bf16.msra.mxu0 %v1991_v42  ;;  %v2031_v42 = vunpack.c.l.s8.bf16 %v853_v23 }
 0x466   : > { %8475 = vmatpush3.bf16.msra.mxu1 %v2007_v0  ;;  %8454 = vmatprep.subr.bf16.mxu0 %v2000_v43  ;;  %v849_v0 = vld [vmem:[%s9427_s8 + $0x1010] sm:$0xff]  ;;  %v2047_v43 = vunpack.c.l.s8.bf16 %v861_v5 }
 0x467   : > { %8476 = vmatprep.subr.bf16.mxu1 %v2016_v41  ;;  %v8152_v40 = vpop.f32.mrb[96].mxu0  ;;  %v857_v41 = vld [vmem:[%s9427_s8 + $0x1050] sm:$0xff]  ;;  %v2023_v31 = vunpack.c.l.s8.bf16 %v849_v0  ;;  %v2024_v51 = vunpack.c.h.s8.bf16 %v849_v0 }
 0x468   : > { %v8174_v29 = vpop.f32.mrb[96].mxu1  ;;  %v8153_v19 = vpop.f32.mrb[97].mxu0  ;;  %v2039_v18 = vunpack.c.l.s8.bf16 %v857_v41  ;;  %v877_v0 = vld [vmem:[%s9427_s8 + $0x10f0] sm:$0xff] }
 0x469   : > { %v8175_v53 = vpop.f32.mrb[97].mxu1  ;;  %v8154_v54 = vadd.f32 %v8153_v19, %v8152_v40  ;;  %v8155_v57 = vpop.f32.mrb[98].mxu0  ;;  %8455 = vmatpush3.bf16.msra.mxu0 %v1992_v45  ;;  %v2032_v45 = vunpack.c.h.s8.bf16 %v853_v23  ;;  %v2040_v40 = vunpack.c.h.s8.bf16 %v857_v41  ;;  %v850_v19 = vld [vmem:[%s9427_s8 + $0x1018] sm:$0xff] }
 0x46a   : > { %v8176_v1 = vadd.f32 %v8175_v53, %v8174_v29  ;;  %8477 = vmatpush3.bf16.msra.mxu1 %v2008_v46  ;;  %v8177_v60 = vpop.f32.mrb[98].mxu1  ;;  %v8156_v61 = vpop.f32.mrb[99].mxu0  ;;  %8456 = vmatprep.subr.bf16.mxu0 %v2001_v49  ;;  %v2048_v46 = vunpack.c.h.s8.bf16 %v861_v5  ;;  %v854_v49 = vld [vmem:[%s9427_s8 + $0x1038] sm:$0xff]  ;;  %v2049_v53 = vunpack.c.l.s8.bf16 %v862_v58 }
 0x46b   : > { %8478 = vmatprep.subr.bf16.mxu1 %v2017_v50  ;;  %v8178_v62 = vpop.f32.mrb[99].mxu1  ;;  %v5497_v63 = vadd.f32 %v8154_v54, %v10353_v7  ;;  %v847_v7 = vld [vmem:[%s9427_s8 + $0x1000] sm:$0xff]  ;;  %v3142_v50 = vcombine.high %v10369_v6, %v10369_v6  ;;  %v2033_v29 = vunpack.c.l.s8.bf16 %v854_v49  ;;  %v858_v54 = vld [vmem:[%s9427_s8 + $0x1058] sm:$0xff]  ;;  %v2034_v12 = vunpack.c.h.s8.bf16 %v854_v49 }
 0x46c   : > { %v2019_v26 = vunpack.c.l.s8.bf16 %v847_v7  ;;  %v2020_v22 = vunpack.c.h.s8.bf16 %v847_v7  ;;  %v2041_v62 = vunpack.c.l.s8.bf16 %v858_v54 }
 0x46d   : > { %v10384_v44 = vadd.f32 %v8176_v1, %v5497_v63  ;;  %8457 = vmatpush3.bf16.msra.mxu0 %v1993_v27  ;;  %v10404_v27 = vrot.slane %v3142_v50, %v9458_v38 }
 0x46e   : > { %8479 = vmatpush3.bf16.msra.mxu1 %v2009_v59  ;;  %8458 = vmatprep.subr.bf16.mxu0 %v2002_v11 }
 0x46f   : > { %8480 = vmatprep.subr.bf16.mxu1 %v2018_v16  ;;  %v2025_v16 = vunpack.c.l.s8.bf16 %v850_v19  ;;  %v3158_v7 = vcombine.high %v10404_v27, %v10404_v27 }
 0x471   : > { %8459 = vmatpush3.bf16.msra.mxu0 %v1994_v4 }
 0x472   : > { %8481 = vmatpush3.bf16.msra.mxu1 %v2010_v9  ;;  %8488 = vmatprep.subr.bf16.mxu0 %v2027_v25  ;;  %v867_v9 = vld [vmem:[%s9427_s8 + $0x10a0] sm:$0xff] }
 0x473   : > { %8510 = vmatprep.subr.bf16.mxu1 %v2043_v10  ;;  %v875_v25 = vld [vmem:[%s9427_s8 + $0x10e0] sm:$0xff]  ;;  %v3165_v10 = vrot.slane %v10375_v2, %v9458_v38 }
 0x474   : > { %6055 = vmatmul.mubr.bf16.vlgmr.msra.gmra.mrb[124].mxu0 %v3123_v56 }
 0x475   : > { %6095 = vmatmul.mubr.bf16.vlgmr.msra.gmra.mrb[124].mxu1 %v3139_v13  ;;  %8489 = vmatpush3.bf16.msra.mxu0 %v2019_v26  ;;  %v2042_v13 = vunpack.c.h.s8.bf16 %v858_v54  ;;  %v2059_v26 = vunpack.c.l.s8.bf16 %v867_v9  ;;  %v3187_v20 = vcombine.high %v3165_v10, %v3165_v10 }
 0x476   : > { %8511 = vmatpush3.bf16.msra.mxu1 %v2035_v14  ;;  %8490 = vmatprep.subr.bf16.mxu0 %v2028_v52  ;;  %v2075_v14 = vunpack.c.l.s8.bf16 %v875_v25  ;;  %v871_v52 = vld [vmem:[%s9427_s8 + $0x10c0] sm:$0xff] }
 0x477   : > { %8512 = vmatprep.subr.bf16.mxu1 %v2044_v17  ;;  %6134 = vmatprep.mubr.bf16.mxu0 %v3179_v8  ;;  %v2026_v8 = vunpack.c.h.s8.bf16 %v850_v19  ;;  %v3186_v17 = vrot.slane %v3158_v7, %v9458_v38  ;;  %v2067_v21 = vunpack.c.l.s8.bf16 %v871_v52  ;;  %v2068_v30 = vunpack.c.h.s8.bf16 %v871_v52  ;;  %v10429_v19 = vld [vmem:[%s9441_s25 + $0x88] sm:$0xff] }
 0x478   : > { %6174 = vmatprep.mubr.bf16.mxu1 %v3189_v47  ;;  %v2060_v47 = vunpack.c.h.s8.bf16 %v867_v9 }
 0x479   : > { %8491 = vmatpush3.bf16.msra.mxu0 %v2020_v22  ;;  %v2076_v22 = vunpack.c.h.s8.bf16 %v875_v25  ;;  %v3190_v48 = vcombine.high %v3186_v17, %v3186_v17 }
 0x47a   : > { %8513 = vmatpush3.bf16.msra.mxu1 %v2036_v24  ;;  %8492 = vmatprep.subr.bf16.mxu0 %v2029_v15  ;;  %v868_v24 = vld [vmem:[%s9427_s8 + $0x10a8] sm:$0xff] }
 0x47b   : > { %8514 = vmatprep.subr.bf16.mxu1 %v2045_v28  ;;  %v876_v15 = vld [vmem:[%s9427_s8 + $0x10e8] sm:$0xff] }
 0x47d   : > { %8493 = vmatpush3.bf16.msra.mxu0 %v2021_v32  ;;  %v2061_v32 = vunpack.c.l.s8.bf16 %v868_v24 }
 0x47e   : > { %8515 = vmatpush3.bf16.msra.mxu1 %v2037_v55  ;;  %8494 = vmatprep.subr.bf16.mxu0 %v2030_v33  ;;  %v864_v55 = vld [vmem:[%s9427_s8 + $0x1088] sm:$0xff]  ;;  %v2077_v33 = vunpack.c.l.s8.bf16 %v876_v15 }
 0x47f   : > { %8516 = vmatprep.subr.bf16.mxu1 %v2046_v34  ;;  %v872_v34 = vld [vmem:[%s9427_s8 + $0x10c8] sm:$0xff]  ;;  %v2053_v23 = vunpack.c.l.s8.bf16 %v864_v55 }
 0x480   : > { %v2069_v5 = vunpack.c.l.s8.bf16 %v872_v34  ;;  %v2070_v41 = vunpack.c.h.s8.bf16 %v872_v34 }
 0x481   : > { %8495 = vmatpush3.bf16.msra.mxu0 %v2022_v36  ;;  %v2062_v36 = vunpack.c.h.s8.bf16 %v868_v24 }
 0x482   : > { %8517 = vmatpush3.bf16.msra.mxu1 %v2038_v37  ;;  %8496 = vmatprep.subr.bf16.mxu0 %v2031_v42  ;;  %v2078_v37 = vunpack.c.h.s8.bf16 %v876_v15  ;;  %v869_v42 = vld [vmem:[%s9427_s8 + $0x10b0] sm:$0xff] }
 0x483   : > { %8518 = vmatprep.subr.bf16.mxu1 %v2047_v43  ;;  %v2054_v43 = vunpack.c.h.s8.bf16 %v864_v55  ;;  %v2064_v50 = vunpack.c.h.s8.bf16 %v869_v42 }
 0x485   : > { %8497 = vmatpush3.bf16.msra.mxu0 %v2023_v31  ;;  %v2063_v31 = vunpack.c.l.s8.bf16 %v869_v42 }
 0x486   : > { %8519 = vmatpush3.bf16.msra.mxu1 %v2039_v18  ;;  %8498 = vmatprep.subr.bf16.mxu0 %v2032_v45  ;;  %v865_v18 = vld [vmem:[%s9427_s8 + $0x1090] sm:$0xff]  ;;  %v2079_v45 = vunpack.c.l.s8.bf16 %v877_v0 }
 0x487   : > { %8520 = vmatprep.subr.bf16.mxu1 %v2048_v46  ;;  %v8196_v57 = vpop.f32.mrb[100].mxu0  ;;  %v873_v46 = vld [vmem:[%s9427_s8 + $0x10d0] sm:$0xff]  ;;  %v2055_v49 = vunpack.c.l.s8.bf16 %v865_v18 }
 0x488   : > { %v8218_v1 = vpop.f32.mrb[100].mxu1  ;;  %v8197_v59 = vpop.f32.mrb[101].mxu0  ;;  %v2071_v58 = vunpack.c.l.s8.bf16 %v873_v46  ;;  %v2072_v54 = vunpack.c.h.s8.bf16 %v873_v46 }
 0x489   : > { %v8219_v60 = vpop.f32.mrb[101].mxu1  ;;  %v8198_v61 = vadd.f32 %v8197_v59, %v8196_v57  ;;  %v8199_v6 = vpop.f32.mrb[102].mxu0  ;;  %8499 = vmatpush3.bf16.msra.mxu0 %v2024_v51  ;;  %v2080_v51 = vunpack.c.h.s8.bf16 %v877_v0 }
 0x48a   : > { %v8220_v11 = vadd.f32 %v8219_v60, %v8218_v1  ;;  %8521 = vmatpush3.bf16.msra.mxu1 %v2040_v40  ;;  %v8221_v63 = vpop.f32.mrb[102].mxu1  ;;  %v8200_v3 = vpop.f32.mrb[103].mxu0  ;;  %8500 = vmatprep.subr.bf16.mxu0 %v2033_v29  ;;  %v870_v40 = vld [vmem:[%s9427_s8 + $0x10b8] sm:$0xff] }
 0x48b   : > { %8522 = vmatprep.subr.bf16.mxu1 %v2049_v53  ;;  %v8222_v56 = vpop.f32.mrb[103].mxu1  ;;  %v5577_v4 = vadd.f32 %v8198_v61, %v10384_v44  ;;  %v863_v44 = vld [vmem:[%s9427_s8 + $0x1080] sm:$0xff]  ;;  %v878_v29 = vld [vmem:[%s9427_s8 + $0x10f8] sm:$0xff]  ;;  %v2056_v53 = vunpack.c.h.s8.bf16 %v865_v18  ;;  %v2065_v57 = vunpack.c.l.s8.bf16 %v870_v40  ;;  %v2066_v25 = vunpack.c.h.s8.bf16 %v870_v40  ;;  %v893_v18 = vld [vmem:[%s9427_s8 + $0x1170] sm:$0xff] }
 0x48c   : > { %v2051_v2 = vunpack.c.l.s8.bf16 %v863_v44  ;;  %v2052_v28 = vunpack.c.h.s8.bf16 %v863_v44  ;;  %v866_v1 = vld [vmem:[%s9427_s8 + $0x1098] sm:$0xff]  ;;  %v2081_v59 = vunpack.c.l.s8.bf16 %v878_v29  ;;  %v2082_v7 = vunpack.c.h.s8.bf16 %v878_v29 }
 0x48d   : > { %v10413_v39 = vadd.f32 %v8220_v11, %v5577_v4  ;;  %8501 = vmatpush3.bf16.msra.mxu0 %v2025_v16  ;;  %v874_v60 = vld [vmem:[%s9427_s8 + $0x10d8] sm:$0xff]  ;;  %v10435_v11 = vrot.slane %v10429_v19, %v9458_v38 }
 0x48e   : > { %8523 = vmatpush3.bf16.msra.mxu1 %v2041_v62  ;;  %8502 = vmatprep.subr.bf16.mxu0 %v2034_v12  ;;  %v2073_v56 = vunpack.c.l.s8.bf16 %v874_v60 }
 0x48f   : > { %8524 = vmatprep.subr.bf16.mxu1 %v2050_v35  ;;  %v2057_v35 = vunpack.c.l.s8.bf16 %v866_v1  ;;  %v3206_v44 = vcombine.high %v10435_v11, %v10435_v11 }
 0x491   : > { %8503 = vmatpush3.bf16.msra.mxu0 %v2026_v8 }
 0x492   : > { %8525 = vmatpush3.bf16.msra.mxu1 %v2042_v13  ;;  %8532 = vmatprep.subr.bf16.mxu0 %v2059_v26  ;;  %v883_v13 = vld [vmem:[%s9427_s8 + $0x1120] sm:$0xff] }
 0x493   : > { %8554 = vmatprep.subr.bf16.mxu1 %v2075_v14  ;;  %v891_v26 = vld [vmem:[%s9427_s8 + $0x1160] sm:$0xff]  ;;  %v3172_v14 = vrot.slane %v10404_v27, %v9458_v38 }
 0x494   : > { %6135 = vmatmul.mubr.bf16.vlgmr.msra.gmra.mrb[128].mxu0 %v3165_v10 }
 0x495   : > { %6175 = vmatmul.mubr.bf16.vlgmr.msra.gmra.mrb[128].mxu1 %v3187_v20  ;;  %8533 = vmatpush3.bf16.msra.mxu0 %v2051_v2  ;;  %v2074_v20 = vunpack.c.h.s8.bf16 %v874_v60  ;;  %v2091_v2 = vunpack.c.l.s8.bf16 %v883_v13  ;;  %v3188_v24 = vcombine.high %v3172_v14, %v3172_v14 }
 0x496   : > { %8555 = vmatpush3.bf16.msra.mxu1 %v2067_v21  ;;  %8534 = vmatprep.subr.bf16.mxu0 %v2060_v47  ;;  %v2107_v21 = vunpack.c.l.s8.bf16 %v891_v26  ;;  %v887_v47 = vld [vmem:[%s9427_s8 + $0x1140] sm:$0xff] }
 0x497   : > { %8556 = vmatprep.subr.bf16.mxu1 %v2076_v22  ;;  %6214 = vmatprep.mubr.bf16.mxu0 %v3186_v17  ;;  %v2058_v17 = vunpack.c.h.s8.bf16 %v866_v1  ;;  %v3228_v22 = vrot.slane %v3206_v44, %v9458_v38  ;;  %v2099_v15 = vunpack.c.l.s8.bf16 %v887_v47  ;;  %v2100_v34 = vunpack.c.h.s8.bf16 %v887_v47  ;;  %v894_v1 = vld [vmem:[%s9427_s8 + $0x1178] sm:$0xff] }
 0x498   : > { %6254 = vmatprep.mubr.bf16.mxu1 %v3190_v48  ;;  %v2092_v48 = vunpack.c.h.s8.bf16 %v883_v13  ;;  %v2114_v44 = vunpack.c.h.s8.bf16 %v894_v1 }
 0x499   : > { %8535 = vmatpush3.bf16.msra.mxu0 %v2052_v28  ;;  %v2108_v28 = vunpack.c.h.s8.bf16 %v891_v26  ;;  %v3238_v55 = vcombine.high %v3228_v22, %v3228_v22 }
 0x49a   : > { %8557 = vmatpush3.bf16.msra.mxu1 %v2068_v30  ;;  %8536 = vmatprep.subr.bf16.mxu0 %v2061_v32  ;;  %v884_v30 = vld [vmem:[%s9427_s8 + $0x1128] sm:$0xff] }
 0x49b   : > { %8558 = vmatprep.subr.bf16.mxu1 %v2077_v33  ;;  %v892_v32 = vld [vmem:[%s9427_s8 + $0x1168] sm:$0xff] }
 0x49d   : > { %8537 = vmatpush3.bf16.msra.mxu0 %v2053_v23  ;;  %v2093_v23 = vunpack.c.l.s8.bf16 %v884_v30 }
 0x49e   : > { %8559 = vmatpush3.bf16.msra.mxu1 %v2069_v5  ;;  %8538 = vmatprep.subr.bf16.mxu0 %v2062_v36  ;;  %v880_v5 = vld [vmem:[%s9427_s8 + $0x1108] sm:$0xff]  ;;  %v2109_v36 = vunpack.c.l.s8.bf16 %v892_v32 }
 0x49f   : > { %8560 = vmatprep.subr.bf16.mxu1 %v2078_v37  ;;  %v888_v37 = vld [vmem:[%s9427_s8 + $0x1148] sm:$0xff]  ;;  %v2085_v42 = vunpack.c.l.s8.bf16 %v880_v5 }
 0x4a0   : > { %v2101_v0 = vunpack.c.l.s8.bf16 %v888_v37  ;;  %v2102_v46 = vunpack.c.h.s8.bf16 %v888_v37 }
 0x4a1   : > { %8539 = vmatpush3.bf16.msra.mxu0 %v2054_v43  ;;  %v2094_v43 = vunpack.c.h.s8.bf16 %v884_v30 }
 0x4a2   : > { %8561 = vmatpush3.bf16.msra.mxu1 %v2070_v41  ;;  %8540 = vmatprep.subr.bf16.mxu0 %v2063_v31  ;;  %v2110_v41 = vunpack.c.h.s8.bf16 %v892_v32  ;;  %v885_v31 = vld [vmem:[%s9427_s8 + $0x1130] sm:$0xff] }
 0x4a3   : > { %8562 = vmatprep.subr.bf16.mxu1 %v2079_v45  ;;  %v2086_v45 = vunpack.c.h.s8.bf16 %v880_v5 }
 0x4a5   : > { %8541 = vmatpush3.bf16.msra.mxu0 %v2055_v49  ;;  %v2095_v49 = vunpack.c.l.s8.bf16 %v885_v31 }
 0x4a6   : > { %8563 = vmatpush3.bf16.msra.mxu1 %v2071_v58  ;;  %8542 = vmatprep.subr.bf16.mxu0 %v2064_v50  ;;  %v881_v58 = vld [vmem:[%s9427_s8 + $0x1110] sm:$0xff]  ;;  %v2111_v50 = vunpack.c.l.s8.bf16 %v893_v18 }
 0x4a7   : > { %8564 = vmatprep.subr.bf16.mxu1 %v2080_v51  ;;  %v8240_v61 = vpop.f32.mrb[104].mxu0  ;;  %v889_v51 = vld [vmem:[%s9427_s8 + $0x1150] sm:$0xff]  ;;  %v2087_v40 = vunpack.c.l.s8.bf16 %v881_v58  ;;  %v2088_v60 = vunpack.c.h.s8.bf16 %v881_v58 }
 0x4a8   : > { %v8262_v6 = vpop.f32.mrb[104].mxu1  ;;  %v8241_v16 = vpop.f32.mrb[105].mxu0  ;;  %v2103_v29 = vunpack.c.l.s8.bf16 %v889_v51  ;;  %v909_v58 = vld [vmem:[%s9427_s8 + $0x11f0] sm:$0xff] }
 0x4a9   : > { %v8263_v62 = vpop.f32.mrb[105].mxu1  ;;  %v8242_v63 = vadd.f32 %v8241_v16, %v8240_v61  ;;  %v8243_v3 = vpop.f32.mrb[106].mxu0  ;;  %8543 = vmatpush3.bf16.msra.mxu0 %v2056_v53  ;;  %v2096_v53 = vunpack.c.h.s8.bf16 %v885_v31  ;;  %v2104_v61 = vunpack.c.h.s8.bf16 %v889_v51  ;;  %v882_v16 = vld [vmem:[%s9427_s8 + $0x1118] sm:$0xff] }
 0x4aa   : > { %v8264_v12 = vadd.f32 %v8263_v62, %v8262_v6  ;;  %8565 = vmatpush3.bf16.msra.mxu1 %v2072_v54  ;;  %v8265_v4 = vpop.f32.mrb[106].mxu1  ;;  %v8244_v9 = vpop.f32.mrb[107].mxu0  ;;  %8544 = vmatprep.subr.bf16.mxu0 %v2065_v57  ;;  %v2112_v54 = vunpack.c.h.s8.bf16 %v893_v18  ;;  %v886_v57 = vld [vmem:[%s9427_s8 + $0x1138] sm:$0xff]  ;;  %v2113_v62 = vunpack.c.l.s8.bf16 %v894_v1 }
 0x4ab   : > { %8566 = vmatprep.subr.bf16.mxu1 %v2081_v59  ;;  %v8266_v10 = vpop.f32.mrb[107].mxu1  ;;  %v5657_v8 = vadd.f32 %v8242_v63, %v10413_v39  ;;  %v879_v39 = vld [vmem:[%s9427_s8 + $0x1100] sm:$0xff]  ;;  %v3191_v59 = vcombine.high %v10429_v19, %v10429_v19  ;;  %v2097_v6 = vunpack.c.l.s8.bf16 %v886_v57  ;;  %v890_v63 = vld [vmem:[%s9427_s8 + $0x1158] sm:$0xff]  ;;  %v2098_v26 = vunpack.c.h.s8.bf16 %v886_v57 }
 0x4ac   : > { %v2083_v27 = vunpack.c.l.s8.bf16 %v879_v39  ;;  %v2084_v33 = vunpack.c.h.s8.bf16 %v879_v39  ;;  %v2105_v10 = vunpack.c.l.s8.bf16 %v890_v63 }
 0x4ad   : > { %v10444_v52 = vadd.f32 %v8264_v12, %v5657_v8  ;;  %8545 = vmatpush3.bf16.msra.mxu0 %v2057_v35  ;;  %v10464_v35 = vrot.slane %v3191_v59, %v9458_v38 }
 0x4ae   : > { %8567 = vmatpush3.bf16.msra.mxu1 %v2073_v56  ;;  %8546 = vmatprep.subr.bf16.mxu0 %v2066_v25 }
 0x4af   : > { %8568 = vmatprep.subr.bf16.mxu1 %v2082_v7  ;;  %v2089_v7 = vunpack.c.l.s8.bf16 %v882_v16  ;;  %v3207_v39 = vcombine.high %v10464_v35, %v10464_v35 }
 0x4b1   : > { %8547 = vmatpush3.bf16.msra.mxu0 %v2058_v17 }
 0x4b2   : > { %8569 = vmatpush3.bf16.msra.mxu1 %v2074_v20  ;;  %8576 = vmatprep.subr.bf16.mxu0 %v2091_v2  ;;  %v899_v20 = vld [vmem:[%s9427_s8 + $0x11a0] sm:$0xff] }
 0x4b3   : > { %8598 = vmatprep.subr.bf16.mxu1 %v2107_v21  ;;  %v907_v2 = vld [vmem:[%s9427_s8 + $0x11e0] sm:$0xff]  ;;  %v3214_v21 = vrot.slane %v10435_v11, %v9458_v38 }
 0x4b4   : > { %6215 = vmatmul.mubr.bf16.vlgmr.msra.gmra.mrb[132].mxu0 %v3172_v14 }
 0x4b5   : > { %6255 = vmatmul.mubr.bf16.vlgmr.msra.gmra.mrb[132].mxu1 %v3188_v24  ;;  %8577 = vmatpush3.bf16.msra.mxu0 %v2083_v27  ;;  %v2106_v24 = vunpack.c.h.s8.bf16 %v890_v63  ;;  %v2123_v27 = vunpack.c.l.s8.bf16 %v899_v20  ;;  %v3236_v30 = vcombine.high %v3214_v21, %v3214_v21 }
 0x4b6   : > { %8599 = vmatpush3.bf16.msra.mxu1 %v2099_v15  ;;  %8578 = vmatprep.subr.bf16.mxu0 %v2092_v48  ;;  %v2139_v15 = vunpack.c.l.s8.bf16 %v907_v2  ;;  %v903_v48 = vld [vmem:[%s9427_s8 + $0x11c0] sm:$0xff] }
 0x4b7   : > { %8600 = vmatprep.subr.bf16.mxu1 %v2108_v28  ;;  %6294 = vmatprep.mubr.bf16.mxu0 %v3228_v22  ;;  %v2090_v22 = vunpack.c.h.s8.bf16 %v882_v16  ;;  %v3235_v28 = vrot.slane %v3207_v39, %v9458_v38  ;;  %v2131_v32 = vunpack.c.l.s8.bf16 %v903_v48  ;;  %v2132_v37 = vunpack.c.h.s8.bf16 %v903_v48  ;;  %v10489_v16 = vld [vmem:[%s9441_s25 + $0x90] sm:$0xff] }
 0x4b8   : > { %6334 = vmatprep.mubr.bf16.mxu1 %v3238_v55  ;;  %v2124_v55 = vunpack.c.h.s8.bf16 %v899_v20 }
 0x4b9   : > { %8579 = vmatpush3.bf16.msra.mxu0 %v2084_v33  ;;  %v2140_v33 = vunpack.c.h.s8.bf16 %v907_v2  ;;  %v3239_v5 = vcombine.high %v3235_v28, %v3235_v28 }
 0x4ba   : > { %8601 = vmatpush3.bf16.msra.mxu1 %v2100_v34  ;;  %8580 = vmatprep.subr.bf16.mxu0 %v2093_v23  ;;  %v900_v34 = vld [vmem:[%s9427_s8 + $0x11a8] sm:$0xff] }
 0x4bb   : > { %8602 = vmatprep.subr.bf16.mxu1 %v2109_v36  ;;  %v908_v23 = vld [vmem:[%s9427_s8 + $0x11e8] sm:$0xff] }
 0x4bd   : > { %8581 = vmatpush3.bf16.msra.mxu0 %v2085_v42  ;;  %v2125_v42 = vunpack.c.l.s8.bf16 %v900_v34 }
 0x4be   : > { %8603 = vmatpush3.bf16.msra.mxu1 %v2101_v0  ;;  %8582 = vmatprep.subr.bf16.mxu0 %v2094_v43  ;;  %v896_v0 = vld [vmem:[%s9427_s8 + $0x1188] sm:$0xff]  ;;  %v2141_v43 = vunpack.c.l.s8.bf16 %v908_v23 }
 0x4bf   : > { %8604 = vmatprep.subr.bf16.mxu1 %v2110_v41  ;;  %v904_v41 = vld [vmem:[%s9427_s8 + $0x11c8] sm:$0xff]  ;;  %v2117_v31 = vunpack.c.l.s8.bf16 %v896_v0 }
 0x4c0   : > { %v2133_v18 = vunpack.c.l.s8.bf16 %v904_v41  ;;  %v2134_v51 = vunpack.c.h.s8.bf16 %v904_v41 }
 0x4c1   : > { %8583 = vmatpush3.bf16.msra.mxu0 %v2086_v45  ;;  %v2126_v45 = vunpack.c.h.s8.bf16 %v900_v34 }
 0x4c2   : > { %8605 = vmatpush3.bf16.msra.mxu1 %v2102_v46  ;;  %8584 = vmatprep.subr.bf16.mxu0 %v2095_v49  ;;  %v2142_v46 = vunpack.c.h.s8.bf16 %v908_v23  ;;  %v901_v49 = vld [vmem:[%s9427_s8 + $0x11b0] sm:$0xff] }
 0x4c3   : > { %8606 = vmatprep.subr.bf16.mxu1 %v2111_v50  ;;  %v2118_v50 = vunpack.c.h.s8.bf16 %v896_v0  ;;  %v2128_v59 = vunpack.c.h.s8.bf16 %v901_v49 }
 0x4c5   : > { %8585 = vmatpush3.bf16.msra.mxu0 %v2087_v40  ;;  %v2127_v40 = vunpack.c.l.s8.bf16 %v901_v49 }
 0x4c6   : > { %8607 = vmatpush3.bf16.msra.mxu1 %v2103_v29  ;;  %8586 = vmatprep.subr.bf16.mxu0 %v2096_v53  ;;  %v897_v29 = vld [vmem:[%s9427_s8 + $0x1190] sm:$0xff]  ;;  %v2143_v53 = vunpack.c.l.s8.bf16 %v909_v58 }
 0x4c7   : > { %8608 = vmatprep.subr.bf16.mxu1 %v2112_v54  ;;  %v8284_v3 = vpop.f32.mrb[108].mxu0  ;;  %v905_v54 = vld [vmem:[%s9427_s8 + $0x11d0] sm:$0xff]  ;;  %v2119_v57 = vunpack.c.l.s8.bf16 %v897_v29 }
 0x4c8   : > { %v8306_v12 = vpop.f32.mrb[108].mxu1  ;;  %v8285_v56 = vpop.f32.mrb[109].mxu0  ;;  %v2135_v1 = vunpack.c.l.s8.bf16 %v905_v54  ;;  %v2136_v63 = vunpack.c.h.s8.bf16 %v905_v54 }
 0x4c9   : > { %v8307_v4 = vpop.f32.mrb[109].mxu1  ;;  %v8286_v9 = vadd.f32 %v8285_v56, %v8284_v3  ;;  %v8287_v19 = vpop.f32.mrb[110].mxu0  ;;  %8587 = vmatpush3.bf16.msra.mxu0 %v2088_v60  ;;  %v2144_v60 = vunpack.c.h.s8.bf16 %v909_v58 }
 0x4ca   : > { %v8308_v25 = vadd.f32 %v8307_v4, %v8306_v12  ;;  %8609 = vmatpush3.bf16.msra.mxu1 %v2104_v61  ;;  %v8309_v8 = vpop.f32.mrb[110].mxu1  ;;  %v8288_v13 = vpop.f32.mrb[111].mxu0  ;;  %8588 = vmatprep.subr.bf16.mxu0 %v2097_v6  ;;  %v902_v61 = vld [vmem:[%s9427_s8 + $0x11b8] sm:$0xff] }
 0x4cb   : > { %8610 = vmatprep.subr.bf16.mxu1 %v2113_v62  ;;  %v8310_v14 = vpop.f32.mrb[111].mxu1  ;;  %v5737_v17 = vadd.f32 %v8286_v9, %v10444_v52  ;;  %v895_v52 = vld [vmem:[%s9427_s8 + $0x1180] sm:$0xff]  ;;  %v910_v6 = vld [vmem:[%s9427_s8 + $0x11f8] sm:$0xff]  ;;  %v2120_v62 = vunpack.c.h.s8.bf16 %v897_v29  ;;  %v2129_v3 = vunpack.c.l.s8.bf16 %v902_v61  ;;  %v2130_v2 = vunpack.c.h.s8.bf16 %v902_v61  ;;  %v925_v29 = vld [vmem:[%s9427_s8 + $0x1270] sm:$0xff] }
 0x4cc   : > { %v2115_v11 = vunpack.c.l.s8.bf16 %v895_v52  ;;  %v2116_v36 = vunpack.c.h.s8.bf16 %v895_v52  ;;  %v898_v12 = vld [vmem:[%s9427_s8 + $0x1198] sm:$0xff]  ;;  %v2145_v56 = vunpack.c.l.s8.bf16 %v910_v6  ;;  %v2146_v39 = vunpack.c.h.s8.bf16 %v910_v6 }
 0x4cd   : > { %v10473_v47 = vadd.f32 %v8308_v25, %v5737_v17  ;;  %8589 = vmatpush3.bf16.msra.mxu0 %v2089_v7  ;;  %v906_v4 = vld [vmem:[%s9427_s8 + $0x11d8] sm:$0xff]  ;;  %v10495_v25 = vrot.slane %v10489_v16, %v9458_v38 }
 0x4ce   : > { %8611 = vmatpush3.bf16.msra.mxu1 %v2105_v10  ;;  %8590 = vmatprep.subr.bf16.mxu0 %v2098_v26  ;;  %v2137_v14 = vunpack.c.l.s8.bf16 %v906_v4 }
 0x4cf   : > { %8612 = vmatprep.subr.bf16.mxu1 %v2114_v44  ;;  %v2121_v44 = vunpack.c.l.s8.bf16 %v898_v12  ;;  %v3255_v52 = vcombine.high %v10495_v25, %v10495_v25 }
 0x4d1   : > { %8591 = vmatpush3.bf16.msra.mxu0 %v2090_v22 }
 0x4d2   : > { %8613 = vmatpush3.bf16.msra.mxu1 %v2106_v24  ;;  %8620 = vmatprep.subr.bf16.mxu0 %v2123_v27  ;;  %v915_v24 = vld [vmem:[%s9427_s8 + $0x1220] sm:$0xff] }
 0x4d3   : > { %8642 = vmatprep.subr.bf16.mxu1 %v2139_v15  ;;  %v923_v27 = vld [vmem:[%s9427_s8 + $0x1260] sm:$0xff]  ;;  %v3221_v15 = vrot.slane %v10464_v35, %v9458_v38 }
 0x4d4   : > { %6295 = vmatmul.mubr.bf16.vlgmr.msra.gmra.mrb[136].mxu0 %v3214_v21 }
 0x4d5   : > { %6335 = vmatmul.mubr.bf16.vlgmr.msra.gmra.mrb[136].mxu1 %v3236_v30  ;;  %8621 = vmatpush3.bf16.msra.mxu0 %v2115_v11  ;;  %v2138_v30 = vunpack.c.h.s8.bf16 %v906_v4  ;;  %v2155_v11 = vunpack.c.l.s8.bf16 %v915_v24  ;;  %v3237_v34 = vcombine.high %v3221_v15, %v3221_v15 }
 0x4d6   : > { %8643 = vmatpush3.bf16.msra.mxu1 %v2131_v32  ;;  %8622 = vmatprep.subr.bf16.mxu0 %v2124_v55  ;;  %v2171_v32 = vunpack.c.l.s8.bf16 %v923_v27  ;;  %v919_v55 = vld [vmem:[%s9427_s8 + $0x1240] sm:$0xff] }
 0x4d7   : > { %8644 = vmatprep.subr.bf16.mxu1 %v2140_v33  ;;  %6374 = vmatprep.mubr.bf16.mxu0 %v3235_v28  ;;  %v2122_v28 = vunpack.c.h.s8.bf16 %v898_v12  ;;  %v3277_v33 = vrot.slane %v3255_v52, %v9458_v38  ;;  %v2163_v23 = vunpack.c.l.s8.bf16 %v919_v55  ;;  %v2164_v41 = vunpack.c.h.s8.bf16 %v919_v55  ;;  %v926_v12 = vld [vmem:[%s9427_s8 + $0x1278] sm:$0xff] }
 0x4d8   : > { %6414 = vmatprep.mubr.bf16.mxu1 %v3239_v5  ;;  %v2156_v5 = vunpack.c.h.s8.bf16 %v915_v24  ;;  %v2178_v52 = vunpack.c.h.s8.bf16 %v926_v12 }
 0x4d9   : > { %8623 = vmatpush3.bf16.msra.mxu0 %v2116_v36  ;;  %v2172_v36 = vunpack.c.h.s8.bf16 %v923_v27  ;;  %v3287_v0 = vcombine.high %v3277_v33, %v3277_v33 }
 0x4da   : > { %8645 = vmatpush3.bf16.msra.mxu1 %v2132_v37  ;;  %8624 = vmatprep.subr.bf16.mxu0 %v2125_v42  ;;  %v916_v37 = vld [vmem:[%s9427_s8 + $0x1228] sm:$0xff] }
 0x4db   : > { %8646 = vmatprep.subr.bf16.mxu1 %v2141_v43  ;;  %v924_v42 = vld [vmem:[%s9427_s8 + $0x1268] sm:$0xff] }
 0x4dd   : > { %8625 = vmatpush3.bf16.msra.mxu0 %v2117_v31  ;;  %v2157_v31 = vunpack.c.l.s8.bf16 %v916_v37 }
 0x4de   : > { %8647 = vmatpush3.bf16.msra.mxu1 %v2133_v18  ;;  %8626 = vmatprep.subr.bf16.mxu0 %v2126_v45  ;;  %v912_v18 = vld [vmem:[%s9427_s8 + $0x1208] sm:$0xff]  ;;  %v2173_v45 = vunpack.c.l.s8.bf16 %v924_v42 }
 0x4df   : > { %8648 = vmatprep.subr.bf16.mxu1 %v2142_v46  ;;  %v920_v46 = vld [vmem:[%s9427_s8 + $0x1248] sm:$0xff]  ;;  %v2149_v49 = vunpack.c.l.s8.bf16 %v912_v18 }
 0x4e0   : > { %v2165_v58 = vunpack.c.l.s8.bf16 %v920_v46  ;;  %v2166_v54 = vunpack.c.h.s8.bf16 %v920_v46 }
 0x4e1   : > { %8627 = vmatpush3.bf16.msra.mxu0 %v2118_v50  ;;  %v2158_v50 = vunpack.c.h.s8.bf16 %v916_v37 }
 0x4e2   : > { %8649 = vmatpush3.bf16.msra.mxu1 %v2134_v51  ;;  %8628 = vmatprep.subr.bf16.mxu0 %v2127_v40  ;;  %v2174_v51 = vunpack.c.h.s8.bf16 %v924_v42  ;;  %v917_v40 = vld [vmem:[%s9427_s8 + $0x1230] sm:$0xff] }
 0x4e3   : > { %8650 = vmatprep.subr.bf16.mxu1 %v2143_v53  ;;  %v2150_v53 = vunpack.c.h.s8.bf16 %v912_v18 }
 0x4e5   : > { %8629 = vmatpush3.bf16.msra.mxu0 %v2119_v57  ;;  %v2159_v57 = vunpack.c.l.s8.bf16 %v917_v40 }
 0x4e6   : > { %8651 = vmatpush3.bf16.msra.mxu1 %v2135_v1  ;;  %8630 = vmatprep.subr.bf16.mxu0 %v2128_v59  ;;  %v913_v1 = vld [vmem:[%s9427_s8 + $0x1210] sm:$0xff]  ;;  %v2175_v59 = vunpack.c.l.s8.bf16 %v925_v29 }
 0x4e7   : > { %8652 = vmatprep.subr.bf16.mxu1 %v2144_v60  ;;  %v8328_v9 = vpop.f32.mrb[112].mxu0  ;;  %v921_v60 = vld [vmem:[%s9427_s8 + $0x1250] sm:$0xff]  ;;  %v2151_v61 = vunpack.c.l.s8.bf16 %v913_v1  ;;  %v2152_v4 = vunpack.c.h.s8.bf16 %v913_v1 }
 0x4e8   : > { %v8350_v19 = vpop.f32.mrb[112].mxu1  ;;  %v8329_v7 = vpop.f32.mrb[113].mxu0  ;;  %v2167_v6 = vunpack.c.l.s8.bf16 %v921_v60  ;;  %v941_v1 = vld [vmem:[%s9427_s8 + $0x12f0] sm:$0xff] }
 0x4e9   : > { %v8351_v10 = vpop.f32.mrb[113].mxu1  ;;  %v8330_v8 = vadd.f32 %v8329_v7, %v8328_v9  ;;  %v8331_v13 = vpop.f32.mrb[114].mxu0  ;;  %8631 = vmatpush3.bf16.msra.mxu0 %v2120_v62  ;;  %v2160_v62 = vunpack.c.h.s8.bf16 %v917_v40  ;;  %v2168_v9 = vunpack.c.h.s8.bf16 %v921_v60  ;;  %v914_v7 = vld [vmem:[%s9427_s8 + $0x1218] sm:$0xff] }
 0x4ea   : > { %v8352_v26 = vadd.f32 %v8351_v10, %v8350_v19  ;;  %8653 = vmatpush3.bf16.msra.mxu1 %v2136_v63  ;;  %v8353_v17 = vpop.f32.mrb[114].mxu1  ;;  %v8332_v20 = vpop.f32.mrb[115].mxu0  ;;  %8632 = vmatprep.subr.bf16.mxu0 %v2129_v3  ;;  %v2176_v63 = vunpack.c.h.s8.bf16 %v925_v29  ;;  %v918_v3 = vld [vmem:[%s9427_s8 + $0x1238] sm:$0xff]  ;;  %v2177_v10 = vunpack.c.l.s8.bf16 %v926_v12 }
 0x4eb   : > { %8654 = vmatprep.subr.bf16.mxu1 %v2145_v56  ;;  %v8354_v21 = vpop.f32.mrb[115].mxu1  ;;  %v5817_v22 = vadd.f32 %v8330_v8, %v10473_v47  ;;  %v911_v47 = vld [vmem:[%s9427_s8 + $0x1200] sm:$0xff]  ;;  %v3240_v56 = vcombine.high %v10489_v16, %v10489_v16  ;;  %v2161_v19 = vunpack.c.l.s8.bf16 %v918_v3  ;;  %v922_v8 = vld [vmem:[%s9427_s8 + $0x1258] sm:$0xff]  ;;  %v2162_v27 = vunpack.c.h.s8.bf16 %v918_v3 }
 0x4ec   : > { %v2147_v35 = vunpack.c.l.s8.bf16 %v911_v47  ;;  %v2148_v43 = vunpack.c.h.s8.bf16 %v911_v47  ;;  %v2169_v21 = vunpack.c.l.s8.bf16 %v922_v8 }
 0x4ed   : > { %v10504_v48 = vadd.f32 %v8352_v26, %v5817_v22  ;;  %8633 = vmatpush3.bf16.msra.mxu0 %v2121_v44  ;;  %v10524_v44 = vrot.slane %v3240_v56, %v9458_v38 }
 0x4ee   : > { %8655 = vmatpush3.bf16.msra.mxu1 %v2137_v14  ;;  %8634 = vmatprep.subr.bf16.mxu0 %v2130_v2 }
 0x4ef   : > { %8656 = vmatprep.subr.bf16.mxu1 %v2146_v39  ;;  %v2153_v39 = vunpack.c.l.s8.bf16 %v914_v7  ;;  %v3256_v47 = vcombine.high %v10524_v44, %v10524_v44 }
 0x4f1   : > { %8635 = vmatpush3.bf16.msra.mxu0 %v2122_v28 }
 0x4f2   : > { %8657 = vmatpush3.bf16.msra.mxu1 %v2138_v30  ;;  %8664 = vmatprep.subr.bf16.mxu0 %v2155_v11  ;;  %v931_v30 = vld [vmem:[%s9427_s8 + $0x12a0] sm:$0xff] }
 0x4f3   : > { %8686 = vmatprep.subr.bf16.mxu1 %v2171_v32  ;;  %v939_v11 = vld [vmem:[%s9427_s8 + $0x12e0] sm:$0xff]  ;;  %v3263_v32 = vrot.slane %v10495_v25, %v9458_v38 }
 0x4f4   : > { %6375 = vmatmul.mubr.bf16.vlgmr.msra.gmra.mrb[140].mxu0 %v3221_v15 }
 0x4f5   : > { %6415 = vmatmul.mubr.bf16.vlgmr.msra.gmra.mrb[140].mxu1 %v3237_v34  ;;  %8665 = vmatpush3.bf16.msra.mxu0 %v2147_v35  ;;  %v2170_v34 = vunpack.c.h.s8.bf16 %v922_v8  ;;  %v2187_v35 = vunpack.c.l.s8.bf16 %v931_v30  ;;  %v3285_v37 = vcombine.high %v3263_v32, %v3263_v32 }
 0x4f6   : > { %8687 = vmatpush3.bf16.msra.mxu1 %v2163_v23  ;;  %8666 = vmatprep.subr.bf16.mxu0 %v2156_v5  ;;  %v2203_v23 = vunpack.c.l.s8.bf16 %v939_v11  ;;  %v935_v5 = vld [vmem:[%s9427_s8 + $0x12c0] sm:$0xff] }
 0x4f7   : > { %8688 = vmatprep.subr.bf16.mxu1 %v2172_v36  ;;  %6454 = vmatprep.mubr.bf16.mxu0 %v3277_v33  ;;  %v2154_v33 = vunpack.c.h.s8.bf16 %v914_v7  ;;  %v3284_v36 = vrot.slane %v3256_v47, %v9458_v38  ;;  %v2195_v42 = vunpack.c.l.s8.bf16 %v935_v5  ;;  %v2196_v46 = vunpack.c.h.s8.bf16 %v935_v5  ;;  %v10549_v7 = vld [vmem:[%s9441_s25 + $0x98] sm:$0xff] }
 0x4f8   : > { %6494 = vmatprep.mubr.bf16.mxu1 %v3287_v0  ;;  %v2188_v0 = vunpack.c.h.s8.bf16 %v931_v30 }
 0x4f9   : > { %8667 = vmatpush3.bf16.msra.mxu0 %v2148_v43  ;;  %v2204_v43 = vunpack.c.h.s8.bf16 %v939_v11  ;;  %v3288_v18 = vcombine.high %v3284_v36, %v3284_v36 }
 0x4fa   : > { %8689 = vmatpush3.bf16.msra.mxu1 %v2164_v41  ;;  %8668 = vmatprep.subr.bf16.mxu0 %v2157_v31  ;;  %v932_v41 = vld [vmem:[%s9427_s8 + $0x12a8] sm:$0xff] }
 0x4fb   : > { %8690 = vmatprep.subr.bf16.mxu1 %v2173_v45  ;;  %v940_v31 = vld [vmem:[%s9427_s8 + $0x12e8] sm:$0xff] }
 0x4fd   : > { %8669 = vmatpush3.bf16.msra.mxu0 %v2149_v49  ;;  %v2189_v49 = vunpack.c.l.s8.bf16 %v932_v41 }
 0x4fe   : > { %8691 = vmatpush3.bf16.msra.mxu1 %v2165_v58  ;;  %8670 = vmatprep.subr.bf16.mxu0 %v2158_v50  ;;  %v928_v58 = vld [vmem:[%s9427_s8 + $0x1288] sm:$0xff]  ;;  %v2205_v50 = vunpack.c.l.s8.bf16 %v940_v31 }
 0x4ff   : > { %8692 = vmatprep.subr.bf16.mxu1 %v2174_v51  ;;  %v936_v51 = vld [vmem:[%s9427_s8 + $0x12c8] sm:$0xff]  ;;  %v2181_v40 = vunpack.c.l.s8.bf16 %v928_v58 }
 0x500   : > { %v2197_v29 = vunpack.c.l.s8.bf16 %v936_v51  ;;  %v2198_v60 = vunpack.c.h.s8.bf16 %v936_v51 }
 0x501   : > { %8671 = vmatpush3.bf16.msra.mxu0 %v2150_v53  ;;  %v2190_v53 = vunpack.c.h.s8.bf16 %v932_v41 }
 0x502   : > { %8693 = vmatpush3.bf16.msra.mxu1 %v2166_v54  ;;  %8672 = vmatprep.subr.bf16.mxu0 %v2159_v57  ;;  %v2206_v54 = vunpack.c.h.s8.bf16 %v940_v31  ;;  %v933_v57 = vld [vmem:[%s9427_s8 + $0x12b0] sm:$0xff] }
 0x503   : > { %8694 = vmatprep.subr.bf16.mxu1 %v2175_v59  ;;  %v2182_v59 = vunpack.c.h.s8.bf16 %v928_v58  ;;  %v2192_v56 = vunpack.c.h.s8.bf16 %v933_v57 }
 0x505   : > { %8673 = vmatpush3.bf16.msra.mxu0 %v2151_v61  ;;  %v2191_v61 = vunpack.c.l.s8.bf16 %v933_v57 }
 0x506   : > { %8695 = vmatpush3.bf16.msra.mxu1 %v2167_v6  ;;  %8674 = vmatprep.subr.bf16.mxu0 %v2160_v62  ;;  %v929_v6 = vld [vmem:[%s9427_s8 + $0x1290] sm:$0xff]  ;;  %v2207_v62 = vunpack.c.l.s8.bf16 %v941_v1 }
 0x507   : > { %8696 = vmatprep.subr.bf16.mxu1 %v2176_v63  ;;  %v8372_v13 = vpop.f32.mrb[116].mxu0  ;;  %v937_v63 = vld [vmem:[%s9427_s8 + $0x12d0] sm:$0xff]  ;;  %v2183_v3 = vunpack.c.l.s8.bf16 %v929_v6 }
 0x508   : > { %v8394_v26 = vpop.f32.mrb[116].mxu1  ;;  %v8373_v14 = vpop.f32.mrb[117].mxu0  ;;  %v2199_v12 = vunpack.c.l.s8.bf16 %v937_v63  ;;  %v2200_v8 = vunpack.c.h.s8.bf16 %v937_v63 }
 0x509   : > { %v8395_v17 = vpop.f32.mrb[117].mxu1  ;;  %v8374_v20 = vadd.f32 %v8373_v14, %v8372_v13  ;;  %v8375_v16 = vpop.f32.mrb[118].mxu0  ;;  %8675 = vmatpush3.bf16.msra.mxu0 %v2152_v4  ;;  %v2208_v4 = vunpack.c.h.s8.bf16 %v941_v1 }
 0x50a   : > { %v8396_v2 = vadd.f32 %v8395_v17, %v8394_v26  ;;  %8697 = vmatpush3.bf16.msra.mxu1 %v2168_v9  ;;  %v8397_v22 = vpop.f32.mrb[118].mxu1  ;;  %v8376_v24 = vpop.f32.mrb[119].mxu0  ;;  %8676 = vmatprep.subr.bf16.mxu0 %v2161_v19  ;;  %v934_v9 = vld [vmem:[%s9427_s8 + $0x12b8] sm:$0xff] }
 0x50b   : > { %8698 = vmatprep.subr.bf16.mxu1 %v2177_v10  ;;  %v8398_v15 = vpop.f32.mrb[119].mxu1  ;;  %v5897_v28 = vadd.f32 %v8374_v20, %v10504_v48  ;;  %v927_v48 = vld [vmem:[%s9427_s8 + $0x1280] sm:$0xff]  ;;  %v942_v19 = vld [vmem:[%s9427_s8 + $0x12f8] sm:$0xff]  ;;  %v2184_v10 = vunpack.c.h.s8.bf16 %v929_v6  ;;  %v2193_v13 = vunpack.c.l.s8.bf16 %v934_v9  ;;  %v2194_v11 = vunpack.c.h.s8.bf16 %v934_v9  ;;  %v957_v6 = vld [vmem:[%s9427_s8 + $0x1370] sm:$0xff] }
 0x50c   : > { %v2179_v25 = vunpack.c.l.s8.bf16 %v927_v48  ;;  %v2180_v45 = vunpack.c.h.s8.bf16 %v927_v48  ;;  %v930_v26 = vld [vmem:[%s9427_s8 + $0x1298] sm:$0xff]  ;;  %v2209_v14 = vunpack.c.l.s8.bf16 %v942_v19  ;;  %v2210_v47 = vunpack.c.h.s8.bf16 %v942_v19 }
 0x50d   : > { %v10533_v55 = vadd.f32 %v8396_v2, %v5897_v28  ;;  %8677 = vmatpush3.bf16.msra.mxu0 %v2153_v39  ;;  %v938_v17 = vld [vmem:[%s9427_s8 + $0x12d8] sm:$0xff]  ;;  %v10555_v2 = vrot.slane %v10549_v7, %v9458_v38 }
 0x50e   : > { %8699 = vmatpush3.bf16.msra.mxu1 %v2169_v21  ;;  %8678 = vmatprep.subr.bf16.mxu0 %v2162_v27  ;;  %v2201_v15 = vunpack.c.l.s8.bf16 %v938_v17 }
 0x50f   : > { %8700 = vmatprep.subr.bf16.mxu1 %v2178_v52  ;;  %v2185_v52 = vunpack.c.l.s8.bf16 %v930_v26  ;;  %v3304_v48 = vcombine.high %v10555_v2, %v10555_v2 }
 0x511   : > { %8679 = vmatpush3.bf16.msra.mxu0 %v2154_v33 }
 0x512   : > { %8701 = vmatpush3.bf16.msra.mxu1 %v2170_v34  ;;  %8708 = vmatprep.subr.bf16.mxu0 %v2187_v35  ;;  %v947_v34 = vld [vmem:[%s9427_s8 + $0x1320] sm:$0xff] }
 0x513   : > { %8730 = vmatprep.subr.bf16.mxu1 %v2203_v23  ;;  %v955_v35 = vld [vmem:[%s9427_s8 + $0x1360] sm:$0xff]  ;;  %v3270_v23 = vrot.slane %v10524_v44, %v9458_v38 }
 0x514   : > { %6455 = vmatmul.mubr.bf16.vlgmr.msra.gmra.mrb[144].mxu0 %v3263_v32 }
 0x515   : > { %6495 = vmatmul.mubr.bf16.vlgmr.msra.gmra.mrb[144].mxu1 %v3285_v37  ;;  %8709 = vmatpush3.bf16.msra.mxu0 %v2179_v25  ;;  %v2202_v37 = vunpack.c.h.s8.bf16 %v938_v17  ;;  %v2219_v25 = vunpack.c.l.s8.bf16 %v947_v34  ;;  %v3286_v41 = vcombine.high %v3270_v23, %v3270_v23 }
 0x516   : > { %8731 = vmatpush3.bf16.msra.mxu1 %v2195_v42  ;;  %8710 = vmatprep.subr.bf16.mxu0 %v2188_v0  ;;  %v2235_v42 = vunpack.c.l.s8.bf16 %v955_v35  ;;  %v951_v0 = vld [vmem:[%s9427_s8 + $0x1340] sm:$0xff] }
 0x517   : > { %8732 = vmatprep.subr.bf16.mxu1 %v2204_v43  ;;  %6534 = vmatprep.mubr.bf16.mxu0 %v3284_v36  ;;  %v2186_v36 = vunpack.c.h.s8.bf16 %v930_v26  ;;  %v3326_v43 = vrot.slane %v3304_v48, %v9458_v38  ;;  %v2227_v31 = vunpack.c.l.s8.bf16 %v951_v0  ;;  %v2228_v51 = vunpack.c.h.s8.bf16 %v951_v0  ;;  %v958_v26 = vld [vmem:[%s9427_s8 + $0x1378] sm:$0xff] }
 0x518   : > { %6574 = vmatprep.mubr.bf16.mxu1 %v3288_v18  ;;  %v2220_v18 = vunpack.c.h.s8.bf16 %v947_v34  ;;  %v2242_v48 = vunpack.c.h.s8.bf16 %v958_v26 }
 0x519   : > { %8711 = vmatpush3.bf16.msra.mxu0 %v2180_v45  ;;  %v2236_v45 = vunpack.c.h.s8.bf16 %v955_v35  ;;  %v3336_v58 = vcombine.high %v3326_v43, %v3326_v43 }
 0x51a   : > { %8733 = vmatpush3.bf16.msra.mxu1 %v2196_v46  ;;  %8712 = vmatprep.subr.bf16.mxu0 %v2189_v49  ;;  %v948_v46 = vld [vmem:[%s9427_s8 + $0x1328] sm:$0xff] }
 0x51b   : > { %8734 = vmatprep.subr.bf16.mxu1 %v2205_v50  ;;  %v956_v49 = vld [vmem:[%s9427_s8 + $0x1368] sm:$0xff] }
 0x51d   : > { %8713 = vmatpush3.bf16.msra.mxu0 %v2181_v40  ;;  %v2221_v40 = vunpack.c.l.s8.bf16 %v948_v46 }
 0x51e   : > { %8735 = vmatpush3.bf16.msra.mxu1 %v2197_v29  ;;  %8714 = vmatprep.subr.bf16.mxu0 %v2190_v53  ;;  %v944_v29 = vld [vmem:[%s9427_s8 + $0x1308] sm:$0xff]  ;;  %v2237_v53 = vunpack.c.l.s8.bf16 %v956_v49 }
 0x51f   : > { %8736 = vmatprep.subr.bf16.mxu1 %v2206_v54  ;;  %v952_v54 = vld [vmem:[%s9427_s8 + $0x1348] sm:$0xff]  ;;  %v2213_v57 = vunpack.c.l.s8.bf16 %v944_v29 }
 0x520   : > { %v2229_v1 = vunpack.c.l.s8.bf16 %v952_v54  ;;  %v2230_v63 = vunpack.c.h.s8.bf16 %v952_v54 }
 0x521   : > { %8715 = vmatpush3.bf16.msra.mxu0 %v2182_v59  ;;  %v2222_v59 = vunpack.c.h.s8.bf16 %v948_v46 }
 0x522   : > { %8737 = vmatpush3.bf16.msra.mxu1 %v2198_v60  ;;  %8716 = vmatprep.subr.bf16.mxu0 %v2191_v61  ;;  %v2238_v60 = vunpack.c.h.s8.bf16 %v956_v49  ;;  %v949_v61 = vld [vmem:[%s9427_s8 + $0x1330] sm:$0xff] }
 0x523   : > { %8738 = vmatprep.subr.bf16.mxu1 %v2207_v62  ;;  %v2214_v62 = vunpack.c.h.s8.bf16 %v944_v29 }
 0x525   : > { %8717 = vmatpush3.bf16.msra.mxu0 %v2183_v3  ;;  %v2223_v3 = vunpack.c.l.s8.bf16 %v949_v61 }
 0x526   : > { %8739 = vmatpush3.bf16.msra.mxu1 %v2199_v12  ;;  %8718 = vmatprep.subr.bf16.mxu0 %v2192_v56  ;;  %v945_v12 = vld [vmem:[%s9427_s8 + $0x1310] sm:$0xff]  ;;  %v2239_v56 = vunpack.c.l.s8.bf16 %v957_v6 }
 0x527   : > { %8740 = vmatprep.subr.bf16.mxu1 %v2208_v4  ;;  %v8416_v20 = vpop.f32.mrb[120].mxu0  ;;  %v953_v4 = vld [vmem:[%s9427_s8 + $0x1350] sm:$0xff]  ;;  %v2215_v9 = vunpack.c.l.s8.bf16 %v945_v12  ;;  %v2216_v17 = vunpack.c.h.s8.bf16 %v945_v12 }
 0x528   : > { %v8438_v16 = vpop.f32.mrb[120].mxu1  ;;  %v8417_v39 = vpop.f32.mrb[121].mxu0  ;;  %v2231_v19 = vunpack.c.l.s8.bf16 %v953_v4  ;;  %v973_v12 = vld [vmem:[%s9427_s8 + $0x13f0] sm:$0xff] }
 0x529   : > { %v8439_v21 = vpop.f32.mrb[121].mxu1  ;;  %v8418_v22 = vadd.f32 %v8417_v39, %v8416_v20  ;;  %v8419_v24 = vpop.f32.mrb[122].mxu0  ;;  %8719 = vmatpush3.bf16.msra.mxu0 %v2184_v10  ;;  %v2224_v10 = vunpack.c.h.s8.bf16 %v949_v61  ;;  %v2232_v20 = vunpack.c.h.s8.bf16 %v953_v4  ;;  %v946_v39 = vld [vmem:[%s9427_s8 + $0x1318] sm:$0xff] }
 0x52a   : > { %v8440_v27 = vadd.f32 %v8439_v21, %v8438_v16  ;;  %8741 = vmatpush3.bf16.msra.mxu1 %v2200_v8  ;;  %v8441_v28 = vpop.f32.mrb[122].mxu1  ;;  %v8420_v30 = vpop.f32.mrb[123].mxu0  ;;  %8720 = vmatprep.subr.bf16.mxu0 %v2193_v13  ;;  %v2240_v8 = vunpack.c.h.s8.bf16 %v957_v6  ;;  %v950_v13 = vld [vmem:[%s9427_s8 + $0x1338] sm:$0xff]  ;;  %v2241_v21 = vunpack.c.l.s8.bf16 %v958_v26 }
 0x52b   : > { %8742 = vmatprep.subr.bf16.mxu1 %v2209_v14  ;;  %v8442_v32 = vpop.f32.mrb[123].mxu1  ;;  %v5977_v33 = vadd.f32 %v8418_v22, %v10533_v55  ;;  %v943_v55 = vld [vmem:[%s9427_s8 + $0x1300] sm:$0xff]  ;;  %v3289_v14 = vcombine.high %v10549_v7, %v10549_v7  ;;  %v2225_v16 = vunpack.c.l.s8.bf16 %v950_v13  ;;  %v954_v22 = vld [vmem:[%s9427_s8 + $0x1358] sm:$0xff]  ;;  %v2226_v35 = vunpack.c.h.s8.bf16 %v950_v13 }
 0x52c   : > { %v2211_v44 = vunpack.c.l.s8.bf16 %v943_v55  ;;  %v2212_v50 = vunpack.c.h.s8.bf16 %v943_v55  ;;  %v2233_v32 = vunpack.c.l.s8.bf16 %v954_v22 }
 0x52d   : > { %v10564_v5 = vadd.f32 %v8440_v27, %v5977_v33  ;;  %8721 = vmatpush3.bf16.msra.mxu0 %v2185_v52  ;;  %v10584_v52 = vrot.slane %v3289_v14, %v9458_v38 }
 0x52e   : > { %8743 = vmatpush3.bf16.msra.mxu1 %v2201_v15  ;;  %8722 = vmatprep.subr.bf16.mxu0 %v2194_v11 }
 0x52f   : > { %8744 = vmatprep.subr.bf16.mxu1 %v2210_v47  ;;  %v2217_v47 = vunpack.c.l.s8.bf16 %v946_v39  ;;  %v3305_v55 = vcombine.high %v10584_v52, %v10584_v52 }
 0x531   : > { %8723 = vmatpush3.bf16.msra.mxu0 %v2186_v36 }
 0x532   : > { %8745 = vmatpush3.bf16.msra.mxu1 %v2202_v37  ;;  %8752 = vmatprep.subr.bf16.mxu0 %v2219_v25  ;;  %v963_v37 = vld [vmem:[%s9427_s8 + $0x13a0] sm:$0xff] }
 0x533   : > { %8774 = vmatprep.subr.bf16.mxu1 %v2235_v42  ;;  %v971_v25 = vld [vmem:[%s9427_s8 + $0x13e0] sm:$0xff]  ;;  %v3312_v42 = vrot.slane %v10555_v2, %v9458_v38 }
 0x534   : > { %6535 = vmatmul.mubr.bf16.vlgmr.msra.gmra.mrb[148].mxu0 %v3270_v23 }
 0x535   : > { %6575 = vmatmul.mubr.bf16.vlgmr.msra.gmra.mrb[148].mxu1 %v3286_v41  ;;  %8753 = vmatpush3.bf16.msra.mxu0 %v2211_v44  ;;  %v2234_v41 = vunpack.c.h.s8.bf16 %v954_v22  ;;  %v2251_v44 = vunpack.c.l.s8.bf16 %v963_v37  ;;  %v3334_v46 = vcombine.high %v3312_v42, %v3312_v42 }
 0x536   : > { %8775 = vmatpush3.bf16.msra.mxu1 %v2227_v31  ;;  %8754 = vmatprep.subr.bf16.mxu0 %v2220_v18  ;;  %v2267_v31 = vunpack.c.l.s8.bf16 %v971_v25  ;;  %v967_v18 = vld [vmem:[%s9427_s8 + $0x13c0] sm:$0xff] }
 0x537   : > { %8776 = vmatprep.subr.bf16.mxu1 %v2236_v45  ;;  %6614 = vmatprep.mubr.bf16.mxu0 %v3326_v43  ;;  %v2218_v43 = vunpack.c.h.s8.bf16 %v946_v39  ;;  %v3333_v45 = vrot.slane %v3305_v55, %v9458_v38  ;;  %v2259_v49 = vunpack.c.l.s8.bf16 %v967_v18  ;;  %v2260_v54 = vunpack.c.h.s8.bf16 %v967_v18  ;;  %v10609_v39 = vld [vmem:[%s9441_s25 + $0xa0] sm:$0x1f] }
 0x538   : > { %6654 = vmatprep.mubr.bf16.mxu1 %v3336_v58  ;;  %v2252_v58 = vunpack.c.h.s8.bf16 %v963_v37 }
 0x539   : > { %8755 = vmatpush3.bf16.msra.mxu0 %v2212_v50  ;;  %v2268_v50 = vunpack.c.h.s8.bf16 %v971_v25  ;;  %v3337_v29 = vcombine.high %v3333_v45, %v3333_v45 }
 0x53a   : > { %8777 = vmatpush3.bf16.msra.mxu1 %v2228_v51  ;;  %8756 = vmatprep.subr.bf16.mxu0 %v2221_v40  ;;  %v964_v51 = vld [vmem:[%s9427_s8 + $0x13a8] sm:$0xff] }
 0x53b   : > { %8778 = vmatprep.subr.bf16.mxu1 %v2237_v53  ;;  %v972_v40 = vld [vmem:[%s9427_s8 + $0x13e8] sm:$0xff] }
 0x53d   : > { %8757 = vmatpush3.bf16.msra.mxu0 %v2213_v57  ;;  %v2253_v57 = vunpack.c.l.s8.bf16 %v964_v51 }
 0x53e   : > { %8779 = vmatpush3.bf16.msra.mxu1 %v2229_v1  ;;  %8758 = vmatprep.subr.bf16.mxu0 %v2222_v59  ;;  %v960_v1 = vld [vmem:[%s9427_s8 + $0x1388] sm:$0xff]  ;;  %v2269_v59 = vunpack.c.l.s8.bf16 %v972_v40 }
 0x53f   : > { %8780 = vmatprep.subr.bf16.mxu1 %v2238_v60  ;;  %v968_v60 = vld [vmem:[%s9427_s8 + $0x13c8] sm:$0xff]  ;;  %v2245_v61 = vunpack.c.l.s8.bf16 %v960_v1 }
 0x540   : > { %v2261_v6 = vunpack.c.l.s8.bf16 %v968_v60  ;;  %v2262_v4 = vunpack.c.h.s8.bf16 %v968_v60 }
 0x541   : > { %8759 = vmatpush3.bf16.msra.mxu0 %v2214_v62  ;;  %v2254_v62 = vunpack.c.h.s8.bf16 %v964_v51 }
 0x542   : > { %8781 = vmatpush3.bf16.msra.mxu1 %v2230_v63  ;;  %8760 = vmatprep.subr.bf16.mxu0 %v2223_v3  ;;  %v2270_v63 = vunpack.c.h.s8.bf16 %v972_v40  ;;  %v965_v3 = vld [vmem:[%s9427_s8 + $0x13b0] sm:$0xff] }
 0x543   : > { %8782 = vmatprep.subr.bf16.mxu1 %v2239_v56  ;;  %v2246_v56 = vunpack.c.h.s8.bf16 %v960_v1  ;;  %v2256_v14 = vunpack.c.h.s8.bf16 %v965_v3 }
 0x545   : > { %8761 = vmatpush3.bf16.msra.mxu0 %v2215_v9  ;;  %v2255_v9 = vunpack.c.l.s8.bf16 %v965_v3 }
 0x546   : > { %8783 = vmatpush3.bf16.msra.mxu1 %v2231_v19  ;;  %8762 = vmatprep.subr.bf16.mxu0 %v2224_v10  ;;  %v961_v19 = vld [vmem:[%s9427_s8 + $0x1390] sm:$0xff]  ;;  %v2271_v10 = vunpack.c.l.s8.bf16 %v973_v12 }
 0x547   : > { %8784 = vmatprep.subr.bf16.mxu1 %v2240_v8  ;;  %v8460_v24 = vpop.f32.mrb[124].mxu0  ;;  %v969_v8 = vld [vmem:[%s9427_s8 + $0x13d0] sm:$0xff]  ;;  %v2247_v13 = vunpack.c.l.s8.bf16 %v961_v19 }
 0x548   : > { %v8482_v27 = vpop.f32.mrb[124].mxu1  ;;  %v8461_v15 = vpop.f32.mrb[125].mxu0  ;;  %v2263_v26 = vunpack.c.l.s8.bf16 %v969_v8  ;;  %v2264_v22 = vunpack.c.h.s8.bf16 %v969_v8 }
 0x549   : > { %v8483_v28 = vpop.f32.mrb[125].mxu1  ;;  %v8462_v30 = vadd.f32 %v8461_v15, %v8460_v24  ;;  %v8463_v7 = vpop.f32.mrb[126].mxu0  ;;  %8763 = vmatpush3.bf16.msra.mxu0 %v2216_v17  ;;  %v2272_v17 = vunpack.c.h.s8.bf16 %v973_v12 }
 0x54a   : > { %v8484_v11 = vadd.f32 %v8483_v28, %v8482_v27  ;;  %8785 = vmatpush3.bf16.msra.mxu1 %v2232_v20  ;;  %v8485_v33 = vpop.f32.mrb[126].mxu1  ;;  %v8464_v34 = vpop.f32.mrb[127].mxu0  ;;  %8764 = vmatprep.subr.bf16.mxu0 %v2225_v16  ;;  %v966_v20 = vld [vmem:[%s9427_s8 + $0x13b8] sm:$0xff] }
 0x54b   : > { %8786 = vmatprep.subr.bf16.mxu1 %v2241_v21  ;;  %v8486_v23 = vpop.f32.mrb[127].mxu1  ;;  %v6057_v36 = vadd.f32 %v8462_v30, %v10564_v5  ;;  %v959_v5 = vld [vmem:[%s9427_s8 + $0x1380] sm:$0xff]  ;;  %v974_v16 = vld [vmem:[%s9427_s8 + $0x13f8] sm:$0xff]  ;;  %v2248_v21 = vunpack.c.h.s8.bf16 %v961_v19  ;;  %v2257_v24 = vunpack.c.l.s8.bf16 %v966_v20  ;;  %v2258_v25 = vunpack.c.h.s8.bf16 %v966_v20  ;;  %v989_v19 = vld [vmem:[%s9427_s8 + $0x1470] sm:$0xff] }
 0x54c   : > { %v2243_v2 = vunpack.c.l.s8.bf16 %v959_v5  ;;  %v2244_v53 = vunpack.c.h.s8.bf16 %v959_v5  ;;  %v962_v27 = vld [vmem:[%s9427_s8 + $0x1398] sm:$0xff]  ;;  %v2273_v15 = vunpack.c.l.s8.bf16 %v974_v16  ;;  %v2274_v55 = vunpack.c.h.s8.bf16 %v974_v16 }
 0x54d   : > { %v10593_v0 = vadd.f32 %v8484_v11, %v6057_v36  ;;  %8765 = vmatpush3.bf16.msra.mxu0 %v2217_v47  ;;  %v970_v28 = vld [vmem:[%s9427_s8 + $0x13d8] sm:$0xff]  ;;  %v10615_v11 = vrot.slane %v10609_v39, %v9458_v38 }
 0x54e   : > { %8787 = vmatpush3.bf16.msra.mxu1 %v2233_v32  ;;  %8766 = vmatprep.subr.bf16.mxu0 %v2226_v35  ;;  %v2265_v23 = vunpack.c.l.s8.bf16 %v970_v28 }
 0x54f   : > { %8788 = vmatprep.subr.bf16.mxu1 %v2242_v48  ;;  %v2249_v48 = vunpack.c.l.s8.bf16 %v962_v27  ;;  %v3353_v5 = vcombine.high %v10615_v11, %v10615_v11 }
 0x551   : > { %8767 = vmatpush3.bf16.msra.mxu0 %v2218_v43 }
 0x552   : > { %8789 = vmatpush3.bf16.msra.mxu1 %v2234_v41  ;;  %8796 = vmatprep.subr.bf16.mxu0 %v2251_v44  ;;  %v979_v41 = vld [vmem:[%s9427_s8 + $0x1420] sm:$0xff] }
 0x553   : > { %8818 = vmatprep.subr.bf16.mxu1 %v2267_v31  ;;  %v987_v44 = vld [vmem:[%s9427_s8 + $0x1460] sm:$0xff]  ;;  %v3319_v31 = vrot.slane %v10584_v52, %v9458_v38 }
 0x554   : > { %6615 = vmatmul.mubr.bf16.vlgmr.msra.gmra.mrb[152].mxu0 %v3312_v42 }
 0x555   : > { %6655 = vmatmul.mubr.bf16.vlgmr.msra.gmra.mrb[152].mxu1 %v3334_v46  ;;  %8797 = vmatpush3.bf16.msra.mxu0 %v2243_v2  ;;  %v2266_v46 = vunpack.c.h.s8.bf16 %v970_v28  ;;  %v2283_v2 = vunpack.c.l.s8.bf16 %v979_v41  ;;  %v3335_v51 = vcombine.high %v3319_v31, %v3319_v31 }
 0x556   : > { %8819 = vmatpush3.bf16.msra.mxu1 %v2259_v49  ;;  %8798 = vmatprep.subr.bf16.mxu0 %v2252_v58  ;;  %v2299_v49 = vunpack.c.l.s8.bf16 %v987_v44  ;;  %v983_v58 = vld [vmem:[%s9427_s8 + $0x1440] sm:$0xff] }
 0x557   : > { %8820 = vmatprep.subr.bf16.mxu1 %v2268_v50  ;;  %6694 = vmatprep.mubr.bf16.mxu0 %v3333_v45  ;;  %v2250_v45 = vunpack.c.h.s8.bf16 %v962_v27  ;;  %v3374_v50 = vrot.slane %v3353_v5, %v9458_v38  ;;  %v2291_v40 = vunpack.c.l.s8.bf16 %v983_v58  ;;  %v2292_v60 = vunpack.c.h.s8.bf16 %v983_v58  ;;  %v990_v27 = vld [vmem:[%s9427_s8 + $0x1478] sm:$0xff] }
 0x558   : > { %6734 = vmatprep.mubr.bf16.mxu1 %v3337_v29  ;;  %v2284_v29 = vunpack.c.h.s8.bf16 %v979_v41 }
 0x559   : > { %8799 = vmatpush3.bf16.msra.mxu0 %v2244_v53  ;;  %v2300_v53 = vunpack.c.h.s8.bf16 %v987_v44  ;;  %v3376_v1 = vcombine.high %v3374_v50, %v3374_v50  ;;  %v2306_v44 = vunpack.c.h.s8.bf16 %v990_v27 }
 0x55a   : > { %8821 = vmatpush3.bf16.msra.mxu1 %v2260_v54  ;;  %8800 = vmatprep.subr.bf16.mxu0 %v2253_v57  ;;  %v980_v54 = vld [vmem:[%s9427_s8 + $0x1428] sm:$0xff] }
 0x55b   : > { %8822 = vmatprep.subr.bf16.mxu1 %v2269_v59  ;;  %v988_v57 = vld [vmem:[%s9427_s8 + $0x1468] sm:$0xff] }
 0x55d   : > { %8801 = vmatpush3.bf16.msra.mxu0 %v2245_v61  ;;  %v2285_v61 = vunpack.c.l.s8.bf16 %v980_v54 }
 0x55e   : > { %8823 = vmatpush3.bf16.msra.mxu1 %v2261_v6  ;;  %8802 = vmatprep.subr.bf16.mxu0 %v2254_v62  ;;  %v976_v6 = vld [vmem:[%s9427_s8 + $0x1408] sm:$0xff]  ;;  %v2301_v62 = vunpack.c.l.s8.bf16 %v988_v57 }
 0x55f   : > { %8824 = vmatprep.subr.bf16.mxu1 %v2270_v63  ;;  %v984_v63 = vld [vmem:[%s9427_s8 + $0x1448] sm:$0xff]  ;;  %v2277_v3 = vunpack.c.l.s8.bf16 %v976_v6 }
 0x560   : > { %v2293_v12 = vunpack.c.l.s8.bf16 %v984_v63  ;;  %v2294_v8 = vunpack.c.h.s8.bf16 %v984_v63 }
 0x561   : > { %8803 = vmatpush3.bf16.msra.mxu0 %v2246_v56  ;;  %v2286_v56 = vunpack.c.h.s8.bf16 %v980_v54 }
 0x562   : > { %8825 = vmatpush3.bf16.msra.mxu1 %v2262_v4  ;;  %8804 = vmatprep.subr.bf16.mxu0 %v2255_v9  ;;  %v2302_v4 = vunpack.c.h.s8.bf16 %v988_v57  ;;  %v981_v9 = vld [vmem:[%s9427_s8 + $0x1430] sm:$0xff]  ;;  %v994_v57 = vld [vmem:[%s9427_s8 + $0x1498] sm:$0xff] }
 0x563   : > { %8826 = vmatprep.subr.bf16.mxu1 %v2271_v10  ;;  %v2278_v10 = vunpack.c.h.s8.bf16 %v976_v6 }
 0x565   : > { %8805 = vmatpush3.bf16.msra.mxu0 %v2247_v13  ;;  %v2287_v13 = vunpack.c.l.s8.bf16 %v981_v9 }
 0x566   : > { %8827 = vmatpush3.bf16.msra.mxu1 %v2263_v26  ;;  %8806 = vmatprep.subr.bf16.mxu0 %v2256_v14  ;;  %v977_v26 = vld [vmem:[%s9427_s8 + $0x1410] sm:$0xff]  ;;  %v2303_v14 = vunpack.c.l.s8.bf16 %v989_v19 }
 0x567   : > { %8828 = vmatprep.subr.bf16.mxu1 %v2272_v17  ;;  %v8504_v30 = vpop.f32.mrb[128].mxu0  ;;  %v985_v17 = vld [vmem:[%s9427_s8 + $0x1450] sm:$0xff]  ;;  %v2279_v20 = vunpack.c.l.s8.bf16 %v977_v26 }
 0x568   : > { %v8526_v7 = vpop.f32.mrb[128].mxu1  ;;  %v8505_v47 = vpop.f32.mrb[129].mxu0  ;;  %v2295_v16 = vunpack.c.l.s8.bf16 %v985_v17  ;;  %v2296_v28 = vunpack.c.h.s8.bf16 %v985_v17 }
 0x569   : > { %v8527_v32 = vpop.f32.mrb[129].mxu1  ;;  %v8506_v33 = vadd.f32 %v8505_v47, %v8504_v30  ;;  %v8507_v34 = vpop.f32.mrb[130].mxu0  ;;  %8807 = vmatpush3.bf16.msra.mxu0 %v2248_v21  ;;  %v2288_v21 = vunpack.c.h.s8.bf16 %v981_v9  ;;  %v2305_v47 = vunpack.c.l.s8.bf16 %v990_v27 }
 0x56a   : > { %v8528_v35 = vadd.f32 %v8527_v32, %v8526_v7  ;;  %8829 = vmatpush3.bf16.msra.mxu1 %v2264_v22  ;;  %v8529_v36 = vpop.f32.mrb[130].mxu1  ;;  %v8508_v37 = vpop.f32.mrb[131].mxu0  ;;  %8808 = vmatprep.subr.bf16.mxu0 %v2257_v24  ;;  %v2304_v22 = vunpack.c.h.s8.bf16 %v989_v19  ;;  %v982_v24 = vld [vmem:[%s9427_s8 + $0x1438] sm:$0xff] }
 0x56b   : > { %8830 = vmatprep.subr.bf16.mxu1 %v2273_v15  ;;  %v8530_v42 = vpop.f32.mrb[131].mxu1  ;;  %v6137_v43 = vadd.f32 %v8506_v33, %v10593_v0  ;;  %v975_v0 = vld [vmem:[%s9427_s8 + $0x1400] sm:$0xff]  ;;  %v2280_v15 = vunpack.c.h.s8.bf16 %v977_v26  ;;  %v2289_v30 = vunpack.c.l.s8.bf16 %v982_v24  ;;  %v978_v7 = vld [vmem:[%s9427_s8 + $0x1418] sm:$0xff]  ;;  %v2290_v41 = vunpack.c.h.s8.bf16 %v982_v24 }
 0x56c   : > { %v2275_v52 = vunpack.c.l.s8.bf16 %v975_v0  ;;  %v2276_v59 = vunpack.c.h.s8.bf16 %v975_v0  ;;  %v986_v32 = vld [vmem:[%s9427_s8 + $0x1458] sm:$0xff] }
 0x56d   : > { %v10624_v18 = vadd.f32 %v8528_v35, %v6137_v43  ;;  %8809 = vmatpush3.bf16.msra.mxu0 %v2249_v48  ;;  %v2298_v0 = vunpack.c.h.s8.bf16 %v986_v32 }
 0x56e   : > { %8831 = vmatpush3.bf16.msra.mxu1 %v2265_v23  ;;  %8810 = vmatprep.subr.bf16.mxu0 %v2258_v25  ;;  %v2281_v25 = vunpack.c.l.s8.bf16 %v978_v7 }
 0x56f   : > { %8832 = vmatprep.subr.bf16.mxu1 %v2274_v55  ;;  %v2297_v55 = vunpack.c.l.s8.bf16 %v986_v32 }
 0x571   : > { %8811 = vmatpush3.bf16.msra.mxu0 %v2250_v45  ;;  %v3360_v45 = vrot.slane %v10615_v11, %v9458_v38 }
 0x572   : > { %8833 = vmatpush3.bf16.msra.mxu1 %v2266_v46  ;;  %8840 = vmatprep.subr.bf16.mxu0 %v2283_v2  ;;  %v2282_v2 = vunpack.c.h.s8.bf16 %v978_v7 }
 0x573   : > { %8862 = vmatprep.subr.bf16.mxu1 %v2299_v49  ;;  %v991_v49 = vld [vmem:[%s9427_s8 + $0x1480] sm:$0xff]  ;;  %v3375_v58 = vcombine.high %v3360_v45, %v3360_v45 }
 0x574   : > { %6695 = vmatmul.mubr.bf16.vlgmr.msra.gmra.mrb[156].mxu0 %v3319_v31  ;;  %v2308_v11 = vunpack.c.h.s8.bf16 %v991_v49 }
 0x575   : > { %6735 = vmatmul.mubr.bf16.vlgmr.msra.gmra.mrb[156].mxu1 %v3335_v51  ;;  %8841 = vmatpush3.bf16.msra.mxu0 %v2275_v52  ;;  %v9218_v51 = vmov 0.0  }
 0x576   : > { %8863 = vmatpush3.bf16.msra.mxu1 %v2291_v40  ;;  %8842 = vmatprep.subr.bf16.mxu0 %v2284_v29  ;;  %v993_v29 = vld [vmem:[%s9427_s8 + $0x1490] sm:$0xff] }
 0x577   : > { %8864 = vmatprep.subr.bf16.mxu1 %v2300_v53  ;;  %6774 = vmatprep.mubr.bf16.mxu0 %v3374_v50  ;;  %v2307_v50 = vunpack.c.l.s8.bf16 %v991_v49  ;;  %v2311_v53 = vunpack.c.l.s8.bf16 %v993_v29  ;;  %v2312_v54 = vunpack.c.h.s8.bf16 %v993_v29 }
 0x578   : > { %6814 = vmatprep.mubr.bf16.mxu1 %v3376_v1 }
 0x579   : > { %8843 = vmatpush3.bf16.msra.mxu0 %v2276_v59 }
 0x57a   : > { %8865 = vmatpush3.bf16.msra.mxu1 %v2292_v60  ;;  %8844 = vmatprep.subr.bf16.mxu0 %v2285_v61  ;;  %v3338_v60 = vcombine.high %v10609_v39, %v10609_v39 }
 0x57b   : > { %8866 = vmatprep.subr.bf16.mxu1 %v2301_v62 }
 0x57d   : > { %8845 = vmatpush3.bf16.msra.mxu0 %v2277_v3 }
 0x57e   : > { %8867 = vmatpush3.bf16.msra.mxu1 %v2293_v12  ;;  %8846 = vmatprep.subr.bf16.mxu0 %v2286_v56  ;;  %v2313_v12 = vunpack.c.l.s8.bf16 %v994_v57 }
 0x57f   : > { %8868 = vmatprep.subr.bf16.mxu1 %v2302_v4 }
 0x581   : > { %8847 = vmatpush3.bf16.msra.mxu0 %v2278_v10  ;;  %v3352_v10 = vrot.slane %v3338_v60, %v9458_v38 }
 0x582   : > { %8869 = vmatpush3.bf16.msra.mxu1 %v2294_v8  ;;  %8848 = vmatprep.subr.bf16.mxu0 %v2287_v13  ;;  %v2314_v13 = vunpack.c.h.s8.bf16 %v994_v57 }
 0x583   : > { %8870 = vmatprep.subr.bf16.mxu1 %v2303_v14  ;;  %v3367_v39 = vrot.slane %v3352_v10, %v9458_v38 }
 0x585   : > { %8849 = vmatpush3.bf16.msra.mxu0 %v2279_v20 }
 0x586   : > { %8871 = vmatpush3.bf16.msra.mxu1 %v2295_v16  ;;  %8850 = vmatprep.subr.bf16.mxu0 %v2288_v21 }
 0x587   : > { %8872 = vmatprep.subr.bf16.mxu1 %v2304_v22  ;;  %v8548_v33 = vpop.f32.mrb[132].mxu0 }
 0x588   : > { %v8570_v34 = vpop.f32.mrb[132].mxu1  ;;  %v8549_v35 = vpop.f32.mrb[133].mxu0 }
 0x589   : > { %v8571_v48 = vpop.f32.mrb[133].mxu1  ;;  %v8550_v23 = vadd.f32 %v8549_v35, %v8548_v33  ;;  %v8551_v36 = vpop.f32.mrb[134].mxu0  ;;  %8851 = vmatpush3.bf16.msra.mxu0 %v2280_v15 }
 0x58a   : > { %v8572_v37 = vadd.f32 %v8571_v48, %v8570_v34  ;;  %8873 = vmatpush3.bf16.msra.mxu1 %v2296_v28  ;;  %v8573_v42 = vpop.f32.mrb[134].mxu1  ;;  %v8552_v43 = vpop.f32.mrb[135].mxu0  ;;  %8852 = vmatprep.subr.bf16.mxu0 %v2289_v30 }
 0x58b   : > { %8874 = vmatprep.subr.bf16.mxu1 %v2305_v47  ;;  %v8574_v5 = vpop.f32.mrb[135].mxu1  ;;  %v6217_v31 = vadd.f32 %v8550_v23, %v10624_v18  ;;  %v992_v18 = vld [vmem:[%s9427_s8 + $0x1488] sm:$0xff] }
 0x58c   : > { %v2309_v52 = vunpack.c.l.s8.bf16 %v992_v18  ;;  %v2310_v40 = vunpack.c.h.s8.bf16 %v992_v18 }
 0x58d   : > { %v6257_v46 = vadd.f32 %v8572_v37, %v6217_v31  ;;  %8853 = vmatpush3.bf16.msra.mxu0 %v2281_v25 }
 0x58e   : > { %8875 = vmatpush3.bf16.msra.mxu1 %v2297_v55  ;;  %8854 = vmatprep.subr.bf16.mxu0 %v2290_v41 }
 0x58f   : > { %8876 = vmatprep.subr.bf16.mxu1 %v2306_v44 }
 0x591   : > { %8855 = vmatpush3.bf16.msra.mxu0 %v2282_v2 }
 0x592   : > { %8877 = vmatpush3.bf16.msra.mxu1 %v2298_v0  ;;  %8910 = vmatprep.subr.bf16.mxu0 %v9218_v51 }
 0x594   : > { %6775 = vmatmul.mubr.bf16.vlgmr.msra.gmra.mrb[160].mxu0 %v3360_v45 }
 0x595   : > { %6815 = vmatmul.mubr.bf16.vlgmr.msra.gmra.mrb[160].mxu1 %v3375_v58  ;;  %8911 = vmatpush3.bf16.msra.mxu0 %v2307_v50 }
 0x596   : > { %8926 = vmatprep.mubr.msk.bf16.mxu0 %vm9219_vm0, %v9218_v51  ;;  %8912 = vmatprep.subr.bf16.mxu0 %v9218_v51 }
 0x599   : > { %8913 = vmatpush3.bf16.msra.mxu0 %v2308_v11 }
 0x59a   : > { %8914 = vmatprep.subr.bf16.mxu0 %v9218_v51 }
 0x59d   : > { %8915 = vmatpush3.bf16.msra.mxu0 %v2309_v52 }
 0x59e   : > { %8916 = vmatprep.subr.bf16.mxu0 %v9218_v51 }
 0x5a1   : > { %8917 = vmatpush3.bf16.msra.mxu0 %v2310_v40 }
 0x5a2   : > { %8918 = vmatprep.subr.bf16.mxu0 %v9218_v51 }
 0x5a5   : > { %8919 = vmatpush3.bf16.msra.mxu0 %v2311_v53 }
 0x5a6   : > { %8920 = vmatprep.subr.bf16.mxu0 %v9218_v51 }
 0x5a7   : > { %v8592_v1 = vpop.f32.mrb[136].mxu0 }
 0x5a8   : > { %v8614_v59 = vpop.f32.mrb[136].mxu1  ;;  %v8593_v61 = vpop.f32.mrb[137].mxu0 }
 0x5a9   : > { %v8615_v6 = vpop.f32.mrb[137].mxu1  ;;  %v8594_v62 = vadd.f32 %v8593_v61, %v8592_v1  ;;  %v8595_v63 = vpop.f32.mrb[138].mxu0  ;;  %8921 = vmatpush3.bf16.msra.mxu0 %v2312_v54 }
 0x5aa   : > { %v8616_v3 = vadd.f32 %v8615_v6, %v8614_v59  ;;  %v8617_v56 = vpop.f32.mrb[138].mxu1  ;;  %v8596_v4 = vpop.f32.mrb[139].mxu0  ;;  %8922 = vmatprep.subr.bf16.mxu0 %v9218_v51 }
 0x5ab   : > { %v8618_v9 = vpop.f32.mrb[139].mxu1  ;;  %v6297_v19 = vadd.f32 %v8594_v62, %v6257_v46 }
 0x5ad   : > { %v6337_v8 = vadd.f32 %v8616_v3, %v6297_v19  ;;  %8923 = vmatpush3.bf16.msra.mxu0 %v2313_v12 }
 0x5ae   : > { %8924 = vmatprep.subr.bf16.mxu0 %v9218_v51 }
 0x5b1   : > { %8925 = vmatpush3.bf16.msra.mxu0 %v2314_v13 }
 0x5b4   : > { %8927 = vmatmul.mubr.bf16.vlgmr.msra.gmra.mrb[164].mxu0 %v3367_v39 }
 0x5c7   : > { %v8636_v26 = vpop.f32.mrb[140].mxu0 }
 0x5c8   : > { %v8658_v14 = vpop.f32.mrb[140].mxu1  ;;  %v8637_v17 = vpop.f32.mrb[141].mxu0 }
 0x5c9   : > { %v8659_v20 = vpop.f32.mrb[141].mxu1  ;;  %v8638_v16 = vadd.f32 %v8637_v17, %v8636_v26  ;;  %v8639_v21 = vpop.f32.mrb[142].mxu0 }
 0x5ca   : > { %v8660_v22 = vadd.f32 %v8659_v20, %v8658_v14  ;;  %v8661_v24 = vpop.f32.mrb[142].mxu1  ;;  %v8640_v27 = vpop.f32.mrb[143].mxu0 }
 0x5cb   : > { %v8662_v15 = vpop.f32.mrb[143].mxu1  ;;  %v6377_v28 = vadd.f32 %v8638_v16, %v6337_v8  ;;  %v2315_v27 = vld [vmem:[#allocation2] sm:$0x3] }
 0x5cd   : > { %v6417_v30 = vadd.f32 %v8660_v22, %v6377_v28 }
 0x5e7   : > { %v8680_v7 = vpop.f32.mrb[144].mxu0 }
 0x5e8   : > { %v8702_v47 = vpop.f32.mrb[144].mxu1  ;;  %v8681_v32 = vpop.f32.mrb[145].mxu0 }
 0x5e9   : > { %v8703_v33 = vpop.f32.mrb[145].mxu1  ;;  %v8682_v34 = vadd.f32 %v8681_v32, %v8680_v7  ;;  %v8683_v38 = vpop.f32.mrb[146].mxu0 }
 0x5ea   : > { %v8704_v35 = vadd.f32 %v8703_v33, %v8702_v47  ;;  %v8705_v48 = vpop.f32.mrb[146].mxu1  ;;  %v8684_v23 = vpop.f32.mrb[147].mxu0  ;;  %v6886_v33 = vld [vmem:[%s10724_s4] sm:$0xff] (!%p7073_p6)  ;;  %v6888_v38 = vld [vmem:[%s10724_s4 + $0x10] sm:$0xff] (!%p7073_p6) }
 0x5eb   : > { %v8706_v36 = vpop.f32.mrb[147].mxu1  ;;  %v6457_v37 = vadd.f32 %v8682_v34, %v6417_v30  ;;  %v6887_v34 = vld [vmem:[%s10724_s4 + $0x8] sm:$0xff] (!%p7073_p6)  ;;  %v6889_v23 = vld [vmem:[%s10724_s4 + $0x18] sm:$0xff] (!%p7073_p6) }
 0x5ec   : > { %v8966_v48 = vpack.c.bf16 (!%p7073_p6), %v6887_v34, %v6886_v33  ;;  %v9222_v36 = vmov (!%p7073_p6), 0.0  }
 0x5ed   : > { %v6497_v25 = vadd.f32 %v8704_v35, %v6457_v37  ;;  %v9220_v35 = vmov (!%p7073_p6), 0.0|0.0   ;;  %8962 = vmatprep.mubr.msk.f32.mxu0 (!%p7073_p6), %vm9221_vm1, %v9222_v36  ;;  %v8969_v37 = vpack.c.bf16 (!%p7073_p6), %v6889_v23, %v6888_v38 }
 0x5ee   : > { %8965 = vmatprep.subr.bf16.mxu0 (!%p7073_p6), %v9220_v35 }
 0x5ef   : > { %8967 = vmatpush3.bf16.msra.mxu0 (!%p7073_p6), %v8966_v48 }
 0x5f0   : > { %8968 = vmatprep.subr.bf16.mxu0 (!%p7073_p6), %v9220_v35 }
 0x5f3   : > { %8970 = vmatpush3.bf16.msra.mxu0 (!%p7073_p6), %v8969_v37 }
 0x5f4   : > { %8971 = vmatprep.subr.bf16.mxu0 (!%p7073_p6), %v9220_v35 }
 0x607   : > { %v8724_v55 = vpop.f32.mrb[148].mxu0 }
 0x608   : > { %v8746_v42 = vpop.f32.mrb[148].mxu1  ;;  %v8725_v43 = vpop.f32.mrb[149].mxu0 }
 0x609   : > { %v8747_v41 = vpop.f32.mrb[149].mxu1  ;;  %v8726_v44 = vadd.f32 %v8725_v43, %v8724_v55  ;;  %v8727_v5 = vpop.f32.mrb[150].mxu0  ;;  %v6891_v55 = vld [vmem:[%s10724_s4 + $0x28] sm:$0xff] (!%p7073_p6)  ;;  %v6892_v43 = vld [vmem:[%s10724_s4 + $0x30] sm:$0xff] (!%p7073_p6) }
 0x60a   : > { %v8748_v31 = vadd.f32 %v8747_v41, %v8746_v42  ;;  %v8749_v45 = vpop.f32.mrb[150].mxu1  ;;  %v8728_v46 = vpop.f32.mrb[151].mxu0  ;;  %v6893_v41 = vld [vmem:[%s10724_s4 + $0x38] sm:$0xff] (!%p7073_p6)  ;;  %v6894_v5 = vld [vmem:[%s10724_s4 + $0x40] sm:$0xff] (!%p7073_p6) }
 0x60b   : > { %v8750_v2 = vpop.f32.mrb[151].mxu1  ;;  %v6537_v0 = vadd.f32 %v8726_v44, %v6497_v25  ;;  %v6890_v25 = vld [vmem:[%s10724_s4 + $0x20] sm:$0xff] (!%p7073_p6)  ;;  %v8975_v44 = vpack.c.bf16 (!%p7073_p6), %v6893_v41, %v6892_v43  ;;  %v6896_v46 = vld [vmem:[%s10724_s4 + $0x50] sm:$0xff] (!%p7073_p6) }
 0x60c   : > { %v8972_v42 = vpack.c.bf16 (!%p7073_p6), %v6891_v55, %v6890_v25  ;;  %v6897_v2 = vld [vmem:[%s10724_s4 + $0x58] sm:$0xff] (!%p7073_p6) }
 0x60d   : > { %v6577_v49 = vadd.f32 %v8748_v31, %v6537_v0  ;;  %v6895_v31 = vld [vmem:[%s10724_s4 + $0x48] sm:$0xff] (!%p7073_p6)  ;;  %v8981_v0 = vpack.c.bf16 (!%p7073_p6), %v6897_v2, %v6896_v46 }
 0x60e   : > { %8973 = vmatpush3.bf16.msra.mxu0 (!%p7073_p6), %v8972_v42  ;;  %v8978_v45 = vpack.c.bf16 (!%p7073_p6), %v6895_v31, %v6894_v5 }
 0x60f   : > { %8974 = vmatprep.subr.bf16.mxu0 (!%p7073_p6), %v9220_v35 }
 0x612   : > { %8976 = vmatpush3.bf16.msra.mxu0 (!%p7073_p6), %v8975_v44 }
 0x613   : > { %8977 = vmatprep.subr.bf16.mxu0 (!%p7073_p6), %v9220_v35 }
 0x616   : > { %8979 = vmatpush3.bf16.msra.mxu0 (!%p7073_p6), %v8978_v45 }
 0x617   : > { %8980 = vmatprep.subr.bf16.mxu0 (!%p7073_p6), %v9220_v35 }
 0x61a   : > { %8982 = vmatpush3.bf16.msra.mxu0 (!%p7073_p6), %v8981_v0 }
 0x61b   : > { %8983 = vmatprep.subr.bf16.mxu0 (!%p7073_p6), %v9220_v35 }
 0x627   : > { %v8768_v58 = vpop.f32.mrb[152].mxu0 }
 0x628   : > { %v8790_v50 = vpop.f32.mrb[152].mxu1  ;;  %v8769_v51 = vpop.f32.mrb[153].mxu0 }
 0x629   : > { %v8791_v11 = vpop.f32.mrb[153].mxu1  ;;  %v8770_v18 = vadd.f32 %v8769_v51, %v8768_v58  ;;  %v8771_v52 = vpop.f32.mrb[154].mxu0  ;;  %v7074_v58 = vld [vmem:[#allocation6] ss:$0 sm:$0xff] (!%p7073_p6)  ;;  %v6899_v51 = vld [vmem:[%s10724_s4 + $0x68] sm:$0xff] (!%p7073_p6) }
 0x62a   : > { %v8792_v40 = vadd.f32 %v8791_v11, %v8790_v50  ;;  %v8793_v29 = vpop.f32.mrb[154].mxu1  ;;  %v8772_v53 = vpop.f32.mrb[155].mxu0  ;;  %v6898_v50 = vld [vmem:[%s10724_s4 + $0x60] sm:$0xff] (!%p7073_p6) }
 0x62b   : > { %v8794_v54 = vpop.f32.mrb[155].mxu1  ;;  %v6617_v57 = vadd.f32 %v8770_v18, %v6577_v49  ;;  %v8984_v18 = vpack.c.bf16 (!%p7073_p6), %v6899_v51, %v6898_v50  ;;  %v7075_v52 = vld [vmem:[#allocation8] ss:$0 sm:$0xff] (!%p7073_p6)  ;;  %v6901_v29 = vld [vmem:[%s10724_s4 + $0x78] sm:$0xff] (!%p7073_p6) }
 0x62d   : > { %v6657_v1 = vadd.f32 %v8792_v40, %v6617_v57  ;;  %v6900_v40 = vld [vmem:[%s10724_s4 + $0x70] sm:$0xff] (!%p7073_p6)  ;;  %8985 = vmatpush3.bf16.msra.mxu0 (!%p7073_p6), %v8984_v18 }
 0x62e   : > { %v8987_v54 = vpack.c.bf16 (!%p7073_p6), %v6901_v29, %v6900_v40  ;;  %8986 = vmatprep.subr.bf16.mxu0 (!%p7073_p6), %v9220_v35 }
 0x631   : > { %8988 = vmatpush3.bf16.msra.mxu0 (!%p7073_p6), %v8987_v54 }
 0x647   : > { %v8812_v59 = vpop.f32.mrb[156].mxu0 }
 0x648   : > { %v8834_v60 = vpop.f32.mrb[156].mxu1  ;;  %v8813_v61 = vpop.f32.mrb[157].mxu0 }
 0x649   : > { %v8835_v6 = vpop.f32.mrb[157].mxu1  ;;  %v8814_v62 = vadd.f32 %v8813_v61, %v8812_v59  ;;  %v8815_v63 = vpop.f32.mrb[158].mxu0 }
 0x64a   : > { %v8836_v3 = vadd.f32 %v8835_v6, %v8834_v60  ;;  %v8837_v12 = vpop.f32.mrb[158].mxu1  ;;  %v8816_v56 = vpop.f32.mrb[159].mxu0 }
 0x64b   : > { %v8838_v4 = vpop.f32.mrb[159].mxu1  ;;  %v6697_v9 = vadd.f32 %v8814_v62, %v6657_v1  ;;  %v7076_v1 = vld [vmem:[#allocation3] ss:$0 sm:$0xff] (!%p7073_p6) }
 0x64d   : > { %v6737_v19 = vadd.f32 %v8836_v3, %v6697_v9 }
 0x667   : > { %v8856_v10 = vpop.f32.mrb[160].mxu0 }
 0x668   : > { %v8878_v8 = vpop.f32.mrb[160].mxu1  ;;  %v8857_v13 = vpop.f32.mrb[161].mxu0 }
 0x669   : > { %v8879_v39 = vpop.f32.mrb[161].mxu1  ;;  %v8858_v26 = vadd.f32 %v8857_v13, %v8856_v10  ;;  %v8859_v14 = vpop.f32.mrb[162].mxu0 }
 0x66a   : > { %v8880_v17 = vadd.f32 %v8879_v39, %v8878_v8  ;;  %v8881_v20 = vpop.f32.mrb[162].mxu1  ;;  %v8860_v16 = vpop.f32.mrb[163].mxu0 }
 0x66b   : > { %v8882_v21 = vpop.f32.mrb[163].mxu1  ;;  %v6777_v22 = vadd.f32 %v8858_v26, %v6737_v19 }
 0x66d   : > { %v6817_v24 = vadd.f32 %v8880_v17, %v6777_v22 }
 0x686   : > { %6867 = sbr.rel (%p7073_p6) target bundleno = 1937 (0x791), region = 64 }
 0x687   : > { %v6856_v15 = vpop.f32.mrb[164].mxu0 }
 0x688   : > { %v6857_v28 = vadd.f32 %v6856_v15, %v6817_v24  ;;  %v8928_v30 = vpop.f32.mrb[165].mxu0 }
 0x689   : > { %v6859_v7 = vpop.f32.mrb[166].mxu0 }
 0x68a   : > { %v6862_v47 = vadd.f32 %v6857_v28, %v2315_v27  ;;  %v8929_v32 = vpop.f32.mrb[167].mxu0 }
 0x68c   : > { %6863 = vst [vmem:[#allocation2] sm:$0x3] %v6862_v47 }
 0x693   : > { %v6868_v49 = vld [vmem:[#allocation2] sm:$0x3] }
 0x694   : > { %v6876_v11 = vmul.f32 %v7074_v58, %v6868_v49 }
 0x696   : > { %v6884_v53 = vadd.f32 %v7075_v52, %v6876_v11 }
 0x698   : > { %v6885_v57 = vmax.f32 %v6884_v53, 0.0 }
 0x69a   : > { %8963 = vmatmul.mubr.f32.vlgmr.msra.gmra.mrb[0].mxu0 %v6885_v57 }
 0x76d   : > { %v6975_v59 = vpop.f32.mrb[0].mxu0 }
 0x76e   : > { %v6976_v60 = vadd.f32 %v7076_v1, %v6975_v59  ;;  %v8964_v61 = vpop.f32.mrb[1].mxu0 }
 0x770   : > { %6980 = vst.msk [vmem:[%s10727_s7] sm:$0x3] %vm6979_vm2, %v6976_v60  ;;  %v6981_v6 = vsub.f32 %v6976_v60, %v6976_v60 }
 0x772   : > { %v6982_v62 = vmul.f32 1.442695, %v6981_v6 }
 0x774   : > { %9081 = vpow2.f32 %v6982_v62 }
 0x77e   : > { %v9082_v63 = vpop.eup %9081 }
 0x77f   : > { %9083 = vlog2.f32 %v9082_v63 }
 0x789   : > { %v9084_v3 = vpop.eup %9083 }
 0x78a   : > { %v6986_v12 = vmul.f32 0.6931472, %v9084_v3 }
 0x78c   : > { %v6987_v56 = vadd.f32 %v6986_v12, %v6976_v60 }
 0x78e   : > { %v6988_v4 = vsub.f32 %v6976_v60, %v6987_v56 }
 0x790   : > { %6989 = vst.msk [vmem:[%s10726_s6] sm:$0x3] %vm6979_vm2, %v6988_v4 }
 0x791 PF: > { %p21_p7 = scmp.ge.s32.totalorder %s9288_s30, 5   ;;  %s10743_s26 = smov %s9201_s27 }
 0x792   : > { %s10744_s27 = smov %s9205_s28  ;;  %s10745_s28 = smov %s9298_s10 }
 0x793   : > { %s10746_s29 = smov %s9288_s30  ;;  %23 = sbr.rel (!%p21_p7) target bundleno = 7 (0x7), region = 107 }
 0x79a   :  { %7007 = vsyncpa [#allocation5], 1 }
 0x79b   :  { %7009 = vsyncpa [#allocation5 + $0x1], 1 }
 0x79c   :  { %7010 = vsyncpa [#allocation7], 1 }

</bundles_post_ra>
